<compile_context>
chip_gen: v6e
topology: v6e:2x2x1
jax: 0.10.0
libtpu: 0.0.40
codegen_flags: <defaults>
</compile_context>

<pallas_src>
import jax
import jax.numpy as jnp
from jax.experimental import pallas as pl
from jax.experimental.pallas import tpu as pltpu

BN_EPS = 1e-5  # PyTorch BatchNorm2d default eps


# ----------------------------- Pallas kernels --------------------------------
def _conv_bn_relu_pool_kernel(p00_ref, p01_ref, p10_ref, p11_ref,
                              w_ref, scale_ref, shift_ref, o_ref):
    """4 pooling-window positions: conv-as-matmul -> BN affine -> max over window -> ReLU."""
    w = w_ref[...]                                 # (K, C) bf16
    scale = scale_ref[...].astype(jnp.float32)     # (1, C)
    shift = shift_ref[...].astype(jnp.float32)     # (1, C)

    def branch(p_ref):
        y = jnp.dot(p_ref[...], w, preferred_element_type=jnp.float32)  # (M, C) f32
        return y * scale + shift

    y = jnp.maximum(jnp.maximum(branch(p00_ref), branch(p01_ref)),
                    jnp.maximum(branch(p10_ref), branch(p11_ref)))
    # relu(maxpool(x)) == maxpool(relu(x)); BN affine already applied per-branch.
    o_ref[...] = jnp.maximum(y, 0.0).astype(o_ref.dtype)


def _mlp_kernel(x_ref, w1_ref, b1_ref, w2_ref, b2_ref,
                w3_ref, b3_ref, w4_ref, b4_ref, o_ref):
    """fc1+ReLU -> fc2+ReLU -> fc3+ReLU -> fc4; all intermediates stay in VMEM."""
    def layer(h, w_r, b_r, relu):
        y = jnp.dot(h.astype(jnp.bfloat16), w_r[...],
                    preferred_element_type=jnp.float32)
        y = y + b_r[...].astype(jnp.float32)
        return jnp.maximum(y, 0.0) if relu else y

    h = x_ref[...].astype(jnp.float32)
    h = layer(h, w1_ref, b1_ref, True)
    h = layer(h, w2_ref, b2_ref, True)
    h = layer(h, w3_ref, b3_ref, True)
    o_ref[...] = layer(h, w4_ref, b4_ref, False).astype(o_ref.dtype)


# ----------------------------- kernel wrappers --------------------------------
def _pool_quads(x_nhwc, ksize):
    """im2col for a VALID ksize x ksize stride-1 conv, grouped by 2x2 maxpool position.

    Returns 4 arrays of shape (B*PH*PW, ksize*ksize*C) (bf16) and the pooled spatial dims.
    Patch feature order is (kh, kw, c_in); rows are ordered (b, ph, pw).
    """
    B, H, W, C = x_nhwc.shape
    OH, OW = H - ksize + 1, W - ksize + 1
    PH, PW = OH // 2, OW // 2
    rows = []
    for dy in range(ksize):
        cols = [x_nhwc[:, dy:dy + OH, dx:dx + OW, :] for dx in range(ksize)]
        rows.append(jnp.stack(cols, axis=3))           # (B, OH, OW, kw, C)
    patches = jnp.stack(rows, axis=3)                  # (B, OH, OW, kh, kw, C)
    patches = patches.reshape(B, OH, OW, ksize * ksize * C)
    quads = []
    for j in range(2):
        for i in range(2):
            q = patches[:, j:2 * PH:2, i:2 * PW:2, :]  # (B, PH, PW, K)
            quads.append(q.reshape(B * PH * PW, ksize * ksize * C).astype(jnp.bfloat16))
    return quads, (PH, PW)


def conv_bn_relu_pool(quads, w_mat, scale, shift):
    mp, k = quads[0].shape
    c = w_mat.shape[1]
    # 2 "parallel" row-tiles -> shards across v7x's 2 TensorCores; cheap elsewhere.
    row_tile = mp // 2 if (mp % 16 == 0) else mp
    grid = (mp // row_tile,)
    qspec = pl.BlockSpec((row_tile, k), lambda i: (i, 0))
    return pl.pallas_call(
        _conv_bn_relu_pool_kernel,
        grid=grid,
        in_specs=[qspec, qspec, qspec, qspec,
                  pl.BlockSpec((k, c), lambda i: (0, 0)),
                  pl.BlockSpec((1, c), lambda i: (0, 0)),
                  pl.BlockSpec((1, c), lambda i: (0, 0))],
        out_specs=pl.BlockSpec((row_tile, c), lambda i: (i, 0)),
        out_shape=jax.ShapeDtypeStruct((mp, c), jnp.float32),
        compiler_params=pltpu.CompilerParams(dimension_semantics=("parallel",)),
    )(*quads, w_mat, scale, shift)


def mlp_head(x, p):
    m = x.shape[0]
    n_out = p["w4"].shape[1]
    args = (x, p["w1"], p["b1"], p["w2"], p["b2"], p["w3"], p["b3"], p["w4"], p["b4"])

    def spec(a):
        return pl.BlockSpec(a.shape, lambda i: (0, 0))

    return pl.pallas_call(
        _mlp_kernel,
        grid=(1,),
        in_specs=[spec(a) for a in args],
        out_specs=pl.BlockSpec((m, n_out), lambda i: (0, 0)),
        out_shape=jax.ShapeDtypeStruct((m, n_out), jnp.float32),
        compiler_params=pltpu.CompilerParams(vmem_limit_bytes=32 * 1024 * 1024),
    )(*args)


# ----------------------------- model forward ----------------------------------
def batchnorm_cnn_forward(params, x_nchw):
    B = x_nchw.shape[0]
    x = jnp.transpose(x_nchw, (0, 2, 3, 1))  # NCHW -> NHWC (data-movement glue)

    # conv1 + bn1 + relu + maxpool (one fused kernel)
    quads1, (ph1, pw1) = _pool_quads(x, 5)
    y1 = conv_bn_relu_pool(quads1, params["conv1_w"],
                           params["bn1_scale"], params["bn1_shift"])
    y1 = y1.reshape(B, ph1, pw1, -1)

    # conv2 + bn2 + relu + maxpool (one fused kernel)
    quads2, _ = _pool_quads(y1, 5)
    y2 = conv_bn_relu_pool(quads2, params["conv2_w"],
                           params["bn2_scale"], params["bn2_shift"])

    # flatten in NHWC order; fc1 weight rows were pre-permuted for PyTorch's NCHW flatten.
    feat = y2.reshape(B, -1)

    # fused fc1..fc4 head (one kernel)
    return mlp_head(feat, params)


# ----------------------------- parameter init ----------------------------------
def init_params(key, *, n_classes, in_channels, img_dims):
    c1, c2, k = 10, 20, 5
    hw1 = (img_dims - (k - 1)) // 2          # spatial after conv1 + pool
    hw2 = (hw1 - (k - 1)) // 2               # spatial after conv2 + pool
    fc_size = c2 * hw2 * hw2                 # matches the PyTorch module's fc_size

    keys = iter(jax.random.split(key, 32))

    def normal(shape, std):
        return jax.random.normal(next(keys), shape, jnp.float32) * std

    # conv weights in PyTorch layout (C_out, C_in, kh, kw), bias=False.
    conv1_pt = normal((c1, in_channels, k, k), (in_channels * k * k) ** -0.5)
    conv2_pt = normal((c2, c1, k, k), (c1 * k * k) ** -0.5)

    def conv_mat(w_pt):
        # -> ((kh*kw*C_in), C_out), matching the im2col patch order (kh, kw, c_in).
        return (jnp.transpose(w_pt, (2, 3, 1, 0))
                .reshape(-1, w_pt.shape[0]).astype(jnp.bfloat16))

    def bn(c):
        gamma = 1.0 + normal((c,), 0.1)
        beta = normal((c,), 0.1)
        running_mean = normal((c,), 0.1)
        running_var = jnp.abs(1.0 + normal((c,), 0.1))
        scale = gamma / jnp.sqrt(running_var + BN_EPS)
        shift = beta - running_mean * scale
        return scale.reshape(1, c), shift.reshape(1, c)

    bn1_scale, bn1_shift = bn(c1)
    bn2_scale, bn2_shift = bn(c2)

    # FC weights in PyTorch layout (out, in).
    fc1_pt = normal((2048, fc_size), fc_size ** -0.5)
    fc2_pt = normal((562, 2048), 2048 ** -0.5)
    fc3_pt = normal((32, 562), 562 ** -0.5)
    fc4_pt = normal((n_classes, 32), 32 ** -0.5)

    # Permute fc1 input features from PyTorch NCHW-flatten order (c*HW + hw) to the
    # kernel's NHWC-flatten order (hw*C + c) so no runtime activation transpose is needed.
    hw = hw2 * hw2
    perm = (jnp.arange(c2)[None, :] * hw + jnp.arange(hw)[:, None]).reshape(-1)
    w1 = fc1_pt.T[perm].astype(jnp.bfloat16)

    return dict(
        conv1_w=conv_mat(conv1_pt), bn1_scale=bn1_scale, bn1_shift=bn1_shift,
        conv2_w=conv_mat(conv2_pt), bn2_scale=bn2_scale, bn2_shift=bn2_shift,
        w1=w1,                               b1=normal((1, 2048), 0.01),
        w2=fc2_pt.T.astype(jnp.bfloat16),    b2=normal((1, 562), 0.01),
        w3=fc3_pt.T.astype(jnp.bfloat16),    b3=normal((1, 32), 0.01),
        w4=fc4_pt.T.astype(jnp.bfloat16),    b4=normal((1, n_classes), 0.01),
    )


if __name__ == "__main__":
    N_CLASSES, IN_CHANNELS, IMG_DIMS, BATCH = 10, 3, 28, 4
    key = jax.random.PRNGKey(0)
    pkey, xkey = jax.random.split(key)
    params = init_params(pkey, n_classes=N_CLASSES,
                         in_channels=IN_CHANNELS, img_dims=IMG_DIMS)
    x = jax.random.normal(xkey, (BATCH, IN_CHANNELS, IMG_DIMS, IMG_DIMS), jnp.float32)

    out = jax.jit(batchnorm_cnn_forward)(params, x)
    out = jax.block_until_ready(out)
    assert out.shape == (BATCH, N_CLASSES), out.shape
    assert bool(jnp.all(jnp.isfinite(out)))
    print("KERNEL_OK")
</pallas_src>

<mosaic_0001>
module attributes {stable_mosaic.version = 11 : i64} {
  func.func @_conv_bn_relu_pool_kernel(%arg0: i32, %arg1: memref<288x75xbf16, #tpu.memory_space<vmem>>, %arg2: memref<288x75xbf16, #tpu.memory_space<vmem>>, %arg3: memref<288x75xbf16, #tpu.memory_space<vmem>>, %arg4: memref<288x75xbf16, #tpu.memory_space<vmem>>, %arg5: memref<75x10xbf16, #tpu.memory_space<vmem>>, %arg6: memref<1x10xf32, #tpu.memory_space<vmem>>, %arg7: memref<1x10xf32, #tpu.memory_space<vmem>>, %arg8: memref<288x10xf32, #tpu.memory_space<vmem>>) attributes {dimension_semantics = [#tpu.dimension_semantics<parallel>], iteration_bounds = array<i64: 2>, scalar_prefetch = 0 : i64, scratch_operands = 0 : i64, tpu.core_type = #tpu.core_type<tc>, window_params = [{transform_indices = @transform_0, window_bounds = array<i64: 288, 75>}, {transform_indices = @transform_1, window_bounds = array<i64: 288, 75>}, {transform_indices = @transform_2, window_bounds = array<i64: 288, 75>}, {transform_indices = @transform_3, window_bounds = array<i64: 288, 75>}, {pipeline_mode = #tpu.pipeline_mode<synchronous>, transform_indices = @transform_4, window_bounds = array<i64: 75, 10>}, {pipeline_mode = #tpu.pipeline_mode<synchronous>, transform_indices = @transform_5, window_bounds = array<i64: 1, 10>}, {pipeline_mode = #tpu.pipeline_mode<synchronous>, transform_indices = @transform_6, window_bounds = array<i64: 1, 10>}, {transform_indices = @transform_7, window_bounds = array<i64: 288, 10>}]} {
    %c0 = arith.constant 0 : index
    %c0_0 = arith.constant 0 : index
    %0 = vector.load %arg5[%c0, %c0_0] : memref<75x10xbf16, #tpu.memory_space<vmem>>, vector<75x10xbf16>
    %c0_1 = arith.constant 0 : index
    %c0_2 = arith.constant 0 : index
    %1 = vector.load %arg6[%c0_1, %c0_2] : memref<1x10xf32, #tpu.memory_space<vmem>>, vector<1x10xf32>
    %c0_3 = arith.constant 0 : index
    %c0_4 = arith.constant 0 : index
    %2 = vector.load %arg7[%c0_3, %c0_4] : memref<1x10xf32, #tpu.memory_space<vmem>>, vector<1x10xf32>
    %c0_5 = arith.constant 0 : index
    %c0_6 = arith.constant 0 : index
    %3 = vector.load %arg1[%c0_5, %c0_6] : memref<288x75xbf16, #tpu.memory_space<vmem>>, vector<288x75xbf16>
    %cst = arith.constant dense<0.000000e+00> : vector<288x10xf32>
    %4 = tpu.matmul %3, %0, %cst {dimension_numbers = #tpu.dot_dimension_numbers<[1], [0], [0], [1], [0, 0, 1, 1], [], []>} : vector<288x75xbf16>, vector<75x10xbf16>, vector<288x10xf32> -> vector<288x10xf32>
    %5 = vector.broadcast %1 : vector<1x10xf32> to vector<288x10xf32>
    %6 = arith.mulf %4, %5 : vector<288x10xf32>
    %7 = vector.broadcast %2 : vector<1x10xf32> to vector<288x10xf32>
    %8 = arith.addf %6, %7 : vector<288x10xf32>
    %c0_7 = arith.constant 0 : index
    %c0_8 = arith.constant 0 : index
    %9 = vector.load %arg2[%c0_7, %c0_8] : memref<288x75xbf16, #tpu.memory_space<vmem>>, vector<288x75xbf16>
    %cst_9 = arith.constant dense<0.000000e+00> : vector<288x10xf32>
    %10 = tpu.matmul %9, %0, %cst_9 {dimension_numbers = #tpu.dot_dimension_numbers<[1], [0], [0], [1], [0, 0, 1, 1], [], []>} : vector<288x75xbf16>, vector<75x10xbf16>, vector<288x10xf32> -> vector<288x10xf32>
    %11 = vector.broadcast %1 : vector<1x10xf32> to vector<288x10xf32>
    %12 = arith.mulf %10, %11 : vector<288x10xf32>
    %13 = vector.broadcast %2 : vector<1x10xf32> to vector<288x10xf32>
    %14 = arith.addf %12, %13 : vector<288x10xf32>
    %15 = arith.maximumf %8, %14 : vector<288x10xf32>
    %c0_10 = arith.constant 0 : index
    %c0_11 = arith.constant 0 : index
    %16 = vector.load %arg3[%c0_10, %c0_11] : memref<288x75xbf16, #tpu.memory_space<vmem>>, vector<288x75xbf16>
    %cst_12 = arith.constant dense<0.000000e+00> : vector<288x10xf32>
    %17 = tpu.matmul %16, %0, %cst_12 {dimension_numbers = #tpu.dot_dimension_numbers<[1], [0], [0], [1], [0, 0, 1, 1], [], []>} : vector<288x75xbf16>, vector<75x10xbf16>, vector<288x10xf32> -> vector<288x10xf32>
    %18 = vector.broadcast %1 : vector<1x10xf32> to vector<288x10xf32>
    %19 = arith.mulf %17, %18 : vector<288x10xf32>
    %20 = vector.broadcast %2 : vector<1x10xf32> to vector<288x10xf32>
    %21 = arith.addf %19, %20 : vector<288x10xf32>
    %c0_13 = arith.constant 0 : index
    %c0_14 = arith.constant 0 : index
    %22 = vector.load %arg4[%c0_13, %c0_14] : memref<288x75xbf16, #tpu.memory_space<vmem>>, vector<288x75xbf16>
    %cst_15 = arith.constant dense<0.000000e+00> : vector<288x10xf32>
    %23 = tpu.matmul %22, %0, %cst_15 {dimension_numbers = #tpu.dot_dimension_numbers<[1], [0], [0], [1], [0, 0, 1, 1], [], []>} : vector<288x75xbf16>, vector<75x10xbf16>, vector<288x10xf32> -> vector<288x10xf32>
    %24 = vector.broadcast %1 : vector<1x10xf32> to vector<288x10xf32>
    %25 = arith.mulf %23, %24 : vector<288x10xf32>
    %26 = vector.broadcast %2 : vector<1x10xf32> to vector<288x10xf32>
    %27 = arith.addf %25, %26 : vector<288x10xf32>
    %28 = arith.maximumf %21, %27 : vector<288x10xf32>
    %29 = arith.maximumf %15, %28 : vector<288x10xf32>
    %cst_16 = arith.constant 0.000000e+00 : f32
    %30 = vector.broadcast %cst_16 : f32 to vector<288x10xf32>
    %31 = arith.maximumf %29, %30 : vector<288x10xf32>
    %c0_17 = arith.constant 0 : index
    %c0_18 = arith.constant 0 : index
    %32 = vector.load %arg8[%c0_17, %c0_18] : memref<288x10xf32, #tpu.memory_space<vmem>>, vector<288x10xf32>
    tpu.vector_store %arg8[%c0_17, %c0_18], %31 {strides = array<i32>} : memref<288x10xf32, #tpu.memory_space<vmem>>, vector<288x10xf32>,
    return
  }
  func.func @transform_0(%arg0: i32) -> (i32, i32) {
    %c0_i32 = arith.constant 0 : i32
    %c0_i32_0 = arith.constant 0 : i32
    return %arg0, %c0_i32 : i32, i32
  }
  func.func @transform_1(%arg0: i32) -> (i32, i32) {
    %c0_i32 = arith.constant 0 : i32
    %c0_i32_0 = arith.constant 0 : i32
    return %arg0, %c0_i32 : i32, i32
  }
  func.func @transform_2(%arg0: i32) -> (i32, i32) {
    %c0_i32 = arith.constant 0 : i32
    %c0_i32_0 = arith.constant 0 : i32
    return %arg0, %c0_i32 : i32, i32
  }
  func.func @transform_3(%arg0: i32) -> (i32, i32) {
    %c0_i32 = arith.constant 0 : i32
    %c0_i32_0 = arith.constant 0 : i32
    return %arg0, %c0_i32 : i32, i32
  }
  func.func @transform_4(%arg0: i32) -> (i32, i32) {
    %c0_i32 = arith.constant 0 : i32
    %c0_i32_0 = arith.constant 0 : i32
    %c0_i32_1 = arith.constant 0 : i32
    return %c0_i32, %c0_i32_0 : i32, i32
  }
  func.func @transform_5(%arg0: i32) -> (i32, i32) {
    %c0_i32 = arith.constant 0 : i32
    %c0_i32_0 = arith.constant 0 : i32
    %c0_i32_1 = arith.constant 0 : i32
    return %c0_i32, %c0_i32_0 : i32, i32
  }
  func.func @transform_6(%arg0: i32) -> (i32, i32) {
    %c0_i32 = arith.constant 0 : i32
    %c0_i32_0 = arith.constant 0 : i32
    %c0_i32_1 = arith.constant 0 : i32
    return %c0_i32, %c0_i32_0 : i32, i32
  }
  func.func @transform_7(%arg0: i32) -> (i32, i32) {
    %c0_i32 = arith.constant 0 : i32
    %c0_i32_0 = arith.constant 0 : i32
    return %arg0, %c0_i32 : i32, i32
  }
}

module attributes {stable_mosaic.version = 11 : i64} {
  func.func @_conv_bn_relu_pool_kernel(%arg0: i32, %arg1: memref<32x250xbf16, #tpu.memory_space<vmem>>, %arg2: memref<32x250xbf16, #tpu.memory_space<vmem>>, %arg3: memref<32x250xbf16, #tpu.memory_space<vmem>>, %arg4: memref<32x250xbf16, #tpu.memory_space<vmem>>, %arg5: memref<250x20xbf16, #tpu.memory_space<vmem>>, %arg6: memref<1x20xf32, #tpu.memory_space<vmem>>, %arg7: memref<1x20xf32, #tpu.memory_space<vmem>>, %arg8: memref<32x20xf32, #tpu.memory_space<vmem>>) attributes {dimension_semantics = [#tpu.dimension_semantics<parallel>], iteration_bounds = array<i64: 2>, scalar_prefetch = 0 : i64, scratch_operands = 0 : i64, tpu.core_type = #tpu.core_type<tc>, window_params = [{transform_indices = @transform_0, window_bounds = array<i64: 32, 250>}, {transform_indices = @transform_1, window_bounds = array<i64: 32, 250>}, {transform_indices = @transform_2, window_bounds = array<i64: 32, 250>}, {transform_indices = @transform_3, window_bounds = array<i64: 32, 250>}, {pipeline_mode = #tpu.pipeline_mode<synchronous>, transform_indices = @transform_4, window_bounds = array<i64: 250, 20>}, {pipeline_mode = #tpu.pipeline_mode<synchronous>, transform_indices = @transform_5, window_bounds = array<i64: 1, 20>}, {pipeline_mode = #tpu.pipeline_mode<synchronous>, transform_indices = @transform_6, window_bounds = array<i64: 1, 20>}, {transform_indices = @transform_7, window_bounds = array<i64: 32, 20>}]} {
    %c0 = arith.constant 0 : index
    %c0_0 = arith.constant 0 : index
    %0 = vector.load %arg5[%c0, %c0_0] : memref<250x20xbf16, #tpu.memory_space<vmem>>, vector<250x20xbf16>
    %c0_1 = arith.constant 0 : index
    %c0_2 = arith.constant 0 : index
    %1 = vector.load %arg6[%c0_1, %c0_2] : memref<1x20xf32, #tpu.memory_space<vmem>>, vector<1x20xf32>
    %c0_3 = arith.constant 0 : index
    %c0_4 = arith.constant 0 : index
    %2 = vector.load %arg7[%c0_3, %c0_4] : memref<1x20xf32, #tpu.memory_space<vmem>>, vector<1x20xf32>
    %c0_5 = arith.constant 0 : index
    %c0_6 = arith.constant 0 : index
    %3 = vector.load %arg1[%c0_5, %c0_6] : memref<32x250xbf16, #tpu.memory_space<vmem>>, vector<32x250xbf16>
    %cst = arith.constant dense<0.000000e+00> : vector<32x20xf32>
    %4 = tpu.matmul %3, %0, %cst {dimension_numbers = #tpu.dot_dimension_numbers<[1], [0], [0], [1], [0, 0, 1, 1], [], []>} : vector<32x250xbf16>, vector<250x20xbf16>, vector<32x20xf32> -> vector<32x20xf32>
    %5 = vector.broadcast %1 : vector<1x20xf32> to vector<32x20xf32>
    %6 = arith.mulf %4, %5 : vector<32x20xf32>
    %7 = vector.broadcast %2 : vector<1x20xf32> to vector<32x20xf32>
    %8 = arith.addf %6, %7 : vector<32x20xf32>
    %c0_7 = arith.constant 0 : index
    %c0_8 = arith.constant 0 : index
    %9 = vector.load %arg2[%c0_7, %c0_8] : memref<32x250xbf16, #tpu.memory_space<vmem>>, vector<32x250xbf16>
    %cst_9 = arith.constant dense<0.000000e+00> : vector<32x20xf32>
    %10 = tpu.matmul %9, %0, %cst_9 {dimension_numbers = #tpu.dot_dimension_numbers<[1], [0], [0], [1], [0, 0, 1, 1], [], []>} : vector<32x250xbf16>, vector<250x20xbf16>, vector<32x20xf32> -> vector<32x20xf32>
    %11 = vector.broadcast %1 : vector<1x20xf32> to vector<32x20xf32>
    %12 = arith.mulf %10, %11 : vector<32x20xf32>
    %13 = vector.broadcast %2 : vector<1x20xf32> to vector<32x20xf32>
    %14 = arith.addf %12, %13 : vector<32x20xf32>
    %15 = arith.maximumf %8, %14 : vector<32x20xf32>
    %c0_10 = arith.constant 0 : index
    %c0_11 = arith.constant 0 : index
    %16 = vector.load %arg3[%c0_10, %c0_11] : memref<32x250xbf16, #tpu.memory_space<vmem>>, vector<32x250xbf16>
    %cst_12 = arith.constant dense<0.000000e+00> : vector<32x20xf32>
    %17 = tpu.matmul %16, %0, %cst_12 {dimension_numbers = #tpu.dot_dimension_numbers<[1], [0], [0], [1], [0, 0, 1, 1], [], []>} : vector<32x250xbf16>, vector<250x20xbf16>, vector<32x20xf32> -> vector<32x20xf32>
    %18 = vector.broadcast %1 : vector<1x20xf32> to vector<32x20xf32>
    %19 = arith.mulf %17, %18 : vector<32x20xf32>
    %20 = vector.broadcast %2 : vector<1x20xf32> to vector<32x20xf32>
    %21 = arith.addf %19, %20 : vector<32x20xf32>
    %c0_13 = arith.constant 0 : index
    %c0_14 = arith.constant 0 : index
    %22 = vector.load %arg4[%c0_13, %c0_14] : memref<32x250xbf16, #tpu.memory_space<vmem>>, vector<32x250xbf16>
    %cst_15 = arith.constant dense<0.000000e+00> : vector<32x20xf32>
    %23 = tpu.matmul %22, %0, %cst_15 {dimension_numbers = #tpu.dot_dimension_numbers<[1], [0], [0], [1], [0, 0, 1, 1], [], []>} : vector<32x250xbf16>, vector<250x20xbf16>, vector<32x20xf32> -> vector<32x20xf32>
    %24 = vector.broadcast %1 : vector<1x20xf32> to vector<32x20xf32>
    %25 = arith.mulf %23, %24 : vector<32x20xf32>
    %26 = vector.broadcast %2 : vector<1x20xf32> to vector<32x20xf32>
    %27 = arith.addf %25, %26 : vector<32x20xf32>
    %28 = arith.maximumf %21, %27 : vector<32x20xf32>
    %29 = arith.maximumf %15, %28 : vector<32x20xf32>
    %cst_16 = arith.constant 0.000000e+00 : f32
    %30 = vector.broadcast %cst_16 : f32 to vector<32x20xf32>
    %31 = arith.maximumf %29, %30 : vector<32x20xf32>
    %c0_17 = arith.constant 0 : index
    %c0_18 = arith.constant 0 : index
    %32 = vector.load %arg8[%c0_17, %c0_18] : memref<32x20xf32, #tpu.memory_space<vmem>>, vector<32x20xf32>
    tpu.vector_store %arg8[%c0_17, %c0_18], %31 {strides = array<i32>} : memref<32x20xf32, #tpu.memory_space<vmem>>, vector<32x20xf32>,
    return
  }
  func.func @transform_0(%arg0: i32) -> (i32, i32) {
    %c0_i32 = arith.constant 0 : i32
    %c0_i32_0 = arith.constant 0 : i32
    return %arg0, %c0_i32 : i32, i32
  }
  func.func @transform_1(%arg0: i32) -> (i32, i32) {
    %c0_i32 = arith.constant 0 : i32
    %c0_i32_0 = arith.constant 0 : i32
    return %arg0, %c0_i32 : i32, i32
  }
  func.func @transform_2(%arg0: i32) -> (i32, i32) {
    %c0_i32 = arith.constant 0 : i32
    %c0_i32_0 = arith.constant 0 : i32
    return %arg0, %c0_i32 : i32, i32
  }
  func.func @transform_3(%arg0: i32) -> (i32, i32) {
    %c0_i32 = arith.constant 0 : i32
    %c0_i32_0 = arith.constant 0 : i32
    return %arg0, %c0_i32 : i32, i32
  }
  func.func @transform_4(%arg0: i32) -> (i32, i32) {
    %c0_i32 = arith.constant 0 : i32
    %c0_i32_0 = arith.constant 0 : i32
    %c0_i32_1 = arith.constant 0 : i32
    return %c0_i32, %c0_i32_0 : i32, i32
  }
  func.func @transform_5(%arg0: i32) -> (i32, i32) {
    %c0_i32 = arith.constant 0 : i32
    %c0_i32_0 = arith.constant 0 : i32
    %c0_i32_1 = arith.constant 0 : i32
    return %c0_i32, %c0_i32_0 : i32, i32
  }
  func.func @transform_6(%arg0: i32) -> (i32, i32) {
    %c0_i32 = arith.constant 0 : i32
    %c0_i32_0 = arith.constant 0 : i32
    %c0_i32_1 = arith.constant 0 : i32
    return %c0_i32, %c0_i32_0 : i32, i32
  }
  func.func @transform_7(%arg0: i32) -> (i32, i32) {
    %c0_i32 = arith.constant 0 : i32
    %c0_i32_0 = arith.constant 0 : i32
    return %arg0, %c0_i32 : i32, i32
  }
}

module attributes {stable_mosaic.version = 11 : i64} {
  func.func @_mlp_kernel(%arg0: i32, %arg1: memref<4x320xf32, #tpu.memory_space<vmem>>, %arg2: memref<320x2048xbf16, #tpu.memory_space<vmem>>, %arg3: memref<1x2048xf32, #tpu.memory_space<vmem>>, %arg4: memref<2048x562xbf16, #tpu.memory_space<vmem>>, %arg5: memref<1x562xf32, #tpu.memory_space<vmem>>, %arg6: memref<562x32xbf16, #tpu.memory_space<vmem>>, %arg7: memref<1x32xf32, #tpu.memory_space<vmem>>, %arg8: memref<32x10xbf16, #tpu.memory_space<vmem>>, %arg9: memref<1x10xf32, #tpu.memory_space<vmem>>, %arg10: memref<4x10xf32, #tpu.memory_space<vmem>>) attributes {dimension_semantics = [#tpu.dimension_semantics<arbitrary>], iteration_bounds = array<i64: 1>, scalar_prefetch = 0 : i64, scratch_operands = 0 : i64, tpu.core_type = #tpu.core_type<tc>, window_params = [{pipeline_mode = #tpu.pipeline_mode<synchronous>, transform_indices = @transform_0, window_bounds = array<i64: 4, 320>}, {pipeline_mode = #tpu.pipeline_mode<synchronous>, transform_indices = @transform_1, window_bounds = array<i64: 320, 2048>}, {pipeline_mode = #tpu.pipeline_mode<synchronous>, transform_indices = @transform_2, window_bounds = array<i64: 1, 2048>}, {pipeline_mode = #tpu.pipeline_mode<synchronous>, transform_indices = @transform_3, window_bounds = array<i64: 2048, 562>}, {pipeline_mode = #tpu.pipeline_mode<synchronous>, transform_indices = @transform_4, window_bounds = array<i64: 1, 562>}, {pipeline_mode = #tpu.pipeline_mode<synchronous>, transform_indices = @transform_5, window_bounds = array<i64: 562, 32>}, {pipeline_mode = #tpu.pipeline_mode<synchronous>, transform_indices = @transform_6, window_bounds = array<i64: 1, 32>}, {pipeline_mode = #tpu.pipeline_mode<synchronous>, transform_indices = @transform_7, window_bounds = array<i64: 32, 10>}, {pipeline_mode = #tpu.pipeline_mode<synchronous>, transform_indices = @transform_8, window_bounds = array<i64: 1, 10>}, {pipeline_mode = #tpu.pipeline_mode<synchronous>, transform_indices = @transform_9, window_bounds = array<i64: 4, 10>}]} {
    %c0 = arith.constant 0 : index
    %c0_0 = arith.constant 0 : index
    %0 = vector.load %arg1[%c0, %c0_0] : memref<4x320xf32, #tpu.memory_space<vmem>>, vector<4x320xf32>
    %1 = arith.truncf %0 : vector<4x320xf32> to vector<4x320xbf16>
    %c0_1 = arith.constant 0 : index
    %c0_2 = arith.constant 0 : index
    %2 = vector.load %arg2[%c0_1, %c0_2] : memref<320x2048xbf16, #tpu.memory_space<vmem>>, vector<320x2048xbf16>
    %cst = arith.constant dense<0.000000e+00> : vector<4x2048xf32>
    %3 = tpu.matmul %1, %2, %cst {dimension_numbers = #tpu.dot_dimension_numbers<[1], [0], [0], [1], [0, 0, 1, 1], [], []>} : vector<4x320xbf16>, vector<320x2048xbf16>, vector<4x2048xf32> -> vector<4x2048xf32>
    %c0_3 = arith.constant 0 : index
    %c0_4 = arith.constant 0 : index
    %4 = vector.load %arg3[%c0_3, %c0_4] : memref<1x2048xf32, #tpu.memory_space<vmem>>, vector<1x2048xf32>
    %5 = vector.broadcast %4 : vector<1x2048xf32> to vector<4x2048xf32>
    %6 = arith.addf %3, %5 : vector<4x2048xf32>
    %cst_5 = arith.constant 0.000000e+00 : f32
    %7 = vector.broadcast %cst_5 : f32 to vector<4x2048xf32>
    %8 = arith.maximumf %6, %7 : vector<4x2048xf32>
    %9 = arith.truncf %8 : vector<4x2048xf32> to vector<4x2048xbf16>
    %c0_6 = arith.constant 0 : index
    %c0_7 = arith.constant 0 : index
    %10 = vector.load %arg4[%c0_6, %c0_7] : memref<2048x562xbf16, #tpu.memory_space<vmem>>, vector<2048x562xbf16>
    %cst_8 = arith.constant dense<0.000000e+00> : vector<4x562xf32>
    %11 = tpu.matmul %9, %10, %cst_8 {dimension_numbers = #tpu.dot_dimension_numbers<[1], [0], [0], [1], [0, 0, 1, 1], [], []>} : vector<4x2048xbf16>, vector<2048x562xbf16>, vector<4x562xf32> -> vector<4x562xf32>
    %c0_9 = arith.constant 0 : index
    %c0_10 = arith.constant 0 : index
    %12 = vector.load %arg5[%c0_9, %c0_10] : memref<1x562xf32, #tpu.memory_space<vmem>>, vector<1x562xf32>
    %13 = vector.broadcast %12 : vector<1x562xf32> to vector<4x562xf32>
    %14 = arith.addf %11, %13 : vector<4x562xf32>
    %cst_11 = arith.constant 0.000000e+00 : f32
    %15 = vector.broadcast %cst_11 : f32 to vector<4x562xf32>
    %16 = arith.maximumf %14, %15 : vector<4x562xf32>
    %17 = arith.truncf %16 : vector<4x562xf32> to vector<4x562xbf16>
    %c0_12 = arith.constant 0 : index
    %c0_13 = arith.constant 0 : index
    %18 = vector.load %arg6[%c0_12, %c0_13] : memref<562x32xbf16, #tpu.memory_space<vmem>>, vector<562x32xbf16>
    %cst_14 = arith.constant dense<0.000000e+00> : vector<4x32xf32>
    %19 = tpu.matmul %17, %18, %cst_14 {dimension_numbers = #tpu.dot_dimension_numbers<[1], [0], [0], [1], [0, 0, 1, 1], [], []>} : vector<4x562xbf16>, vector<562x32xbf16>, vector<4x32xf32> -> vector<4x32xf32>
    %c0_15 = arith.constant 0 : index
    %c0_16 = arith.constant 0 : index
    %20 = vector.load %arg7[%c0_15, %c0_16] : memref<1x32xf32, #tpu.memory_space<vmem>>, vector<1x32xf32>
    %21 = vector.broadcast %20 : vector<1x32xf32> to vector<4x32xf32>
    %22 = arith.addf %19, %21 : vector<4x32xf32>
    %cst_17 = arith.constant 0.000000e+00 : f32
    %23 = vector.broadcast %cst_17 : f32 to vector<4x32xf32>
    %24 = arith.maximumf %22, %23 : vector<4x32xf32>
    %25 = arith.truncf %24 : vector<4x32xf32> to vector<4x32xbf16>
    %c0_18 = arith.constant 0 : index
    %c0_19 = arith.constant 0 : index
    %26 = vector.load %arg8[%c0_18, %c0_19] : memref<32x10xbf16, #tpu.memory_space<vmem>>, vector<32x10xbf16>
    %cst_20 = arith.constant dense<0.000000e+00> : vector<4x10xf32>
    %27 = tpu.matmul %25, %26, %cst_20 {dimension_numbers = #tpu.dot_dimension_numbers<[1], [0], [0], [1], [0, 0, 1, 1], [], []>} : vector<4x32xbf16>, vector<32x10xbf16>, vector<4x10xf32> -> vector<4x10xf32>
    %c0_21 = arith.constant 0 : index
    %c0_22 = arith.constant 0 : index
    %28 = vector.load %arg9[%c0_21, %c0_22] : memref<1x10xf32, #tpu.memory_space<vmem>>, vector<1x10xf32>
    %29 = vector.broadcast %28 : vector<1x10xf32> to vector<4x10xf32>
    %30 = arith.addf %27, %29 : vector<4x10xf32>
    %c0_23 = arith.constant 0 : index
    %c0_24 = arith.constant 0 : index
    %31 = vector.load %arg10[%c0_23, %c0_24] : memref<4x10xf32, #tpu.memory_space<vmem>>, vector<4x10xf32>
    tpu.vector_store %arg10[%c0_23, %c0_24], %30 {strides = array<i32>} : memref<4x10xf32, #tpu.memory_space<vmem>>, vector<4x10xf32>,
    return
  }
  func.func @transform_0(%arg0: i32) -> (i32, i32) {
    %c0_i32 = arith.constant 0 : i32
    %c0_i32_0 = arith.constant 0 : i32
    %c0_i32_1 = arith.constant 0 : i32
    return %c0_i32, %c0_i32_0 : i32, i32
  }
  func.func @transform_1(%arg0: i32) -> (i32, i32) {
    %c0_i32 = arith.constant 0 : i32
    %c0_i32_0 = arith.constant 0 : i32
    %c0_i32_1 = arith.constant 0 : i32
    return %c0_i32, %c0_i32_0 : i32, i32
  }
  func.func @transform_2(%arg0: i32) -> (i32, i32) {
    %c0_i32 = arith.constant 0 : i32
    %c0_i32_0 = arith.constant 0 : i32
    %c0_i32_1 = arith.constant 0 : i32
    return %c0_i32, %c0_i32_0 : i32, i32
  }
  func.func @transform_3(%arg0: i32) -> (i32, i32) {
    %c0_i32 = arith.constant 0 : i32
    %c0_i32_0 = arith.constant 0 : i32
    %c0_i32_1 = arith.constant 0 : i32
    return %c0_i32, %c0_i32_0 : i32, i32
  }
  func.func @transform_4(%arg0: i32) -> (i32, i32) {
    %c0_i32 = arith.constant 0 : i32
    %c0_i32_0 = arith.constant 0 : i32
    %c0_i32_1 = arith.constant 0 : i32
    return %c0_i32, %c0_i32_0 : i32, i32
  }
  func.func @transform_5(%arg0: i32) -> (i32, i32) {
    %c0_i32 = arith.constant 0 : i32
    %c0_i32_0 = arith.constant 0 : i32
    %c0_i32_1 = arith.constant 0 : i32
    return %c0_i32, %c0_i32_0 : i32, i32
  }
  func.func @transform_6(%arg0: i32) -> (i32, i32) {
    %c0_i32 = arith.constant 0 : i32
    %c0_i32_0 = arith.constant 0 : i32
    %c0_i32_1 = arith.constant 0 : i32
    return %c0_i32, %c0_i32_0 : i32, i32
  }
  func.func @transform_7(%arg0: i32) -> (i32, i32) {
    %c0_i32 = arith.constant 0 : i32
    %c0_i32_0 = arith.constant 0 : i32
    %c0_i32_1 = arith.constant 0 : i32
    return %c0_i32, %c0_i32_0 : i32, i32
  }
  func.func @transform_8(%arg0: i32) -> (i32, i32) {
    %c0_i32 = arith.constant 0 : i32
    %c0_i32_0 = arith.constant 0 : i32
    %c0_i32_1 = arith.constant 0 : i32
    return %c0_i32, %c0_i32_0 : i32, i32
  }
  func.func @transform_9(%arg0: i32) -> (i32, i32) {
    %c0_i32 = arith.constant 0 : i32
    %c0_i32_0 = arith.constant 0 : i32
    %c0_i32_1 = arith.constant 0 : i32
    return %c0_i32, %c0_i32_0 : i32, i32
  }
}

</mosaic_0001>

<bundles_post_ra>
// kernel: batchnorm_cnn_forward.3
= control target key start
LH: loop header
LB: loop body
LE: loop exit
PB: predicated region body
PF: predicated region fallthrough
CT: control target
= control target key end

     0   :  { %s2975_s24 = smov 0   ;;  %s3884_s0 = inlined_call_operand.vmem [shape: bf16[576,75], index: 0, kind: input, shape index: {}]   ;;  %s3885_s1 = inlined_call_operand.vmem [shape: bf16[576,75], index: 1, kind: input, shape index: {}]   ;;  %s3886_s2 = inlined_call_operand.vmem [shape: bf16[576,75], index: 2, kind: input, shape index: {}]   ;;  %s3887_s3 = inlined_call_operand.vmem [shape: bf16[576,75], index: 3, kind: input, shape index: {}]   ;;  %s3888_s4 = inlined_call_operand.vmem [shape: bf16[75,10], index: 4, kind: input, shape index: {}]   ;;  %s3889_s5 = inlined_call_operand.vmem [shape: f32[1,10], index: 5, kind: input, shape index: {}]   ;;  %s3890_s6 = inlined_call_operand.vmem [shape: f32[1,10], index: 6, kind: input, shape index: {}]   ;;  %s3891_s7 = inlined_call_operand.vmem [shape: f32[576,10], index: 7, kind: output, shape index: {}]  }
   0x1 LB: > { %s2399_s25 = sadd.s32 4294967295, %s2932_s24   ;;  %p2403_p0 = scmp.ge.s32.totalorder %s2932_s24, 1  ;;  %s2932_s24 = sphi %s2975_s24, %s17_s24  }
   0x2   : > { %p271_p1 = scmp.lt.s32.totalorder %s2932_s24, 3 }
   0x4   : > { %p272_p2 = pnand %p2403_p0, %p271_p1 }
   0x6   : > { %275 = sbr.rel (%p272_p2) target bundleno = 382 (0x17e), region = 48 }
   0xb   : > { %v2847_v0 = vld [vmem:[%s3888_s4 + $0x20] sm:$0x3f]   ;;  %vm571_vm0 = vcmask 1044480   ;;  %vm572_vm1 = vcmask 1045504   ;;  %v2934_v1 = vmov 65535   ;;  %v2848_v4 = vld [vmem:[%s3888_s4 + $0x18] sm:$0xff]  }
   0xc   : > { %v573_v2 = vsel %vm571_vm0, 4294967295, %v2934_v1  ;;  %s318_s30 = smul.u32 36, %s2399_s25  ;;  %v2849_v6 = vld [vmem:[%s3888_s4 + $0x10] sm:$0xff]   ;;  %v2850_v7 = vld [vmem:[%s3888_s4 + $0x8] sm:$0xff]   ;;  %vm516_vm2 = vcmask 613376   ;;  %v2851_v10 = vld [vmem:[%s3888_s4] sm:$0xff]  }
   0xd   : > { %v574_v3 = vsel %vm572_vm1, %v573_v2, 0  ;;  %vm2270_vm3 = vcmask 80896  }
   0xe   : > { %v576_v5 = vand.u32 %v2847_v0, %v574_v3  ;;  %p319_p3 = scmp.lt.s32.totalorder %s318_s30, 71 }
  0x10   : > { %2654 = vmatprep.subr.bf16.mxu0 %v576_v5  ;;  %2700 = vmatprep.subr.bf16.mxu1 %v576_v5  ;;  %s4013_s30 = smov (!%p319_p3, %s318_s30), 71 }
  0x11   : > { %2655 = vmatpush3.bf16.msra.mxu0 %v576_v5  ;;  %2701 = vmatpush3.bf16.msra.mxu1 %v576_v5  ;;  %s2995_s10 = sshll.u32 %s4013_s30, 2 }
  0x12   : > { %2656 = vmatprep.subr.bf16.mxu0 %v2848_v4  ;;  %2702 = vmatprep.subr.bf16.mxu1 %v2848_v4  ;;  %s3004_s15 = scalar_lea.vmem %s3884_s0, %s2995_s10  ;;  %s3011_s18 = scalar_lea.vmem %s3885_s1, %s2995_s10 }
  0x13   : > { %v2852_v8 = vld [vmem:[%s3004_s15] sm:$0xff]   ;;  %v2854_v11 = vld [vmem:[%s3004_s15 + $0x8] sm:$0xff]   ;;  %v2856_v13 = vld [vmem:[%s3004_s15 + $0x10] sm:$0xff]   ;;  %s3051_s23 = scalar_lea.vmem %s3886_s2, %s2995_s10  ;;  %s3057_s27 = scalar_lea.vmem %s3887_s3, %s2995_s10 }
  0x14   : > { %v2853_v9 = vld [vmem:[%s3011_s18] sm:$0xff]   ;;  %2664 = vmatprep.mubr.msk.bf16.mxu0 %vm516_vm2, %v2852_v8  ;;  %v2855_v12 = vld [vmem:[%s3011_s18 + $0x8] sm:$0xff]   ;;  %v2857_v14 = vld [vmem:[%s3011_s18 + $0x10] sm:$0xff]   ;;  %s2408_s10 = sshll.u32 %s4013_s30, 3 }
  0x15   : > { %2657 = vmatpush3.bf16.msra.mxu0 %v2848_v4  ;;  %2703 = vmatpush3.bf16.msra.mxu1 %v2848_v4  ;;  %v2858_v15 = vld [vmem:[%s3004_s15 + $0x18] sm:$0xff]   ;;  %v2860_v17 = vld [vmem:[%s3004_s15 + $0x20] sm:$0xff]   ;;  %v2862_v19 = vld [vmem:[%s3004_s15 + $0x28] sm:$0xff]   ;;  %s3560_s12 = scalar_lea.vmem %s3891_s7, %s2408_s10 }
  0x16   : > { %2658 = vmatprep.subr.bf16.mxu0 %v2849_v6  ;;  %2704 = vmatprep.subr.bf16.mxu1 %v2849_v6  ;;  %v2859_v16 = vld [vmem:[%s3011_s18 + $0x18] sm:$0xff]   ;;  %v2861_v18 = vld [vmem:[%s3011_s18 + $0x20] sm:$0xff]   ;;  %v2863_v20 = vld [vmem:[%s3011_s18 + $0x28] sm:$0xff]  }
  0x17   : > { %2710 = vmatprep.mubr.msk.bf16.mxu1 %vm516_vm2, %v2853_v9  ;;  %v2864_v21 = vld [vmem:[%s3004_s15 + $0x30] sm:$0xff]   ;;  %v2866_v23 = vld [vmem:[%s3004_s15 + $0x38] sm:$0xff]   ;;  %v2868_v25 = vld [vmem:[%s3004_s15 + $0x40] sm:$0xff]  }
  0x18   : > { %v2865_v22 = vld [vmem:[%s3011_s18 + $0x30] sm:$0xff]   ;;  %v2867_v24 = vld [vmem:[%s3011_s18 + $0x38] sm:$0xff]   ;;  %v2869_v26 = vld [vmem:[%s3011_s18 + $0x40] sm:$0xff]  }
  0x19   : > { %2659 = vmatpush3.bf16.msra.mxu0 %v2849_v6  ;;  %2705 = vmatpush3.bf16.msra.mxu1 %v2849_v6  ;;  %v2870_v27 = vld [vmem:[%s3004_s15 + $0x48] sm:$0xff]   ;;  %v2872_v29 = vld [vmem:[%s3004_s15 + $0x50] sm:$0xff]   ;;  %v2874_v31 = vld [vmem:[%s3004_s15 + $0x58] sm:$0xff]  }
  0x1a   : > { %2660 = vmatprep.subr.bf16.mxu0 %v2850_v7  ;;  %2706 = vmatprep.subr.bf16.mxu1 %v2850_v7  ;;  %v2871_v28 = vld [vmem:[%s3011_s18 + $0x48] sm:$0xff]   ;;  %v2873_v30 = vld [vmem:[%s3011_s18 + $0x50] sm:$0xff]   ;;  %v2875_v32 = vld [vmem:[%s3011_s18 + $0x58] sm:$0xff]  }
  0x1b   : > { %v2876_v33 = vld [vmem:[%s3004_s15 + $0x60] sm:$0xff]   ;;  %v2878_v35 = vld [vmem:[%s3004_s15 + $0x68] sm:$0xff]   ;;  %v2880_v37 = vld [vmem:[%s3004_s15 + $0x70] sm:$0xff]  }
  0x1c   : > { %v2877_v34 = vld [vmem:[%s3011_s18 + $0x60] sm:$0xff]   ;;  %v2879_v36 = vld [vmem:[%s3011_s18 + $0x68] sm:$0xff]   ;;  %v2881_v38 = vld [vmem:[%s3011_s18 + $0x70] sm:$0xff]  }
  0x1d   : > { %2661 = vmatpush3.bf16.msra.mxu0 %v2850_v7  ;;  %2707 = vmatpush3.bf16.msra.mxu1 %v2850_v7  ;;  %v2882_v39 = vld [vmem:[%s3004_s15 + $0x78] sm:$0xff]   ;;  %v2884_v41 = vld [vmem:[%s3004_s15 + $0x80] sm:$0xff]   ;;  %v2886_v43 = vld [vmem:[%s3004_s15 + $0x88] sm:$0xff]  }
  0x1e   : > { %2662 = vmatprep.subr.bf16.mxu0 %v2851_v10  ;;  %2708 = vmatprep.subr.bf16.mxu1 %v2851_v10  ;;  %v2883_v40 = vld [vmem:[%s3011_s18 + $0x78] sm:$0xff]   ;;  %v2885_v42 = vld [vmem:[%s3011_s18 + $0x80] sm:$0xff]   ;;  %v2887_v44 = vld [vmem:[%s3011_s18 + $0x88] sm:$0xff]  }
  0x1f   : > { %v2888_v45 = vld [vmem:[%s3051_s23] sm:$0xff]   ;;  %v2890_v47 = vld [vmem:[%s3051_s23 + $0x8] sm:$0xff]   ;;  %v2892_v49 = vld [vmem:[%s3051_s23 + $0x10] sm:$0xff]  }
  0x20   : > { %v2889_v46 = vld [vmem:[%s3057_s27] sm:$0xff]   ;;  %v2891_v48 = vld [vmem:[%s3057_s27 + $0x8] sm:$0xff]   ;;  %v2893_v50 = vld [vmem:[%s3057_s27 + $0x10] sm:$0xff]  }
  0x21   : > { %2663 = vmatpush3.bf16.msra.mxu0 %v2851_v10  ;;  %2709 = vmatpush3.bf16.msra.mxu1 %v2851_v10  ;;  %v2894_v51 = vld [vmem:[%s3051_s23 + $0x18] sm:$0xff]   ;;  %v2896_v53 = vld [vmem:[%s3051_s23 + $0x20] sm:$0xff]   ;;  %v2898_v55 = vld [vmem:[%s3051_s23 + $0x28] sm:$0xff]  }
  0x22   : > { %2746 = vmatprep.subr.bf16.mxu0 %v576_v5  ;;  %2792 = vmatprep.subr.bf16.mxu1 %v576_v5  ;;  %v2895_v52 = vld [vmem:[%s3057_s27 + $0x18] sm:$0xff]   ;;  %v2897_v54 = vld [vmem:[%s3057_s27 + $0x20] sm:$0xff]   ;;  %v2899_v56 = vld [vmem:[%s3057_s27 + $0x28] sm:$0xff]  }
  0x23   : > { %v2900_v57 = vld [vmem:[%s3051_s23 + $0x30] sm:$0xff]   ;;  %v2902_v59 = vld [vmem:[%s3051_s23 + $0x38] sm:$0xff]   ;;  %v2904_v61 = vld [vmem:[%s3051_s23 + $0x40] sm:$0xff]  }
  0x24   : > { %2665 = vmatmul.mubr.msk.bf16.vlgmr.msra.gmra.mxu0 %vm516_vm2, %v2854_v11  ;;  %2711 = vmatmul.mubr.msk.bf16.vlgmr.msra.gmra.mxu1 %vm516_vm2, %v2855_v12  ;;  %v2901_v58 = vld [vmem:[%s3057_s27 + $0x30] sm:$0xff]   ;;  %v2903_v60 = vld [vmem:[%s3057_s27 + $0x38] sm:$0xff]   ;;  %v2905_v62 = vld [vmem:[%s3057_s27 + $0x40] sm:$0xff]  }
  0x25   : > { %2747 = vmatpush3.bf16.msra.mxu0 %v576_v5  ;;  %2793 = vmatpush3.bf16.msra.mxu1 %v576_v5  ;;  %v2906_v63 = vld [vmem:[%s3051_s23 + $0x48] sm:$0xff]   ;;  %v2908_v1 = vld [vmem:[%s3051_s23 + $0x50] sm:$0xff]   ;;  %v2910_v3 = vld [vmem:[%s3051_s23 + $0x58] sm:$0xff]  }
  0x26   : > { %2668 = vmatprep.mubr.msk.bf16.mxu0 %vm516_vm2, %v2856_v13  ;;  %2714 = vmatprep.mubr.msk.bf16.mxu1 %vm516_vm2, %v2857_v14  ;;  %v2907_v0 = vld [vmem:[%s3057_s27 + $0x48] sm:$0xff]   ;;  %v2909_v2 = vld [vmem:[%s3057_s27 + $0x50] sm:$0xff]   ;;  %v2912_v5 = vld [vmem:[%s3051_s23 + $0x60] sm:$0xff]  }
  0x27   : > { %2748 = vmatprep.subr.bf16.mxu0 %v2848_v4  ;;  %2794 = vmatprep.subr.bf16.mxu1 %v2848_v4  ;;  %v2915_v8 = vld [vmem:[%s3057_s27 + $0x68] sm:$0xff]   ;;  %v2916_v9 = vld [vmem:[%s3051_s23 + $0x70] sm:$0xff]   ;;  %v2918_v11 = vld [vmem:[%s3051_s23 + $0x78] sm:$0xff]  }
  0x28   : > { %v2919_v12 = vld [vmem:[%s3057_s27 + $0x78] sm:$0xff]   ;;  %v2920_v13 = vld [vmem:[%s3051_s23 + $0x80] sm:$0xff]  }
  0x29   : > { %2749 = vmatpush3.bf16.msra.mxu0 %v2848_v4  ;;  %2795 = vmatpush3.bf16.msra.mxu1 %v2848_v4  ;;  %v2911_v4 = vld [vmem:[%s3057_s27 + $0x58] sm:$0xff]   ;;  %v2921_v14 = vld [vmem:[%s3057_s27 + $0x80] sm:$0xff]  }
  0x2a   : > { %2750 = vmatprep.subr.bf16.mxu0 %v2849_v6  ;;  %2796 = vmatprep.subr.bf16.mxu1 %v2849_v6 }
  0x2c   : > { %2669 = vmatmul.mubr.msk.bf16.gmra.mxu0 %vm516_vm2, %v2858_v15  ;;  %2715 = vmatmul.mubr.msk.bf16.gmra.mxu1 %vm516_vm2, %v2859_v16  ;;  %v2922_v15 = vld [vmem:[%s3051_s23 + $0x88] sm:$0xff]  }
  0x2d   : > { %2672 = vmatprep.mubr.msk.bf16.mxu0 %vm516_vm2, %v2860_v17  ;;  %2718 = vmatprep.mubr.msk.bf16.mxu1 %vm516_vm2, %v2861_v18  ;;  %v2923_v16 = vld [vmem:[%s3057_s27 + $0x88] sm:$0xff]   ;;  %v3174_v17 = vld [vmem:[%s3889_s5] ss:$0 sm:$0xff] }
  0x2e   : > { %2751 = vmatpush3.bf16.msra.mxu0 %v2849_v6  ;;  %2797 = vmatpush3.bf16.msra.mxu1 %v2849_v6  ;;  %v2913_v6 = vld [vmem:[%s3057_s27 + $0x60] sm:$0xff]  }
  0x2f   : > { %2752 = vmatprep.subr.bf16.mxu0 %v2850_v7  ;;  %2798 = vmatprep.subr.bf16.mxu1 %v2850_v7  ;;  %v3179_v18 = vld [vmem:[%s3890_s6] ss:$0 sm:$0xff] }
  0x32   : > { %2753 = vmatpush3.bf16.msra.mxu0 %v2850_v7  ;;  %2799 = vmatpush3.bf16.msra.mxu1 %v2850_v7  ;;  %v2914_v7 = vld [vmem:[%s3051_s23 + $0x68] sm:$0xff]  }
  0x33   : > { %2754 = vmatprep.subr.bf16.mxu0 %v2851_v10  ;;  %2800 = vmatprep.subr.bf16.mxu1 %v2851_v10 }
  0x34   : > { %2673 = vmatmul.mubr.msk.bf16.gmra.mxu0 %vm516_vm2, %v2862_v19  ;;  %2719 = vmatmul.mubr.msk.bf16.gmra.mxu1 %vm516_vm2, %v2863_v20 }
  0x35   : > { %2676 = vmatprep.mubr.msk.bf16.mxu0 %vm516_vm2, %v2864_v21  ;;  %2722 = vmatprep.mubr.msk.bf16.mxu1 %vm516_vm2, %v2865_v22 }
  0x36   : > { %2755 = vmatpush3.bf16.msra.mxu0 %v2851_v10  ;;  %2801 = vmatpush3.bf16.msra.mxu1 %v2851_v10  ;;  %v2917_v10 = vld [vmem:[%s3057_s27 + $0x70] sm:$0xff]  }
  0x3c   : > { %2677 = vmatmul.mubr.msk.bf16.gmra.mxu0 %vm516_vm2, %v2866_v23  ;;  %2723 = vmatmul.mubr.msk.bf16.gmra.mxu1 %vm516_vm2, %v2867_v24 }
  0x3d   : > { %2680 = vmatprep.mubr.msk.bf16.mxu0 %vm516_vm2, %v2868_v25  ;;  %2726 = vmatprep.mubr.msk.bf16.mxu1 %vm516_vm2, %v2869_v26 }
  0x44   : > { %2681 = vmatmul.mubr.msk.bf16.gmra.mxu0 %vm516_vm2, %v2870_v27  ;;  %2727 = vmatmul.mubr.msk.bf16.gmra.mxu1 %vm516_vm2, %v2871_v28 }
  0x45   : > { %2684 = vmatprep.mubr.msk.bf16.mxu0 %vm516_vm2, %v2872_v29  ;;  %2730 = vmatprep.mubr.msk.bf16.mxu1 %vm516_vm2, %v2873_v30 }
  0x4c   : > { %2685 = vmatmul.mubr.msk.bf16.gmra.mxu0 %vm516_vm2, %v2874_v31  ;;  %2731 = vmatmul.mubr.msk.bf16.gmra.mxu1 %vm516_vm2, %v2875_v32 }
  0x4d   : > { %2688 = vmatprep.mubr.msk.bf16.mxu0 %vm516_vm2, %v2876_v33  ;;  %2734 = vmatprep.mubr.msk.bf16.mxu1 %vm516_vm2, %v2877_v34 }
  0x54   : > { %2689 = vmatmul.mubr.msk.bf16.gmra.mxu0 %vm516_vm2, %v2878_v35  ;;  %2735 = vmatmul.mubr.msk.bf16.gmra.mxu1 %vm516_vm2, %v2879_v36 }
  0x55   : > { %2692 = vmatprep.mubr.msk.bf16.mxu0 %vm516_vm2, %v2880_v37  ;;  %2738 = vmatprep.mubr.msk.bf16.mxu1 %vm516_vm2, %v2881_v38 }
  0x5c   : > { %2693 = vmatmul.mubr.msk.bf16.gmra.mxu0 %vm516_vm2, %v2882_v39  ;;  %2739 = vmatmul.mubr.msk.bf16.gmra.mxu1 %vm516_vm2, %v2883_v40 }
  0x5d   : > { %2696 = vmatprep.mubr.msk.bf16.mxu0 %vm516_vm2, %v2884_v41  ;;  %2742 = vmatprep.mubr.msk.bf16.mxu1 %vm516_vm2, %v2885_v42 }
  0x64   : > { %2697 = vmatmul.mubr.msk.bf16.gmra.mxu0 %vm516_vm2, %v2886_v43  ;;  %2743 = vmatmul.mubr.msk.bf16.gmra.mxu1 %vm516_vm2, %v2887_v44 }
  0x65   : > { %2756 = vmatprep.mubr.msk.bf16.mxu0 %vm516_vm2, %v2888_v45  ;;  %2802 = vmatprep.mubr.msk.bf16.mxu1 %vm516_vm2, %v2889_v46 }
  0x6c   : > { %2757 = vmatmul.mubr.msk.bf16.vlgmr.msra.gmra.mxu0 %vm516_vm2, %v2890_v47  ;;  %2803 = vmatmul.mubr.msk.bf16.vlgmr.msra.gmra.mxu1 %vm516_vm2, %v2891_v48 }
  0x6d   : > { %2760 = vmatprep.mubr.msk.bf16.mxu0 %vm516_vm2, %v2892_v49  ;;  %2806 = vmatprep.mubr.msk.bf16.mxu1 %vm516_vm2, %v2893_v50 }
  0x74   : > { %2761 = vmatmul.mubr.msk.bf16.gmra.mxu0 %vm516_vm2, %v2894_v51  ;;  %2807 = vmatmul.mubr.msk.bf16.gmra.mxu1 %vm516_vm2, %v2895_v52 }
  0x75   : > { %2764 = vmatprep.mubr.msk.bf16.mxu0 %vm516_vm2, %v2896_v53  ;;  %2810 = vmatprep.mubr.msk.bf16.mxu1 %vm516_vm2, %v2897_v54 }
  0x7c   : > { %2765 = vmatmul.mubr.msk.bf16.gmra.mxu0 %vm516_vm2, %v2898_v55  ;;  %2811 = vmatmul.mubr.msk.bf16.gmra.mxu1 %vm516_vm2, %v2899_v56 }
  0x7d   : > { %2768 = vmatprep.mubr.msk.bf16.mxu0 %vm516_vm2, %v2900_v57  ;;  %2814 = vmatprep.mubr.msk.bf16.mxu1 %vm516_vm2, %v2901_v58 }
  0x84   : > { %2769 = vmatmul.mubr.msk.bf16.gmra.mxu0 %vm516_vm2, %v2902_v59  ;;  %2815 = vmatmul.mubr.msk.bf16.gmra.mxu1 %vm516_vm2, %v2903_v60 }
  0x85   : > { %2772 = vmatprep.mubr.msk.bf16.mxu0 %vm516_vm2, %v2904_v61  ;;  %2818 = vmatprep.mubr.msk.bf16.mxu1 %vm516_vm2, %v2905_v62 }
  0x8c   : > { %2773 = vmatmul.mubr.msk.bf16.gmra.mxu0 %vm516_vm2, %v2906_v63  ;;  %2819 = vmatmul.mubr.msk.bf16.gmra.mxu1 %vm516_vm2, %v2907_v0 }
  0x8d   : > { %2776 = vmatprep.mubr.msk.bf16.mxu0 %vm516_vm2, %v2908_v1  ;;  %2822 = vmatprep.mubr.msk.bf16.mxu1 %vm516_vm2, %v2909_v2 }
  0x94   : > { %2777 = vmatmul.mubr.msk.bf16.gmra.mxu0 %vm516_vm2, %v2910_v3  ;;  %2823 = vmatmul.mubr.msk.bf16.gmra.mxu1 %vm516_vm2, %v2911_v4 }
  0x95   : > { %2780 = vmatprep.mubr.msk.bf16.mxu0 %vm516_vm2, %v2912_v5  ;;  %2826 = vmatprep.mubr.msk.bf16.mxu1 %vm516_vm2, %v2913_v6 }
  0x9c   : > { %2781 = vmatmul.mubr.msk.bf16.gmra.mxu0 %vm516_vm2, %v2914_v7  ;;  %2827 = vmatmul.mubr.msk.bf16.gmra.mxu1 %vm516_vm2, %v2915_v8 }
  0x9d   : > { %2784 = vmatprep.mubr.msk.bf16.mxu0 %vm516_vm2, %v2916_v9  ;;  %2830 = vmatprep.mubr.msk.bf16.mxu1 %vm516_vm2, %v2917_v10 }
  0xa4   : > { %2785 = vmatmul.mubr.msk.bf16.gmra.mxu0 %vm516_vm2, %v2918_v11  ;;  %2831 = vmatmul.mubr.msk.bf16.gmra.mxu1 %vm516_vm2, %v2919_v12 }
  0xa5   : > { %2788 = vmatprep.mubr.msk.bf16.mxu0 %vm516_vm2, %v2920_v13  ;;  %2834 = vmatprep.mubr.msk.bf16.mxu1 %vm516_vm2, %v2921_v14 }
  0xac   : > { %2789 = vmatmul.mubr.msk.bf16.gmra.mxu0 %vm516_vm2, %v2922_v15  ;;  %2835 = vmatmul.mubr.msk.bf16.gmra.mxu1 %vm516_vm2, %v2923_v16 }
  0xe4   : > { %v2666_v19 = vpop.f32.mrf.mxu0  ;;  %v2712_v20 = vpop.f32.mrf.mxu1 }
  0xe5   : > { %v763_v21 = vmul.f32 %v2666_v19, %v3174_v17  ;;  %v1198_v22 = vmul.f32 %v2712_v20, %v3174_v17 }
  0xe6   : > { %v612_v23 = vpop.f32.mrf.mxu0  ;;  %v1053_v24 = vpop.f32.mrf.mxu1 }
  0xe7   : > { %v3184_v25 = vadd.f32 %v3179_v18, %v763_v21  ;;  %v3187_v26 = vadd.f32 %v3179_v18, %v1198_v22  ;;  %v761_v27 = vmul.f32 %v3174_v17, %v612_v23  ;;  %v1196_v28 = vmul.f32 %v3174_v17, %v1053_v24 }
  0xe8   : > { %v2667_v29 = vpop.f32.mrf.mxu0  ;;  %v2713_v30 = vpop.f32.mrf.mxu1 }
  0xe9   : > { %v3194_v32 = vadd.f32 %v3179_v18, %v761_v27  ;;  %v3197_v33 = vadd.f32 %v3179_v18, %v1196_v28  ;;  %v764_v34 = vmul.f32 %v2667_v29, %v3174_v17  ;;  %v1199_v35 = vmul.f32 %v2713_v30, %v3174_v17 }
  0xea   : > { %v615_v36 = vpop.f32.mrf.mxu0  ;;  %v1056_v37 = vpop.f32.mrf.mxu1 }
  0xeb   : > { %v3204_v39 = vadd.f32 %v3179_v18, %v764_v34  ;;  %v762_v40 = vmul.f32 %v3174_v17, %v615_v36  ;;  %v1197_v41 = vmul.f32 %v3174_v17, %v1056_v37  ;;  %v3209_v42 = vadd.f32 %v3179_v18, %v1199_v35 }
  0xec   : > { %v2670_v43 = vpop.f32.mrf.mxu0  ;;  %v2716_v44 = vpop.f32.mrf.mxu1 }
  0xed   : > { %v3212_v45 = vadd.f32 %v3179_v18, %v762_v40  ;;  %v3215_v46 = vadd.f32 %v3179_v18, %v1197_v41  ;;  %v767_v47 = vmul.f32 %v2670_v43, %v3174_v17  ;;  %v1202_v48 = vmul.f32 %v2716_v44, %v3174_v17 }
  0xee   : > { %v628_v50 = vpop.f32.mrf.mxu0  ;;  %v1069_v51 = vpop.f32.mrf.mxu1 }
  0xef   : > { %v3224_v53 = vadd.f32 %v3179_v18, %v767_v47  ;;  %v3227_v54 = vadd.f32 %v3179_v18, %v1202_v48  ;;  %v765_v55 = vmul.f32 %v3174_v17, %v628_v50  ;;  %v1200_v56 = vmul.f32 %v3174_v17, %v1069_v51 }
  0xf0   : > { %v2671_v57 = vpop.f32.mrf.mxu0  ;;  %v2717_v58 = vpop.f32.mrf.mxu1 }
  0xf1   : > { %v3234_v60 = vadd.f32 %v3179_v18, %v765_v55  ;;  %v768_v61 = vmul.f32 %v2671_v57, %v3174_v17  ;;  %v1203_v62 = vmul.f32 %v2717_v58, %v3174_v17  ;;  %v3239_v63 = vadd.f32 %v3179_v18, %v1200_v56 }
  0xf2   : > { %v631_v0 = vpop.f32.mrf.mxu0  ;;  %v1072_v1 = vpop.f32.mrf.mxu1 }
  0xf3   : > { %v3242_v2 = vadd.f32 %v3179_v18, %v768_v61  ;;  %v3245_v3 = vadd.f32 %v3179_v18, %v1203_v62  ;;  %v766_v4 = vmul.f32 %v3174_v17, %v631_v0  ;;  %v1201_v5 = vmul.f32 %v3174_v17, %v1072_v1 }
  0xf4   : > { %v2674_v7 = vpop.f32.mrf.mxu0  ;;  %v2720_v8 = vpop.f32.mrf.mxu1 }
  0xf5   : > { %v3254_v10 = vadd.f32 %v3179_v18, %v766_v4  ;;  %v3257_v11 = vadd.f32 %v3179_v18, %v1201_v5  ;;  %v771_v12 = vmul.f32 %v2674_v7, %v3174_v17  ;;  %v1206_v13 = vmul.f32 %v2720_v8, %v3174_v17 }
  0xf6   : > { %v644_v14 = vpop.f32.mrf.mxu0  ;;  %v1085_v15 = vpop.f32.mrf.mxu1 }
  0xf7   : > { %v3264_v19 = vadd.f32 %v3179_v18, %v771_v12  ;;  %v769_v20 = vmul.f32 %v3174_v17, %v644_v14  ;;  %v1204_v21 = vmul.f32 %v3174_v17, %v1085_v15  ;;  %v3269_v22 = vadd.f32 %v3179_v18, %v1206_v13 }
  0xf8   : > { %v2675_v23 = vpop.f32.mrf.mxu0  ;;  %v2721_v24 = vpop.f32.mrf.mxu1 }
  0xf9   : > { %v3272_v27 = vadd.f32 %v3179_v18, %v769_v20  ;;  %v3275_v28 = vadd.f32 %v3179_v18, %v1204_v21  ;;  %v772_v29 = vmul.f32 %v2675_v23, %v3174_v17  ;;  %v1207_v30 = vmul.f32 %v2721_v24, %v3174_v17 }
  0xfa   : > { %v647_v35 = vpop.f32.mrf.mxu0  ;;  %v1088_v36 = vpop.f32.mrf.mxu1 }
  0xfb   : > { %v3284_v40 = vadd.f32 %v3179_v18, %v772_v29  ;;  %v3287_v41 = vadd.f32 %v3179_v18, %v1207_v30  ;;  %v770_v43 = vmul.f32 %v3174_v17, %v647_v35  ;;  %v1205_v44 = vmul.f32 %v3174_v17, %v1088_v36 }
  0xfc   : > { %v2678_v47 = vpop.f32.mrf.mxu0  ;;  %v2724_v48 = vpop.f32.mrf.mxu1 }
  0xfd   : > { %v3294_v51 = vadd.f32 %v3179_v18, %v770_v43  ;;  %v775_v55 = vmul.f32 %v2678_v47, %v3174_v17  ;;  %v1210_v56 = vmul.f32 %v2724_v48, %v3174_v17  ;;  %v3299_v57 = vadd.f32 %v3179_v18, %v1205_v44 }
  0xfe   : > { %v660_v58 = vpop.f32.mrf.mxu0  ;;  %v1101_v61 = vpop.f32.mrf.mxu1 }
  0xff   : > { %v3302_v62 = vadd.f32 %v3179_v18, %v775_v55  ;;  %v3305_v0 = vadd.f32 %v3179_v18, %v1210_v56  ;;  %v773_v1 = vmul.f32 %v3174_v17, %v660_v58  ;;  %v1208_v4 = vmul.f32 %v3174_v17, %v1101_v61 }
 0x100   : > { %v2679_v7 = vpop.f32.mrf.mxu0  ;;  %v2725_v8 = vpop.f32.mrf.mxu1 }
 0x101   : > { %v3314_v13 = vadd.f32 %v3179_v18, %v773_v1  ;;  %v3317_v14 = vadd.f32 %v3179_v18, %v1208_v4  ;;  %v776_v15 = vmul.f32 %v2679_v7, %v3174_v17  ;;  %v1211_v20 = vmul.f32 %v2725_v8, %v3174_v17 }
 0x102   : > { %v663_v21 = vpop.f32.mrf.mxu0  ;;  %v1104_v23 = vpop.f32.mrf.mxu1 }
 0x103   : > { %v3324_v29 = vadd.f32 %v3179_v18, %v776_v15  ;;  %v774_v30 = vmul.f32 %v3174_v17, %v663_v21  ;;  %v1209_v35 = vmul.f32 %v3174_v17, %v1104_v23  ;;  %v3329_v36 = vadd.f32 %v3179_v18, %v1211_v20 }
 0x104   : > { %v2682_v43 = vpop.f32.mrf.mxu0  ;;  %v2728_v44 = vpop.f32.mrf.mxu1 }
 0x105   : > { %v3332_v47 = vadd.f32 %v3179_v18, %v774_v30  ;;  %v3335_v48 = vadd.f32 %v3179_v18, %v1209_v35  ;;  %v779_v55 = vmul.f32 %v2682_v43, %v3174_v17  ;;  %v1214_v56 = vmul.f32 %v2728_v44, %v3174_v17 }
 0x106   : > { %v676_v61 = vpop.f32.mrf.mxu0  ;;  %v1117_v1 = vpop.f32.mrf.mxu1 }
 0x107   : > { %v3344_v7 = vadd.f32 %v3179_v18, %v779_v55  ;;  %v3347_v8 = vadd.f32 %v3179_v18, %v1214_v56  ;;  %v777_v15 = vmul.f32 %v3174_v17, %v676_v61  ;;  %v1212_v20 = vmul.f32 %v3174_v17, %v1117_v1 }
 0x108   : > { %v2683_v21 = vpop.f32.mrf.mxu0  ;;  %v2729_v23 = vpop.f32.mrf.mxu1 }
 0x109   : > { %v3354_v35 = vadd.f32 %v3179_v18, %v777_v15  ;;  %v780_v43 = vmul.f32 %v2683_v21, %v3174_v17  ;;  %v1215_v44 = vmul.f32 %v2729_v23, %v3174_v17  ;;  %v3359_v55 = vadd.f32 %v3179_v18, %v1212_v20 }
 0x10a   : > { %v679_v56 = vpop.f32.mrf.mxu0  ;;  %v1120_v4 = vpop.f32.mrf.mxu1 }
 0x10b   : > { %v3362_v61 = vadd.f32 %v3179_v18, %v780_v43  ;;  %v3365_v1 = vadd.f32 %v3179_v18, %v1215_v44  ;;  %v778_v30 = vmul.f32 %v3174_v17, %v679_v56  ;;  %v1213_v15 = vmul.f32 %v3174_v17, %v1120_v4 }
 0x10c   : > { %v2686_v58 = vpop.f32.mrf.mxu0  ;;  %v2732_v23 = vpop.f32.mrf.mxu1 }
 0x10d   : > { %v3374_v24 = vadd.f32 %v3179_v18, %v778_v30  ;;  %v3377_v43 = vadd.f32 %v3179_v18, %v1213_v15  ;;  %v783_v44 = vmul.f32 %v2686_v58, %v3174_v17  ;;  %v1218_v56 = vmul.f32 %v2732_v23, %v3174_v17 }
 0x10e   : > { %v692_v12 = vpop.f32.mrf.mxu0  ;;  %v1133_v4 = vpop.f32.mrf.mxu1 }
 0x10f   : > { %v3384_v5 = vadd.f32 %v3179_v18, %v783_v44  ;;  %v781_v20 = vmul.f32 %v3174_v17, %v692_v12  ;;  %v1216_v30 = vmul.f32 %v3174_v17, %v1133_v4  ;;  %v3389_v50 = vadd.f32 %v3179_v18, %v1218_v56 }
 0x110   : > { %v2687_v15 = vpop.f32.mrf.mxu0  ;;  %v2733_v37 = vpop.f32.mrf.mxu1 }
 0x111   : > { %v3392_v58 = vadd.f32 %v3179_v18, %v781_v20  ;;  %v3395_v23 = vadd.f32 %v3179_v18, %v1216_v30  ;;  %v784_v21 = vmul.f32 %v2687_v15, %v3174_v17  ;;  %v1219_v44 = vmul.f32 %v2733_v37, %v3174_v17 }
 0x112   : > { %v695_v34 = vpop.f32.mrf.mxu0  ;;  %v1136_v4 = vpop.f32.mrf.mxu1 }
 0x113   : > { %3920 = vst [vmem:[#allocation2_spill] sm:$0xff] %v3395_v23  ;;  %v3404_v16 = vadd.f32 %v3179_v18, %v784_v21  ;;  %v3407_v20 = vadd.f32 %v3179_v18, %v1219_v44  ;;  %v782_v30 = vmul.f32 %v3174_v17, %v695_v34  ;;  %v1217_v15 = vmul.f32 %v3174_v17, %v1136_v4 }
 0x114   : > { %v2690_v9 = vpop.f32.mrf.mxu0  ;;  %v2736_v37 = vpop.f32.mrf.mxu1 }
 0x115   : > { %3921 = vst [vmem:[#allocation3_spill] sm:$0xff] %v3404_v16  ;;  %3922 = vst [vmem:[#allocation4_spill] sm:$0xff] %v3407_v20  ;;  %v3414_v6 = vadd.f32 %v3179_v18, %v782_v30  ;;  %v787_v56 = vmul.f32 %v2690_v9, %v3174_v17  ;;  %v1222_v21 = vmul.f32 %v2736_v37, %v3174_v17 }
 0x116   : > { %v3419_v59 = vadd.f32 %v3179_v18, %v1217_v15  ;;  %v708_v44 = vpop.f32.mrf.mxu0  ;;  %v1149_v52 = vpop.f32.mrf.mxu1 }
 0x117   : > { %3923 = vst [vmem:[#allocation5_spill] sm:$0xff] %v3414_v6  ;;  %v3422_v34 = vadd.f32 %v3179_v18, %v787_v56  ;;  %v3425_v4 = vadd.f32 %v3179_v18, %v1222_v21  ;;  %v785_v12 = vmul.f32 %v3174_v17, %v708_v44  ;;  %v1220_v30 = vmul.f32 %v3174_v17, %v1149_v52 }
 0x118   : > { %3924 = vst [vmem:[#allocation6_spill] sm:$0xff] %v3419_v59  ;;  %v2691_v49 = vpop.f32.mrf.mxu0  ;;  %v2737_v37 = vpop.f32.mrf.mxu1 }
 0x119   : > { %3925 = vst [vmem:[#allocation7_spill] sm:$0xff] %v3422_v34  ;;  %3926 = vst [vmem:[#allocation8_spill] sm:$0xff] %v3425_v4  ;;  %v3434_v38 = vadd.f32 %v3179_v18, %v785_v12  ;;  %v3437_v56 = vadd.f32 %v3179_v18, %v1220_v30  ;;  %v788_v21 = vmul.f32 %v2691_v49, %v3174_v17 }
 0x11a   : > { %v1223_v44 = vmul.f32 %v2737_v37, %v3174_v17  ;;  %v711_v31 = vpop.f32.mrf.mxu0  ;;  %v1152_v52 = vpop.f32.mrf.mxu1 }
 0x11b   : > { %3927 = vst [vmem:[#allocation9_spill] sm:$0xff] %v3434_v38  ;;  %3928 = vst [vmem:[#allocation10_spill] sm:$0xff] %v3437_v56  ;;  %v3444_v59 = vadd.f32 %v3179_v18, %v788_v21  ;;  %v786_v15 = vmul.f32 %v3174_v17, %v711_v31  ;;  %v1221_v12 = vmul.f32 %v3174_v17, %v1152_v52 }
 0x11c   : > { %v3449_v4 = vadd.f32 %v3179_v18, %v1223_v44  ;;  %v2694_v30 = vpop.f32.mrf.mxu0  ;;  %v2740_v34 = vpop.f32.mrf.mxu1 }
 0x11d   : > { %3929 = vst [vmem:[#allocation11_spill] sm:$0xff] %v3444_v59  ;;  %v3452_v49 = vadd.f32 %v3179_v18, %v786_v15  ;;  %v3455_v37 = vadd.f32 %v3179_v18, %v1221_v12  ;;  %v791_v9 = vmul.f32 %v2694_v30, %v3174_v17  ;;  %v1226_v21 = vmul.f32 %v2740_v34, %v3174_v17 }
 0x11e   : > { %3930 = vst [vmem:[#allocation12_spill] sm:$0xff] %v3449_v4  ;;  %v724_v56 = vpop.f32.mrf.mxu0  ;;  %v1165_v52 = vpop.f32.mrf.mxu1 }
 0x11f   : > { %3931 = vst [vmem:[#allocation13_spill] sm:$0xff] %v3452_v49  ;;  %3932 = vst [vmem:[#allocation14_spill] sm:$0xff] %v3455_v37  ;;  %v3464_v38 = vadd.f32 %v3179_v18, %v791_v9  ;;  %v3467_v15 = vadd.f32 %v3179_v18, %v1226_v21  ;;  %v789_v12 = vmul.f32 %v3174_v17, %v724_v56 }
 0x120   : > { %v1224_v30 = vmul.f32 %v3174_v17, %v1165_v52  ;;  %v2695_v6 = vpop.f32.mrf.mxu0  ;;  %v2741_v34 = vpop.f32.mrf.mxu1 }
 0x121   : > { %3933 = vst [vmem:[#allocation15_spill] sm:$0xff] %v3464_v38  ;;  %3934 = vst [vmem:[#allocation16_spill] sm:$0xff] %v3467_v15  ;;  %v3474_v4 = vadd.f32 %v3179_v18, %v789_v12  ;;  %v792_v44 = vmul.f32 %v2695_v6, %v3174_v17  ;;  %v1227_v9 = vmul.f32 %v2741_v34, %v3174_v17 }
 0x122   : > { %v3479_v37 = vadd.f32 %v3179_v18, %v1224_v30  ;;  %v727_v21 = vpop.f32.mrf.mxu0  ;;  %v1168_v49 = vpop.f32.mrf.mxu1 }
 0x123   : > { %3935 = vst [vmem:[#allocation17_spill] sm:$0xff] %v3474_v4  ;;  %v3482_v56 = vadd.f32 %v3179_v18, %v792_v44  ;;  %v3485_v52 = vadd.f32 %v3179_v18, %v1227_v9  ;;  %v790_v31 = vmul.f32 %v3174_v17, %v727_v21  ;;  %v1225_v12 = vmul.f32 %v3174_v17, %v1168_v49 }
 0x124   : > { %3936 = vst [vmem:[#allocation18_spill] sm:$0xff] %v3479_v37  ;;  %v2698_v15 = vpop.f32.mrf.mxu0  ;;  %v2744_v34 = vpop.f32.mrf.mxu1 }
 0x125   : > { %3937 = vst [vmem:[#allocation19_spill] sm:$0xff] %v3482_v56  ;;  %3938 = vst [vmem:[#allocation20_spill] sm:$0xff] %v3485_v52  ;;  %v3494_v38 = vadd.f32 %v3179_v18, %v790_v31  ;;  %v3497_v44 = vadd.f32 %v3179_v18, %v1225_v12  ;;  %v795_v9 = vmul.f32 %v2698_v15, %v3174_v17 }
 0x126   : > { %v1230_v21 = vmul.f32 %v2744_v34, %v3174_v17  ;;  %v740_v59 = vpop.f32.mrf.mxu0  ;;  %v1181_v49 = vpop.f32.mrf.mxu1 }
 0x127   : > { %3939 = vst [vmem:[#allocation21_spill] sm:$0xff] %v3494_v38  ;;  %3940 = vst [vmem:[#allocation22_spill] sm:$0xff] %v3497_v44  ;;  %v3504_v37 = vadd.f32 %v3179_v18, %v795_v9  ;;  %v793_v30 = vmul.f32 %v3174_v17, %v740_v59  ;;  %v1228_v31 = vmul.f32 %v3174_v17, %v1181_v49 }
 0x128   : > { %v3509_v52 = vadd.f32 %v3179_v18, %v1230_v21  ;;  %v2699_v12 = vpop.f32.mrf.mxu0  ;;  %v2745_v56 = vpop.f32.mrf.mxu1 }
 0x129   : > { %3941 = vst [vmem:[#allocation23_spill] sm:$0xff] %v3504_v37  ;;  %v3512_v15 = vadd.f32 %v3179_v18, %v793_v30  ;;  %v3515_v34 = vadd.f32 %v3179_v18, %v1228_v31  ;;  %v796_v6 = vmul.f32 %v2699_v12, %v3174_v17  ;;  %v1231_v9 = vmul.f32 %v2745_v56, %v3174_v17 }
 0x12a   : > { %3942 = vst [vmem:[#allocation24_spill] sm:$0xff] %v3509_v52  ;;  %v743_v44 = vpop.f32.mrf.mxu0  ;;  %v1184_v49 = vpop.f32.mrf.mxu1 }
 0x12b   : > { %3943 = vst [vmem:[#allocation25_spill] sm:$0xff] %v3512_v15  ;;  %3944 = vst [vmem:[#allocation26_spill] sm:$0xff] %v3515_v34  ;;  %v3524_v38 = vadd.f32 %v3179_v18, %v796_v6  ;;  %v3527_v30 = vadd.f32 %v3179_v18, %v1231_v9  ;;  %v794_v31 = vmul.f32 %v3174_v17, %v743_v44 }
 0x12c   : > { %v1229_v12 = vmul.f32 %v3174_v17, %v1184_v49  ;;  %v2758_v4 = vpop.f32.mrf.mxu0  ;;  %v2804_v56 = vpop.f32.mrf.mxu1 }
 0x12d   : > { %3945 = vst [vmem:[#allocation27_spill] sm:$0xff] %v3524_v38  ;;  %3946 = vst [vmem:[#allocation28_spill] sm:$0xff] %v3527_v30  ;;  %v3534_v52 = vadd.f32 %v3179_v18, %v794_v31  ;;  %v1663_v21 = vmul.f32 %v2758_v4, %v3174_v17  ;;  %v2092_v6 = vmul.f32 %v2804_v56, %v3174_v17 }
 0x12e   : > { %v3539_v9 = vadd.f32 %v3179_v18, %v1229_v12  ;;  %v1518_v34 = vpop.f32.mrf.mxu0  ;;  %v1947_v44 = vpop.f32.mrf.mxu1 }
 0x12f   : > { %v1699_v49 = vadd.f32 %v3179_v18, %v1663_v21  ;;  %v2128_v15 = vadd.f32 %v3179_v18, %v2092_v6  ;;  %v1661_v37 = vmul.f32 %v3174_v17, %v1518_v34  ;;  %v2090_v59 = vmul.f32 %v3174_v17, %v1947_v44 }
 0x130   : > { %3947 = vst [vmem:[#allocation29_spill] sm:$0xff] %v3539_v9  ;;  %v2759_v30 = vpop.f32.mrf.mxu0  ;;  %v2805_v4 = vpop.f32.mrf.mxu1  ;;  %v3948_v34 = vmax.f32 %v3184_v25, %v3187_v26  ;;  %v3949_v26 = vmax.f32 %v3194_v32, %v3197_v33 }
 0x131   : > { %v2164_v56 = vmax.f32 %v1699_v49, %v2128_v15  ;;  %v1697_v12 = vadd.f32 %v3179_v18, %v1661_v37  ;;  %v2126_v38 = vadd.f32 %v3179_v18, %v2090_v59  ;;  %v1664_v20 = vmul.f32 %v2759_v30, %v3174_v17 }
 0x132   : > { %v2093_v21 = vmul.f32 %v2805_v4, %v3174_v17  ;;  %v1521_v6 = vpop.f32.mrf.mxu0  ;;  %v1950_v16 = vpop.f32.mrf.mxu1 }
 0x133   : > { %v2200_v44 = vmax.f32 %v3948_v34, %v2164_v56  ;;  %v2162_v23 = vmax.f32 %v1697_v12, %v2126_v38  ;;  %v1700_v31 = vadd.f32 %v3179_v18, %v1664_v20  ;;  %v1662_v9 = vmul.f32 %v3174_v17, %v1521_v6 }
 0x134   : > { %v2129_v37 = vadd.f32 %v3179_v18, %v2093_v21  ;;  %v2091_v15 = vmul.f32 %v3174_v17, %v1950_v16  ;;  %v2762_v59 = vpop.f32.mrf.mxu0  ;;  %v2808_v30 = vpop.f32.mrf.mxu1 }
 0x135   : > { %v2236_v25 = vmax.f32 %v2200_v44, 0.0  ;;  %v2198_v38 = vmax.f32 %v3949_v26, %v2162_v23  ;;  %v1698_v20 = vadd.f32 %v3179_v18, %v1662_v9  ;;  %v1667_v49 = vmul.f32 %v2762_v59, %v3174_v17 }
 0x136   : > { %v2165_v4 = vmax.f32 %v1700_v31, %v2129_v37  ;;  %v2127_v56 = vadd.f32 %v3179_v18, %v2091_v15  ;;  %v2096_v12 = vmul.f32 %v2808_v30, %v3174_v17  ;;  %v1534_v21 = vpop.f32.mrf.mxu0  ;;  %v1963_v6 = vpop.f32.mrf.mxu1  ;;  %v3950_v23 = vmax.f32 %v3204_v39, %v3209_v42 }
 0x137   : > { %2273 = vst.msk [vmem:[%s3560_s12 + $0x10] sm:$0xff] %vm2270_vm3, %v2236_v25  ;;  %v2234_v16 = vmax.f32 %v2198_v38, 0.0  ;;  %v1703_v34 = vadd.f32 %v3179_v18, %v1667_v49  ;;  %v1665_v32 = vmul.f32 %v3174_v17, %v1534_v21  ;;  %v2094_v33 = vmul.f32 %v3174_v17, %v1963_v6 }
 0x138   : > { %v2201_v9 = vmax.f32 %v3950_v23, %v2165_v4  ;;  %v2163_v31 = vmax.f32 %v1698_v20, %v2127_v56  ;;  %v2132_v44 = vadd.f32 %v3179_v18, %v2096_v12  ;;  %v2763_v37 = vpop.f32.mrf.mxu0  ;;  %v2809_v15 = vpop.f32.mrf.mxu1  ;;  %v3951_v39 = vmax.f32 %v3212_v45, %v3215_v46 }
 0x139   : > { %2271 = vst.msk [vmem:[%s3560_s12] sm:$0xff] %vm2270_vm3, %v2234_v16  ;;  %v1701_v59 = vadd.f32 %v3179_v18, %v1665_v32  ;;  %v2130_v30 = vadd.f32 %v3179_v18, %v2094_v33  ;;  %v1668_v25 = vmul.f32 %v2763_v37, %v3174_v17  ;;  %v2097_v26 = vmul.f32 %v2809_v15, %v3174_v17 }
 0x13a   : > { %v2237_v38 = vmax.f32 %v2201_v9, 0.0  ;;  %v2199_v42 = vmax.f32 %v3951_v39, %v2163_v31  ;;  %v2168_v20 = vmax.f32 %v1703_v34, %v2132_v44  ;;  %v1537_v49 = vpop.f32.mrf.mxu0  ;;  %v1966_v4 = vpop.f32.mrf.mxu1  ;;  %v3952_v32 = vmax.f32 %v3224_v53, %v3227_v54 }
 0x13b   : > { %v2166_v56 = vmax.f32 %v1701_v59, %v2130_v30  ;;  %v1704_v12 = vadd.f32 %v3179_v18, %v1668_v25  ;;  %v2133_v21 = vadd.f32 %v3179_v18, %v2097_v26  ;;  %v1666_v6 = vmul.f32 %v3174_v17, %v1537_v49 }
 0x13c   : > { %2274 = vst.msk [vmem:[%s3560_s12 + $0x18] sm:$0xff] %vm2270_vm3, %v2237_v38  ;;  %v2235_v16 = vmax.f32 %v2199_v42, 0.0  ;;  %v2204_v33 = vmax.f32 %v3952_v32, %v2168_v20  ;;  %v2095_v45 = vmul.f32 %v3174_v17, %v1966_v4  ;;  %v2766_v46 = vpop.f32.mrf.mxu0  ;;  %v2812_v34 = vpop.f32.mrf.mxu1  ;;  %v3953_v23 = vmax.f32 %v3234_v60, %v3239_v63 }
 0x13d   : > { %v2169_v31 = vmax.f32 %v1704_v12, %v2133_v21  ;;  %v1702_v44 = vadd.f32 %v3179_v18, %v1666_v6  ;;  %v1671_v37 = vmul.f32 %v2766_v46, %v3174_v17  ;;  %v2100_v54 = vmul.f32 %v2812_v34, %v3174_v17 }
 0x13e   : > { %v2202_v9 = vmax.f32 %v3953_v23, %v2166_v56  ;;  %2272 = vst.msk [vmem:[%s3560_s12 + $0x8] sm:$0xff] %vm2270_vm3, %v2235_v16  ;;  %v2240_v15 = vmax.f32 %v2204_v33, 0.0  ;;  %v2131_v53 = vadd.f32 %v3179_v18, %v2095_v45  ;;  %v1550_v59 = vpop.f32.mrf.mxu0  ;;  %v1979_v30 = vpop.f32.mrf.mxu1  ;;  %v3954_v60 = vmax.f32 %v3242_v2, %v3245_v3 }
 0x13f   : > { %v1707_v26 = vadd.f32 %v3179_v18, %v1671_v37  ;;  %v1669_v38 = vmul.f32 %v3174_v17, %v1550_v59  ;;  %v2136_v42 = vadd.f32 %v3179_v18, %v2100_v54  ;;  %v2098_v20 = vmul.f32 %v3174_v17, %v1979_v30 }
 0x140   : > { %v2238_v25 = vmax.f32 %v2202_v9, 0.0  ;;  %v2205_v63 = vmax.f32 %v3954_v60, %v2169_v31  ;;  %2277 = vst.msk [vmem:[%s3560_s12 + $0x30] sm:$0xff] %vm2270_vm3, %v2240_v15  ;;  %v2167_v39 = vmax.f32 %v1702_v44, %v2131_v53  ;;  %v2767_v49 = vpop.f32.mrf.mxu0  ;;  %v2813_v4 = vpop.f32.mrf.mxu1  ;;  %v3955_v21 = vmax.f32 %v3254_v10, %v3257_v11 }
 0x141   : > { %v1705_v2 = vadd.f32 %v3179_v18, %v1669_v38  ;;  %v1672_v3 = vmul.f32 %v2767_v49, %v3174_v17  ;;  %v2101_v12 = vmul.f32 %v2813_v4, %v3174_v17  ;;  %v2172_v16 = vmax.f32 %v1707_v26, %v2136_v42 }
 0x142   : > { %2275 = vst.msk [vmem:[%s3560_s12 + $0x20] sm:$0xff] %vm2270_vm3, %v2238_v25  ;;  %v2241_v56 = vmax.f32 %v2205_v63, 0.0  ;;  %v2203_v6 = vmax.f32 %v3955_v21, %v2167_v39  ;;  %v2134_v32 = vadd.f32 %v3179_v18, %v2098_v20  ;;  %v1553_v33 = vpop.f32.mrf.mxu0  ;;  %v1982_v45 = vpop.f32.mrf.mxu1  ;;  %v3956_v10 = vmax.f32 %v3264_v19, %v3269_v22 }
 0x143   : > { %v1708_v46 = vadd.f32 %v3179_v18, %v1672_v3  ;;  %v2137_v34 = vadd.f32 %v3179_v18, %v2101_v12  ;;  %v1670_v23 = vmul.f32 %v3174_v17, %v1553_v33  ;;  %v2099_v9 = vmul.f32 %v3174_v17, %v1982_v45 }
 0x144   : > { %2278 = vst.msk [vmem:[%s3560_s12 + $0x38] sm:$0xff] %vm2270_vm3, %v2241_v56  ;;  %v2239_v31 = vmax.f32 %v2203_v6, 0.0  ;;  %v2208_v11 = vmax.f32 %v3956_v10, %v2172_v16  ;;  %v2170_v44 = vmax.f32 %v1705_v2, %v2134_v32  ;;  %v2770_v37 = vpop.f32.mrf.mxu0  ;;  %v2816_v15 = vpop.f32.mrf.mxu1  ;;  %v3957_v60 = vmax.f32 %v3272_v27, %v3275_v28 }
 0x145   : > { %v2173_v53 = vmax.f32 %v1708_v46, %v2137_v34  ;;  %v1706_v54 = vadd.f32 %v3179_v18, %v1670_v23  ;;  %v2135_v59 = vadd.f32 %v3179_v18, %v2099_v9  ;;  %v1675_v30 = vmul.f32 %v2770_v37, %v3174_v17 }
 0x146   : > { %2276 = vst.msk [vmem:[%s3560_s12 + $0x28] sm:$0xff] %vm2270_vm3, %v2239_v31  ;;  %v2244_v25 = vmax.f32 %v2208_v11, 0.0  ;;  %v2206_v63 = vmax.f32 %v3957_v60, %v2170_v44  ;;  %v2104_v19 = vmul.f32 %v2816_v15, %v3174_v17  ;;  %v1566_v22 = vpop.f32.mrf.mxu0  ;;  %v1995_v26 = vpop.f32.mrf.mxu1  ;;  %v3958_v38 = vmax.f32 %v3284_v40, %v3287_v41 }
 0x147   : > { %v2171_v42 = vmax.f32 %v1706_v54, %v2135_v59  ;;  %v1711_v20 = vadd.f32 %v3179_v18, %v1675_v30  ;;  %v1673_v49 = vmul.f32 %v3174_v17, %v1566_v22  ;;  %v2102_v28 = vmul.f32 %v3174_v17, %v1995_v26 }
 0x148   : > { %v2209_v39 = vmax.f32 %v3958_v38, %v2173_v53  ;;  %2281 = vst.msk [vmem:[%s3560_s12 + $0x50] sm:$0xff] %vm2270_vm3, %v2244_v25  ;;  %v2242_v4 = vmax.f32 %v2206_v63, 0.0  ;;  %v2140_v27 = vadd.f32 %v3179_v18, %v2104_v19  ;;  %v2771_v56 = vpop.f32.mrf.mxu0  ;;  %v2817_v2 = vpop.f32.mrf.mxu1  ;;  %v3959_v40 = vmax.f32 %v3294_v51, %v3299_v57 }
 0x149   : > { %v1709_v12 = vadd.f32 %v3179_v18, %v1673_v49  ;;  %v1676_v21 = vmul.f32 %v2771_v56, %v3174_v17  ;;  %v2138_v16 = vadd.f32 %v3179_v18, %v2102_v28  ;;  %v2105_v32 = vmul.f32 %v2817_v2, %v3174_v17 }
 0x14a   : > { %v2245_v3 = vmax.f32 %v2209_v39, 0.0  ;;  %v2207_v41 = vmax.f32 %v3959_v40, %v2171_v42  ;;  %2279 = vst.msk [vmem:[%s3560_s12 + $0x40] sm:$0xff] %vm2270_vm3, %v2242_v4  ;;  %v2176_v6 = vmax.f32 %v1711_v20, %v2140_v27  ;;  %v1569_v33 = vpop.f32.mrf.mxu0  ;;  %v1998_v45 = vpop.f32.mrf.mxu1  ;;  %v3960_v23 = vmax.f32 %v3302_v62, %v3305_v0 }
 0x14b   : > { %v1712_v51 = vadd.f32 %v3179_v18, %v1676_v21  ;;  %v1674_v57 = vmul.f32 %v3174_v17, %v1569_v33  ;;  %v2103_v34 = vmul.f32 %v3174_v17, %v1998_v45  ;;  %v2174_v31 = vmax.f32 %v1709_v12, %v2138_v16 }
 0x14c   : > { %2282 = vst.msk [vmem:[%s3560_s12 + $0x58] sm:$0xff] %vm2270_vm3, %v2245_v3  ;;  %v2243_v46 = vmax.f32 %v2207_v41, 0.0  ;;  %v2212_v9 = vmax.f32 %v3960_v23, %v2176_v6  ;;  %v2141_v10 = vadd.f32 %v3179_v18, %v2105_v32  ;;  %v2774_v11 = vpop.f32.mrf.mxu0  ;;  %v2820_v44 = vpop.f32.mrf.mxu1  ;;  %v3961_v62 = vmax.f32 %v3314_v13, %v3317_v14 }
 0x14d   : > { %v1710_v37 = vadd.f32 %v3179_v18, %v1674_v57  ;;  %v2139_v15 = vadd.f32 %v3179_v18, %v2103_v34  ;;  %v1679_v53 = vmul.f32 %v2774_v11, %v3174_v17  ;;  %v2108_v54 = vmul.f32 %v2820_v44, %v3174_v17 }
 0x14e   : > { %2280 = vst.msk [vmem:[%s3560_s12 + $0x48] sm:$0xff] %vm2270_vm3, %v2243_v46  ;;  %v2248_v59 = vmax.f32 %v2212_v9, 0.0  ;;  %v2210_v0 = vmax.f32 %v3961_v62, %v2174_v31  ;;  %v2177_v30 = vmax.f32 %v1712_v51, %v2141_v10  ;;  %v1582_v25 = vpop.f32.mrf.mxu0  ;;  %v2011_v60 = vpop.f32.mrf.mxu1  ;;  %v3962_v39 = vmax.f32 %v3324_v29, %v3329_v36 }
 0x14f   : > { %v2175_v63 = vmax.f32 %v1710_v37, %v2139_v15  ;;  %v1715_v19 = vadd.f32 %v3179_v18, %v1679_v53  ;;  %v2144_v22 = vadd.f32 %v3179_v18, %v2108_v54  ;;  %v1677_v26 = vmul.f32 %v3174_v17, %v1582_v25 }
 0x150   : > { %2285 = vst.msk [vmem:[%s3560_s12 + $0x70] sm:$0xff] %vm2270_vm3, %v2248_v59  ;;  %v2246_v38 = vmax.f32 %v2210_v0, 0.0  ;;  %v2213_v42 = vmax.f32 %v3962_v39, %v2177_v30  ;;  %v2106_v13 = vmul.f32 %v3174_v17, %v2011_v60  ;;  %v2775_v14 = vpop.f32.mrf.mxu0  ;;  %v2821_v20 = vpop.f32.mrf.mxu1  ;;  %v3963_v49 = vmax.f32 %v3332_v47, %v3335_v48 }
 0x151   : > { %v2180_v27 = vmax.f32 %v1715_v19, %v2144_v22  ;;  %v1713_v28 = vadd.f32 %v3179_v18, %v1677_v26  ;;  %v1680_v56 = vmul.f32 %v2775_v14, %v3174_v17  ;;  %v2109_v36 = vmul.f32 %v2821_v20, %v3174_v17 }
 0x152   : > { %v2211_v4 = vmax.f32 %v3963_v49, %v2175_v63  ;;  %2283 = vst.msk [vmem:[%s3560_s12 + $0x60] sm:$0xff] %vm2270_vm3, %v2246_v38  ;;  %v2249_v2 = vmax.f32 %v2213_v42, 0.0  ;;  %v2142_v29 = vadd.f32 %v3179_v18, %v2106_v13  ;;  %v1585_v3 = vpop.f32.mrf.mxu0  ;;  %v2014_v40 = vpop.f32.mrf.mxu1  ;;  %v3964_v47 = vmax.f32 %v3344_v7, %v3347_v8 }
 0x153   : > { %v1716_v12 = vadd.f32 %v3179_v18, %v1680_v56  ;;  %v1678_v21 = vmul.f32 %v3174_v17, %v1585_v3  ;;  %v2145_v16 = vadd.f32 %v3179_v18, %v2109_v36  ;;  %v2107_v32 = vmul.f32 %v3174_v17, %v2014_v40 }
 0x154   : > { %v2247_v41 = vmax.f32 %v2211_v4, 0.0  ;;  %v2216_v48 = vmax.f32 %v3964_v47, %v2180_v27  ;;  %2286 = vst.msk [vmem:[%s3560_s12 + $0x78] sm:$0xff] %vm2270_vm3, %v2249_v2  ;;  %v2178_v6 = vmax.f32 %v1713_v28, %v2142_v29  ;;  %v2778_v33 = vpop.f32.mrf.mxu0  ;;  %v2824_v45 = vpop.f32.mrf.mxu1  ;;  %v3965_v57 = vmax.f32 %v3354_v35, %v3359_v55  ;;  %v3969_v28 = vld [vmem:[#allocation2_spill] sm:$0xff] }
 0x155   : > { %v1714_v7 = vadd.f32 %v3179_v18, %v1678_v21  ;;  %v1683_v8 = vmul.f32 %v2778_v33, %v3174_v17  ;;  %v2112_v51 = vmul.f32 %v2824_v45, %v3174_v17  ;;  %v2181_v23 = vmax.f32 %v1716_v12, %v2145_v16  ;;  %v3971_v21 = vld [vmem:[#allocation3_spill] sm:$0xff] }
 0x156   : > { %2284 = vst.msk [vmem:[%s3560_s12 + $0x68] sm:$0xff] %vm2270_vm3, %v2247_v41  ;;  %v2252_v46 = vmax.f32 %v2216_v48, 0.0  ;;  %v2214_v34 = vmax.f32 %v3965_v57, %v2178_v6  ;;  %v2143_v9 = vadd.f32 %v3179_v18, %v2107_v32  ;;  %v1598_v31 = vpop.f32.mrf.mxu0  ;;  %v2027_v10 = vpop.f32.mrf.mxu1  ;;  %v3966_v35 = vmax.f32 %v3362_v61, %v3365_v1  ;;  %v3972_v6 = vld [vmem:[#allocation4_spill] sm:$0xff] }
 0x157   : > { %v1719_v11 = vadd.f32 %v3179_v18, %v1683_v8  ;;  %v2148_v44 = vadd.f32 %v3179_v18, %v2112_v51  ;;  %v1681_v37 = vmul.f32 %v3174_v17, %v1598_v31  ;;  %v2110_v15 = vmul.f32 %v3174_v17, %v2027_v10  ;;  %v3975_v31 = vld [vmem:[#allocation6_spill] sm:$0xff] }
 0x158   : > { %2289 = vst.msk [vmem:[%s3560_s12 + $0x90] sm:$0xff] %vm2270_vm3, %v2252_v46  ;;  %v2250_v53 = vmax.f32 %v2214_v34, 0.0  ;;  %v2217_v55 = vmax.f32 %v3966_v35, %v2181_v23  ;;  %v2179_v54 = vmax.f32 %v1714_v7, %v2143_v9  ;;  %v2779_v59 = vpop.f32.mrf.mxu0  ;;  %v2825_v62 = vpop.f32.mrf.mxu1  ;;  %v3967_v19 = vmax.f32 %v3374_v24, %v3377_v43  ;;  %v3974_v9 = vld [vmem:[#allocation5_spill] sm:$0xff]  ;;  %v3772_v35 = vld [vmem:[%s3890_s6] ss:$0 sm:$0xff] }
 0x159   : > { %v2184_v0 = vmax.f32 %v1719_v11, %v2148_v44  ;;  %v1717_v30 = vadd.f32 %v3179_v18, %v1681_v37  ;;  %v2146_v25 = vadd.f32 %v3179_v18, %v2110_v15  ;;  %v1684_v60 = vmul.f32 %v2779_v59, %v3174_v17 }
 0x15a   : > { %2287 = vst.msk [vmem:[%s3560_s12 + $0x80] sm:$0xff] %vm2270_vm3, %v2250_v53  ;;  %v2253_v63 = vmax.f32 %v2217_v55, 0.0  ;;  %v2215_v22 = vmax.f32 %v3967_v19, %v2179_v54  ;;  %v2113_v61 = vmul.f32 %v2825_v62, %v3174_v17  ;;  %v1601_v1 = vpop.f32.mrf.mxu0  ;;  %v2030_v26 = vpop.f32.mrf.mxu1  ;;  %v3968_v38 = vmax.f32 %v3384_v5, %v3389_v50  ;;  %v3977_v62 = vld [vmem:[#allocation7_spill] sm:$0xff] }
 0x15b   : > { %v2182_v42 = vmax.f32 %v1717_v30, %v2146_v25  ;;  %v1720_v13 = vadd.f32 %v3179_v18, %v1684_v60  ;;  %v1682_v14 = vmul.f32 %v3174_v17, %v1601_v1  ;;  %v2111_v43 = vmul.f32 %v3174_v17, %v2030_v26 }
 0x15c   : > { %v2220_v39 = vmax.f32 %v3968_v38, %v2184_v0  ;;  %2290 = vst.msk [vmem:[%s3560_s12 + $0x98] sm:$0xff] %vm2270_vm3, %v2253_v63  ;;  %v2251_v20 = vmax.f32 %v2215_v22, 0.0  ;;  %v2149_v24 = vadd.f32 %v3179_v18, %v2113_v61  ;;  %v2782_v49 = vpop.f32.mrf.mxu0  ;;  %v2828_v4 = vpop.f32.mrf.mxu1  ;;  %v3970_v50 = vmax.f32 %v3392_v58, %v3969_v28  ;;  %v3978_v0 = vld [vmem:[#allocation8_spill] sm:$0xff]  ;;  %v3980_v22 = vld [vmem:[#allocation9_spill] sm:$0xff]  ;;  %v3981_v61 = vld [vmem:[#allocation10_spill] sm:$0xff] }
 0x15d   : > { %v1718_v56 = vadd.f32 %v3179_v18, %v1682_v14  ;;  %v1687_v2 = vmul.f32 %v2782_v49, %v3174_v17  ;;  %v2147_v36 = vadd.f32 %v3179_v18, %v2111_v43  ;;  %v2116_v3 = vmul.f32 %v2828_v4, %v3174_v17  ;;  %v3983_v4 = vld [vmem:[#allocation11_spill] sm:$0xff] }
 0x15e   : > { %v2256_v27 = vmax.f32 %v2220_v39, 0.0  ;;  %v2218_v5 = vmax.f32 %v3970_v50, %v2182_v42  ;;  %2288 = vst.msk [vmem:[%s3560_s12 + $0x88] sm:$0xff] %vm2270_vm3, %v2251_v20  ;;  %v2185_v29 = vmax.f32 %v1720_v13, %v2149_v24  ;;  %v1614_v40 = vpop.f32.mrf.mxu0  ;;  %v2043_v41 = vpop.f32.mrf.mxu1  ;;  %v3973_v16 = vmax.f32 %v3971_v21, %v3972_v6  ;;  %v3987_v21 = vld [vmem:[#allocation14_spill] sm:$0xff] }
 0x15f   : > { %v1723_v58 = vadd.f32 %v3179_v18, %v1687_v2  ;;  %v1685_v48 = vmul.f32 %v3174_v17, %v1614_v40  ;;  %v2114_v12 = vmul.f32 %v3174_v17, %v2043_v41  ;;  %v2183_v33 = vmax.f32 %v1718_v56, %v2147_v36 }
 0x160   : > { %2293 = vst.msk [vmem:[%s3560_s12 + $0xb0] sm:$0xff] %vm2270_vm3, %v2256_v27  ;;  %v2254_v47 = vmax.f32 %v2218_v5, 0.0  ;;  %v2221_v32 = vmax.f32 %v3973_v16, %v2185_v29  ;;  %v2152_v45 = vadd.f32 %v3179_v18, %v2116_v3  ;;  %v2783_v46 = vpop.f32.mrf.mxu0  ;;  %v2829_v7 = vpop.f32.mrf.mxu1  ;;  %v3976_v10 = vmax.f32 %v3974_v9, %v3975_v31  ;;  %v3984_v27 = vld [vmem:[#allocation12_spill] sm:$0xff] }
 0x161   : > { %v1721_v8 = vadd.f32 %v3179_v18, %v1685_v48  ;;  %v2150_v51 = vadd.f32 %v3179_v18, %v2114_v12  ;;  %v1688_v57 = vmul.f32 %v2783_v46, %v3174_v17  ;;  %v2117_v34 = vmul.f32 %v2829_v7, %v3174_v17  ;;  %v3779_v17 = vld [vmem:[%s3889_s5] ss:$0 sm:$0xff]  ;;  %v3986_v12 = vld [vmem:[#allocation13_spill] sm:$0xff]  ;;  %v3990_v9 = vld [vmem:[#allocation16_spill] sm:$0xff] }
 0x162   : > { %2291 = vst.msk [vmem:[%s3560_s12 + $0xa0] sm:$0xff] %vm2270_vm3, %v2254_v47  ;;  %v2257_v23 = vmax.f32 %v2221_v32, 0.0  ;;  %v2219_v11 = vmax.f32 %v3976_v10, %v2183_v33  ;;  %v2188_v44 = vmax.f32 %v1723_v58, %v2152_v45  ;;  %v1617_v37 = vpop.f32.mrf.mxu0  ;;  %v2046_v15 = vpop.f32.mrf.mxu1  ;;  %v3979_v30 = vmax.f32 %v3977_v62, %v3978_v0  ;;  %v3993_v62 = vld [vmem:[#allocation18_spill] sm:$0xff] }
 0x163   : > { %v2186_v53 = vmax.f32 %v1721_v8, %v2150_v51  ;;  %v1724_v18 = vadd.f32 %v3772_v35, %v1688_v57  ;;  %v2153_v55 = vadd.f32 %v3772_v35, %v2117_v34  ;;  %v1686_v54 = vmul.f32 %v3779_v17, %v1617_v37 }
 0x164   : > { %2294 = vst.msk [vmem:[%s3560_s12 + $0xb8] sm:$0xff] %vm2270_vm3, %v2257_v23  ;;  %v2255_v59 = vmax.f32 %v2219_v11, 0.0  ;;  %v2224_v25 = vmax.f32 %v3979_v30, %v2188_v44  ;;  %v2115_v60 = vmul.f32 %v3779_v17, %v2046_v15  ;;  %v2786_v63 = vpop.f32.mrf.mxu0  ;;  %v2832_v19 = vpop.f32.mrf.mxu1  ;;  %v3982_v1 = vmax.f32 %v3980_v22, %v3981_v61  ;;  %v3989_v23 = vld [vmem:[#allocation15_spill] sm:$0xff]  ;;  %v3996_v22 = vld [vmem:[#allocation20_spill] sm:$0xff] }
 0x165   : > { %v2189_v38 = vmax.f32 %v1724_v18, %v2153_v55  ;;  %v1722_v39 = vadd.f32 %v3772_v35, %v1686_v54  ;;  %v1691_v42 = vmul.f32 %v3779_v17, %v2786_v63  ;;  %v2120_v20 = vmul.f32 %v3779_v17, %v2832_v19  ;;  %v3995_v19 = vld [vmem:[#allocation19_spill] sm:$0xff] }
 0x166   : > { %v2222_v26 = vmax.f32 %v3982_v1, %v2186_v53  ;;  %2292 = vst.msk [vmem:[%s3560_s12 + $0xa8] sm:$0xff] %vm2270_vm3, %v2255_v59  ;;  %v2260_v13 = vmax.f32 %v2224_v25, 0.0  ;;  %v2151_v14 = vadd.f32 %v3772_v35, %v2115_v60  ;;  %v1630_v24 = vpop.f32.mrf.mxu0  ;;  %v2059_v43 = vpop.f32.mrf.mxu1  ;;  %v3985_v28 = vmax.f32 %v3983_v4, %v3984_v27  ;;  %v3992_v59 = vld [vmem:[#allocation17_spill] sm:$0xff]  ;;  %v3999_v4 = vld [vmem:[#allocation22_spill] sm:$0xff] }
 0x167   : > { %v1727_v5 = vadd.f32 %v3772_v35, %v1691_v42  ;;  %v1689_v56 = vmul.f32 %v3779_v17, %v1630_v24  ;;  %v2156_v29 = vadd.f32 %v3772_v35, %v2120_v20  ;;  %v2118_v36 = vmul.f32 %v3779_v17, %v2059_v43 }
 0x168   : > { %v2258_v49 = vmax.f32 %v2222_v26, 0.0  ;;  %v2225_v50 = vmax.f32 %v3985_v28, %v2189_v38  ;;  %2297 = vst.msk [vmem:[%s3560_s12 + $0xd0] sm:$0xff] %vm2270_vm3, %v2260_v13  ;;  %v2187_v2 = vmax.f32 %v1722_v39, %v2151_v14  ;;  %v2787_v3 = vpop.f32.mrf.mxu0  ;;  %v2833_v40 = vpop.f32.mrf.mxu1  ;;  %v3988_v6 = vmax.f32 %v3986_v12, %v3987_v21  ;;  %v4002_v12 = vld [vmem:[#allocation24_spill] sm:$0xff] }
 0x169   : > { %v1725_v47 = vadd.f32 %v3772_v35, %v1689_v56  ;;  %v1692_v58 = vmul.f32 %v3779_v17, %v2787_v3  ;;  %v2121_v48 = vmul.f32 %v3779_v17, %v2833_v40  ;;  %v2192_v32 = vmax.f32 %v1727_v5, %v2156_v29 }
 0x16a   : > { %2295 = vst.msk [vmem:[%s3560_s12 + $0xc0] sm:$0xff] %vm2270_vm3, %v2258_v49  ;;  %v2261_v41 = vmax.f32 %v2225_v50, 0.0  ;;  %v2223_v16 = vmax.f32 %v3988_v6, %v2187_v2  ;;  %v2154_v33 = vadd.f32 %v3772_v35, %v2118_v36  ;;  %v1633_v45 = vpop.f32.mrf.mxu0  ;;  %v2062_v46 = vpop.f32.mrf.mxu1  ;;  %v3991_v31 = vmax.f32 %v3989_v23, %v3990_v9  ;;  %v3998_v49 = vld [vmem:[#allocation21_spill] sm:$0xff]  ;;  %v4007_v9 = vld [vmem:[#allocation27_spill] sm:$0xff] }
 0x16b   : > { %v1728_v7 = vadd.f32 %v3772_v35, %v1692_v58  ;;  %v2157_v8 = vadd.f32 %v3772_v35, %v2121_v48  ;;  %v1690_v51 = vmul.f32 %v3779_v17, %v1633_v45  ;;  %v2119_v57 = vmul.f32 %v3779_v17, %v2062_v46  ;;  %v4001_v48 = vld [vmem:[#allocation23_spill] sm:$0xff] }
 0x16c   : > { %2298 = vst.msk [vmem:[%s3560_s12 + $0xd8] sm:$0xff] %vm2270_vm3, %v2261_v41  ;;  %v2259_v34 = vmax.f32 %v2223_v16, 0.0  ;;  %v2228_v10 = vmax.f32 %v3991_v31, %v2192_v32  ;;  %v2190_v11 = vmax.f32 %v1725_v47, %v2154_v33  ;;  %v2790_v44 = vpop.f32.mrf.mxu0  ;;  %v2836_v37 = vpop.f32.mrf.mxu1  ;;  %v3994_v0 = vmax.f32 %v3992_v59, %v3993_v62  ;;  %v4008_v31 = vld [vmem:[#allocation28_spill] sm:$0xff] }
 0x16d   : > { %v2193_v15 = vmax.f32 %v1728_v7, %v2157_v8  ;;  %v1726_v53 = vadd.f32 %v3772_v35, %v1690_v51  ;;  %v2155_v18 = vadd.f32 %v3772_v35, %v2119_v57  ;;  %v1695_v55 = vmul.f32 %v3779_v17, %v2790_v44  ;;  %v4004_v7 = vld [vmem:[#allocation25_spill] sm:$0xff]  ;;  %v4005_v8 = vld [vmem:[#allocation26_spill] sm:$0xff] }
 0x16e   : > { %2296 = vst.msk [vmem:[%s3560_s12 + $0xc8] sm:$0xff] %vm2270_vm3, %v2259_v34  ;;  %v2264_v54 = vmax.f32 %v2228_v10, 0.0  ;;  %v2226_v30 = vmax.f32 %v3994_v0, %v2190_v11  ;;  %v2124_v25 = vmul.f32 %v3779_v17, %v2836_v37  ;;  %v1646_v60 = vpop.f32.mrf.mxu0  ;;  %v2075_v63 = vpop.f32.mrf.mxu1  ;;  %v3997_v61 = vmax.f32 %v3995_v19, %v3996_v22  ;;  %v4010_v44 = vld [vmem:[#allocation29_spill] sm:$0xff] }
 0x16f   : > { %v2191_v26 = vmax.f32 %v1726_v53, %v2155_v18  ;;  %v1731_v38 = vadd.f32 %v3772_v35, %v1695_v55  ;;  %v1693_v39 = vmul.f32 %v3779_v17, %v1646_v60  ;;  %v2122_v14 = vmul.f32 %v3779_v17, %v2075_v63 }
 0x170   : > { %v2229_v1 = vmax.f32 %v3997_v61, %v2193_v15  ;;  %2301 = vst.msk [vmem:[%s3560_s12 + $0xf0] sm:$0xff] %vm2270_vm3, %v2264_v54  ;;  %v2262_v42 = vmax.f32 %v2226_v30, 0.0  ;;  %v2160_v13 = vadd.f32 %v3772_v35, %v2124_v25  ;;  %v2791_v20 = vpop.f32.mrf.mxu0  ;;  %v2837_v24 = vpop.f32.mrf.mxu1  ;;  %v4000_v27 = vmax.f32 %v3998_v49, %v3999_v4 }
 0x171   : > { %v1729_v50 = vadd.f32 %v3772_v35, %v1693_v39  ;;  %v1696_v5 = vmul.f32 %v3779_v17, %v2791_v20  ;;  %v2158_v2 = vadd.f32 %v3772_v35, %v2122_v14  ;;  %v2125_v29 = vmul.f32 %v3779_v17, %v2837_v24 }
 0x172   : > { %v2265_v43 = vmax.f32 %v2229_v1, 0.0  ;;  %v2227_v28 = vmax.f32 %v4000_v27, %v2191_v26  ;;  %2299 = vst.msk [vmem:[%s3560_s12 + $0xe0] sm:$0xff] %vm2270_vm3, %v2262_v42  ;;  %v2196_v56 = vmax.f32 %v1731_v38, %v2160_v13  ;;  %v1649_v36 = vpop.f32.mrf.mxu0  ;;  %v2078_v3 = vpop.f32.mrf.mxu1  ;;  %v4003_v21 = vmax.f32 %v4001_v48, %v4002_v12 }
 0x173   : > { %v1732_v41 = vadd.f32 %v3772_v35, %v1696_v5  ;;  %v1694_v47 = vmul.f32 %v3779_v17, %v1649_v36  ;;  %v2123_v58 = vmul.f32 %v3779_v17, %v2078_v3  ;;  %v2194_v16 = vmax.f32 %v1729_v50, %v2158_v2 }
 0x174   : > { %2302 = vst.msk [vmem:[%s3560_s12 + $0xf8] sm:$0xff] %vm2270_vm3, %v2265_v43  ;;  %v2263_v40 = vmax.f32 %v2227_v28, 0.0  ;;  %v2232_v6 = vmax.f32 %v4003_v21, %v2196_v56  ;;  %v2161_v32 = vadd.f32 %v3772_v35, %v2125_v29  ;;  %v4006_v51 = vmax.f32 %v4004_v7, %v4005_v8 }
 0x175   : > { %v1730_v33 = vadd.f32 %v3772_v35, %v1694_v47  ;;  %v2159_v45 = vadd.f32 %v3772_v35, %v2123_v58  ;;  %v4009_v10 = vmax.f32 %v4007_v9, %v4008_v31  ;;  %v4011_v37 = vmax.f32 %v3534_v52, %v4010_v44 }
 0x176   : > { %2300 = vst.msk [vmem:[%s3560_s12 + $0xe8] sm:$0xff] %vm2270_vm3, %v2263_v40  ;;  %v2268_v46 = vmax.f32 %v2232_v6, 0.0  ;;  %v2230_v17 = vmax.f32 %v4006_v51, %v2194_v16  ;;  %v2197_v57 = vmax.f32 %v1732_v41, %v2161_v32 }
 0x177   : > { %v2195_v34 = vmax.f32 %v1730_v33, %v2159_v45 }
 0x178   : > { %2305 = vst.msk [vmem:[%s3560_s12 + $0x110] sm:$0xff] %vm2270_vm3, %v2268_v46  ;;  %v2266_v23 = vmax.f32 %v2230_v17, 0.0  ;;  %v2233_v11 = vmax.f32 %v4009_v10, %v2197_v57 }
 0x179   : > { %v2231_v15 = vmax.f32 %v4011_v37, %v2195_v34 }
 0x17a   : > { %2303 = vst.msk [vmem:[%s3560_s12 + $0x100] sm:$0xff] %vm2270_vm3, %v2266_v23  ;;  %v2269_v35 = vmax.f32 %v2233_v11, 0.0 }
 0x17b   : > { %v2267_v53 = vmax.f32 %v2231_v15, 0.0 }
 0x17c   : > { %2306 = vst.msk [vmem:[%s3560_s12 + $0x118] sm:$0xff] %vm2270_vm3, %v2269_v35 }
 0x17d   : > { %2304 = vst.msk [vmem:[%s3560_s12 + $0x108] sm:$0xff] %vm2270_vm3, %v2267_v53 }
 0x17e PF: > { %s17_s24 = sadd.s32 1, %s2932_s24  }
 0x17f   : > { %p14_p4 = scmp.ge.s32.totalorder %s17_s24, 4  }
 0x181   :  { %16 = sbr.rel (!%p14_p4) target bundleno = 1 (0x1), region = 87 }

// kernel: batchnorm_cnn_forward.4
= control target key start
LH: loop header
LB: loop body
LE: loop exit
PB: predicated region body
PF: predicated region fallthrough
CT: control target
= control target key end

     0   :  { %s1239_s24 = smov 0   ;;  %s1474_s0 = inlined_call_operand.vmem [shape: bf16[64,250], index: 0, kind: input, shape index: {}]   ;;  %s1475_s1 = inlined_call_operand.vmem [shape: bf16[64,250], index: 1, kind: input, shape index: {}]   ;;  %s1476_s2 = inlined_call_operand.vmem [shape: bf16[64,250], index: 2, kind: input, shape index: {}]   ;;  %s1477_s3 = inlined_call_operand.vmem [shape: bf16[64,250], index: 3, kind: input, shape index: {}]   ;;  %s1478_s4 = inlined_call_operand.vmem [shape: bf16[250,20], index: 4, kind: input, shape index: {}]   ;;  %s1479_s5 = inlined_call_operand.vmem [shape: f32[1,20], index: 5, kind: input, shape index: {}]   ;;  %s1480_s6 = inlined_call_operand.vmem [shape: f32[1,20], index: 6, kind: input, shape index: {}]   ;;  %s1481_s7 = inlined_call_operand.vmem [shape: f32[64,20], index: 7, kind: output, shape index: {}]  }
   0x1 LB: > { %s960_s25 = sadd.s32 4294967295, %s1197_s24   ;;  %p964_p0 = scmp.ge.s32.totalorder %s1197_s24, 1  ;;  %s1197_s24 = sphi %s1239_s24, %s17_s24  }
   0x2   : > { %p275_p1 = scmp.lt.s32.totalorder %s1197_s24, 3 }
   0x4   : > { %p276_p2 = pnand %p964_p0, %p275_p1 }
   0x5   : > { %s965_s9 = sshll.u32 (!%p276_p2), %s960_s25, 2 }
   0x6   : > { %279 = sbr.rel (%p276_p2) target bundleno = 296 (0x128), region = 48  ;;  %p327_p3 = scmp.lt.s32.totalorder (!%p276_p2), %s965_s9, 7 }
   0xb   : > { %v1250_v0 = vld [vmem:[%s1478_s4 + $0x78] sm:$0x1f]   ;;  %vm519_vm0 = vcmask 1044480   ;;  %v1264_v2 = vld [vmem:[%s1478_s4 + $0x70] sm:$0xff]   ;;  %v1278_v4 = vld [vmem:[%s1478_s4 + $0x68] sm:$0xff]   ;;  %s1483_s9 = smov (!%p327_p3, %s965_s9), 7 }
   0xc   : > { %v1255_v1 = vld [vmem:[%s1478_s4 + $0x38] sm:$0xff]   ;;  %1139 = vmatprep.subr.msk.bf16.mxu0 %vm519_vm0, %v1250_v0  ;;  %1140 = vmatprep.subr.msk.bf16.mxu1 %vm519_vm0, %v1250_v0  ;;  %v1271_v3 = vld [vmem:[%s1478_s4 + $0x30] sm:$0xff]   ;;  %v1285_v5 = vld [vmem:[%s1478_s4 + $0x28] sm:$0xff]   ;;  %s1301_s20 = sshll.u32 %s1483_s9, 3  ;;  %vm512_vm1 = vcmask 998400   ;;  %vm863_vm2 = vcmask 162816  }
   0xd   : > { %1028 = vmatpush3.bf16.msra.mxu0 %v1255_v1  ;;  %1056 = vmatpush3.bf16.msra.mxu1 %v1255_v1  ;;  %v1292_v6 = vld [vmem:[%s1478_s4 + $0x60] sm:$0xff]   ;;  %v1308_v8 = vld [vmem:[%s1478_s4 + $0x58] sm:$0xff]   ;;  %s1314_s26 = scalar_lea.vmem %s1474_s0, %s1301_s20  ;;  %s1327_s8 = scalar_lea.vmem %s1475_s1, %s1301_s20  ;;  %v1334_v10 = vld [vmem:[%s1478_s4 + $0x50] sm:$0xff]  }
   0xe   : > { %1029 = vmatprep.subr.bf16.mxu0 %v1264_v2  ;;  %1057 = vmatprep.subr.bf16.mxu1 %v1264_v2  ;;  %v1299_v7 = vld [vmem:[%s1478_s4 + $0x20] sm:$0xff]   ;;  %v1321_v9 = vld [vmem:[%s1478_s4 + $0x18] sm:$0xff]   ;;  %v1162_v13 = vld [vmem:[%s1478_s4 + $0x10] sm:$0xff]   ;;  %s1352_s17 = scalar_lea.vmem %s1476_s2, %s1301_s20  ;;  %s1360_s21 = scalar_lea.vmem %s1477_s3, %s1301_s20 }
   0xf   : > { %v1169_v11 = vld [vmem:[%s1314_s26 + $0x4] ss:$8 sps:$4 sm:$0xff]   ;;  %v1167_v18 = vld [vmem:[%s1314_s26] ss:$8 sps:$4 sm:$0xff]   ;;  %v1173_v20 = vld [vmem:[%s1314_s26 + $0x14] ss:$8 sps:$4 sm:$0xff]   ;;  %s1448_s12 = scalar_lea.vmem %s1481_s7, %s1301_s20 }
  0x10   : > { %v1172_v12 = vld [vmem:[%s1327_s8 + $0x4] ss:$8 sps:$4 sm:$0xff]   ;;  %999 = vmatprep.mubr.msk.bf16.mxu0 %vm512_vm1, %v1169_v11  ;;  %v1170_v19 = vld [vmem:[%s1327_s8] ss:$8 sps:$4 sm:$0xff]   ;;  %v1175_v21 = vld [vmem:[%s1327_s8 + $0x14] ss:$8 sps:$4 sm:$0xff]  }
  0x11   : > { %1030 = vmatpush3.bf16.msra.mxu0 %v1271_v3  ;;  %1058 = vmatpush3.bf16.msra.mxu1 %v1271_v3  ;;  %v1163_v14 = vld [vmem:[%s1478_s4 + $0x48] sm:$0xff]   ;;  %v1165_v16 = vld [vmem:[%s1478_s4 + $0x40] sm:$0xff]   ;;  %v1177_v22 = vld [vmem:[%s1314_s26 + $0x10] ss:$8 sps:$4 sm:$0xff]  }
  0x12   : > { %1031 = vmatprep.subr.bf16.mxu0 %v1278_v4  ;;  %1059 = vmatprep.subr.bf16.mxu1 %v1278_v4  ;;  %v1164_v15 = vld [vmem:[%s1478_s4 + $0x8] sm:$0xff]   ;;  %v1166_v17 = vld [vmem:[%s1478_s4] sm:$0xff]   ;;  %v1178_v23 = vld [vmem:[%s1327_s8 + $0x10] ss:$8 sps:$4 sm:$0xff]  }
  0x13   : > { %1007 = vmatprep.mubr.msk.bf16.mxu1 %vm512_vm1, %v1172_v12  ;;  %v1181_v24 = vld [vmem:[%s1352_s17 + $0x4] ss:$8 sps:$4 sm:$0xff]   ;;  %v1179_v26 = vld [vmem:[%s1352_s17] ss:$8 sps:$4 sm:$0xff]   ;;  %v1185_v28 = vld [vmem:[%s1352_s17 + $0x14] ss:$8 sps:$4 sm:$0xff]  }
  0x14   : > { %v1184_v25 = vld [vmem:[%s1360_s21 + $0x4] ss:$8 sps:$4 sm:$0xff]   ;;  %v1182_v27 = vld [vmem:[%s1360_s21] ss:$8 sps:$4 sm:$0xff]   ;;  %v1187_v29 = vld [vmem:[%s1360_s21 + $0x14] ss:$8 sps:$4 sm:$0xff]  }
  0x15   : > { %1032 = vmatpush3.bf16.msra.mxu0 %v1285_v5  ;;  %1060 = vmatpush3.bf16.msra.mxu1 %v1285_v5  ;;  %v1189_v30 = vld [vmem:[%s1352_s17 + $0x10] ss:$8 sps:$4 sm:$0xff]   ;;  %v1418_v48 = vld [vmem:[%s1479_s5] ss:$0 sm:$0xff] }
  0x16   : > { %1033 = vmatprep.subr.bf16.mxu0 %v1292_v6  ;;  %1061 = vmatprep.subr.bf16.mxu1 %v1292_v6  ;;  %v1190_v31 = vld [vmem:[%s1360_s21 + $0x10] ss:$8 sps:$4 sm:$0xff]   ;;  %v1425_v57 = vld [vmem:[%s1480_s6] ss:$0 sm:$0xff] }
  0x19   : > { %1034 = vmatpush3.bf16.msra.mxu0 %v1299_v7  ;;  %1062 = vmatpush3.bf16.msra.mxu1 %v1299_v7 }
  0x1a   : > { %1035 = vmatprep.subr.bf16.mxu0 %v1308_v8  ;;  %1063 = vmatprep.subr.bf16.mxu1 %v1308_v8 }
  0x1d   : > { %1036 = vmatpush3.bf16.msra.mxu0 %v1321_v9  ;;  %1064 = vmatpush3.bf16.msra.mxu1 %v1321_v9 }
  0x1e   : > { %1037 = vmatprep.subr.bf16.mxu0 %v1334_v10  ;;  %1065 = vmatprep.subr.bf16.mxu1 %v1334_v10 }
  0x21   : > { %1038 = vmatpush3.bf16.msra.mxu0 %v1162_v13  ;;  %1066 = vmatpush3.bf16.msra.mxu1 %v1162_v13 }
  0x22   : > { %1039 = vmatprep.subr.bf16.mxu0 %v1163_v14  ;;  %1067 = vmatprep.subr.bf16.mxu1 %v1163_v14 }
  0x25   : > { %1040 = vmatpush3.bf16.msra.mxu0 %v1164_v15  ;;  %1068 = vmatpush3.bf16.msra.mxu1 %v1164_v15 }
  0x26   : > { %1041 = vmatprep.subr.bf16.mxu0 %v1165_v16  ;;  %1069 = vmatprep.subr.bf16.mxu1 %v1165_v16 }
  0x29   : > { %1042 = vmatpush3.bf16.msra.mxu0 %v1166_v17  ;;  %1070 = vmatpush3.bf16.msra.mxu1 %v1166_v17 }
  0x2a   : > { %1141 = vmatprep.subr.msk.bf16.mxu0 %vm519_vm0, %v1250_v0  ;;  %1142 = vmatprep.subr.msk.bf16.mxu1 %vm519_vm0, %v1250_v0 }
  0x2c   : > { %556 = vmatmul.mubr.bf16.vlgmr.msra.gmra.mxu0 %v1167_v18  ;;  %653 = vmatmul.mubr.bf16.vlgmr.msra.gmra.mxu1 %v1170_v19 }
  0x2d   : > { %1084 = vmatpush3.bf16.msra.mxu0 %v1255_v1  ;;  %1112 = vmatpush3.bf16.msra.mxu1 %v1255_v1 }
  0x2e   : > { %1085 = vmatprep.subr.bf16.mxu0 %v1264_v2  ;;  %1113 = vmatprep.subr.bf16.mxu1 %v1264_v2 }
  0x2f   : > { %1000 = vmatprep.mubr.msk.bf16.mxu0 %vm512_vm1, %v1173_v20  ;;  %1008 = vmatprep.mubr.msk.bf16.mxu1 %vm512_vm1, %v1175_v21 }
  0x31   : > { %1086 = vmatpush3.bf16.msra.mxu0 %v1271_v3  ;;  %1114 = vmatpush3.bf16.msra.mxu1 %v1271_v3 }
  0x32   : > { %1087 = vmatprep.subr.bf16.mxu0 %v1278_v4  ;;  %1115 = vmatprep.subr.bf16.mxu1 %v1278_v4 }
  0x34   : > { %564 = vmatmul.mubr.bf16.gmra.mxu0 %v1177_v22  ;;  %661 = vmatmul.mubr.bf16.gmra.mxu1 %v1178_v23 }
  0x35   : > { %1088 = vmatpush3.bf16.msra.mxu0 %v1285_v5  ;;  %1116 = vmatpush3.bf16.msra.mxu1 %v1285_v5 }
  0x36   : > { %1089 = vmatprep.subr.bf16.mxu0 %v1292_v6  ;;  %1117 = vmatprep.subr.bf16.mxu1 %v1292_v6 }
  0x37   : > { %1013 = vmatprep.mubr.msk.bf16.mxu0 %vm512_vm1, %v1181_v24  ;;  %1019 = vmatprep.mubr.msk.bf16.mxu1 %vm512_vm1, %v1184_v25 }
  0x39   : > { %1090 = vmatpush3.bf16.msra.mxu0 %v1299_v7  ;;  %1118 = vmatpush3.bf16.msra.mxu1 %v1299_v7 }
  0x3a   : > { %1091 = vmatprep.subr.bf16.mxu0 %v1308_v8  ;;  %1119 = vmatprep.subr.bf16.mxu1 %v1308_v8 }
  0x3d   : > { %1092 = vmatpush3.bf16.msra.mxu0 %v1321_v9  ;;  %1120 = vmatpush3.bf16.msra.mxu1 %v1321_v9 }
  0x3e   : > { %1093 = vmatprep.subr.bf16.mxu0 %v1334_v10  ;;  %1121 = vmatprep.subr.bf16.mxu1 %v1334_v10 }
  0x41   : > { %1094 = vmatpush3.bf16.msra.mxu0 %v1162_v13  ;;  %1122 = vmatpush3.bf16.msra.mxu1 %v1162_v13 }
  0x42   : > { %1095 = vmatprep.subr.bf16.mxu0 %v1163_v14  ;;  %1123 = vmatprep.subr.bf16.mxu1 %v1163_v14 }
  0x45   : > { %1096 = vmatpush3.bf16.msra.mxu0 %v1164_v15  ;;  %1124 = vmatpush3.bf16.msra.mxu1 %v1164_v15 }
  0x46   : > { %1097 = vmatprep.subr.bf16.mxu0 %v1165_v16  ;;  %1125 = vmatprep.subr.bf16.mxu1 %v1165_v16 }
  0x49   : > { %1098 = vmatpush3.bf16.msra.mxu0 %v1166_v17  ;;  %1126 = vmatpush3.bf16.msra.mxu1 %v1166_v17 }
  0x4c   : > { %742 = vmatmul.mubr.bf16.vlgmr.msra.gmra.mxu0 %v1179_v26  ;;  %827 = vmatmul.mubr.bf16.vlgmr.msra.gmra.mxu1 %v1182_v27 }
  0x4d   : > { %1014 = vmatprep.mubr.msk.bf16.mxu0 %vm512_vm1, %v1185_v28  ;;  %1020 = vmatprep.mubr.msk.bf16.mxu1 %vm512_vm1, %v1187_v29 }
  0x54   : > { %750 = vmatmul.mubr.bf16.gmra.mxu0 %v1189_v30  ;;  %835 = vmatmul.mubr.bf16.gmra.mxu1 %v1190_v31 }
  0xec   : > { %v1043_v32 = vpop.f32.mrf.mxu0  ;;  %v1071_v33 = vpop.f32.mrf.mxu1 }
  0xee   : > { %v1044_v34 = vpop.f32.mrf.mxu0  ;;  %v1072_v35 = vpop.f32.mrf.mxu1 }
  0xef   : > { %v1045_v46 = vadd.f32 %v1044_v34, %v1043_v32  ;;  %v1073_v47 = vadd.f32 %v1072_v35, %v1071_v33 }
  0xf0   : > { %v1046_v36 = vpop.f32.mrf.mxu0  ;;  %v1074_v37 = vpop.f32.mrf.mxu1 }
  0xf1   : > { %v578_v51 = vmul.f32 %v1045_v46, %v1418_v48  ;;  %v669_v52 = vmul.f32 %v1073_v47, %v1418_v48 }
  0xf2   : > { %v1047_v38 = vpop.f32.mrf.mxu0  ;;  %v1075_v39 = vpop.f32.mrf.mxu1 }
  0xf3   : > { %v1048_v53 = vadd.f32 %v1047_v38, %v1046_v36  ;;  %v1076_v54 = vadd.f32 %v1075_v39, %v1074_v37  ;;  %v588_v62 = vadd.f32 %v1425_v57, %v578_v51  ;;  %v673_v63 = vadd.f32 %v1425_v57, %v669_v52 }
  0xf4   : > { %v1049_v40 = vpop.f32.mrf.mxu0  ;;  %v1077_v41 = vpop.f32.mrf.mxu1 }
  0xf5   : > { %v579_v0 = vmul.f32 %v1048_v53, %v1418_v48  ;;  %v670_v1 = vmul.f32 %v1076_v54, %v1418_v48  ;;  %v677_v14 = vmax.f32 %v588_v62, %v673_v63 }
  0xf6   : > { %v1050_v42 = vpop.f32.mrf.mxu0  ;;  %v1078_v43 = vpop.f32.mrf.mxu1 }
  0xf7   : > { %v1051_v6 = vadd.f32 %v1050_v42, %v1049_v40  ;;  %v1079_v7 = vadd.f32 %v1078_v43, %v1077_v41  ;;  %v589_v15 = vadd.f32 %v1425_v57, %v579_v0  ;;  %v674_v16 = vadd.f32 %v1425_v57, %v670_v1 }
  0xf8   : > { %v1052_v44 = vpop.f32.mrf.mxu0  ;;  %v1080_v45 = vpop.f32.mrf.mxu1 }
  0xf9   : > { %v580_v24 = vmul.f32 %v1051_v6, %v1418_v48  ;;  %v671_v25 = vmul.f32 %v1079_v7, %v1418_v48  ;;  %v678_v32 = vmax.f32 %v589_v15, %v674_v16 }
  0xfa   : > { %v1053_v49 = vpop.f32.mrf.mxu0  ;;  %v1081_v50 = vpop.f32.mrf.mxu1 }
  0xfb   : > { %v1054_v17 = vadd.f32 %v1053_v49, %v1052_v44  ;;  %v1082_v20 = vadd.f32 %v1081_v50, %v1080_v45  ;;  %v590_v41 = vadd.f32 %v1425_v57, %v580_v24  ;;  %v675_v42 = vadd.f32 %v1425_v57, %v671_v25 }
  0xfd   : > { %v581_v33 = vmul.f32 %v1054_v17, %v1418_v48  ;;  %v672_v37 = vmul.f32 %v1082_v20, %v1418_v48 }
  0xff   : > { %v591_v51 = vadd.f32 %v1425_v57, %v581_v33  ;;  %v676_v53 = vadd.f32 %v1425_v57, %v672_v37 }
 0x101   : > { %v680_v63 = vmax.f32 %v591_v51, %v676_v53 }
 0x10c   : > { %v1099_v55 = vpop.f32.mrf.mxu0  ;;  %v1127_v56 = vpop.f32.mrf.mxu1 }
 0x10e   : > { %v1100_v58 = vpop.f32.mrf.mxu0  ;;  %v1128_v59 = vpop.f32.mrf.mxu1 }
 0x10f   : > { %v1101_v60 = vadd.f32 %v1100_v58, %v1099_v55  ;;  %v1129_v61 = vadd.f32 %v1128_v59, %v1127_v56  ;;  %v679_v58 = vmax.f32 %v590_v41, %v675_v42 }
 0x110   : > { %v1102_v2 = vpop.f32.mrf.mxu0  ;;  %v1130_v3 = vpop.f32.mrf.mxu1 }
 0x111   : > { %v758_v4 = vmul.f32 %v1101_v60, %v1418_v48  ;;  %v843_v5 = vmul.f32 %v1129_v61, %v1418_v48 }
 0x112   : > { %v1103_v8 = vpop.f32.mrf.mxu0  ;;  %v1131_v9 = vpop.f32.mrf.mxu1 }
 0x113   : > { %v762_v10 = vadd.f32 %v1425_v57, %v758_v4  ;;  %v847_v11 = vadd.f32 %v1425_v57, %v843_v5  ;;  %v1104_v12 = vadd.f32 %v1103_v8, %v1102_v2  ;;  %v1132_v13 = vadd.f32 %v1131_v9, %v1130_v3 }
 0x114   : > { %v1105_v18 = vpop.f32.mrf.mxu0  ;;  %v1133_v19 = vpop.f32.mrf.mxu1 }
 0x115   : > { %v851_v21 = vmax.f32 %v762_v10, %v847_v11  ;;  %v759_v22 = vmul.f32 %v1104_v12, %v1418_v48  ;;  %v844_v23 = vmul.f32 %v1132_v13, %v1418_v48 }
 0x116   : > { %v1106_v26 = vpop.f32.mrf.mxu0  ;;  %v1134_v27 = vpop.f32.mrf.mxu1 }
 0x117   : > { %v855_v28 = vmax.f32 %v677_v14, %v851_v21  ;;  %v763_v29 = vadd.f32 %v1425_v57, %v759_v22  ;;  %v848_v30 = vadd.f32 %v1425_v57, %v844_v23  ;;  %v1107_v31 = vadd.f32 %v1106_v26, %v1105_v18 }
 0x118   : > { %v1135_v34 = vadd.f32 %v1134_v27, %v1133_v19  ;;  %v1108_v35 = vpop.f32.mrf.mxu0  ;;  %v1136_v36 = vpop.f32.mrf.mxu1 }
 0x119   : > { %v859_v38 = vmax.f32 %v855_v28, 0.0  ;;  %v852_v39 = vmax.f32 %v763_v29, %v848_v30  ;;  %v760_v40 = vmul.f32 %v1107_v31, %v1418_v48 }
 0x11a   : > { %v845_v43 = vmul.f32 %v1135_v34, %v1418_v48  ;;  %v1109_v44 = vpop.f32.mrf.mxu0  ;;  %v1137_v45 = vpop.f32.mrf.mxu1 }
 0x11b   : > { %864 = vst.msk [vmem:[%s1448_s12] sm:$0xff] %vm863_vm2, %v859_v38  ;;  %v856_v46 = vmax.f32 %v678_v32, %v852_v39  ;;  %v764_v47 = vadd.f32 %v1425_v57, %v760_v40  ;;  %v1110_v49 = vadd.f32 %v1109_v44, %v1108_v35  ;;  %v1138_v50 = vadd.f32 %v1137_v45, %v1136_v36 }
 0x11c   : > { %v849_v52 = vadd.f32 %v1425_v57, %v845_v43 }
 0x11d   : > { %v860_v54 = vmax.f32 %v856_v46, 0.0  ;;  %v761_v55 = vmul.f32 %v1110_v49, %v1418_v48  ;;  %v846_v56 = vmul.f32 %v1138_v50, %v1418_v48 }
 0x11e   : > { %v853_v59 = vmax.f32 %v764_v47, %v849_v52 }
 0x11f   : > { %865 = vst.msk [vmem:[%s1448_s12 + $0x8] sm:$0xff] %vm863_vm2, %v860_v54  ;;  %v765_v60 = vadd.f32 %v1425_v57, %v761_v55  ;;  %v850_v61 = vadd.f32 %v1425_v57, %v846_v56 }
 0x120   : > { %v857_v62 = vmax.f32 %v679_v58, %v853_v59 }
 0x121   : > { %v854_v0 = vmax.f32 %v765_v60, %v850_v61 }
 0x122   : > { %v861_v1 = vmax.f32 %v857_v62, 0.0 }
 0x123   : > { %v858_v2 = vmax.f32 %v680_v63, %v854_v0 }
 0x124   : > { %866 = vst.msk [vmem:[%s1448_s12 + $0x10] sm:$0xff] %vm863_vm2, %v861_v1 }
 0x125   : > { %v862_v3 = vmax.f32 %v858_v2, 0.0 }
 0x127   : > { %867 = vst.msk [vmem:[%s1448_s12 + $0x18] sm:$0xff] %vm863_vm2, %v862_v3 }
 0x128 PF: > { %s17_s24 = sadd.s32 1, %s1197_s24  }
 0x129   : > { %p14_p4 = scmp.ge.s32.totalorder %s17_s24, 4  }
 0x12b   :  { %16 = sbr.rel (!%p14_p4) target bundleno = 1 (0x1), region = 87 }

// kernel: batchnorm_cnn_forward.5
= control target key start
LH: loop header
LB: loop body
LE: loop exit
PB: predicated region body
PF: predicated region fallthrough
CT: control target
= control target key end

     0   :  { %v10573_v8 = vmov 0   ;;  %vm2046_vm0 = vcmask 523264   ;;  %s13962_s0 = inlined_call_operand.vmem [shape: f32[4,320], index: 0, kind: input, shape index: {}]   ;;  %s13963_s1 = inlined_call_operand.vmem [shape: bf16[320,2048], index: 1, kind: input, shape index: {}]   ;;  %s13964_s2 = inlined_call_operand.vmem [shape: f32[1,2048], index: 2, kind: input, shape index: {}]   ;;  %s13965_s3 = inlined_call_operand.vmem [shape: bf16[2048,562], index: 3, kind: input, shape index: {}]   ;;  %s13966_s4 = inlined_call_operand.vmem [shape: f32[1,562], index: 4, kind: input, shape index: {}]   ;;  %s13967_s5 = inlined_call_operand.vmem [shape: bf16[562,32], index: 5, kind: input, shape index: {}]   ;;  %s13968_s6 = inlined_call_operand.vmem [shape: f32[1,32], index: 6, kind: input, shape index: {}]   ;;  %s13969_s7 = inlined_call_operand.vmem [shape: bf16[32,10], index: 7, kind: input, shape index: {}]   ;;  %s13970_s8 = inlined_call_operand.vmem [shape: f32[1,10], index: 8, kind: input, shape index: {}]   ;;  %s13971_s9 = inlined_call_operand.hbm [shape: f32[4,10], index: 9, kind: output, shape index: {}]  }
   0x1   :  { %v154_v0 = vld [vmem:[%s13963_s1 + $0x380] sm:$0xff]  ;;  %2123 = vmatprep.mubr.bf16.mxu1 %v10573_v8  ;;  %v155_v33 = vld [vmem:[%s13963_s1 + $0x388] sm:$0xff] }
   0x2   :  { %v162_v1 = vld [vmem:[%s13963_s1 + $0x3c0] sm:$0xff]  ;;  %v163_v34 = vld [vmem:[%s13963_s1 + $0x3c8] sm:$0xff] }
   0x3   :  { %v346_v2 = vld [vmem:[%s13963_s1 + $0x980] sm:$0xff]  ;;  %v8464_v3 = vcombine.high %v154_v0, %v162_v1  ;;  %v8463_v5 = vcombine.low %v154_v0, %v162_v1  ;;  %v35_v38 = vld [vmem:[%s13962_s0 + $0x8] sm:$0xf]  ;;  %v8466_v39 = vcombine.high %v155_v33, %v163_v34  ;;  %v8465_v46 = vcombine.low %v155_v33, %v163_v34 }
   0x4   :  { %v354_v4 = vld [vmem:[%s13963_s1 + $0x9c0] sm:$0xff]  ;;  %v139_v42 = vld [vmem:[%s13963_s1 + $0x308] sm:$0xff]  ;;  %v10703_v44 = vpack.c.bf16 %v35_v38, %v35_v38 }
   0x5   :  { %v138_v6 = vld [vmem:[%s13963_s1 + $0x300] sm:$0xff]  ;;  %v8656_v9 = vcombine.high %v346_v2, %v354_v4  ;;  %v8655_v10 = vcombine.low %v346_v2, %v354_v4  ;;  %2050 = vmatprep.subr.bf16.mxu0 %v8464_v3  ;;  %v147_v43 = vld [vmem:[%s13963_s1 + $0x348] sm:$0xff] }
   0x6   :  { %v146_v7 = vld [vmem:[%s13963_s1 + $0x340] sm:$0xff]  ;;  %2051 = vmatpush1.bf16.msra.mxu0 %v8463_v5  ;;  %v8450_v48 = vcombine.high %v139_v42, %v147_v43  ;;  %v123_v51 = vld [vmem:[%s13963_s1 + $0x288] sm:$0xff]  ;;  %v8449_v54 = vcombine.low %v139_v42, %v147_v43 }
   0x7   :  { %v8448_v11 = vcombine.high %v138_v6, %v146_v7  ;;  %v330_v12 = vld [vmem:[%s13963_s1 + $0x900] sm:$0xff]  ;;  %2099 = vmatprep.subr.bf16.mxu1 %v8656_v9  ;;  %v8447_v19 = vcombine.low %v138_v6, %v146_v7  ;;  %v131_v52 = vld [vmem:[%s13963_s1 + $0x2c8] sm:$0xff] }
   0x8   :  { %v338_v13 = vld [vmem:[%s13963_s1 + $0x940] sm:$0xff]  ;;  %2100 = vmatpush1.bf16.msra.mxu1 %v8655_v10  ;;  %v8434_v57 = vcombine.high %v123_v51, %v131_v52  ;;  %v107_v61 = vld [vmem:[%s13963_s1 + $0x208] sm:$0xff]  ;;  %v8433_v1 = vcombine.low %v123_v51, %v131_v52 }
   0x9   :  { %v122_v14 = vld [vmem:[%s13963_s1 + $0x280] sm:$0xff]  ;;  %v8640_v15 = vcombine.high %v330_v12, %v338_v13  ;;  %2052 = vmatprep.subr.bf16.mxu0 %v8448_v11  ;;  %v8639_v20 = vcombine.low %v330_v12, %v338_v13  ;;  %v115_v62 = vld [vmem:[%s13963_s1 + $0x248] sm:$0xff] }
   0xa   :  { %v130_v16 = vld [vmem:[%s13963_s1 + $0x2c0] sm:$0xff]  ;;  %2053 = vmatpush1.bf16.msra.mxu0 %v8447_v19  ;;  %v8418_v3 = vcombine.high %v107_v61, %v115_v62  ;;  %v91_v6 = vld [vmem:[%s13963_s1 + $0x188] sm:$0xff]  ;;  %v8417_v10 = vcombine.low %v107_v61, %v115_v62 }
   0xb   :  { %v314_v17 = vld [vmem:[%s13963_s1 + $0x880] sm:$0xff]  ;;  %v8432_v21 = vcombine.high %v122_v14, %v130_v16  ;;  %2101 = vmatprep.subr.bf16.mxu1 %v8640_v15  ;;  %v8431_v27 = vcombine.low %v122_v14, %v130_v16  ;;  %v99_v7 = vld [vmem:[%s13963_s1 + $0x1c8] sm:$0xff] }
   0xc   :  { %v322_v18 = vld [vmem:[%s13963_s1 + $0x8c0] sm:$0xff]  ;;  %2102 = vmatpush1.bf16.msra.mxu1 %v8639_v20  ;;  %v8402_v12 = vcombine.high %v91_v6, %v99_v7  ;;  %v75_v15 = vld [vmem:[%s13963_s1 + $0x108] sm:$0xff] }
   0xd   :  { %v8624_v22 = vcombine.high %v314_v17, %v322_v18  ;;  %v106_v23 = vld [vmem:[%s13963_s1 + $0x200] sm:$0xff]  ;;  %2054 = vmatprep.subr.bf16.mxu0 %v8432_v21  ;;  %v8623_v28 = vcombine.low %v314_v17, %v322_v18  ;;  %v83_v16 = vld [vmem:[%s13963_s1 + $0x148] sm:$0xff]  ;;  %v8401_v18 = vcombine.low %v91_v6, %v99_v7 }
   0xe   :  { %v114_v24 = vld [vmem:[%s13963_s1 + $0x240] sm:$0xff]  ;;  %2055 = vmatpush1.bf16.msra.mxu0 %v8431_v27  ;;  %v8386_v20 = vcombine.high %v75_v15, %v83_v16 }
   0xf   :  { %v298_v25 = vld [vmem:[%s13963_s1 + $0x800] sm:$0xff]  ;;  %v8416_v29 = vcombine.high %v106_v23, %v114_v24  ;;  %2103 = vmatprep.subr.bf16.mxu1 %v8624_v22  ;;  %v8415_v35 = vcombine.low %v106_v23, %v114_v24  ;;  %v59_v23 = vld [vmem:[%s13963_s1 + $0x88] sm:$0xff] }
  0x10   :  { %v306_v26 = vld [vmem:[%s13963_s1 + $0x840] sm:$0xff]  ;;  %2104 = vmatpush1.bf16.msra.mxu1 %v8623_v28  ;;  %v67_v24 = vld [vmem:[%s13963_s1 + $0xc8] sm:$0xff] }
  0x11   :  { %v8608_v30 = vcombine.high %v298_v25, %v306_v26  ;;  %v90_v31 = vld [vmem:[%s13963_s1 + $0x180] sm:$0xff]  ;;  %2056 = vmatprep.subr.bf16.mxu0 %v8416_v29  ;;  %v8607_v36 = vcombine.low %v298_v25, %v306_v26  ;;  %v8385_v26 = vcombine.low %v75_v15, %v83_v16  ;;  %v8370_v28 = vcombine.high %v59_v23, %v67_v24 }
  0x12   :  { %v98_v32 = vld [vmem:[%s13963_s1 + $0x1c0] sm:$0xff]  ;;  %2057 = vmatpush1.bf16.msra.mxu0 %v8415_v35  ;;  %v8369_v34 = vcombine.low %v59_v23, %v67_v24 }
  0x13   :  { %v8400_v37 = vcombine.high %v90_v31, %v98_v32  ;;  %2105 = vmatprep.subr.bf16.mxu1 %v8608_v30  ;;  %v74_v40 = vld [vmem:[%s13963_s1 + $0x100] sm:$0xff]  ;;  %v8399_v45 = vcombine.low %v90_v31, %v98_v32  ;;  %v43_v31 = vld [vmem:[%s13963_s1 + $0x8] sm:$0xff] }
  0x14   :  { %v82_v41 = vld [vmem:[%s13963_s1 + $0x140] sm:$0xff]  ;;  %2106 = vmatpush1.bf16.msra.mxu1 %v8607_v36  ;;  %v51_v32 = vld [vmem:[%s13963_s1 + $0x48] sm:$0xff] }
  0x15   :  { %2058 = vmatprep.subr.bf16.mxu0 %v8400_v37  ;;  %v8384_v47 = vcombine.high %v74_v40, %v82_v41  ;;  %2132 = vmatprep.subr.bf16.mxu1 %v8466_v39  ;;  %v58_v49 = vld [vmem:[%s13963_s1 + $0x80] sm:$0xff]  ;;  %v8383_v53 = vcombine.low %v74_v40, %v82_v41  ;;  %v8354_v36 = vcombine.high %v43_v31, %v51_v32  ;;  %v283_v39 = vld [vmem:[%s13963_s1 + $0x788] sm:$0xff] }
  0x16   :  { %v66_v50 = vld [vmem:[%s13963_s1 + $0xc0] sm:$0xff]  ;;  %2059 = vmatpush1.bf16.msra.mxu0 %v8399_v45  ;;  %v291_v40 = vld [vmem:[%s13963_s1 + $0x7c8] sm:$0xff]  ;;  %v8353_v42 = vcombine.low %v43_v31, %v51_v32 }
  0x17   :  { %8671 = vmatmul.mubr.msk.bf16.vlgmr.msra.gmra.mxu1 %vm2046_vm0, %v10703_v44  ;;  %2060 = vmatprep.subr.bf16.mxu0 %v8384_v47  ;;  %v8368_v55 = vcombine.high %v58_v49, %v66_v50  ;;  %v10722_v56 = vld [vmem:[%s13962_s0] sm:$0xff]  ;;  %v8367_v63 = vcombine.low %v58_v49, %v66_v50  ;;  %v8594_v45 = vcombine.high %v283_v39, %v291_v40  ;;  %v275_v49 = vld [vmem:[%s13963_s1 + $0x748] sm:$0xff] }
  0x18   :  { %2133 = vmatpush1.bf16.msra.mxu1 %v8465_v46  ;;  %v42_v58 = vld [vmem:[%s13963_s1] sm:$0xff]  ;;  %v37_v60 = vcombine.high %v10722_v56, %v10722_v56  ;;  %v8593_v51 = vcombine.low %v283_v39, %v291_v40  ;;  %v171_v32 = vld [vmem:[%s13963_s1 + $0x408] sm:$0xff]  ;;  %v156_v40 = vld [vmem:[%s13963_s1 + $0x390] sm:$0xff] }
  0x19   :  { %2134 = vmatprep.subr.bf16.mxu1 %v8450_v48  ;;  %v50_v59 = vld [vmem:[%s13963_s1 + $0x40] sm:$0xff]  ;;  %v267_v48 = vld [vmem:[%s13963_s1 + $0x708] sm:$0xff] }
  0x1a   :  { %2061 = vmatpush1.bf16.msra.mxu0 %v8383_v53  ;;  %v10738_v0 = vpack.c.bf16 %v37_v60, %v37_v60  ;;  %v8352_v2 = vcombine.high %v42_v58, %v50_v59  ;;  %v282_v4 = vld [vmem:[%s13963_s1 + $0x780] sm:$0xff]  ;;  %v8351_v9 = vcombine.low %v42_v58, %v50_v59  ;;  %v8578_v53 = vcombine.high %v267_v48, %v275_v49  ;;  %v259_v58 = vld [vmem:[%s13963_s1 + $0x6c8] sm:$0xff] }
  0x1b   :  { %2062 = vmatprep.subr.bf16.mxu0 %v8368_v55  ;;  %v290_v5 = vld [vmem:[%s13963_s1 + $0x7c0] sm:$0xff]  ;;  %v8577_v60 = vcombine.low %v267_v48, %v275_v49  ;;  %v140_v49 = vld [vmem:[%s13963_s1 + $0x310] sm:$0xff] }
  0x1c   :  { %2135 = vmatpush1.bf16.msra.mxu1 %v8449_v54  ;;  %2082 = vmatprep.mubr.bf16.mxu0 %v10738_v0  ;;  %v8592_v11 = vcombine.high %v282_v4, %v290_v5  ;;  %v266_v13 = vld [vmem:[%s13963_s1 + $0x700] sm:$0xff]  ;;  %v8591_v17 = vcombine.low %v282_v4, %v290_v5 }
  0x1d   :  { %2136 = vmatprep.subr.bf16.mxu1 %v8434_v57  ;;  %2164 = vmatprep.mubr.bf16.mxu1 %v10738_v0  ;;  %v274_v14 = vld [vmem:[%s13963_s1 + $0x740] sm:$0xff]  ;;  %v251_v57 = vld [vmem:[%s13963_s1 + $0x688] sm:$0xff] }
  0x1e   :  { %2063 = vmatpush1.bf16.msra.mxu0 %v8367_v63  ;;  %v8576_v19 = vcombine.high %v266_v13, %v274_v14  ;;  %v250_v21 = vld [vmem:[%s13963_s1 + $0x680] sm:$0xff]  ;;  %v8575_v25 = vcombine.low %v266_v13, %v274_v14  ;;  %v8562_v62 = vcombine.high %v251_v57, %v259_v58  ;;  %v8561_v5 = vcombine.low %v251_v57, %v259_v58  ;;  %v124_v58 = vld [vmem:[%s13963_s1 + $0x290] sm:$0xff] }
  0x1f   :  { %2064 = vmatprep.subr.bf16.mxu0 %v8352_v2  ;;  %v258_v22 = vld [vmem:[%s13963_s1 + $0x6c0] sm:$0xff]  ;;  %v235_v2 = vld [vmem:[%s13963_s1 + $0x608] sm:$0xff] }
  0x20   :  { %2137 = vmatpush1.bf16.msra.mxu1 %v8433_v1  ;;  %v8560_v27 = vcombine.high %v250_v21, %v258_v22  ;;  %v234_v29 = vld [vmem:[%s13963_s1 + $0x600] sm:$0xff]  ;;  %v8559_v33 = vcombine.low %v250_v21, %v258_v22  ;;  %v211_v21 = vld [vmem:[%s13963_s1 + $0x548] sm:$0xff] }
  0x21   :  { %2138 = vmatprep.subr.bf16.mxu1 %v8418_v3  ;;  %v242_v30 = vld [vmem:[%s13963_s1 + $0x640] sm:$0xff]  ;;  %v243_v3 = vld [vmem:[%s13963_s1 + $0x648] sm:$0xff] }
  0x22   :  { %2065 = vmatpush1.bf16.msra.mxu0 %v8351_v9  ;;  %v8544_v35 = vcombine.high %v234_v29, %v242_v30  ;;  %v218_v37 = vld [vmem:[%s13963_s1 + $0x580] sm:$0xff]  ;;  %v8543_v41 = vcombine.low %v234_v29, %v242_v30  ;;  %v8546_v7 = vcombine.high %v235_v2, %v243_v3  ;;  %v347_v9 = vld [vmem:[%s13963_s1 + $0x988] sm:$0xff]  ;;  %v8545_v14 = vcombine.low %v235_v2, %v243_v3  ;;  %v108_v3 = vld [vmem:[%s13963_s1 + $0x210] sm:$0xff] }
  0x23   :  { %2066 = vmatprep.subr.bf16.mxu0 %v8592_v11  ;;  %v226_v38 = vld [vmem:[%s13963_s1 + $0x5c0] sm:$0xff]  ;;  %v219_v11 = vld [vmem:[%s13963_s1 + $0x588] sm:$0xff] }
  0x24   :  { %2139 = vmatpush1.bf16.msra.mxu1 %v8417_v10  ;;  %v8528_v43 = vcombine.high %v218_v37, %v226_v38  ;;  %v202_v46 = vld [vmem:[%s13963_s1 + $0x500] sm:$0xff]  ;;  %v8527_v50 = vcombine.low %v218_v37, %v226_v38  ;;  %v355_v10 = vld [vmem:[%s13963_s1 + $0x9c8] sm:$0xff] }
  0x25   :  { %2140 = vmatprep.subr.bf16.mxu1 %v8402_v12  ;;  %v210_v47 = vld [vmem:[%s13963_s1 + $0x540] sm:$0xff]  ;;  %v227_v12 = vld [vmem:[%s13963_s1 + $0x5c8] sm:$0xff]  ;;  %v8658_v15 = vcombine.high %v347_v9, %v355_v10  ;;  %v8657_v22 = vcombine.low %v347_v9, %v355_v10 }
  0x26   :  { %2067 = vmatpush2.bf16.msra.mxu0 %v8591_v17  ;;  %v8512_v52 = vcombine.high %v202_v46, %v210_v47  ;;  %v186_v54 = vld [vmem:[%s13963_s1 + $0x480] sm:$0xff]  ;;  %v8511_v59 = vcombine.low %v202_v46, %v210_v47  ;;  %v8530_v16 = vcombine.high %v219_v11, %v227_v12  ;;  %v331_v17 = vld [vmem:[%s13963_s1 + $0x908] sm:$0xff]  ;;  %v8529_v23 = vcombine.low %v219_v11, %v227_v12  ;;  %v92_v12 = vld [vmem:[%s13963_s1 + $0x190] sm:$0xff] }
  0x27   :  { %2068 = vmatprep.subr.bf16.mxu0 %v8576_v19  ;;  %v194_v55 = vld [vmem:[%s13963_s1 + $0x4c0] sm:$0xff]  ;;  %v10858_v19 = vpack.c.bf16 %v10722_v56, %v10722_v56  ;;  %v195_v56 = vld [vmem:[%s13963_s1 + $0x4c8] sm:$0xff] }
  0x28   :  { %2141 = vmatpush1.bf16.msra.mxu1 %v8401_v18  ;;  %v8496_v61 = vcombine.high %v186_v54, %v194_v55  ;;  %v170_v63 = vld [vmem:[%s13963_s1 + $0x400] sm:$0xff]  ;;  %v8495_v4 = vcombine.low %v186_v54, %v194_v55  ;;  %v339_v18 = vld [vmem:[%s13963_s1 + $0x948] sm:$0xff] }
  0x29   :  { %2142 = vmatprep.subr.bf16.mxu1 %v8386_v20  ;;  %v178_v1 = vld [vmem:[%s13963_s1 + $0x440] sm:$0xff]  ;;  %v203_v20 = vld [vmem:[%s13963_s1 + $0x508] sm:$0xff]  ;;  %v8642_v24 = vcombine.high %v331_v17, %v339_v18  ;;  %v8641_v29 = vcombine.low %v331_v17, %v339_v18 }
  0x2a   :  { %2069 = vmatpush2.bf16.msra.mxu0 %v8575_v25  ;;  %v8480_v6 = vcombine.high %v170_v63, %v178_v1  ;;  %v8479_v13 = vcombine.low %v170_v63, %v178_v1  ;;  %v187_v25 = vld [vmem:[%s13963_s1 + $0x488] sm:$0xff]  ;;  %v8513_v30 = vcombine.low %v203_v20, %v211_v21 }
  0x2b   :  { %2070 = vmatprep.subr.bf16.mxu0 %v8560_v27  ;;  %v8514_v27 = vcombine.high %v203_v20, %v211_v21  ;;  %v8497_v38 = vcombine.low %v187_v25, %v195_v56  ;;  %v76_v21 = vld [vmem:[%s13963_s1 + $0x110] sm:$0xff] }
  0x2c   :  { %2143 = vmatpush1.bf16.msra.mxu1 %v8385_v26  ;;  %v315_v26 = vld [vmem:[%s13963_s1 + $0x888] sm:$0xff] }
  0x2d   :  { %2144 = vmatprep.subr.bf16.mxu1 %v8370_v28  ;;  %v323_v28 = vld [vmem:[%s13963_s1 + $0x8c8] sm:$0xff] }
  0x2e   :  { %2071 = vmatpush2.bf16.msra.mxu0 %v8559_v33  ;;  %v8626_v31 = vcombine.high %v315_v26, %v323_v28  ;;  %v179_v33 = vld [vmem:[%s13963_s1 + $0x448] sm:$0xff]  ;;  %v8625_v37 = vcombine.low %v315_v26, %v323_v28  ;;  %v60_v28 = vld [vmem:[%s13963_s1 + $0x90] sm:$0xff] }
  0x2f   :  { %2072 = vmatprep.subr.bf16.mxu0 %v8544_v35  ;;  %v8498_v35 = vcombine.high %v187_v25, %v195_v56  ;;  %v8481_v47 = vcombine.low %v171_v32, %v179_v33  ;;  %v149_v25 = vld [vmem:[%s13963_s1 + $0x358] sm:$0xff] }
  0x30   :  { %2145 = vmatpush1.bf16.msra.mxu1 %v8369_v34  ;;  %v299_v34 = vld [vmem:[%s13963_s1 + $0x808] sm:$0xff] }
  0x31   :  { %2146 = vmatprep.subr.bf16.mxu1 %v8354_v36  ;;  %v307_v36 = vld [vmem:[%s13963_s1 + $0x848] sm:$0xff] }
  0x32   :  { %2073 = vmatpush2.bf16.msra.mxu0 %v8543_v41  ;;  %v8610_v39 = vcombine.high %v299_v34, %v307_v36  ;;  %v164_v41 = vld [vmem:[%s13963_s1 + $0x3d0] sm:$0xff]  ;;  %v8609_v46 = vcombine.low %v299_v34, %v307_v36 }
  0x33   :  { %2074 = vmatprep.subr.bf16.mxu0 %v8528_v43  ;;  %v8482_v43 = vcombine.high %v171_v32, %v179_v33  ;;  %v8468_v48 = vcombine.high %v156_v40, %v164_v41  ;;  %v8467_v54 = vcombine.low %v156_v40, %v164_v41  ;;  %v133_v32 = vld [vmem:[%s13963_s1 + $0x2d8] sm:$0xff]  ;;  %v44_v36 = vld [vmem:[%s13963_s1 + $0x10] sm:$0xff] }
  0x34   :  { %2147 = vmatpush1.bf16.msra.mxu1 %v8353_v42  ;;  %v348_v42 = vld [vmem:[%s13963_s1 + $0x990] sm:$0xff]  ;;  %v117_v40 = vld [vmem:[%s13963_s1 + $0x258] sm:$0xff] }
  0x35   :  { %2148 = vmatprep.subr.bf16.mxu1 %v8594_v45  ;;  %v356_v45 = vld [vmem:[%s13963_s1 + $0x9d0] sm:$0xff] }
  0x36   :  { %2075 = vmatpush2.bf16.msra.mxu0 %v8527_v50  ;;  %v148_v50 = vld [vmem:[%s13963_s1 + $0x350] sm:$0xff]  ;;  %v8659_v55 = vcombine.low %v348_v42, %v356_v45 }
  0x37   :  { %2076 = vmatprep.subr.bf16.mxu0 %v8512_v52  ;;  %v8660_v52 = vcombine.high %v348_v42, %v356_v45  ;;  %v8452_v57 = vcombine.high %v140_v49, %v148_v50  ;;  %v8451_v63 = vcombine.low %v140_v49, %v148_v50  ;;  %v284_v45 = vld [vmem:[%s13963_s1 + $0x790] sm:$0xff]  ;;  %v101_v49 = vld [vmem:[%s13963_s1 + $0x1d8] sm:$0xff] }
  0x38   :  { %2149 = vmatpush2.bf16.msra.mxu1 %v8593_v51  ;;  %v332_v51 = vld [vmem:[%s13963_s1 + $0x910] sm:$0xff] }
  0x39   :  { %2150 = vmatprep.subr.bf16.mxu1 %v8578_v53  ;;  %v340_v53 = vld [vmem:[%s13963_s1 + $0x950] sm:$0xff] }
  0x3a   :  { %2077 = vmatpush2.bf16.msra.mxu0 %v8511_v59  ;;  %v132_v59 = vld [vmem:[%s13963_s1 + $0x2d0] sm:$0xff]  ;;  %v8643_v1 = vcombine.low %v332_v51, %v340_v53 }
  0x3b   :  { %2078 = vmatprep.subr.bf16.mxu0 %v8496_v61  ;;  %v8644_v61 = vcombine.high %v332_v51, %v340_v53  ;;  %v8436_v2 = vcombine.high %v124_v58, %v132_v59  ;;  %v8435_v9 = vcombine.low %v124_v58, %v132_v59  ;;  %v268_v53 = vld [vmem:[%s13963_s1 + $0x710] sm:$0xff]  ;;  %v85_v58 = vld [vmem:[%s13963_s1 + $0x158] sm:$0xff] }
  0x3c   :  { %2151 = vmatpush2.bf16.msra.mxu1 %v8577_v60  ;;  %v316_v60 = vld [vmem:[%s13963_s1 + $0x890] sm:$0xff] }
  0x3d   :  { %2152 = vmatprep.subr.bf16.mxu1 %v8562_v62  ;;  %v324_v62 = vld [vmem:[%s13963_s1 + $0x8d0] sm:$0xff] }
  0x3e   :  { %2079 = vmatpush2.bf16.msra.mxu0 %v8495_v4  ;;  %v116_v4 = vld [vmem:[%s13963_s1 + $0x250] sm:$0xff]  ;;  %v8627_v10 = vcombine.low %v316_v60, %v324_v62 }
  0x3f   :  { %2080 = vmatprep.subr.bf16.mxu0 %v8480_v6  ;;  %v8628_v6 = vcombine.high %v316_v60, %v324_v62  ;;  %v8420_v11 = vcombine.high %v108_v3, %v116_v4  ;;  %v8419_v17 = vcombine.low %v108_v3, %v116_v4  ;;  %v252_v62 = vld [vmem:[%s13963_s1 + $0x690] sm:$0xff]  ;;  %v69_v3 = vld [vmem:[%s13963_s1 + $0xd8] sm:$0xff] }
  0x40   :  { %2153 = vmatpush2.bf16.msra.mxu1 %v8561_v5  ;;  %v300_v5 = vld [vmem:[%s13963_s1 + $0x810] sm:$0xff] }
  0x41   :  { %2154 = vmatprep.subr.bf16.mxu1 %v8546_v7  ;;  %v308_v7 = vld [vmem:[%s13963_s1 + $0x850] sm:$0xff] }
  0x42   :  { %2081 = vmatpush2.bf16.msra.mxu0 %v8479_v13  ;;  %v100_v13 = vld [vmem:[%s13963_s1 + $0x1d0] sm:$0xff]  ;;  %v8611_v18 = vcombine.low %v300_v5, %v308_v7 }
  0x43   :  { %2181 = vmatprep.subr.bf16.mxu0 %v8658_v15  ;;  %v8612_v15 = vcombine.high %v300_v5, %v308_v7  ;;  %v8404_v20 = vcombine.high %v92_v12, %v100_v13  ;;  %v8403_v56 = vcombine.low %v92_v12, %v100_v13  ;;  %v236_v7 = vld [vmem:[%s13963_s1 + $0x610] sm:$0xff]  ;;  %v53_v12 = vld [vmem:[%s13963_s1 + $0x58] sm:$0xff] }
  0x44   :  { %2155 = vmatpush2.bf16.msra.mxu1 %v8545_v14  ;;  %v157_v14 = vld [vmem:[%s13963_s1 + $0x398] sm:$0xff] }
  0x45   :  { %2156 = vmatprep.subr.bf16.mxu1 %v8530_v16  ;;  %2083 = vmatmul.mubr.bf16.vlgmr.msra.gmra.mxu0 %v10858_v19  ;;  %v165_v16 = vld [vmem:[%s13963_s1 + $0x3d8] sm:$0xff] }
  0x46   :  { %2182 = vmatpush1.bf16.msra.mxu0 %v8657_v22  ;;  %2205 = vmatprep.mubr.bf16.mxu0 %v10573_v8  ;;  %v84_v22 = vld [vmem:[%s13963_s1 + $0x150] sm:$0xff]  ;;  %v8469_v26 = vcombine.low %v157_v14, %v165_v16 }
  0x47   :  { %2183 = vmatprep.subr.bf16.mxu0 %v8642_v24  ;;  %v8470_v24 = vcombine.high %v157_v14, %v165_v16  ;;  %v8387_v33 = vcombine.low %v76_v21, %v84_v22  ;;  %v220_v16 = vld [vmem:[%s13963_s1 + $0x590] sm:$0xff] }
  0x48   :  { %2157 = vmatpush2.bf16.msra.mxu1 %v8529_v23  ;;  %v141_v23 = vld [vmem:[%s13963_s1 + $0x318] sm:$0xff] }
  0x49   :  { %2158 = vmatprep.subr.bf16.mxu1 %v8514_v27  ;;  %v8388_v27 = vcombine.high %v76_v21, %v84_v22  ;;  %v8453_v34 = vcombine.low %v141_v23, %v149_v25  ;;  %v293_v21 = vld [vmem:[%s13963_s1 + $0x7d8] sm:$0xff] }
  0x4a   :  { %2184 = vmatpush1.bf16.msra.mxu0 %v8641_v29  ;;  %v68_v29 = vld [vmem:[%s13963_s1 + $0xd0] sm:$0xff] }
  0x4b   :  { %2185 = vmatprep.subr.bf16.mxu0 %v8626_v31  ;;  %v8454_v31 = vcombine.high %v141_v23, %v149_v25  ;;  %v8371_v41 = vcombine.low %v60_v28, %v68_v29  ;;  %v204_v25 = vld [vmem:[%s13963_s1 + $0x510] sm:$0xff] }
  0x4c   :  { %2159 = vmatpush2.bf16.msra.mxu1 %v8513_v30  ;;  %v125_v30 = vld [vmem:[%s13963_s1 + $0x298] sm:$0xff] }
  0x4d   :  { %2160 = vmatprep.subr.bf16.mxu1 %v8498_v35  ;;  %v8372_v35 = vcombine.high %v60_v28, %v68_v29  ;;  %v8437_v42 = vcombine.low %v125_v30, %v133_v32  ;;  %v277_v28 = vld [vmem:[%s13963_s1 + $0x758] sm:$0xff] }
  0x4e   :  { %2186 = vmatpush1.bf16.msra.mxu0 %v8625_v37  ;;  %v52_v37 = vld [vmem:[%s13963_s1 + $0x50] sm:$0xff] }
  0x4f   :  { %2187 = vmatprep.subr.bf16.mxu0 %v8610_v39  ;;  %v8438_v39 = vcombine.high %v125_v30, %v133_v32  ;;  %v8355_v50 = vcombine.low %v44_v36, %v52_v37  ;;  %v188_v32 = vld [vmem:[%s13963_s1 + $0x490] sm:$0xff] }
  0x50   :  { %2161 = vmatpush2.bf16.msra.mxu1 %v8497_v38  ;;  %v109_v38 = vld [vmem:[%s13963_s1 + $0x218] sm:$0xff] }
  0x51   :  { %2162 = vmatprep.subr.bf16.mxu1 %v8482_v43  ;;  %v8356_v43 = vcombine.high %v44_v36, %v52_v37  ;;  %v8421_v51 = vcombine.low %v109_v38, %v117_v40  ;;  %v261_v36 = vld [vmem:[%s13963_s1 + $0x6d8] sm:$0xff] }
  0x52   :  { %2188 = vmatpush1.bf16.msra.mxu0 %v8609_v46  ;;  %v292_v46 = vld [vmem:[%s13963_s1 + $0x7d0] sm:$0xff] }
  0x53   :  { %2214 = vmatprep.subr.bf16.mxu0 %v8468_v48  ;;  %v8422_v48 = vcombine.high %v109_v38, %v117_v40  ;;  %v8595_v59 = vcombine.low %v284_v45, %v292_v46  ;;  %v172_v40 = vld [vmem:[%s13963_s1 + $0x410] sm:$0xff] }
  0x54   :  { %2163 = vmatpush2.bf16.msra.mxu1 %v8481_v47  ;;  %v93_v47 = vld [vmem:[%s13963_s1 + $0x198] sm:$0xff] }
  0x55   :  { %2263 = vmatprep.subr.bf16.mxu1 %v8660_v52  ;;  %8672 = vmatmul.mubr.msk.bf16.vlgmr.msra.gmra.mxu0 %vm2046_vm0, %v10703_v44  ;;  %v8596_v52 = vcombine.high %v284_v45, %v292_v46  ;;  %v8405_v60 = vcombine.low %v93_v47, %v101_v49  ;;  %v245_v45 = vld [vmem:[%s13963_s1 + $0x658] sm:$0xff] }
  0x56   :  { %2215 = vmatpush1.bf16.msra.mxu0 %v8467_v54  ;;  %2246 = vmatprep.mubr.bf16.mxu0 %v10738_v0  ;;  %v276_v54 = vld [vmem:[%s13963_s1 + $0x750] sm:$0xff] }
  0x57   :  { %2165 = vmatmul.mubr.bf16.vlgmr.msra.gmra.mxu1 %v10858_v19  ;;  %2216 = vmatprep.subr.bf16.mxu0 %v8452_v57  ;;  %v8406_v57 = vcombine.high %v93_v47, %v101_v49  ;;  %v8579_v4 = vcombine.low %v268_v53, %v276_v54  ;;  %v221_v49 = vld [vmem:[%s13963_s1 + $0x598] sm:$0xff] }
  0x58   :  { %2264 = vmatpush1.bf16.msra.mxu1 %v8659_v55  ;;  %2287 = vmatprep.mubr.bf16.mxu1 %v10573_v8  ;;  %v77_v55 = vld [vmem:[%s13963_s1 + $0x118] sm:$0xff] }
  0x59   :  { %2265 = vmatprep.subr.bf16.mxu1 %v8644_v61  ;;  %v8580_v61 = vcombine.high %v268_v53, %v276_v54  ;;  %v8389_v5 = vcombine.low %v77_v55, %v85_v58  ;;  %v357_v53 = vld [vmem:[%s13963_s1 + $0x9d8] sm:$0xff] }
  0x5a   :  { %2217 = vmatpush1.bf16.msra.mxu0 %v8451_v63  ;;  %v260_v63 = vld [vmem:[%s13963_s1 + $0x6d0] sm:$0xff] }
  0x5b   :  { %2218 = vmatprep.subr.bf16.mxu0 %v8436_v2  ;;  %v8390_v2 = vcombine.high %v77_v55, %v85_v58  ;;  %v8563_v13 = vcombine.low %v252_v62, %v260_v63  ;;  %v205_v58 = vld [vmem:[%s13963_s1 + $0x518] sm:$0xff] }
  0x5c   :  { %2266 = vmatpush1.bf16.msra.mxu1 %v8643_v1  ;;  %v61_v1 = vld [vmem:[%s13963_s1 + $0x98] sm:$0xff] }
  0x5d   :  { %2267 = vmatprep.subr.bf16.mxu1 %v8628_v6  ;;  %v8564_v6 = vcombine.high %v252_v62, %v260_v63  ;;  %v8373_v14 = vcombine.low %v61_v1, %v69_v3  ;;  %v341_v62 = vld [vmem:[%s13963_s1 + $0x958] sm:$0xff] }
  0x5e   :  { %2219 = vmatpush1.bf16.msra.mxu0 %v8435_v9  ;;  %v244_v9 = vld [vmem:[%s13963_s1 + $0x650] sm:$0xff] }
  0x5f   :  { %2220 = vmatprep.subr.bf16.mxu0 %v8420_v11  ;;  %v8374_v11 = vcombine.high %v61_v1, %v69_v3  ;;  %v8547_v22 = vcombine.low %v236_v7, %v244_v9  ;;  %v189_v3 = vld [vmem:[%s13963_s1 + $0x498] sm:$0xff] }
  0x60   :  { %2268 = vmatpush1.bf16.msra.mxu1 %v8627_v10  ;;  %v45_v10 = vld [vmem:[%s13963_s1 + $0x18] sm:$0xff] }
  0x61   :  { %2269 = vmatprep.subr.bf16.mxu1 %v8612_v15  ;;  %v8548_v15 = vcombine.high %v236_v7, %v244_v9  ;;  %v8357_v23 = vcombine.low %v45_v10, %v53_v12  ;;  %v325_v7 = vld [vmem:[%s13963_s1 + $0x8d8] sm:$0xff] }
  0x62   :  { %2221 = vmatpush1.bf16.msra.mxu0 %v8419_v17  ;;  %v228_v17 = vld [vmem:[%s13963_s1 + $0x5d0] sm:$0xff] }
  0x63   :  { %2222 = vmatprep.subr.bf16.mxu0 %v8404_v20  ;;  %v8358_v20 = vcombine.high %v45_v10, %v53_v12  ;;  %v8531_v29 = vcombine.low %v220_v16, %v228_v17  ;;  %v173_v12 = vld [vmem:[%s13963_s1 + $0x418] sm:$0xff] }
  0x64   :  { %2270 = vmatpush1.bf16.msra.mxu1 %v8611_v18  ;;  %v285_v18 = vld [vmem:[%s13963_s1 + $0x798] sm:$0xff] }
  0x65   :  { %2296 = vmatprep.subr.bf16.mxu1 %v8470_v24  ;;  %v8532_v24 = vcombine.high %v220_v16, %v228_v17  ;;  %v8597_v30 = vcombine.low %v285_v18, %v293_v21  ;;  %v309_v16 = vld [vmem:[%s13963_s1 + $0x858] sm:$0xff] }
  0x66   :  { %2223 = vmatpush1.bf16.msra.mxu0 %v8403_v56  ;;  %v212_v56 = vld [vmem:[%s13963_s1 + $0x550] sm:$0xff] }
  0x67   :  { %8673 = vmatmul.mubr.msk.bf16.vlgmr.msra.gmra.mxu1 %vm2046_vm0, %v10703_v44  ;;  %2224 = vmatprep.subr.bf16.mxu0 %v8388_v27  ;;  %v8598_v27 = vcombine.high %v285_v18, %v293_v21  ;;  %v8515_v37 = vcombine.low %v204_v25, %v212_v56  ;;  %v158_v21 = vld [vmem:[%s13963_s1 + $0x3a0] sm:$0xff] }
  0x68   :  { %2297 = vmatpush1.bf16.msra.mxu1 %v8469_v26  ;;  %2328 = vmatprep.mubr.bf16.mxu1 %v10738_v0  ;;  %v269_v26 = vld [vmem:[%s13963_s1 + $0x718] sm:$0xff] }
  0x69   :  { %2298 = vmatprep.subr.bf16.mxu1 %v8454_v31  ;;  %v8516_v31 = vcombine.high %v204_v25, %v212_v56  ;;  %v8581_v38 = vcombine.low %v269_v26, %v277_v28  ;;  %v358_v25 = vld [vmem:[%s13963_s1 + $0x9e0] sm:$0xff] }
  0x6a   :  { %2225 = vmatpush1.bf16.msra.mxu0 %v8387_v33  ;;  %v196_v33 = vld [vmem:[%s13963_s1 + $0x4d0] sm:$0xff] }
  0x6b   :  { %2226 = vmatprep.subr.bf16.mxu0 %v8372_v35  ;;  %v253_v35 = vld [vmem:[%s13963_s1 + $0x698] sm:$0xff]  ;;  %v8499_v46 = vcombine.low %v188_v32, %v196_v33 }
  0x6c   :  { %2299 = vmatpush1.bf16.msra.mxu1 %v8453_v34  ;;  %v8582_v34 = vcombine.high %v269_v26, %v277_v28  ;;  %v8565_v47 = vcombine.low %v253_v35, %v261_v36  ;;  %v142_v28 = vld [vmem:[%s13963_s1 + $0x320] sm:$0xff] }
  0x6d   :  { %2300 = vmatprep.subr.bf16.mxu1 %v8438_v39  ;;  %v8500_v39 = vcombine.high %v188_v32, %v196_v33  ;;  %v342_v32 = vld [vmem:[%s13963_s1 + $0x960] sm:$0xff] }
  0x6e   :  { %2227 = vmatpush1.bf16.msra.mxu0 %v8371_v41  ;;  %v180_v41 = vld [vmem:[%s13963_s1 + $0x450] sm:$0xff] }
  0x6f   :  { %2228 = vmatprep.subr.bf16.mxu0 %v8356_v43  ;;  %v8566_v43 = vcombine.high %v253_v35, %v261_v36  ;;  %v8483_v54 = vcombine.low %v172_v40, %v180_v41  ;;  %v126_v36 = vld [vmem:[%s13963_s1 + $0x2a0] sm:$0xff] }
  0x70   :  { %2301 = vmatpush1.bf16.msra.mxu1 %v8437_v42  ;;  %v237_v42 = vld [vmem:[%s13963_s1 + $0x618] sm:$0xff] }
  0x71   :  { %2302 = vmatprep.subr.bf16.mxu1 %v8422_v48  ;;  %v8484_v48 = vcombine.high %v172_v40, %v180_v41  ;;  %v8549_v55 = vcombine.low %v237_v42, %v245_v45  ;;  %v326_v40 = vld [vmem:[%s13963_s1 + $0x8e0] sm:$0xff] }
  0x72   :  { %2229 = vmatpush1.bf16.msra.mxu0 %v8355_v50  ;;  %v229_v50 = vld [vmem:[%s13963_s1 + $0x5d8] sm:$0xff] }
  0x73   :  { %2230 = vmatprep.subr.bf16.mxu0 %v8596_v52  ;;  %v8550_v52 = vcombine.high %v237_v42, %v245_v45  ;;  %v8533_v1 = vcombine.low %v221_v49, %v229_v50  ;;  %v110_v45 = vld [vmem:[%s13963_s1 + $0x220] sm:$0xff] }
  0x74   :  { %2303 = vmatpush1.bf16.msra.mxu1 %v8421_v51  ;;  %v349_v51 = vld [vmem:[%s13963_s1 + $0x998] sm:$0xff] }
  0x75   :  { %2304 = vmatprep.subr.bf16.mxu1 %v8406_v57  ;;  %v8662_v57 = vcombine.high %v349_v51, %v357_v53  ;;  %v8661_v63 = vcombine.low %v349_v51, %v357_v53  ;;  %v94_v53 = vld [vmem:[%s13963_s1 + $0x1a0] sm:$0xff] }
  0x76   :  { %2231 = vmatpush2.bf16.msra.mxu0 %v8595_v59  ;;  %v213_v59 = vld [vmem:[%s13963_s1 + $0x558] sm:$0xff] }
  0x77   :  { %2232 = vmatprep.subr.bf16.mxu0 %v8580_v61  ;;  %v8534_v61 = vcombine.high %v221_v49, %v229_v50  ;;  %v8517_v10 = vcombine.low %v205_v58, %v213_v59  ;;  %v310_v49 = vld [vmem:[%s13963_s1 + $0x860] sm:$0xff] }
  0x78   :  { %2305 = vmatpush1.bf16.msra.mxu1 %v8405_v60  ;;  %v333_v60 = vld [vmem:[%s13963_s1 + $0x918] sm:$0xff] }
  0x79   :  { %2306 = vmatprep.subr.bf16.mxu1 %v8390_v2  ;;  %v8646_v2 = vcombine.high %v333_v60, %v341_v62  ;;  %v8645_v9 = vcombine.low %v333_v60, %v341_v62  ;;  %v78_v62 = vld [vmem:[%s13963_s1 + $0x120] sm:$0xff] }
  0x7a   :  { %2233 = vmatpush2.bf16.msra.mxu0 %v8579_v4  ;;  %v197_v4 = vld [vmem:[%s13963_s1 + $0x4d8] sm:$0xff] }
  0x7b   :  { %2234 = vmatprep.subr.bf16.mxu0 %v8564_v6  ;;  %v8518_v6 = vcombine.high %v205_v58, %v213_v59  ;;  %v8501_v18 = vcombine.low %v189_v3, %v197_v4  ;;  %v167_v58 = vld [vmem:[%s13963_s1 + $0x3e8] sm:$0xff] }
  0x7c   :  { %2307 = vmatpush1.bf16.msra.mxu1 %v8389_v5  ;;  %v317_v5 = vld [vmem:[%s13963_s1 + $0x898] sm:$0xff] }
  0x7d   :  { %2308 = vmatprep.subr.bf16.mxu1 %v8374_v11  ;;  %v8630_v11 = vcombine.high %v317_v5, %v325_v7  ;;  %v8629_v17 = vcombine.low %v317_v5, %v325_v7  ;;  %v62_v7 = vld [vmem:[%s13963_s1 + $0xa0] sm:$0xff] }
  0x7e   :  { %2235 = vmatpush2.bf16.msra.mxu0 %v8563_v13  ;;  %v181_v13 = vld [vmem:[%s13963_s1 + $0x458] sm:$0xff] }
  0x7f   :  { %2236 = vmatprep.subr.bf16.mxu0 %v8548_v15  ;;  %v8502_v15 = vcombine.high %v189_v3, %v197_v4  ;;  %v8485_v26 = vcombine.low %v173_v12, %v181_v13  ;;  %v151_v3 = vld [vmem:[%s13963_s1 + $0x368] sm:$0xff] }
  0x80   :  { %2309 = vmatpush1.bf16.msra.mxu1 %v8373_v14  ;;  %v301_v14 = vld [vmem:[%s13963_s1 + $0x818] sm:$0xff] }
  0x81   :  { %2310 = vmatprep.subr.bf16.mxu1 %v8358_v20  ;;  %v8614_v20 = vcombine.high %v301_v14, %v309_v16  ;;  %v8613_v56 = vcombine.low %v301_v14, %v309_v16  ;;  %v46_v16 = vld [vmem:[%s13963_s1 + $0x20] sm:$0xff] }
  0x82   :  { %2237 = vmatpush2.bf16.msra.mxu0 %v8547_v22  ;;  %v166_v22 = vld [vmem:[%s13963_s1 + $0x3e0] sm:$0xff] }
  0x83   :  { %2238 = vmatprep.subr.bf16.mxu0 %v8532_v24  ;;  %v8486_v24 = vcombine.high %v173_v12, %v181_v13  ;;  %v8471_v33 = vcombine.low %v158_v21, %v166_v22  ;;  %v135_v12 = vld [vmem:[%s13963_s1 + $0x2e8] sm:$0xff] }
  0x84   :  { %2311 = vmatpush1.bf16.msra.mxu1 %v8357_v23  ;;  %v350_v23 = vld [vmem:[%s13963_s1 + $0x9a0] sm:$0xff] }
  0x85   :  { %2312 = vmatprep.subr.bf16.mxu1 %v8598_v27  ;;  %v8472_v27 = vcombine.high %v158_v21, %v166_v22  ;;  %v119_v21 = vld [vmem:[%s13963_s1 + $0x268] sm:$0xff] }
  0x86   :  { %2239 = vmatpush2.bf16.msra.mxu0 %v8531_v29  ;;  %v150_v29 = vld [vmem:[%s13963_s1 + $0x360] sm:$0xff] }
  0x87   :  { %2240 = vmatprep.subr.bf16.mxu0 %v8516_v31  ;;  %v8664_v31 = vcombine.high %v350_v23, %v358_v25  ;;  %v8456_v35 = vcombine.high %v142_v28, %v150_v29  ;;  %v8455_v41 = vcombine.low %v142_v28, %v150_v29  ;;  %v103_v28 = vld [vmem:[%s13963_s1 + $0x1e8] sm:$0xff] }
  0x88   :  { %2313 = vmatpush2.bf16.msra.mxu1 %v8597_v30  ;;  %v334_v30 = vld [vmem:[%s13963_s1 + $0x920] sm:$0xff] }
  0x89   :  { %2314 = vmatprep.subr.bf16.mxu1 %v8582_v34  ;;  %v8663_v34 = vcombine.low %v350_v23, %v358_v25  ;;  %v8647_v42 = vcombine.low %v334_v30, %v342_v32  ;;  %v286_v25 = vld [vmem:[%s13963_s1 + $0x7a0] sm:$0xff] }
  0x8a   :  { %2241 = vmatpush2.bf16.msra.mxu0 %v8515_v37  ;;  %v134_v37 = vld [vmem:[%s13963_s1 + $0x2e0] sm:$0xff] }
  0x8b   :  { %2242 = vmatprep.subr.bf16.mxu0 %v8500_v39  ;;  %v8648_v39 = vcombine.high %v334_v30, %v342_v32  ;;  %v8439_v50 = vcombine.low %v126_v36, %v134_v37  ;;  %v270_v32 = vld [vmem:[%s13963_s1 + $0x720] sm:$0xff] }
  0x8c   :  { %2315 = vmatpush2.bf16.msra.mxu1 %v8581_v38  ;;  %v318_v38 = vld [vmem:[%s13963_s1 + $0x8a0] sm:$0xff] }
  0x8d   :  { %2316 = vmatprep.subr.bf16.mxu1 %v8566_v43  ;;  %v8440_v43 = vcombine.high %v126_v36, %v134_v37  ;;  %v8631_v51 = vcombine.low %v318_v38, %v326_v40  ;;  %v87_v36 = vld [vmem:[%s13963_s1 + $0x168] sm:$0xff] }
  0x8e   :  { %2243 = vmatpush2.bf16.msra.mxu0 %v8499_v46  ;;  %v118_v46 = vld [vmem:[%s13963_s1 + $0x260] sm:$0xff] }
  0x8f   :  { %2244 = vmatprep.subr.bf16.mxu0 %v8484_v48  ;;  %v8632_v48 = vcombine.high %v318_v38, %v326_v40  ;;  %v8423_v59 = vcombine.low %v110_v45, %v118_v46 }
  0x90   :  { %2317 = vmatpush2.bf16.msra.mxu1 %v8565_v47  ;;  %v302_v47 = vld [vmem:[%s13963_s1 + $0x820] sm:$0xff] }
  0x91   :  { %2318 = vmatprep.subr.bf16.mxu1 %v8550_v52  ;;  %v8424_v52 = vcombine.high %v110_v45, %v118_v46  ;;  %v8615_v60 = vcombine.low %v302_v47, %v310_v49  ;;  %v71_v45 = vld [vmem:[%s13963_s1 + $0xe8] sm:$0xff] }
  0x92   :  { %2245 = vmatpush2.bf16.msra.mxu0 %v8483_v54  ;;  %v102_v54 = vld [vmem:[%s13963_s1 + $0x1e0] sm:$0xff] }
  0x93   :  { %2345 = vmatprep.subr.bf16.mxu0 %v8662_v57  ;;  %v8616_v57 = vcombine.high %v302_v47, %v310_v49  ;;  %v8407_v4 = vcombine.low %v94_v53, %v102_v54 }
  0x94   :  { %2319 = vmatpush2.bf16.msra.mxu1 %v8549_v55  ;;  %v159_v55 = vld [vmem:[%s13963_s1 + $0x3a8] sm:$0xff] }
  0x95   :  { %2320 = vmatprep.subr.bf16.mxu1 %v8534_v61  ;;  %2247 = vmatmul.mubr.bf16.vlgmr.msra.gmra.mxu0 %v10858_v19  ;;  %v8408_v61 = vcombine.high %v94_v53, %v102_v54  ;;  %v8473_v5 = vcombine.low %v159_v55, %v167_v58  ;;  %v55_v53 = vld [vmem:[%s13963_s1 + $0x68] sm:$0xff] }
  0x96   :  { %2346 = vmatpush1.bf16.msra.mxu0 %v8661_v63  ;;  %2369 = vmatprep.mubr.bf16.mxu0 %v10573_v8  ;;  %v86_v63 = vld [vmem:[%s13963_s1 + $0x160] sm:$0xff] }
  0x97   :  { %2347 = vmatprep.subr.bf16.mxu0 %v8646_v2  ;;  %v8474_v2 = vcombine.high %v159_v55, %v167_v58  ;;  %v8391_v13 = vcombine.low %v78_v62, %v86_v63  ;;  %v222_v58 = vld [vmem:[%s13963_s1 + $0x5a0] sm:$0xff] }
  0x98   :  { %2321 = vmatpush2.bf16.msra.mxu1 %v8533_v1  ;;  %v143_v1 = vld [vmem:[%s13963_s1 + $0x328] sm:$0xff] }
  0x99   :  { %2322 = vmatprep.subr.bf16.mxu1 %v8518_v6  ;;  %v8392_v6 = vcombine.high %v78_v62, %v86_v63  ;;  %v8457_v14 = vcombine.low %v143_v1, %v151_v3  ;;  %v295_v62 = vld [vmem:[%s13963_s1 + $0x7e8] sm:$0xff] }
  0x9a   :  { %2348 = vmatpush1.bf16.msra.mxu0 %v8645_v9  ;;  %v70_v9 = vld [vmem:[%s13963_s1 + $0xe0] sm:$0xff] }
  0x9b   :  { %2349 = vmatprep.subr.bf16.mxu0 %v8630_v11  ;;  %v8458_v11 = vcombine.high %v143_v1, %v151_v3  ;;  %v8375_v22 = vcombine.low %v62_v7, %v70_v9  ;;  %v206_v3 = vld [vmem:[%s13963_s1 + $0x520] sm:$0xff] }
  0x9c   :  { %2323 = vmatpush2.bf16.msra.mxu1 %v8517_v10  ;;  %v127_v10 = vld [vmem:[%s13963_s1 + $0x2a8] sm:$0xff] }
  0x9d   :  { %2324 = vmatprep.subr.bf16.mxu1 %v8502_v15  ;;  %v8376_v15 = vcombine.high %v62_v7, %v70_v9  ;;  %v8441_v23 = vcombine.low %v127_v10, %v135_v12  ;;  %v279_v7 = vld [vmem:[%s13963_s1 + $0x768] sm:$0xff] }
  0x9e   :  { %2350 = vmatpush1.bf16.msra.mxu0 %v8629_v17  ;;  %v54_v17 = vld [vmem:[%s13963_s1 + $0x60] sm:$0xff] }
  0x9f   :  { %2351 = vmatprep.subr.bf16.mxu0 %v8614_v20  ;;  %v8442_v20 = vcombine.high %v127_v10, %v135_v12  ;;  %v8359_v29 = vcombine.low %v46_v16, %v54_v17  ;;  %v190_v10 = vld [vmem:[%s13963_s1 + $0x4a0] sm:$0xff] }
  0xa0   :  { %2325 = vmatpush2.bf16.msra.mxu1 %v8501_v18  ;;  %v111_v18 = vld [vmem:[%s13963_s1 + $0x228] sm:$0xff] }
  0xa1   :  { %2326 = vmatprep.subr.bf16.mxu1 %v8486_v24  ;;  %v8360_v24 = vcombine.high %v46_v16, %v54_v17  ;;  %v8425_v30 = vcombine.low %v111_v18, %v119_v21  ;;  %v263_v16 = vld [vmem:[%s13963_s1 + $0x6e8] sm:$0xff] }
  0xa2   :  { %2352 = vmatpush1.bf16.msra.mxu0 %v8613_v56  ;;  %v294_v56 = vld [vmem:[%s13963_s1 + $0x7e0] sm:$0xff] }
  0xa3   :  { %2378 = vmatprep.subr.bf16.mxu0 %v8472_v27  ;;  %v8426_v27 = vcombine.high %v111_v18, %v119_v21  ;;  %v8599_v37 = vcombine.low %v286_v25, %v294_v56  ;;  %v182_v21 = vld [vmem:[%s13963_s1 + $0x460] sm:$0xff] }
  0xa4   :  { %2327 = vmatpush2.bf16.msra.mxu1 %v8485_v26  ;;  %v95_v26 = vld [vmem:[%s13963_s1 + $0x1a8] sm:$0xff] }
  0xa5   :  { %2427 = vmatprep.subr.bf16.mxu1 %v8664_v31  ;;  %8674 = vmatmul.mubr.msk.bf16.vlgmr.msra.gmra.mxu0 %vm2046_vm0, %v10703_v44  ;;  %v8600_v31 = vcombine.high %v286_v25, %v294_v56  ;;  %v8409_v38 = vcombine.low %v95_v26, %v103_v28  ;;  %v239_v56 = vld [vmem:[%s13963_s1 + $0x628] sm:$0xff] }
  0xa6   :  { %2379 = vmatpush1.bf16.msra.mxu0 %v8471_v33  ;;  %2410 = vmatprep.mubr.bf16.mxu0 %v10738_v0  ;;  %v278_v33 = vld [vmem:[%s13963_s1 + $0x760] sm:$0xff] }
  0xa7   :  { %2329 = vmatmul.mubr.bf16.vlgmr.msra.gmra.mxu1 %v10858_v19  ;;  %2380 = vmatprep.subr.bf16.mxu0 %v8456_v35  ;;  %v8410_v35 = vcombine.high %v95_v26, %v103_v28  ;;  %v8583_v46 = vcombine.low %v270_v32, %v278_v33  ;;  %v247_v26 = vld [vmem:[%s13963_s1 + $0x668] sm:$0xff] }
  0xa8   :  { %2428 = vmatpush1.bf16.msra.mxu1 %v8663_v34  ;;  %2451 = vmatprep.mubr.bf16.mxu1 %v10573_v8  ;;  %v79_v34 = vld [vmem:[%s13963_s1 + $0x128] sm:$0xff] }
  0xa9   :  { %2429 = vmatprep.subr.bf16.mxu1 %v8648_v39  ;;  %v8584_v39 = vcombine.high %v270_v32, %v278_v33  ;;  %v8394_v40 = vcombine.high %v79_v34, %v87_v36  ;;  %v8393_v47 = vcombine.low %v79_v34, %v87_v36  ;;  %v8554_v34 = vcombine.high %v239_v56, %v247_v26  ;;  %v231_v36 = vld [vmem:[%s13963_s1 + $0x5e8] sm:$0xff] }
  0xaa   :  { %2381 = vmatpush1.bf16.msra.mxu0 %v8455_v41  ;;  %v254_v41 = vld [vmem:[%s13963_s1 + $0x6a0] sm:$0xff] }
  0xab   :  { %2382 = vmatprep.subr.bf16.mxu0 %v8440_v43  ;;  %v63_v43 = vld [vmem:[%s13963_s1 + $0xa8] sm:$0xff] }
  0xac   :  { %2430 = vmatpush1.bf16.msra.mxu1 %v8647_v42  ;;  %v262_v42 = vld [vmem:[%s13963_s1 + $0x6e0] sm:$0xff]  ;;  %v8378_v49 = vcombine.high %v63_v43, %v71_v45  ;;  %v8377_v55 = vcombine.low %v63_v43, %v71_v45  ;;  %v343_v45 = vld [vmem:[%s13963_s1 + $0x968] sm:$0xff] }
  0xad   :  { %2431 = vmatprep.subr.bf16.mxu1 %v8632_v48  ;;  %v8568_v48 = vcombine.high %v254_v41, %v262_v42  ;;  %v8567_v54 = vcombine.low %v254_v41, %v262_v42  ;;  %v215_v41 = vld [vmem:[%s13963_s1 + $0x568] sm:$0xff] }
  0xae   :  { %2383 = vmatpush1.bf16.msra.mxu0 %v8439_v50  ;;  %v238_v50 = vld [vmem:[%s13963_s1 + $0x620] sm:$0xff]  ;;  %v335_v42 = vld [vmem:[%s13963_s1 + $0x928] sm:$0xff] }
  0xaf   :  { %2384 = vmatprep.subr.bf16.mxu0 %v8424_v52  ;;  %v47_v52 = vld [vmem:[%s13963_s1 + $0x28] sm:$0xff] }
  0xb0   :  { %2432 = vmatpush1.bf16.msra.mxu1 %v8631_v51  ;;  %v246_v51 = vld [vmem:[%s13963_s1 + $0x660] sm:$0xff]  ;;  %v8361_v1 = vcombine.low %v47_v52, %v55_v53 }
  0xb1   :  { %2433 = vmatprep.subr.bf16.mxu1 %v8616_v57  ;;  %v8552_v57 = vcombine.high %v238_v50, %v246_v51  ;;  %v8551_v63 = vcombine.low %v238_v50, %v246_v51  ;;  %v8650_v50 = vcombine.high %v335_v42, %v343_v45 }
  0xb2   :  { %2385 = vmatpush1.bf16.msra.mxu0 %v8423_v59  ;;  %v230_v59 = vld [vmem:[%s13963_s1 + $0x5e0] sm:$0xff] }
  0xb3   :  { %2386 = vmatprep.subr.bf16.mxu0 %v8408_v61  ;;  %v8362_v61 = vcombine.high %v47_v52, %v55_v53  ;;  %v8535_v9 = vcombine.low %v222_v58, %v230_v59  ;;  %v191_v52 = vld [vmem:[%s13963_s1 + $0x4a8] sm:$0xff] }
  0xb4   :  { %2434 = vmatpush1.bf16.msra.mxu1 %v8615_v60  ;;  %v287_v60 = vld [vmem:[%s13963_s1 + $0x7a8] sm:$0xff] }
  0xb5   :  { %2460 = vmatprep.subr.bf16.mxu1 %v8474_v2  ;;  %v8536_v2 = vcombine.high %v222_v58, %v230_v59  ;;  %v8601_v12 = vcombine.low %v287_v60, %v295_v62  ;;  %v199_v53 = vld [vmem:[%s13963_s1 + $0x4e8] sm:$0xff] }
  0xb6   :  { %2387 = vmatpush1.bf16.msra.mxu0 %v8407_v4  ;;  %v214_v4 = vld [vmem:[%s13963_s1 + $0x560] sm:$0xff] }
  0xb7   :  { %8675 = vmatmul.mubr.msk.bf16.vlgmr.msra.gmra.mxu1 %vm2046_vm0, %v10703_v44  ;;  %2388 = vmatprep.subr.bf16.mxu0 %v8392_v6  ;;  %v8602_v6 = vcombine.high %v287_v60, %v295_v62  ;;  %v8519_v18 = vcombine.low %v206_v3, %v214_v4  ;;  %v8506_v60 = vcombine.high %v191_v52, %v199_v53  ;;  %v183_v62 = vld [vmem:[%s13963_s1 + $0x468] sm:$0xff] }
  0xb8   :  { %2461 = vmatpush1.bf16.msra.mxu1 %v8473_v5  ;;  %2492 = vmatprep.mubr.bf16.mxu1 %v10738_v0  ;;  %v271_v5 = vld [vmem:[%s13963_s1 + $0x728] sm:$0xff] }
  0xb9   :  { %2462 = vmatprep.subr.bf16.mxu1 %v8458_v11  ;;  %v198_v11 = vld [vmem:[%s13963_s1 + $0x4e0] sm:$0xff] }
  0xba   :  { %2389 = vmatpush1.bf16.msra.mxu0 %v8391_v13  ;;  %v8520_v13 = vcombine.high %v206_v3, %v214_v4  ;;  %v8503_v28 = vcombine.low %v190_v10, %v198_v11  ;;  %v8505_v3 = vcombine.low %v191_v52, %v199_v53  ;;  %v88_v52 = vld [vmem:[%s13963_s1 + $0x170] sm:$0xff]  ;;  %v145_v53 = vld [vmem:[%s13963_s1 + $0x338] sm:$0xff] }
  0xbb   :  { %2390 = vmatprep.subr.bf16.mxu0 %v8376_v15  ;;  %v255_v15 = vld [vmem:[%s13963_s1 + $0x6a8] sm:$0xff] }
  0xbc   :  { %2463 = vmatpush1.bf16.msra.mxu1 %v8457_v14  ;;  %v8586_v14 = vcombine.high %v271_v5, %v279_v7  ;;  %v8570_v25 = vcombine.high %v255_v15, %v263_v16 }
  0xbd   :  { %2464 = vmatprep.subr.bf16.mxu1 %v8442_v20  ;;  %v174_v20 = vld [vmem:[%s13963_s1 + $0x420] sm:$0xff] }
  0xbe   :  { %2391 = vmatpush1.bf16.msra.mxu0 %v8375_v22  ;;  %v8585_v22 = vcombine.low %v271_v5, %v279_v7  ;;  %v8488_v32 = vcombine.high %v174_v20, %v182_v21  ;;  %v360_v7 = vld [vmem:[%s13963_s1 + $0x9f0] sm:$0xff] }
  0xbf   :  { %2392 = vmatprep.subr.bf16.mxu0 %v8360_v24 }
  0xc0   :  { %2465 = vmatpush1.bf16.msra.mxu1 %v8441_v23  ;;  %v8504_v23 = vcombine.high %v190_v10, %v198_v11 }
  0xc1   :  { %2466 = vmatprep.subr.bf16.mxu1 %v8426_v27 }
  0xc2   :  { %2393 = vmatpush1.bf16.msra.mxu0 %v8359_v29  ;;  %v351_v29 = vld [vmem:[%s13963_s1 + $0x9a8] sm:$0xff] }
  0xc3   :  { %2394 = vmatprep.subr.bf16.mxu0 %v8600_v31  ;;  %v8569_v31 = vcombine.low %v255_v15, %v263_v16  ;;  %v344_v16 = vld [vmem:[%s13963_s1 + $0x970] sm:$0xff] }
  0xc4   :  { %2467 = vmatpush1.bf16.msra.mxu1 %v8425_v30  ;;  %v359_v30 = vld [vmem:[%s13963_s1 + $0x9e8] sm:$0xff] }
  0xc5   :  { %2468 = vmatprep.subr.bf16.mxu1 %v8410_v35  ;;  %v223_v35 = vld [vmem:[%s13963_s1 + $0x5a8] sm:$0xff] }
  0xc6   :  { %2395 = vmatpush2.bf16.msra.mxu0 %v8599_v37  ;;  %v8487_v37 = vcombine.low %v174_v20, %v182_v21  ;;  %v8538_v43 = vcombine.high %v223_v35, %v231_v36  ;;  %v128_v20 = vld [vmem:[%s13963_s1 + $0x2b0] sm:$0xff] }
  0xc7   :  { %2396 = vmatprep.subr.bf16.mxu0 %v8584_v39  ;;  %v8666_v39 = vcombine.high %v351_v29, %v359_v30  ;;  %v136_v21 = vld [vmem:[%s13963_s1 + $0x2f0] sm:$0xff] }
  0xc8   :  { %2469 = vmatpush1.bf16.msra.mxu1 %v8409_v38  ;;  %v8553_v38 = vcombine.low %v239_v56, %v247_v26  ;;  %v320_v56 = vld [vmem:[%s13963_s1 + $0x8b0] sm:$0xff] }
  0xc9   :  { %2470 = vmatprep.subr.bf16.mxu1 %v8394_v40  ;;  %v207_v40 = vld [vmem:[%s13963_s1 + $0x528] sm:$0xff]  ;;  %v328_v26 = vld [vmem:[%s13963_s1 + $0x8f0] sm:$0xff] }
  0xca   :  { %2397 = vmatpush2.bf16.msra.mxu0 %v8583_v46  ;;  %v8665_v46 = vcombine.low %v351_v29, %v359_v30  ;;  %v8522_v51 = vcombine.high %v207_v40, %v215_v41  ;;  %v8521_v58 = vcombine.low %v207_v40, %v215_v41  ;;  %v120_v29 = vld [vmem:[%s13963_s1 + $0x270] sm:$0xff]  ;;  %v366_v30 = vlaneseq }
  0xcb   :  { %2398 = vmatprep.subr.bf16.mxu0 %v8568_v48  ;;  %v327_v48 = vld [vmem:[%s13963_s1 + $0x8e8] sm:$0xff]  ;;  %v96_v41 = vld [vmem:[%s13963_s1 + $0x1b0] sm:$0xff] }
  0xcc   :  { %2471 = vmatpush1.bf16.msra.mxu1 %v8393_v47  ;;  %v319_v47 = vld [vmem:[%s13963_s1 + $0x8a8] sm:$0xff] }
  0xcd   :  { %2472 = vmatprep.subr.bf16.mxu1 %v8378_v49  ;;  %v8537_v49 = vcombine.low %v223_v35, %v231_v36  ;;  %v8634_v59 = vcombine.high %v319_v47, %v327_v48  ;;  %v312_v35 = vld [vmem:[%s13963_s1 + $0x870] sm:$0xff]  ;;  %v8443_v36 = vcombine.low %v128_v20, %v136_v21 }
  0xce   :  { %2399 = vmatpush2.bf16.msra.mxu0 %v8567_v54  ;;  %v8649_v54 = vcombine.low %v335_v42, %v343_v45  ;;  %v104_v42 = vld [vmem:[%s13963_s1 + $0x1f0] sm:$0xff]  ;;  %v11463_v45 = vld [vmem:[%s13964_s2] sm:$0xff] }
  0xcf   :  { %2400 = vmatprep.subr.bf16.mxu0 %v8552_v57  ;;  %v311_v57 = vld [vmem:[%s13963_s1 + $0x868] sm:$0xff] }
  0xd0   :  { %2473 = vmatpush1.bf16.msra.mxu1 %v8377_v55  ;;  %v303_v55 = vld [vmem:[%s13963_s1 + $0x828] sm:$0xff] }
  0xd1   :  { %2474 = vmatprep.subr.bf16.mxu1 %v8362_v61  ;;  %v175_v61 = vld [vmem:[%s13963_s1 + $0x428] sm:$0xff]  ;;  %v8618_v4 = vcombine.high %v303_v55, %v311_v57 }
  0xd2   :  { %2401 = vmatpush2.bf16.msra.mxu0 %v8551_v63  ;;  %v8633_v63 = vcombine.low %v319_v47, %v327_v48  ;;  %v8490_v5 = vcombine.high %v175_v61, %v183_v62  ;;  %v8489_v10 = vcombine.low %v175_v61, %v183_v62 }
  0xd3   :  { %2402 = vmatprep.subr.bf16.mxu0 %v8536_v2  ;;  %v168_v2 = vld [vmem:[%s13963_s1 + $0x3f0] sm:$0xff] }
  0xd4   :  { %2475 = vmatpush1.bf16.msra.mxu1 %v8361_v1  ;;  %v160_v1 = vld [vmem:[%s13963_s1 + $0x3b0] sm:$0xff] }
  0xd5   :  { %2476 = vmatprep.subr.bf16.mxu1 %v8602_v6  ;;  %v352_v6 = vld [vmem:[%s13963_s1 + $0x9b0] sm:$0xff]  ;;  %v8476_v11 = vcombine.high %v160_v1, %v168_v2 }
  0xd6   :  { %2403 = vmatpush2.bf16.msra.mxu0 %v8535_v9  ;;  %v8617_v9 = vcombine.low %v303_v55, %v311_v57  ;;  %v8668_v15 = vcombine.high %v352_v6, %v360_v7  ;;  %v153_v55 = vld [vmem:[%s13963_s1 + $0x378] sm:$0xff] }
  0xd7   :  { %v11330_v17 = vpop.f32.mrf.mxu1  ;;  %2404 = vmatprep.subr.bf16.mxu0 %v8520_v13  ;;  %v152_v13 = vld [vmem:[%s13963_s1 + $0x370] sm:$0xff] }
  0xd8   :  { %2477 = vmatpush2.bf16.msra.mxu1 %v8601_v12  ;;  %v144_v12 = vld [vmem:[%s13963_s1 + $0x330] sm:$0xff] }
  0xd9   :  { %v11338_v24 = vpop.f32.mrf.mxu1  ;;  %2478 = vmatprep.subr.bf16.mxu1 %v8586_v14  ;;  %v336_v14 = vld [vmem:[%s13963_s1 + $0x930] sm:$0xff] }
  0xda   :  { %2405 = vmatpush2.bf16.msra.mxu0 %v8519_v18  ;;  %v8475_v18 = vcombine.low %v160_v1, %v168_v2  ;;  %v129_v2 = vld [vmem:[%s13963_s1 + $0x2b8] sm:$0xff] }
  0xdb   :  { %v2129_v27 = vpop.f32.mrf.mxu1  ;;  %2406 = vmatprep.subr.bf16.mxu0 %v8504_v23  ;;  %v8460_v23 = vcombine.high %v144_v12, %v152_v13 }
  0xdc   :  { %2479 = vmatpush2.bf16.msra.mxu1 %v8585_v22  ;;  %v8667_v22 = vcombine.low %v352_v6, %v360_v7  ;;  %v8459_v27 = vcombine.low %v144_v12, %v152_v13  ;;  %v8461_v7 = vcombine.low %v145_v53, %v153_v55  ;;  %v48_v12 = vld [vmem:[%s13963_s1 + $0x30] sm:$0xff] }
  0xdd   :  { %v2130_v33 = vpop.f32.mrf.mxu1  ;;  %2480 = vmatprep.subr.bf16.mxu1 %v8570_v25  ;;  %v8652_v25 = vcombine.high %v336_v14, %v344_v16  ;;  %v56_v13 = vld [vmem:[%s13963_s1 + $0x70] sm:$0xff] }
  0xde   :  { %2407 = vmatpush2.bf16.msra.mxu0 %v8503_v28  ;;  %v112_v28 = vld [vmem:[%s13963_s1 + $0x230] sm:$0xff]  ;;  %v8636_v33 = vcombine.high %v320_v56, %v328_v26 }
  0xdf   :  { %2408 = vmatprep.subr.bf16.mxu0 %v8488_v32  ;;  %v8444_v32 = vcombine.high %v128_v20, %v136_v21  ;;  %v8427_v47 = vcombine.low %v112_v28, %v120_v29  ;;  %v8364_v21 = vcombine.high %v48_v12, %v56_v13 }
  0xe0   :  { %2481 = vmatpush2.bf16.msra.mxu1 %v8569_v31  ;;  %v8651_v31 = vcombine.low %v336_v14, %v344_v16  ;;  %v113_v14 = vld [vmem:[%s13963_s1 + $0x238] sm:$0xff] }
  0xe1   :  { %2482 = vmatprep.subr.bf16.mxu1 %v8554_v34  ;;  %v304_v34 = vld [vmem:[%s13963_s1 + $0x830] sm:$0xff] }
  0xe2   :  { %2409 = vmatpush2.bf16.msra.mxu0 %v8487_v37  ;;  %v11449_v37 = vshrl.u32 %v366_v30, 7  ;;  %v8620_v40 = vcombine.high %v304_v34, %v312_v35  ;;  %v272_v30 = vld [vmem:[%s13963_s1 + $0x730] sm:$0xff] }
  0xe3   :  { %2509 = vmatprep.subr.bf16.mxu0 %v8666_v39  ;;  %v8428_v39 = vcombine.high %v112_v28, %v120_v29 }
  0xe4   :  { %2483 = vmatpush2.bf16.msra.mxu1 %v8553_v38  ;;  %v8635_v38 = vcombine.low %v320_v56, %v328_v26  ;;  %v11469_v48 = vsub.s32 0, %v11449_v37  ;;  %v105_v56 = vld [vmem:[%s13963_s1 + $0x1f8] sm:$0xff]  ;;  %v8363_v26 = vcombine.low %v48_v12, %v56_v13  ;;  %v11530_v28 = vsub.s32 2, %v11449_v37 }
  0xe5   :  { %2484 = vmatprep.subr.bf16.mxu1 %v8538_v43  ;;  %2411 = vmatmul.mubr.bf16.vlgmr.msra.gmra.mxu0 %v10858_v19  ;;  %v161_v43 = vld [vmem:[%s13963_s1 + $0x3b8] sm:$0xff] }
  0xe6   :  { %2510 = vmatpush1.bf16.msra.mxu0 %v8665_v46  ;;  %2533 = vmatprep.mubr.bf16.mxu0 %v10573_v8  ;;  %v169_v46 = vld [vmem:[%s13963_s1 + $0x3f8] sm:$0xff]  ;;  %v369_v57 = vrot.slane %v11463_v45, %v11469_v48 }
  0xe7   :  { %2511 = vmatprep.subr.bf16.mxu0 %v8650_v50  ;;  %v8412_v50 = vcombine.high %v96_v41, %v104_v42  ;;  %v8477_v61 = vcombine.low %v161_v43, %v169_v46  ;;  %v289_v13 = vld [vmem:[%s13963_s1 + $0x7b8] sm:$0xff] }
  0xe8   :  { %2485 = vmatpush2.bf16.msra.mxu1 %v8537_v49  ;;  %v8619_v49 = vcombine.low %v304_v34, %v312_v35  ;;  %v89_v34 = vld [vmem:[%s13963_s1 + $0x178] sm:$0xff] }
  0xe9   :  { %2486 = vmatprep.subr.bf16.mxu1 %v8522_v51  ;;  %v80_v51 = vld [vmem:[%s13963_s1 + $0x130] sm:$0xff] }
  0xea   :  { %2512 = vmatpush1.bf16.msra.mxu0 %v8649_v54  ;;  %v8478_v54 = vcombine.high %v161_v43, %v169_v46  ;;  %v8396_v62 = vcombine.high %v80_v51, %v88_v52  ;;  %v73_v46 = vld [vmem:[%s13963_s1 + $0xf8] sm:$0xff] }
  0xeb   :  { %2513 = vmatprep.subr.bf16.mxu0 %v8634_v59  ;;  %v64_v59 = vld [vmem:[%s13963_s1 + $0xb0] sm:$0xff] }
  0xec   :  { %2487 = vmatpush2.bf16.msra.mxu1 %v8521_v58  ;;  %v8411_v58 = vcombine.low %v96_v41, %v104_v42  ;;  %v264_v41 = vld [vmem:[%s13963_s1 + $0x6f0] sm:$0xff]  ;;  %v65_v42 = vld [vmem:[%s13963_s1 + $0xb8] sm:$0xff] }
  0xed   :  { %2488 = vmatprep.subr.bf16.mxu1 %v8506_v60  ;;  %v72_v60 = vld [vmem:[%s13963_s1 + $0xf0] sm:$0xff] }
  0xee   :  { %2514 = vmatpush1.bf16.msra.mxu0 %v8633_v63  ;;  %v8462_v63 = vcombine.high %v145_v53, %v153_v55  ;;  %v8379_v16 = vcombine.low %v64_v59, %v72_v60  ;;  %v240_v55 = vld [vmem:[%s13963_s1 + $0x630] sm:$0xff] }
  0xef   :  { %2515 = vmatprep.subr.bf16.mxu0 %v8618_v4 }
  0xf0   :  { %2489 = vmatpush2.bf16.msra.mxu1 %v8505_v3  ;;  %v137_v3 = vld [vmem:[%s13963_s1 + $0x2f8] sm:$0xff] }
  0xf1   :  { %2490 = vmatprep.subr.bf16.mxu1 %v8490_v5  ;;  %v8395_v5 = vcombine.low %v80_v51, %v88_v52  ;;  %v8445_v20 = vcombine.low %v129_v2, %v137_v3 }
  0xf2   :  { %2516 = vmatpush1.bf16.msra.mxu0 %v8617_v9  ;;  %v8380_v9 = vcombine.high %v64_v59, %v72_v60  ;;  %v8382_v60 = vcombine.high %v65_v42, %v73_v46 }
  0xf3   :  { %2542 = vmatprep.subr.bf16.mxu0 %v8476_v11  ;;  %v8446_v11 = vcombine.high %v129_v2, %v137_v3 }
  0xf4   :  { %2491 = vmatpush2.bf16.msra.mxu1 %v8489_v10 }
  0xf5   :  { %2591 = vmatprep.subr.bf16.mxu1 %v8668_v15  ;;  %8676 = vmatmul.mubr.msk.bf16.vlgmr.msra.gmra.mxu0 %vm2046_vm0, %v10703_v44 }
  0xf6   :  { %2543 = vmatpush1.bf16.msra.mxu0 %v8475_v18  ;;  %2574 = vmatprep.mubr.bf16.mxu0 %v10738_v0 }
  0xf7   :  { %2493 = vmatmul.mubr.bf16.vlgmr.msra.gmra.mxu1 %v10858_v19  ;;  %2544 = vmatprep.subr.bf16.mxu0 %v8460_v23  ;;  %v97_v23 = vld [vmem:[%s13963_s1 + $0x1b8] sm:$0xff] }
  0xf8   :  { %2592 = vmatpush1.bf16.msra.mxu1 %v8667_v22  ;;  %2615 = vmatprep.mubr.bf16.mxu1 %v10573_v8  ;;  %v288_v22 = vld [vmem:[%s13963_s1 + $0x7b0] sm:$0xff] }
  0xf9   :  { %2593 = vmatprep.subr.bf16.mxu1 %v8652_v25 }
  0xfa   :  { %2545 = vmatpush1.bf16.msra.mxu0 %v8459_v27 }
  0xfb   :  { %2546 = vmatprep.subr.bf16.mxu0 %v8444_v32  ;;  %v81_v32 = vld [vmem:[%s13963_s1 + $0x138] sm:$0xff] }
  0xfc   :  { %2594 = vmatpush1.bf16.msra.mxu1 %v8651_v31  ;;  %v280_v31 = vld [vmem:[%s13963_s1 + $0x770] sm:$0xff]  ;;  %v8398_v43 = vcombine.high %v81_v32, %v89_v34  ;;  %v8397_v53 = vcombine.low %v81_v32, %v89_v34 }
  0xfd   :  { %2595 = vmatprep.subr.bf16.mxu1 %v8636_v33  ;;  %v8414_v33 = vcombine.high %v97_v23, %v105_v56  ;;  %v176_v34 = vld [vmem:[%s13963_s1 + $0x430] sm:$0xff] }
  0xfe   :  { %2547 = vmatpush1.bf16.msra.mxu0 %v8443_v36  ;;  %v377_v36 = vrot.slane %v11463_v45, %v11530_v28 }
  0xff   :  { %2548 = vmatprep.subr.bf16.mxu0 %v8428_v39  ;;  %v8588_v39 = vcombine.high %v272_v30, %v280_v31 }
 0x100   :  { %2596 = vmatpush1.bf16.msra.mxu1 %v8635_v38  ;;  %v8413_v38 = vcombine.low %v97_v23, %v105_v56 }
 0x101   :  { %2597 = vmatprep.subr.bf16.mxu1 %v8620_v40  ;;  %v256_v40 = vld [vmem:[%s13963_s1 + $0x6b0] sm:$0xff] }
 0x102   :  { %2549 = vmatpush1.bf16.msra.mxu0 %v8427_v47  ;;  %v8571_v2 = vcombine.low %v256_v40, %v264_v41 }
 0x103   :  { %2550 = vmatprep.subr.bf16.mxu0 %v8412_v50  ;;  %v8587_v50 = vcombine.low %v272_v30, %v280_v31  ;;  %v257_v30 = vld [vmem:[%s13963_s1 + $0x6b8] sm:$0xff] }
 0x104   :  { %2598 = vmatpush1.bf16.msra.mxu1 %v8619_v49  ;;  %v265_v31 = vld [vmem:[%s13963_s1 + $0x6f8] sm:$0xff] }
 0x105   :  { %2624 = vmatprep.subr.bf16.mxu1 %v8478_v54  ;;  %v2084_v1 = vpop.f32.mrf.mxu0  ;;  %v8572_v54 = vcombine.high %v256_v40, %v264_v41  ;;  %v8574_v40 = vcombine.high %v257_v30, %v265_v31  ;;  %v241_v41 = vld [vmem:[%s13963_s1 + $0x638] sm:$0xff] }
 0x106   :  { %v2085_v4 = vadd.f32 %v2084_v1, %v369_v57  ;;  %2551 = vmatpush1.bf16.msra.mxu0 %v8411_v58  ;;  %v248_v57 = vld [vmem:[%s13963_s1 + $0x670] sm:$0xff]  ;;  %v49_v58 = vld [vmem:[%s13963_s1 + $0x38] sm:$0xff] }
 0x107   :  { %8677 = vmatmul.mubr.msk.bf16.vlgmr.msra.gmra.mxu1 %vm2046_vm0, %v10703_v44  ;;  %v11499_v6 = vpop.f32.mrf.mxu0  ;;  %2552 = vmatprep.subr.bf16.mxu0 %v8396_v62 }
 0x108   :  { %2625 = vmatpush1.bf16.msra.mxu1 %v8477_v61  ;;  %v11502_v10 = vadd.f32 %v11330_v17, %v2085_v4  ;;  %2656 = vmatprep.mubr.bf16.mxu1 %v10738_v0  ;;  %v121_v17 = vld [vmem:[%s13963_s1 + $0x278] sm:$0xff]  ;;  %v296_v0 = vld [vmem:[%s13963_s1 + $0x7f0] sm:$0xff]  ;;  %v8381_v4 = vcombine.low %v65_v42, %v73_v46 }
 0x109   :  { %2626 = vmatprep.subr.bf16.mxu1 %v8462_v63  ;;  %v2088_v15 = vpop.f32.mrf.mxu0  ;;  %v8430_v25 = vcombine.high %v113_v14, %v121_v17  ;;  %v8429_v27 = vcombine.low %v113_v14, %v121_v17  ;;  %v8604_v29 = vcombine.high %v288_v22, %v296_v0  ;;  %v8603_v35 = vcombine.low %v288_v22, %v296_v0  ;;  %v57_v61 = vld [vmem:[%s13963_s1 + $0x78] sm:$0xff] }
 0x10a   :  { %2553 = vmatpush1.bf16.msra.mxu0 %v8395_v5  ;;  %v8556_v5 = vcombine.high %v240_v55, %v248_v57  ;;  %v8366_v12 = vcombine.high %v49_v58, %v57_v61  ;;  %v297_v14 = vld [vmem:[%s13963_s1 + $0x7f8] sm:$0xff]  ;;  %v8555_v15 = vcombine.low %v240_v55, %v248_v57  ;;  %v8365_v17 = vcombine.low %v49_v58, %v57_v61 }
 0x10b   :  { %v2089_v18 = vpop.f32.mrf.mxu0  ;;  %2554 = vmatprep.subr.bf16.mxu0 %v8380_v9  ;;  %v232_v9 = vld [vmem:[%s13963_s1 + $0x5f0] sm:$0xff]  ;;  %v8606_v22 = vcombine.high %v289_v13, %v297_v14  ;;  %v281_v0 = vld [vmem:[%s13963_s1 + $0x778] sm:$0xff]  ;;  %v8605_v56 = vcombine.low %v289_v13, %v297_v14 }
 0x10c   :  { %2627 = vmatpush1.bf16.msra.mxu1 %v8461_v7  ;;  %v224_v7 = vld [vmem:[%s13963_s1 + $0x5b0] sm:$0xff]  ;;  %v249_v42 = vld [vmem:[%s13963_s1 + $0x678] sm:$0xff] }
 0x10d   :  { %2628 = vmatprep.subr.bf16.mxu1 %v8446_v11  ;;  %v208_v18 = vld [vmem:[%s13963_s1 + $0x530] sm:$0xff]  ;;  %v8539_v23 = vcombine.low %v224_v7, %v232_v9  ;;  %v225_v55 = vld [vmem:[%s13963_s1 + $0x5b8] sm:$0xff] }
 0x10e   :  { %2555 = vmatpush1.bf16.msra.mxu0 %v8379_v16  ;;  %v8540_v16 = vcombine.high %v224_v7, %v232_v9  ;;  %v233_v57 = vld [vmem:[%s13963_s1 + $0x5f8] sm:$0xff]  ;;  %v11656_v7 = vsub.s32 3, %v11449_v37 }
 0x10f   :  { %2556 = vmatprep.subr.bf16.mxu0 %v8364_v21  ;;  %v273_v21 = vld [vmem:[%s13963_s1 + $0x738] sm:$0xff]  ;;  %v8541_v13 = vcombine.low %v225_v55, %v233_v57 }
 0x110   :  { %2629 = vmatpush1.bf16.msra.mxu1 %v8445_v20  ;;  %v216_v20 = vld [vmem:[%s13963_s1 + $0x570] sm:$0xff] }
 0x111   :  { %2630 = vmatprep.subr.bf16.mxu1 %v8430_v25  ;;  %v192_v25 = vld [vmem:[%s13963_s1 + $0x4b0] sm:$0xff] }
 0x112   :  { %2557 = vmatpush1.bf16.msra.mxu0 %v8363_v26  ;;  %v8524_v26 = vcombine.high %v208_v18, %v216_v20 }
 0x113   :  { %2558 = vmatprep.subr.bf16.mxu0 %v8604_v29  ;;  %v8590_v29 = vcombine.high %v273_v21, %v281_v0 }
 0x114   :  { %2631 = vmatpush1.bf16.msra.mxu1 %v8429_v27  ;;  %v200_v27 = vld [vmem:[%s13963_s1 + $0x4f0] sm:$0xff] }
 0x115   :  { %2632 = vmatprep.subr.bf16.mxu1 %v8414_v33  ;;  %v2207_v47 = vpop.f32.mrf.mxu0  ;;  %v8523_v33 = vcombine.low %v208_v18, %v216_v20  ;;  %v8507_v46 = vcombine.low %v192_v25, %v200_v27  ;;  %v201_v18 = vld [vmem:[%s13963_s1 + $0x4f8] sm:$0xff]  ;;  %v381_v20 = vrot.slane %v11463_v45, %v11656_v7 }
 0x116   :  { %2559 = vmatpush2.bf16.msra.mxu0 %v8603_v35  ;;  %v184_v35 = vld [vmem:[%s13963_s1 + $0x470] sm:$0xff] }
 0x117   :  { %v2166_v49 = vpop.f32.mrf.mxu1  ;;  %v11558_v52 = vpop.f32.mrf.mxu0  ;;  %2560 = vmatprep.subr.bf16.mxu0 %v8588_v39  ;;  %v8491_v58 = vcombine.low %v176_v34, %v184_v35 }
 0x118   :  { %v2167_v51 = vadd.f32 %v2166_v49, %v377_v36  ;;  %2633 = vmatpush1.bf16.msra.mxu1 %v8413_v38  ;;  %v8589_v36 = vcombine.low %v273_v21, %v281_v0  ;;  %v8508_v38 = vcombine.high %v192_v25, %v200_v27  ;;  %v361_v49 = vld [vmem:[%s13963_s1 + $0x9f8] sm:$0xff] }
 0x119   :  { %v11569_v59 = vpop.f32.mrf.mxu1  ;;  %2634 = vmatprep.subr.bf16.mxu1 %v8398_v43  ;;  %v2211_v63 = vpop.f32.mrf.mxu0  ;;  %v313_v0 = vld [vmem:[%s13963_s1 + $0x878] sm:$0xff] }
 0x11a   :  { %v11574_v62 = vadd.f32 %v2207_v47, %v2167_v51  ;;  %2561 = vmatpush2.bf16.msra.mxu0 %v8587_v50  ;;  %v353_v47 = vld [vmem:[%s13963_s1 + $0x9b8] sm:$0xff]  ;;  %v8573_v50 = vcombine.low %v257_v30, %v265_v31  ;;  %v8492_v51 = vcombine.high %v176_v34, %v184_v35  ;;  %v2169_v30 = vadd.f32 %v11569_v59, %v381_v20 }
 0x11b   :  { %v2170_v1 = vpop.f32.mrf.mxu1  ;;  %v2212_v3 = vpop.f32.mrf.mxu0  ;;  %2562 = vmatprep.subr.bf16.mxu0 %v8572_v54  ;;  %v8558_v54 = vcombine.high %v241_v41, %v249_v42  ;;  %v8670_v61 = vcombine.high %v353_v47, %v361_v49  ;;  %v209_v63 = vld [vmem:[%s13963_s1 + $0x538] sm:$0xff]  ;;  %v8669_v9 = vcombine.low %v353_v47, %v361_v49  ;;  %v9623_v49 = vld [vmem:[%s13965_s3 + $0x370] ss:$20 sps:$4 sm:$0xff]  }
 0x11c   :  { %2635 = vmatpush1.bf16.msra.mxu1 %v8397_v53  ;;  %v217_v1 = vld [vmem:[%s13963_s1 + $0x578] sm:$0xff]  ;;  %v8542_v3 = vcombine.high %v225_v55, %v233_v57  ;;  %v2210_v35 = vadd.f32 %v11558_v52, %v2169_v30  ;;  %v9632_v57 = vld [vmem:[%s13965_s3 + $0xa0] ss:$20 sps:$4 sm:$0xff]  }
 0x11d   :  { %v2171_v11 = vpop.f32.mrf.mxu1  ;;  %2636 = vmatprep.subr.bf16.mxu1 %v8382_v60  ;;  %v8557_v60 = vcombine.low %v241_v41, %v249_v42  ;;  %v177_v27 = vld [vmem:[%s13963_s1 + $0x438] sm:$0xff] }
 0x11e   :  { %2563 = vmatpush2.bf16.msra.mxu0 %v8571_v2  ;;  %v337_v2 = vld [vmem:[%s13963_s1 + $0x938] sm:$0xff]  ;;  %v2709_v42 = vmax.f32 %v2210_v35, 0.0  ;;  %v9668_v35 = vld [vmem:[%s13965_s3 + $0x230] ss:$20 sps:$4 sm:$0xff]  }
 0x11f   :  { %2564 = vmatprep.subr.bf16.mxu0 %v8556_v5  ;;  %v11653_v5 = vsub.s32 1, %v11449_v37  ;;  %v321_v11 = vld [vmem:[%s13963_s1 + $0x8b8] sm:$0xff] }
 0x120   :  { %2637 = vmatpush1.bf16.msra.mxu1 %v8381_v4  ;;  %v345_v4 = vld [vmem:[%s13963_s1 + $0x978] sm:$0xff] }
 0x121   :  { %2638 = vmatprep.subr.bf16.mxu1 %v8366_v12  ;;  %v329_v12 = vld [vmem:[%s13963_s1 + $0x8f8] sm:$0xff]  ;;  %v8654_v14 = vcombine.high %v337_v2, %v345_v4  ;;  %v8653_v21 = vcombine.low %v337_v2, %v345_v4 }
 0x122   :  { %2565 = vmatpush2.bf16.msra.mxu0 %v8555_v15  ;;  %v8526_v15 = vcombine.high %v209_v63, %v217_v1  ;;  %v8638_v25 = vcombine.high %v321_v11, %v329_v12  ;;  %v9616_v59 = vld [vmem:[%s13965_s3 + $0x11c] ss:$20 sps:$4 sm:$0xff]   ;;  %v9617_v52 = vld [vmem:[%s13965_s3 + $0x398] ss:$20 sps:$4 sm:$0xff]  }
 0x123   :  { %2566 = vmatprep.subr.bf16.mxu0 %v8540_v16  ;;  %v193_v16 = vld [vmem:[%s13963_s1 + $0x4b8] sm:$0xff] }
 0x124   :  { %2639 = vmatpush1.bf16.msra.mxu1 %v8365_v17  ;;  %v373_v17 = vrot.slane %v11463_v45, %v11653_v5  ;;  %v8509_v31 = vcombine.low %v193_v16, %v201_v18  ;;  %v9634_v55 = vld [vmem:[%s13965_s3 + $0xa4] ss:$20 sps:$4 sm:$0xff]  }
 0x125   :  { %2640 = vmatprep.subr.bf16.mxu1 %v8606_v22  ;;  %v305_v22 = vld [vmem:[%s13963_s1 + $0x838] sm:$0xff] }
 0x126   :  { %2567 = vmatpush2.bf16.msra.mxu0 %v8539_v23  ;;  %v8525_v23 = vcombine.low %v209_v63, %v217_v1  ;;  %v9640_v63 = vld [vmem:[%s13965_s3 + $0x7c] ss:$20 sps:$4 sm:$0xff]   ;;  %v9638_v2 = vld [vmem:[%s13965_s3 + $0x78] ss:$20 sps:$4 sm:$0xff]  }
 0x127   :  { %v11612_v32 = vpop.f32.mrf.mxu1  ;;  %2568 = vmatprep.subr.bf16.mxu0 %v8524_v26  ;;  %v2087_v26 = vadd.f32 %v11499_v6, %v373_v17  ;;  %v9643_v1 = vld [vmem:[%s13965_s3 + $0x2fc] ss:$20 sps:$4 sm:$0xff]   ;;  %v9641_v4 = vld [vmem:[%s13965_s3 + $0x2f8] ss:$20 sps:$4 sm:$0xff]  }
 0x128   :  { %2641 = vmatpush2.bf16.msra.mxu1 %v8605_v56  ;;  %v8510_v56 = vcombine.high %v193_v16, %v201_v18  ;;  %v9652_v17 = vld [vmem:[%s13965_s3 + $0x2c] ss:$20 sps:$4 sm:$0xff]  }
 0x129   :  { %v11620_v39 = vpop.f32.mrf.mxu1  ;;  %2642 = vmatprep.subr.bf16.mxu1 %v8590_v29  ;;  %v185_v29 = vld [vmem:[%s13963_s1 + $0x478] sm:$0xff]  ;;  %v2128_v6 = vadd.f32 %v11338_v24, %v2087_v26  ;;  %v9655_v18 = vld [vmem:[%s13965_s3 + $0x2ac] ss:$20 sps:$4 sm:$0xff]   ;;  %v392_v26 = vsub.s32 6, %v11449_v37 }
 0x12a   :  { %2569 = vmatpush2.bf16.msra.mxu0 %v8523_v33  ;;  %v8622_v33 = vcombine.high %v305_v22, %v313_v0  ;;  %v8494_v34 = vcombine.high %v177_v27, %v185_v29  ;;  %v9614_v24 = vld [vmem:[%s13965_s3 + $0x118] ss:$20 sps:$4 sm:$0xff]  }
 0x12b   :  { %v2293_v43 = vpop.f32.mrf.mxu1  ;;  %2570 = vmatprep.subr.bf16.mxu0 %v8508_v38  ;;  %v8493_v38 = vcombine.low %v177_v27, %v185_v29  ;;  %v2707_v41 = vmax.f32 %v2128_v6, 0.0  ;;  %v9664_v27 = vld [vmem:[%s13965_s3 + $0x25c] ss:$20 sps:$4 sm:$0xff]   ;;  %v9662_v30 = vld [vmem:[%s13965_s3 + $0x258] ss:$20 sps:$4 sm:$0xff]  }
 0x12c   :  { %2643 = vmatpush2.bf16.msra.mxu1 %v8589_v36  ;;  %v8621_v36 = vcombine.low %v305_v22, %v313_v0  ;;  %v9622_v43 = vld [vmem:[%s13965_s3 + $0xf4] ss:$20 sps:$4 sm:$0xff]   ;;  %v9667_v29 = vld [vmem:[%s13965_s3 + $0x4dc] ss:$20 sps:$4 sm:$0xff]  }
 0x12d   :  { %v2294_v53 = vpop.f32.mrf.mxu1  ;;  %2644 = vmatprep.subr.bf16.mxu1 %v8574_v40  ;;  %v9619_v40 = vld [vmem:[%s13965_s3 + $0x39c] ss:$20 sps:$4 sm:$0xff]   ;;  %v11710_v47 = vpack.c.bf16 %v2707_v41, %v2707_v41  ;;  %v9673_v6 = vld [vmem:[%s13965_s3 + $0x4b4] ss:$20 sps:$4 sm:$0xff]   ;;  %v9676_v41 = vld [vmem:[%s13965_s3 + $0x20c] ss:$20 sps:$4 sm:$0xff]  }
 0x12e   :  { %2571 = vmatpush2.bf16.msra.mxu0 %v8507_v46  ;;  %v9620_v46 = vld [vmem:[%s13965_s3 + $0xf0] ss:$20 sps:$4 sm:$0xff]   ;;  %v9628_v53 = vld [vmem:[%s13965_s3 + $0xcc] ss:$20 sps:$4 sm:$0xff]   ;;  %v9653_v0 = vld [vmem:[%s13965_s3 + $0x2a8] ss:$20 sps:$4 sm:$0xff]  }
 0x12f   :  { %2572 = vmatprep.subr.bf16.mxu0 %v8492_v51  ;;  %v11720_v51 = vpack.c.bf16 %v2709_v42, %v2709_v42 }
 0x130   :  { %2645 = vmatpush2.bf16.msra.mxu1 %v8573_v50  ;;  %v9625_v50 = vld [vmem:[%s13965_s3 + $0x374] ss:$20 sps:$4 sm:$0xff]  }
 0x131   :  { %2646 = vmatprep.subr.bf16.mxu1 %v8558_v54  ;;  %v9629_v54 = vld [vmem:[%s13965_s3 + $0x348] ss:$20 sps:$4 sm:$0xff]  }
 0x132   :  { %2573 = vmatpush2.bf16.msra.mxu0 %v8491_v58  ;;  %v9637_v58 = vld [vmem:[%s13965_s3 + $0x324] ss:$20 sps:$4 sm:$0xff]  }
 0x133   :  { %2673 = vmatprep.subr.bf16.mxu0 %v8670_v61  ;;  %v9635_v61 = vld [vmem:[%s13965_s3 + $0x320] ss:$20 sps:$4 sm:$0xff]  }
 0x134   :  { %2647 = vmatpush2.bf16.msra.mxu1 %v8557_v60  ;;  %v11747_v60 = vsub.s32 4, %v11449_v37 }
 0x135   :  { %2648 = vmatprep.subr.bf16.mxu1 %v8542_v3  ;;  %2575 = vmatmul.mubr.bf16.vlgmr.msra.gmra.mxu0 %v10858_v19 }
 0x136   :  { %2674 = vmatpush1.bf16.msra.mxu0 %v8669_v9  ;;  %2697 = vmatprep.mubr.bf16.mxu0 %v10573_v8  ;;  %v8637_v8 = vcombine.low %v321_v11, %v329_v12  ;;  %v385_v3 = vrot.slane %v11463_v45, %v11747_v60  ;;  %v9646_v9 = vld [vmem:[%s13965_s3 + $0x54] ss:$20 sps:$4 sm:$0xff]   ;;  %v9644_v12 = vld [vmem:[%s13965_s3 + $0x50] ss:$20 sps:$4 sm:$0xff]  }
 0x137   :  { %2675 = vmatprep.subr.bf16.mxu0 %v8654_v14  ;;  %v9649_v11 = vld [vmem:[%s13965_s3 + $0x2d4] ss:$20 sps:$4 sm:$0xff]  }
 0x138   :  { %2649 = vmatpush2.bf16.msra.mxu1 %v8541_v13 }
 0x139   :  { %2650 = vmatprep.subr.bf16.mxu1 %v8526_v15  ;;  %v9647_v15 = vld [vmem:[%s13965_s3 + $0x2d0] ss:$20 sps:$4 sm:$0xff]  }
 0x13a   :  { %2676 = vmatpush1.bf16.msra.mxu0 %v8653_v21  ;;  %v9650_v21 = vld [vmem:[%s13965_s3 + $0x28] ss:$20 sps:$4 sm:$0xff]  }
 0x13b   :  { %2677 = vmatprep.subr.bf16.mxu0 %v8638_v25  ;;  %v9661_v25 = vld [vmem:[%s13965_s3 + $0x284] ss:$20 sps:$4 sm:$0xff]  }
 0x13c   :  { %2651 = vmatpush2.bf16.msra.mxu1 %v8525_v23  ;;  %v9656_v23 = vld [vmem:[%s13965_s3] ss:$20 sps:$4 sm:$0xff]  }
 0x13d   :  { %2652 = vmatprep.subr.bf16.mxu1 %v8510_v56  ;;  %v9659_v56 = vld [vmem:[%s13965_s3 + $0x280] ss:$20 sps:$4 sm:$0xff]  }
 0x13e   :  { %2678 = vmatpush1.bf16.msra.mxu0 %v8637_v8  ;;  %v10548_v8 = vld [vmem:[%s13964_s2] sm:$0xff] }
 0x13f   :  { %2679 = vmatprep.subr.bf16.mxu0 %v8622_v33  ;;  %v9665_v33 = vld [vmem:[%s13965_s3 + $0x4d8] ss:$20 sps:$4 sm:$0xff]  }
 0x140   :  { %2653 = vmatpush2.bf16.msra.mxu1 %v8509_v31  ;;  %v393_v31 = vrot.slane %v10548_v8, %v392_v26 }
 0x141   :  { %2654 = vmatprep.subr.bf16.mxu1 %v8494_v34  ;;  %v9670_v34 = vld [vmem:[%s13965_s3 + $0x234] ss:$20 sps:$4 sm:$0xff]  }
 0x142   :  { %2680 = vmatpush1.bf16.msra.mxu0 %v8621_v36 }
 0x143   :  { %6861 = vmatprep.subr.bf16.mxu0 %v9616_v59 }
 0x144   :  { %2655 = vmatpush2.bf16.msra.mxu1 %v8493_v38 }
 0x145   :  { %6902 = vmatprep.subr.bf16.mxu1 %v9619_v40  ;;  %8678 = vmatmul.mubr.msk.bf16.vlgmr.msra.gmra.mxu0 %vm2046_vm0, %v10703_v44  ;;  %v9631_v44 = vld [vmem:[%s13965_s3 + $0x34c] ss:$20 sps:$4 sm:$0xff]  }
 0x146   :  { %6862 = vmatpush1.bf16.msra.mxu0 %v9614_v24  ;;  %6893 = vmatprep.mubr.bf16.mxu0 %v11710_v47  ;;  %v9671_v24 = vld [vmem:[%s13965_s3 + $0x4b0] ss:$20 sps:$4 sm:$0xff]  }
 0x147   :  { %2657 = vmatmul.mubr.bf16.vlgmr.msra.gmra.mxu1 %v10858_v19  ;;  %6863 = vmatprep.subr.bf16.mxu0 %v9622_v43  ;;  %v9626_v19 = vld [vmem:[%s13965_s3 + $0xc8] ss:$20 sps:$4 sm:$0xff]  }
 0x148   :  { %6903 = vmatpush1.bf16.msra.mxu1 %v9617_v52  ;;  %6934 = vmatprep.mubr.bf16.mxu1 %v11720_v51  ;;  %v9679_v52 = vld [vmem:[%s13965_s3 + $0x48c] ss:$20 sps:$4 sm:$0xff]   ;;  %v9674_v43 = vld [vmem:[%s13965_s3 + $0x208] ss:$20 sps:$4 sm:$0xff]  }
 0x149   :  { %6904 = vmatprep.subr.bf16.mxu1 %v9625_v50 }
 0x14a   :  { %6864 = vmatpush1.bf16.msra.mxu0 %v9620_v46 }
 0x14b   :  { %6865 = vmatprep.subr.bf16.mxu0 %v9628_v53 }
 0x14c   :  { %6905 = vmatpush1.bf16.msra.mxu1 %v9623_v49 }
 0x14d   :  { %6906 = vmatprep.subr.bf16.mxu1 %v9631_v44  ;;  %v9677_v44 = vld [vmem:[%s13965_s3 + $0x488] ss:$20 sps:$4 sm:$0xff]  }
 0x14e   :  { %6866 = vmatpush1.bf16.msra.mxu0 %v9626_v19  ;;  %v9682_v19 = vld [vmem:[%s13965_s3 + $0x1e4] ss:$20 sps:$4 sm:$0xff]  }
 0x14f   :  { %6867 = vmatprep.subr.bf16.mxu0 %v9634_v55  ;;  %v396_v55 = vsub.s32 7, %v11449_v37 }
 0x150   :  { %6907 = vmatpush1.bf16.msra.mxu1 %v9629_v54  ;;  %v388_v54 = vsub.s32 5, %v11449_v37 }
 0x151   :  { %6908 = vmatprep.subr.bf16.mxu1 %v9637_v58  ;;  %v9685_v58 = vld [vmem:[%s13965_s3 + $0x464] ss:$20 sps:$4 sm:$0xff]  }
 0x152   :  { %6868 = vmatpush1.bf16.msra.mxu0 %v9632_v57 }
 0x153   :  { %6869 = vmatprep.subr.bf16.mxu0 %v9640_v63  ;;  %v9683_v63 = vld [vmem:[%s13965_s3 + $0x460] ss:$20 sps:$4 sm:$0xff]  }
 0x154   :  { %6909 = vmatpush1.bf16.msra.mxu1 %v9635_v61  ;;  %v9680_v61 = vld [vmem:[%s13965_s3 + $0x1e0] ss:$20 sps:$4 sm:$0xff]  }
 0x155   :  { %6910 = vmatprep.subr.bf16.mxu1 %v9643_v1  ;;  %v2248_v45 = vpop.f32.mrf.mxu0  ;;  %v9688_v1 = vld [vmem:[%s13965_s3 + $0x1bc] ss:$20 sps:$4 sm:$0xff]  }
 0x156   :  { %v2249_v13 = vadd.f32 %v2248_v45, %v385_v3  ;;  %6870 = vmatpush1.bf16.msra.mxu0 %v9638_v2  ;;  %v9691_v2 = vld [vmem:[%s13965_s3 + $0x43c] ss:$20 sps:$4 sm:$0xff]   ;;  %v9686_v3 = vld [vmem:[%s13965_s3 + $0x1b8] ss:$20 sps:$4 sm:$0xff]   ;;  %v397_v45 = vrot.slane %v10548_v8, %v396_v55 }
 0x157   :  { %v11775_v14 = vpop.f32.mrf.mxu0  ;;  %6871 = vmatprep.subr.bf16.mxu0 %v9646_v9  ;;  %v9694_v9 = vld [vmem:[%s13965_s3 + $0x194] ss:$20 sps:$4 sm:$0xff]  }
 0x158   :  { %6911 = vmatpush1.bf16.msra.mxu1 %v9641_v4  ;;  %v11784_v16 = vadd.f32 %v11612_v32, %v2249_v13  ;;  %v9658_v32 = vld [vmem:[%s13965_s3 + $0x4] ss:$20 sps:$4 sm:$0xff]  }
 0x159   :  { %6912 = vmatprep.subr.bf16.mxu1 %v9649_v11  ;;  %v2252_v20 = vpop.f32.mrf.mxu0  ;;  %v9689_v4 = vld [vmem:[%s13965_s3 + $0x438] ss:$20 sps:$4 sm:$0xff]   ;;  %v9697_v11 = vld [vmem:[%s13965_s3 + $0x414] ss:$20 sps:$4 sm:$0xff]   ;;  %v9692_v13 = vld [vmem:[%s13965_s3 + $0x190] ss:$20 sps:$4 sm:$0xff]  }
 0x15a   :  { %6872 = vmatpush1.bf16.msra.mxu0 %v9644_v12  ;;  %v389_v12 = vrot.slane %v10548_v8, %v388_v54  ;;  %v9703_v20 = vld [vmem:[%s13965_s3 + $0x3ec] ss:$20 sps:$4 sm:$0xff]  }
 0x15b   :  { %v2253_v22 = vpop.f32.mrf.mxu0  ;;  %6873 = vmatprep.subr.bf16.mxu0 %v9652_v17  ;;  %v9704_v8 = vld [vmem:[%s13965_s3 + $0x140] ss:$20 sps:$4 sm:$0xff]  }
 0x15c   :  { %6913 = vmatpush1.bf16.msra.mxu1 %v9647_v15  ;;  %v9695_v15 = vld [vmem:[%s13965_s3 + $0x410] ss:$20 sps:$4 sm:$0xff]  }
 0x15d   :  { %6914 = vmatprep.subr.bf16.mxu1 %v9655_v18  ;;  %v9700_v18 = vld [vmem:[%s13965_s3 + $0x16c] ss:$20 sps:$4 sm:$0xff]  }
 0x15e   :  { %6874 = vmatpush1.bf16.msra.mxu0 %v9650_v21  ;;  %v2251_v21 = vadd.f32 %v11775_v14, %v389_v12  ;;  %v9709_v14 = vld [vmem:[%s13965_s3 + $0x3c4] ss:$20 sps:$4 sm:$0xff]  }
 0x15f   :  { %6875 = vmatprep.subr.bf16.mxu0 %v9658_v32  ;;  %v9698_v32 = vld [vmem:[%s13965_s3 + $0x168] ss:$20 sps:$4 sm:$0xff]   ;;  %v9743_v12 = vld [vmem:[%s13965_s3 + $0x7d0] ss:$20 sps:$4 sm:$0xff]  }
 0x160   :  { %6915 = vmatpush1.bf16.msra.mxu1 %v9653_v0 }
 0x161   :  { %6916 = vmatprep.subr.bf16.mxu1 %v9661_v25 }
 0x162   :  { %6876 = vmatpush1.bf16.msra.mxu0 %v9656_v23  ;;  %v9701_v23 = vld [vmem:[%s13965_s3 + $0x3e8] ss:$20 sps:$4 sm:$0xff]  }
 0x163   :  { %6877 = vmatprep.subr.bf16.mxu0 %v9664_v27  ;;  %v2292_v27 = vadd.f32 %v11620_v39, %v2251_v21  ;;  %v9712_v39 = vld [vmem:[%s13965_s3 + $0x61c] ss:$20 sps:$4 sm:$0xff]   ;;  %v9752_v21 = vld [vmem:[%s13965_s3 + $0x500] ss:$20 sps:$4 sm:$0xff]  }
 0x164   :  { %6917 = vmatpush1.bf16.msra.mxu1 %v9659_v56  ;;  %v9706_v56 = vld [vmem:[%s13965_s3 + $0x144] ss:$20 sps:$4 sm:$0xff]  }
 0x165   :  { %6918 = vmatprep.subr.bf16.mxu1 %v9667_v29  ;;  %v2371_v36 = vpop.f32.mrf.mxu0 }
 0x166   :  { %6878 = vmatpush2.bf16.msra.mxu0 %v9662_v30 }
 0x167   :  { %v2330_v38 = vpop.f32.mrf.mxu1  ;;  %v2373_v40 = vpop.f32.mrf.mxu0  ;;  %6879 = vmatprep.subr.bf16.mxu0 %v9670_v34  ;;  %v2708_v34 = vmax.f32 %v11574_v62, 0.0  ;;  %v9718_v62 = vld [vmem:[%s13965_s3 + $0x5f4] ss:$20 sps:$4 sm:$0xff]  }
 0x168   :  { %v2331_v59 = vadd.f32 %v2330_v38, %v393_v31  ;;  %6919 = vmatpush2.bf16.msra.mxu1 %v9665_v33  ;;  %v9707_v31 = vld [vmem:[%s13965_s3 + $0x3c0] ss:$20 sps:$4 sm:$0xff]   ;;  %v2706_v33 = vmax.f32 %v11502_v10, 0.0  ;;  %v9710_v38 = vld [vmem:[%s13965_s3 + $0x618] ss:$20 sps:$4 sm:$0xff]  }
 0x169   :  { %v2332_v42 = vpop.f32.mrf.mxu1  ;;  %6920 = vmatprep.subr.bf16.mxu1 %v9673_v6  ;;  %v2375_v49 = vpop.f32.mrf.mxu0  ;;  %v9715_v6 = vld [vmem:[%s13965_s3 + $0x89c] ss:$20 sps:$4 sm:$0xff]   ;;  %v9713_v10 = vld [vmem:[%s13965_s3 + $0x898] ss:$20 sps:$4 sm:$0xff]  }
 0x16a   :  { %v11846_v46 = vadd.f32 %v2371_v36, %v2331_v59  ;;  %6880 = vmatpush2.bf16.msra.mxu0 %v9668_v35  ;;  %v2333_v22 = vadd.f32 %v2332_v42, %v397_v45  ;;  %v2711_v35 = vmax.f32 %v2292_v27, 0.0  ;;  %v11940_v59 = vpack.c.bf16 %v2706_v33, %v2706_v33  ;;  %v9721_v42 = vld [vmem:[%s13965_s3 + $0x874] ss:$20 sps:$4 sm:$0xff]   ;;  %v9724_v49 = vld [vmem:[%s13965_s3 + $0x5cc] ss:$20 sps:$4 sm:$0xff]  }
 0x16b   :  { %v2334_v50 = vpop.f32.mrf.mxu1  ;;  %v2376_v53 = vpop.f32.mrf.mxu0  ;;  %6881 = vmatprep.subr.bf16.mxu0 %v9676_v41  ;;  %v9748_v45 = vld [vmem:[%s13965_s3 + $0x52c] ss:$20 sps:$4 sm:$0xff]  }
 0x16c   :  { %6921 = vmatpush2.bf16.msra.mxu1 %v9671_v24  ;;  %v2374_v29 = vadd.f32 %v2373_v40, %v2333_v22  ;;  %v11942_v40 = vpack.c.bf16 %v2708_v34, %v2708_v34  ;;  %v9716_v24 = vld [vmem:[%s13965_s3 + $0x5f0] ss:$20 sps:$4 sm:$0xff]   ;;  %v11947_v41 = vpack.c.bf16 %v2711_v35, %v2711_v35  ;;  %v9727_v50 = vld [vmem:[%s13965_s3 + $0x84c] ss:$20 sps:$4 sm:$0xff]   ;;  %v9722_v53 = vld [vmem:[%s13965_s3 + $0x5c8] ss:$20 sps:$4 sm:$0xff]  }
 0x16d   :  { %v2335_v57 = vpop.f32.mrf.mxu1  ;;  %6922 = vmatprep.subr.bf16.mxu1 %v9679_v52  ;;  %v9719_v52 = vld [vmem:[%s13965_s3 + $0x870] ss:$20 sps:$4 sm:$0xff]   ;;  %v9772_v35 = vld [vmem:[%s13965_s3 + $0x70c] ss:$20 sps:$4 sm:$0xff]  }
 0x16e   :  { %6882 = vmatpush2.bf16.msra.mxu0 %v9674_v43  ;;  %v2713_v36 = vmax.f32 %v2374_v29, 0.0  ;;  %v9733_v57 = vld [vmem:[%s13965_s3 + $0x824] ss:$20 sps:$4 sm:$0xff]  }
 0x16f   :  { %6883 = vmatprep.subr.bf16.mxu0 %v9682_v19  ;;  %v9730_v19 = vld [vmem:[%s13965_s3 + $0x5a4] ss:$20 sps:$4 sm:$0xff]  }
 0x170   :  { %6923 = vmatpush2.bf16.msra.mxu1 %v9677_v44  ;;  %v11956_v43 = vpack.c.bf16 %v2713_v36, %v2713_v36  ;;  %v9725_v44 = vld [vmem:[%s13965_s3 + $0x848] ss:$20 sps:$4 sm:$0xff]   ;;  %v9757_v22 = vld [vmem:[%s13965_s3 + $0x784] ss:$20 sps:$4 sm:$0xff]  }
 0x171   :  { %6924 = vmatprep.subr.bf16.mxu1 %v9685_v58  ;;  %v9728_v58 = vld [vmem:[%s13965_s3 + $0x5a0] ss:$20 sps:$4 sm:$0xff]   ;;  %v9761_v29 = vld [vmem:[%s13965_s3 + $0x9d8] ss:$20 sps:$4 sm:$0xff]  }
 0x172   :  { %6884 = vmatpush2.bf16.msra.mxu0 %v9680_v61  ;;  %v9731_v61 = vld [vmem:[%s13965_s3 + $0x820] ss:$20 sps:$4 sm:$0xff]  }
 0x173   :  { %6885 = vmatprep.subr.bf16.mxu0 %v9688_v1  ;;  %v9739_v1 = vld [vmem:[%s13965_s3 + $0x7fc] ss:$20 sps:$4 sm:$0xff]  }
 0x174   :  { %6925 = vmatpush2.bf16.msra.mxu1 %v9683_v63  ;;  %v9736_v63 = vld [vmem:[%s13965_s3 + $0x57c] ss:$20 sps:$4 sm:$0xff]  }
 0x175   :  { %6926 = vmatprep.subr.bf16.mxu1 %v9691_v2  ;;  %v9734_v2 = vld [vmem:[%s13965_s3 + $0x578] ss:$20 sps:$4 sm:$0xff]  }
 0x176   :  { %6886 = vmatpush2.bf16.msra.mxu0 %v9686_v3  ;;  %v9737_v3 = vld [vmem:[%s13965_s3 + $0x7f8] ss:$20 sps:$4 sm:$0xff]  }
 0x177   :  { %v11893_v17 = vpop.f32.mrf.mxu1  ;;  %6887 = vmatprep.subr.bf16.mxu0 %v9694_v9  ;;  %v9740_v9 = vld [vmem:[%s13965_s3 + $0x550] ss:$20 sps:$4 sm:$0xff]  }
 0x178   :  { %6927 = vmatpush2.bf16.msra.mxu1 %v9689_v4  ;;  %v9742_v4 = vld [vmem:[%s13965_s3 + $0x554] ss:$20 sps:$4 sm:$0xff]  }
 0x179   :  { %v11902_v0 = vpop.f32.mrf.mxu1  ;;  %6928 = vmatprep.subr.bf16.mxu1 %v9697_v11  ;;  %v9745_v11 = vld [vmem:[%s13965_s3 + $0x7d4] ss:$20 sps:$4 sm:$0xff]  }
 0x17a   :  { %6888 = vmatpush2.bf16.msra.mxu0 %v9692_v13  ;;  %v9746_v13 = vld [vmem:[%s13965_s3 + $0x528] ss:$20 sps:$4 sm:$0xff]  }
 0x17b   :  { %v2457_v25 = vpop.f32.mrf.mxu1  ;;  %6889 = vmatprep.subr.bf16.mxu0 %v9700_v18  ;;  %v9749_v18 = vld [vmem:[%s13965_s3 + $0x7a8] ss:$20 sps:$4 sm:$0xff]  }
 0x17c   :  { %6929 = vmatpush2.bf16.msra.mxu1 %v9695_v15  ;;  %v9751_v15 = vld [vmem:[%s13965_s3 + $0x7ac] ss:$20 sps:$4 sm:$0xff]   ;;  %v9760_v25 = vld [vmem:[%s13965_s3 + $0x75c] ss:$20 sps:$4 sm:$0xff]  }
 0x17d   :  { %v2458_v30 = vpop.f32.mrf.mxu1  ;;  %6930 = vmatprep.subr.bf16.mxu1 %v9703_v20  ;;  %v9754_v20 = vld [vmem:[%s13965_s3 + $0x504] ss:$20 sps:$4 sm:$0xff]  }
 0x17e   :  { %6890 = vmatpush2.bf16.msra.mxu0 %v9698_v32  ;;  %v9755_v32 = vld [vmem:[%s13965_s3 + $0x780] ss:$20 sps:$4 sm:$0xff]  }
 0x17f   :  { %6891 = vmatprep.subr.bf16.mxu0 %v9706_v56  ;;  %v9763_v56 = vld [vmem:[%s13965_s3 + $0x9dc] ss:$20 sps:$4 sm:$0xff]   ;;  %v9766_v30 = vld [vmem:[%s13965_s3 + $0x734] ss:$20 sps:$4 sm:$0xff]  }
 0x180   :  { %6931 = vmatpush2.bf16.msra.mxu1 %v9701_v23  ;;  %v12036_v23 = vld [vmem:[%s13964_s2 + $0x8] sm:$0xff] }
 0x181   :  { %6932 = vmatprep.subr.bf16.mxu1 %v9709_v14  ;;  %v9758_v14 = vld [vmem:[%s13965_s3 + $0x758] ss:$20 sps:$4 sm:$0xff]   ;;  %v401_v27 = vrot.slane %v12036_v23, %v11469_v48 }
 0x182   :  { %6892 = vmatpush2.bf16.msra.mxu0 %v9704_v8  ;;  %v9769_v8 = vld [vmem:[%s13965_s3 + $0x9b4] ss:$20 sps:$4 sm:$0xff]  }
 0x183   :  { %6943 = vmatprep.subr.bf16.mxu0 %v9712_v39 }
 0x184   :  { %6933 = vmatpush2.bf16.msra.mxu1 %v9707_v31  ;;  %v9764_v31 = vld [vmem:[%s13965_s3 + $0x730] ss:$20 sps:$4 sm:$0xff]  }
 0x185   :  { %6984 = vmatprep.subr.bf16.mxu1 %v9715_v6  ;;  %6894 = vmatmul.mubr.bf16.vlgmr.msra.gmra.mxu0 %v11940_v59  ;;  %v9767_v6 = vld [vmem:[%s13965_s3 + $0x9b0] ss:$20 sps:$4 sm:$0xff]  }
 0x186   :  { %6944 = vmatpush1.bf16.msra.mxu0 %v9710_v38  ;;  %6975 = vmatprep.mubr.bf16.mxu0 %v11947_v41  ;;  %v9775_v38 = vld [vmem:[%s13965_s3 + $0x98c] ss:$20 sps:$4 sm:$0xff]  }
 0x187   :  { %6935 = vmatmul.mubr.bf16.vlgmr.msra.gmra.mxu1 %v11942_v40  ;;  %6945 = vmatprep.subr.bf16.mxu0 %v9718_v62  ;;  %v9770_v62 = vld [vmem:[%s13965_s3 + $0x708] ss:$20 sps:$4 sm:$0xff]  }
 0x188   :  { %6985 = vmatpush1.bf16.msra.mxu1 %v9713_v10  ;;  %7016 = vmatprep.mubr.bf16.mxu1 %v11956_v43 }
 0x189   :  { %6986 = vmatprep.subr.bf16.mxu1 %v9721_v42  ;;  %v9776_v42 = vld [vmem:[%s13965_s3 + $0x6e0] ss:$20 sps:$4 sm:$0xff]  }
 0x18a   :  { %6946 = vmatpush1.bf16.msra.mxu0 %v9716_v24 }
 0x18b   :  { %6947 = vmatprep.subr.bf16.mxu0 %v9724_v49  ;;  %v9781_v49 = vld [vmem:[%s13965_s3 + $0x964] ss:$20 sps:$4 sm:$0xff]  }
 0x18c   :  { %6987 = vmatpush1.bf16.msra.mxu1 %v9719_v52  ;;  %v9773_v52 = vld [vmem:[%s13965_s3 + $0x988] ss:$20 sps:$4 sm:$0xff]  }
 0x18d   :  { %6988 = vmatprep.subr.bf16.mxu1 %v9727_v50  ;;  %v9779_v50 = vld [vmem:[%s13965_s3 + $0x960] ss:$20 sps:$4 sm:$0xff]  }
 0x18e   :  { %6948 = vmatpush1.bf16.msra.mxu0 %v9722_v53  ;;  %v9784_v53 = vld [vmem:[%s13965_s3 + $0x6bc] ss:$20 sps:$4 sm:$0xff]  }
 0x18f   :  { %6949 = vmatprep.subr.bf16.mxu0 %v9730_v19  ;;  %v9782_v19 = vld [vmem:[%s13965_s3 + $0x6b8] ss:$20 sps:$4 sm:$0xff]  }
 0x190   :  { %6989 = vmatpush1.bf16.msra.mxu1 %v9725_v44  ;;  %v9787_v44 = vld [vmem:[%s13965_s3 + $0x93c] ss:$20 sps:$4 sm:$0xff]  }
 0x191   :  { %6990 = vmatprep.subr.bf16.mxu1 %v9733_v57  ;;  %v409_v57 = vrot.slane %v12036_v23, %v11530_v28 }
 0x192   :  { %6950 = vmatpush1.bf16.msra.mxu0 %v9728_v58  ;;  %v9785_v58 = vld [vmem:[%s13965_s3 + $0x938] ss:$20 sps:$4 sm:$0xff]  }
 0x193   :  { %6951 = vmatprep.subr.bf16.mxu0 %v9736_v63  ;;  %v9793_v63 = vld [vmem:[%s13965_s3 + $0x914] ss:$20 sps:$4 sm:$0xff]  }
 0x194   :  { %6991 = vmatpush1.bf16.msra.mxu1 %v9731_v61  ;;  %v9790_v61 = vld [vmem:[%s13965_s3 + $0x694] ss:$20 sps:$4 sm:$0xff]  }
 0x195   :  { %6992 = vmatprep.subr.bf16.mxu1 %v9739_v1  ;;  %v405_v1 = vrot.slane %v12036_v23, %v11653_v5 }
 0x196   :  { %6952 = vmatpush1.bf16.msra.mxu0 %v9734_v2  ;;  %v9788_v2 = vld [vmem:[%s13965_s3 + $0x690] ss:$20 sps:$4 sm:$0xff]  }
 0x197   :  { %6953 = vmatprep.subr.bf16.mxu0 %v9742_v4  ;;  %v413_v4 = vrot.slane %v12036_v23, %v11656_v7 }
 0x198   :  { %6993 = vmatpush1.bf16.msra.mxu1 %v9737_v3 }
 0x199   :  { %6994 = vmatprep.subr.bf16.mxu1 %v9745_v11 }
 0x19a   :  { %6954 = vmatpush1.bf16.msra.mxu0 %v9740_v9 }
 0x19b   :  { %6955 = vmatprep.subr.bf16.mxu0 %v9748_v45  ;;  %v9791_v45 = vld [vmem:[%s13965_s3 + $0x910] ss:$20 sps:$4 sm:$0xff]  }
 0x19c   :  { %6995 = vmatpush1.bf16.msra.mxu1 %v9743_v12 }
 0x19d   :  { %6996 = vmatprep.subr.bf16.mxu1 %v9751_v15  ;;  %v9799_v15 = vld [vmem:[%s13965_s3 + $0x8ec] ss:$20 sps:$4 sm:$0xff]  }
 0x19e   :  { %6956 = vmatpush1.bf16.msra.mxu0 %v9746_v13  ;;  %v9796_v13 = vld [vmem:[%s13965_s3 + $0x66c] ss:$20 sps:$4 sm:$0xff]  }
 0x19f   :  { %6957 = vmatprep.subr.bf16.mxu0 %v9754_v20 }
 0x1a0   :  { %6997 = vmatpush1.bf16.msra.mxu1 %v9749_v18 }
 0x1a1   :  { %6998 = vmatprep.subr.bf16.mxu1 %v9757_v22 }
 0x1a2   :  { %6958 = vmatpush1.bf16.msra.mxu0 %v9752_v21  ;;  %v9794_v21 = vld [vmem:[%s13965_s3 + $0x668] ss:$20 sps:$4 sm:$0xff]  }
 0x1a3   :  { %6959 = vmatprep.subr.bf16.mxu0 %v9760_v25 }
 0x1a4   :  { %6999 = vmatpush1.bf16.msra.mxu1 %v9755_v32 }
 0x1a5   :  { %7000 = vmatprep.subr.bf16.mxu1 %v9763_v56  ;;  %v2412_v33 = vpop.f32.mrf.mxu0 }
 0x1a6   :  { %v2413_v34 = vadd.f32 %v2412_v33, %v401_v27  ;;  %6960 = vmatpush2.bf16.msra.mxu0 %v9758_v14  ;;  %v9797_v27 = vld [vmem:[%s13965_s3 + $0x8e8] ss:$20 sps:$4 sm:$0xff]   ;;  %v9800_v33 = vld [vmem:[%s13965_s3 + $0x640] ss:$20 sps:$4 sm:$0xff]  }
 0x1a7   :  { %v2414_v39 = vpop.f32.mrf.mxu0  ;;  %6961 = vmatprep.subr.bf16.mxu0 %v9766_v30 }
 0x1a8   :  { %7001 = vmatpush2.bf16.msra.mxu1 %v9761_v29  ;;  %v12068_v36 = vadd.f32 %v11893_v17, %v2413_v34  ;;  %v9778_v17 = vld [vmem:[%s13965_s3 + $0x6e4] ss:$20 sps:$4 sm:$0xff]   ;;  %v2415_v18 = vadd.f32 %v2414_v39, %v405_v1  ;;  %v9803_v39 = vld [vmem:[%s13965_s3 + $0x8c0] ss:$20 sps:$4 sm:$0xff]  }
 0x1a9   :  { %7002 = vmatprep.subr.bf16.mxu1 %v9769_v8  ;;  %v2416_v10 = vpop.f32.mrf.mxu0  ;;  %v9802_v29 = vld [vmem:[%s13965_s3 + $0x644] ss:$20 sps:$4 sm:$0xff]  }
 0x1aa   :  { %6962 = vmatpush2.bf16.msra.mxu0 %v9764_v31  ;;  %v2456_v30 = vadd.f32 %v11902_v0, %v2415_v18  ;;  %v9805_v34 = vld [vmem:[%s13965_s3 + $0x8c4] ss:$20 sps:$4 sm:$0xff]   ;;  %v2712_v0 = vmax.f32 %v11846_v46, 0.0  ;;  %v9814_v46 = vld [vmem:[%s13965_s3 + $0xaf4] ss:$20 sps:$4 sm:$0xff]  }
 0x1ab   :  { %v2417_v24 = vpop.f32.mrf.mxu0  ;;  %6963 = vmatprep.subr.bf16.mxu0 %v9772_v35  ;;  %v9808_v35 = vld [vmem:[%s13965_s3 + $0xb1c] ss:$20 sps:$4 sm:$0xff]   ;;  %v9833_v18 = vld [vmem:[%s13965_s3 + $0xcf8] ss:$20 sps:$4 sm:$0xff]  }
 0x1ac   :  { %7003 = vmatpush2.bf16.msra.mxu1 %v9767_v6  ;;  %v2710_v6 = vmax.f32 %v11784_v16, 0.0  ;;  %v2715_v10 = vmax.f32 %v2456_v30, 0.0  ;;  %v9806_v24 = vld [vmem:[%s13965_s3 + $0xb18] ss:$20 sps:$4 sm:$0xff]  }
 0x1ad   :  { %7004 = vmatprep.subr.bf16.mxu1 %v9775_v38  ;;  %v9811_v38 = vld [vmem:[%s13965_s3 + $0xd9c] ss:$20 sps:$4 sm:$0xff]   ;;  %v9809_v16 = vld [vmem:[%s13965_s3 + $0xd98] ss:$20 sps:$4 sm:$0xff]  }
 0x1ae   :  { %6964 = vmatpush2.bf16.msra.mxu0 %v9770_v62  ;;  %v9850_v30 = vld [vmem:[%s13965_s3 + $0xa04] ss:$20 sps:$4 sm:$0xff]  }
 0x1af   :  { %6965 = vmatprep.subr.bf16.mxu0 %v9778_v17  ;;  %v9817_v17 = vld [vmem:[%s13965_s3 + $0xd74] ss:$20 sps:$4 sm:$0xff]  }
 0x1b0   :  { %7005 = vmatpush2.bf16.msra.mxu1 %v9773_v52  ;;  %v12165_v52 = vpack.c.bf16 %v2710_v6, %v2710_v6  ;;  %v9859_v6 = vld [vmem:[%s13965_s3 + $0xedc] ss:$20 sps:$4 sm:$0xff]  }
 0x1b1   :  { %7006 = vmatprep.subr.bf16.mxu1 %v9781_v49  ;;  %v12172_v49 = vpack.c.bf16 %v2715_v10, %v2715_v10  ;;  %v9865_v10 = vld [vmem:[%s13965_s3 + $0xeb4] ss:$20 sps:$4 sm:$0xff]  }
 0x1b2   :  { %6966 = vmatpush2.bf16.msra.mxu0 %v9776_v42  ;;  %v12170_v42 = vpack.c.bf16 %v2712_v0, %v2712_v0  ;;  %v9857_v0 = vld [vmem:[%s13965_s3 + $0xed8] ss:$20 sps:$4 sm:$0xff]  }
 0x1b3   :  { %6967 = vmatprep.subr.bf16.mxu0 %v9784_v53  ;;  %v9815_v53 = vld [vmem:[%s13965_s3 + $0xd70] ss:$20 sps:$4 sm:$0xff]  }
 0x1b4   :  { %7007 = vmatpush2.bf16.msra.mxu1 %v9779_v50  ;;  %v9812_v50 = vld [vmem:[%s13965_s3 + $0xaf0] ss:$20 sps:$4 sm:$0xff]  }
 0x1b5   :  { %7008 = vmatprep.subr.bf16.mxu1 %v9787_v44  ;;  %v2535_v3 = vpop.f32.mrf.mxu0 }
 0x1b6   :  { %6968 = vmatpush2.bf16.msra.mxu0 %v9782_v19 }
 0x1b7   :  { %v2494_v9 = vpop.f32.mrf.mxu1  ;;  %v2537_v12 = vpop.f32.mrf.mxu0  ;;  %6969 = vmatprep.subr.bf16.mxu0 %v9790_v61 }
 0x1b8   :  { %v2495_v11 = vadd.f32 %v2494_v9, %v409_v57  ;;  %7009 = vmatpush2.bf16.msra.mxu1 %v9785_v58  ;;  %v9820_v57 = vld [vmem:[%s13965_s3 + $0xacc] ss:$20 sps:$4 sm:$0xff]   ;;  %v9829_v9 = vld [vmem:[%s13965_s3 + $0xd24] ss:$20 sps:$4 sm:$0xff]  }
 0x1b9   :  { %v2496_v20 = vpop.f32.mrf.mxu1  ;;  %7010 = vmatprep.subr.bf16.mxu1 %v9793_v63  ;;  %v2539_v25 = vpop.f32.mrf.mxu0  ;;  %v9823_v58 = vld [vmem:[%s13965_s3 + $0xd4c] ss:$20 sps:$4 sm:$0xff]   ;;  %v9818_v63 = vld [vmem:[%s13965_s3 + $0xac8] ss:$20 sps:$4 sm:$0xff]  }
 0x1ba   :  { %v12130_v22 = vadd.f32 %v2535_v3, %v2495_v11  ;;  %v2497_v32 = vadd.f32 %v2496_v20, %v413_v4  ;;  %6970 = vmatpush2.bf16.msra.mxu0 %v9788_v2  ;;  %v9821_v2 = vld [vmem:[%s13965_s3 + $0xd48] ss:$20 sps:$4 sm:$0xff]   ;;  %v9826_v3 = vld [vmem:[%s13965_s3 + $0xaa4] ss:$20 sps:$4 sm:$0xff]   ;;  %v9824_v11 = vld [vmem:[%s13965_s3 + $0xaa0] ss:$20 sps:$4 sm:$0xff]  }
 0x1bb   :  { %v2498_v56 = vpop.f32.mrf.mxu1  ;;  %v2540_v14 = vpop.f32.mrf.mxu0  ;;  %6971 = vmatprep.subr.bf16.mxu0 %v9796_v13  ;;  %v9830_v13 = vld [vmem:[%s13965_s3 + $0xa78] ss:$20 sps:$4 sm:$0xff]   ;;  %v9838_v20 = vld [vmem:[%s13965_s3 + $0xa54] ss:$20 sps:$4 sm:$0xff]   ;;  %v9839_v25 = vld [vmem:[%s13965_s3 + $0xcd0] ss:$20 sps:$4 sm:$0xff]  }
 0x1bc   :  { %7011 = vmatpush2.bf16.msra.mxu1 %v9791_v45  ;;  %v2538_v8 = vadd.f32 %v2537_v12, %v2497_v32  ;;  %v9827_v12 = vld [vmem:[%s13965_s3 + $0xd20] ss:$20 sps:$4 sm:$0xff]   ;;  %v9832_v45 = vld [vmem:[%s13965_s3 + $0xa7c] ss:$20 sps:$4 sm:$0xff]  }
 0x1bd   :  { %v2499_v31 = vpop.f32.mrf.mxu1  ;;  %7012 = vmatprep.subr.bf16.mxu1 %v9799_v15  ;;  %v9835_v15 = vld [vmem:[%s13965_s3 + $0xcfc] ss:$20 sps:$4 sm:$0xff]   ;;  %v9841_v32 = vld [vmem:[%s13965_s3 + $0xcd4] ss:$20 sps:$4 sm:$0xff]   ;;  %v9844_v56 = vld [vmem:[%s13965_s3 + $0xa2c] ss:$20 sps:$4 sm:$0xff]  }
 0x1be   :  { %6972 = vmatpush2.bf16.msra.mxu0 %v9794_v21  ;;  %v2717_v62 = vmax.f32 %v2538_v8, 0.0  ;;  %v9836_v21 = vld [vmem:[%s13965_s3 + $0xa50] ss:$20 sps:$4 sm:$0xff]   ;;  %v9842_v14 = vld [vmem:[%s13965_s3 + $0xa28] ss:$20 sps:$4 sm:$0xff]  }
 0x1bf   :  { %6973 = vmatprep.subr.bf16.mxu0 %v9802_v29  ;;  %v9845_v29 = vld [vmem:[%s13965_s3 + $0xca8] ss:$20 sps:$4 sm:$0xff]   ;;  %v9848_v8 = vld [vmem:[%s13965_s3 + $0xa00] ss:$20 sps:$4 sm:$0xff]   ;;  %v9853_v31 = vld [vmem:[%s13965_s3 + $0xc84] ss:$20 sps:$4 sm:$0xff]  }
 0x1c0   :  { %7013 = vmatpush2.bf16.msra.mxu1 %v9797_v27  ;;  %v12181_v44 = vpack.c.bf16 %v2717_v62, %v2717_v62  ;;  %v9847_v27 = vld [vmem:[%s13965_s3 + $0xcac] ss:$20 sps:$4 sm:$0xff]   ;;  %v9863_v62 = vld [vmem:[%s13965_s3 + $0xeb0] ss:$20 sps:$4 sm:$0xff]  }
 0x1c1   :  { %7014 = vmatprep.subr.bf16.mxu1 %v9805_v34  ;;  %v9856_v34 = vld [vmem:[%s13965_s3 + $0xc5c] ss:$20 sps:$4 sm:$0xff]  }
 0x1c2   :  { %6974 = vmatpush2.bf16.msra.mxu0 %v9800_v33  ;;  %v9851_v33 = vld [vmem:[%s13965_s3 + $0xc80] ss:$20 sps:$4 sm:$0xff]  }
 0x1c3   :  { %7025 = vmatprep.subr.bf16.mxu0 %v9808_v35  ;;  %v9862_v35 = vld [vmem:[%s13965_s3 + $0xc34] ss:$20 sps:$4 sm:$0xff]  }
 0x1c4   :  { %7015 = vmatpush2.bf16.msra.mxu1 %v9803_v39  ;;  %v9854_v39 = vld [vmem:[%s13965_s3 + $0xc58] ss:$20 sps:$4 sm:$0xff]  }
 0x1c5   :  { %7066 = vmatprep.subr.bf16.mxu1 %v9811_v38  ;;  %6976 = vmatmul.mubr.bf16.vlgmr.msra.gmra.mxu0 %v12165_v52  ;;  %v9860_v38 = vld [vmem:[%s13965_s3 + $0xc30] ss:$20 sps:$4 sm:$0xff]  }
 0x1c6   :  { %7026 = vmatpush1.bf16.msra.mxu0 %v9806_v24  ;;  %7057 = vmatprep.mubr.bf16.mxu0 %v12172_v49  ;;  %v9868_v24 = vld [vmem:[%s13965_s3 + $0xc0c] ss:$20 sps:$4 sm:$0xff]  }
 0x1c7   :  { %v12183_v19 = vpop.f32.mrf.mxu1  ;;  %7017 = vmatmul.mubr.bf16.vlgmr.msra.gmra.mxu1 %v12170_v42  ;;  %7027 = vmatprep.subr.bf16.mxu0 %v9814_v46  ;;  %v9871_v46 = vld [vmem:[%s13965_s3 + $0xe8c] ss:$20 sps:$4 sm:$0xff]  }
 0x1c8   :  { %7067 = vmatpush1.bf16.msra.mxu1 %v9809_v16  ;;  %7098 = vmatprep.mubr.bf16.mxu1 %v12181_v44  ;;  %v9866_v16 = vld [vmem:[%s13965_s3 + $0xc08] ss:$20 sps:$4 sm:$0xff]  }
 0x1c9   :  { %v12194_v61 = vpop.f32.mrf.mxu1  ;;  %7068 = vmatprep.subr.bf16.mxu1 %v9817_v17  ;;  %v9869_v17 = vld [vmem:[%s13965_s3 + $0xe88] ss:$20 sps:$4 sm:$0xff]  }
 0x1ca   :  { %7028 = vmatpush1.bf16.msra.mxu0 %v9812_v50  ;;  %v9874_v50 = vld [vmem:[%s13965_s3 + $0xbe4] ss:$20 sps:$4 sm:$0xff]  }
 0x1cb   :  { %v2621_v1 = vpop.f32.mrf.mxu1  ;;  %7029 = vmatprep.subr.bf16.mxu0 %v9820_v57  ;;  %v9872_v57 = vld [vmem:[%s13965_s3 + $0xbe0] ss:$20 sps:$4 sm:$0xff]  }
 0x1cc   :  { %7069 = vmatpush1.bf16.msra.mxu1 %v9815_v53  ;;  %v9877_v53 = vld [vmem:[%s13965_s3 + $0xe64] ss:$20 sps:$4 sm:$0xff]  }
 0x1cd   :  { %v2622_v4 = vpop.f32.mrf.mxu1  ;;  %7070 = vmatprep.subr.bf16.mxu1 %v9823_v58 }
 0x1ce   :  { %7030 = vmatpush1.bf16.msra.mxu0 %v9818_v63 }
 0x1cf   :  { %7031 = vmatprep.subr.bf16.mxu0 %v9826_v3 }
 0x1d0   :  { %7071 = vmatpush1.bf16.msra.mxu1 %v9821_v2 }
 0x1d1   :  { %7072 = vmatprep.subr.bf16.mxu1 %v9829_v9 }
 0x1d2   :  { %7032 = vmatpush1.bf16.msra.mxu0 %v9824_v11 }
 0x1d3   :  { %7033 = vmatprep.subr.bf16.mxu0 %v9832_v45 }
 0x1d4   :  { %7073 = vmatpush1.bf16.msra.mxu1 %v9827_v12 }
 0x1d5   :  { %7074 = vmatprep.subr.bf16.mxu1 %v9835_v15 }
 0x1d6   :  { %7034 = vmatpush1.bf16.msra.mxu0 %v9830_v13 }
 0x1d7   :  { %7035 = vmatprep.subr.bf16.mxu0 %v9838_v20 }
 0x1d8   :  { %7075 = vmatpush1.bf16.msra.mxu1 %v9833_v18 }
 0x1d9   :  { %7076 = vmatprep.subr.bf16.mxu1 %v9841_v32 }
 0x1da   :  { %7036 = vmatpush1.bf16.msra.mxu0 %v9836_v21 }
 0x1db   :  { %7037 = vmatprep.subr.bf16.mxu0 %v9844_v56 }
 0x1dc   :  { %7077 = vmatpush1.bf16.msra.mxu1 %v9839_v25 }
 0x1dd   :  { %7078 = vmatprep.subr.bf16.mxu1 %v9847_v27 }
 0x1de   :  { %7038 = vmatpush1.bf16.msra.mxu0 %v9842_v14 }
 0x1df   :  { %7039 = vmatprep.subr.bf16.mxu0 %v9850_v30 }
 0x1e0   :  { %7079 = vmatpush1.bf16.msra.mxu1 %v9845_v29 }
 0x1e1   :  { %7080 = vmatprep.subr.bf16.mxu1 %v9853_v31 }
 0x1e2   :  { %7040 = vmatpush1.bf16.msra.mxu0 %v9848_v8 }
 0x1e3   :  { %7041 = vmatprep.subr.bf16.mxu0 %v9856_v34 }
 0x1e4   :  { %7081 = vmatpush1.bf16.msra.mxu1 %v9851_v33 }
 0x1e5   :  { %7082 = vmatprep.subr.bf16.mxu1 %v9859_v6 }
 0x1e6   :  { %7042 = vmatpush2.bf16.msra.mxu0 %v9854_v39 }
 0x1e7   :  { %7043 = vmatprep.subr.bf16.mxu0 %v9862_v35 }
 0x1e8   :  { %7083 = vmatpush2.bf16.msra.mxu1 %v9857_v0 }
 0x1e9   :  { %7084 = vmatprep.subr.bf16.mxu1 %v9865_v10 }
 0x1ea   :  { %7044 = vmatpush2.bf16.msra.mxu0 %v9860_v38 }
 0x1eb   :  { %7045 = vmatprep.subr.bf16.mxu0 %v9868_v24 }
 0x1ec   :  { %7085 = vmatpush2.bf16.msra.mxu1 %v9863_v62 }
 0x1ed   :  { %7086 = vmatprep.subr.bf16.mxu1 %v9871_v46 }
 0x1ee   :  { %7046 = vmatpush2.bf16.msra.mxu0 %v9866_v16 }
 0x1ef   :  { %14 = vsyncpa [#allocation3], 0  ;;  %7047 = vmatprep.subr.bf16.mxu0 %v9874_v50  ;;  %v9875_v58 = vld [vmem:[%s13965_s3 + $0xe60] ss:$20 sps:$4 sm:$0xff]   ;;  %v9880_v63 = vld [vmem:[%s13965_s3 + $0xbbc] ss:$20 sps:$4 sm:$0xff]   ;;  %v417_v2 = vrot.slane %v12036_v23, %v11747_v60  ;;  %v421_v45 = vrot.slane %v12036_v23, %v388_v54  ;;  %v429_v46 = vrot.slane %v12036_v23, %v396_v55 }
 0x1f0   :  { %7087 = vmatpush2.bf16.msra.mxu1 %v9869_v17  ;;  %v9883_v1 = vld [vmem:[%s13965_s3 + $0xe3c] ss:$20 sps:$4 sm:$0xff]   ;;  %v9878_v3 = vld [vmem:[%s13965_s3 + $0xbb8] ss:$20 sps:$4 sm:$0xff]   ;;  %v9886_v9 = vld [vmem:[%s13965_s3 + $0xb94] ss:$20 sps:$4 sm:$0xff]  }
 0x1f1   :  { %7088 = vmatprep.subr.bf16.mxu1 %v9877_v53  ;;  %v9881_v4 = vld [vmem:[%s13965_s3 + $0xe38] ss:$20 sps:$4 sm:$0xff]   ;;  %v9889_v11 = vld [vmem:[%s13965_s3 + $0xe14] ss:$20 sps:$4 sm:$0xff]   ;;  %v9884_v15 = vld [vmem:[%s13965_s3 + $0xb90] ss:$20 sps:$4 sm:$0xff]  }
 0x1f2   :  { %7048 = vmatpush2.bf16.msra.mxu0 %v9872_v57  ;;  %v9887_v20 = vld [vmem:[%s13965_s3 + $0xe10] ss:$20 sps:$4 sm:$0xff]   ;;  %v9892_v21 = vld [vmem:[%s13965_s3 + $0xb6c] ss:$20 sps:$4 sm:$0xff]   ;;  %v9890_v14 = vld [vmem:[%s13965_s3 + $0xb68] ss:$20 sps:$4 sm:$0xff]  }
 0x1f3   :  { %7049 = vmatprep.subr.bf16.mxu0 %v9880_v63  ;;  %v9895_v54 = vld [vmem:[%s13965_s3 + $0xdec] ss:$20 sps:$4 sm:$0xff]   ;;  %v9898_v29 = vld [vmem:[%s13965_s3 + $0xb44] ss:$20 sps:$4 sm:$0xff]   ;;  %v2714_v33 = vmax.f32 %v12068_v36, 0.0  ;;  %v2716_v6 = vmax.f32 %v12130_v22, 0.0 }
 0x1f4   :  { %7089 = vmatpush2.bf16.msra.mxu1 %v9875_v58  ;;  %v9901_v30 = vld [vmem:[%s13965_s3 + $0xdc4] ss:$20 sps:$4 sm:$0xff]   ;;  %v9896_v31 = vld [vmem:[%s13965_s3 + $0xb40] ss:$20 sps:$4 sm:$0xff]   ;;  %v9904_v39 = vld [vmem:[%s13965_s3 + $0x101c] ss:$20 sps:$4 sm:$0xff]  }
 0x1f5   :  { %7090 = vmatprep.subr.bf16.mxu1 %v9883_v1  ;;  %v2576_v12 = vpop.f32.mrf.mxu0  ;;  %v9899_v34 = vld [vmem:[%s13965_s3 + $0xdc0] ss:$20 sps:$4 sm:$0xff]   ;;  %v9902_v36 = vld [vmem:[%s13965_s3 + $0x1018] ss:$20 sps:$4 sm:$0xff]   ;;  %v12378_v35 = vpack.c.bf16 %v2714_v33, %v2714_v33  ;;  %v12383_v22 = vpack.c.bf16 %v2716_v6, %v2716_v6  ;;  %v9908_v50 = vld [vmem:[%s13965_s3 + $0xff0] ss:$20 sps:$4 sm:$0xff]  }
 0x1f6   :  { %v2577_v13 = vadd.f32 %v2576_v12, %v417_v2  ;;  %7050 = vmatpush2.bf16.msra.mxu0 %v9878_v3  ;;  %v9905_v38 = vld [vmem:[%s13965_s3 + $0x1298] ss:$20 sps:$4 sm:$0xff]   ;;  %v9910_v10 = vld [vmem:[%s13965_s3 + $0xff4] ss:$20 sps:$4 sm:$0xff]   ;;  %v9911_v57 = vld [vmem:[%s13965_s3 + $0x1270] ss:$20 sps:$4 sm:$0xff]  }
 0x1f7   :  { %v2578_v18 = vpop.f32.mrf.mxu0  ;;  %7051 = vmatprep.subr.bf16.mxu0 %v9886_v9  ;;  %v9913_v62 = vld [vmem:[%s13965_s3 + $0x1274] ss:$20 sps:$4 sm:$0xff]   ;;  %v9916_v55 = vld [vmem:[%s13965_s3 + $0xfcc] ss:$20 sps:$4 sm:$0xff]   ;;  %v9922_v12 = vld [vmem:[%s13965_s3 + $0xfa4] ss:$20 sps:$4 sm:$0xff]  }
 0x1f8   :  { %7091 = vmatpush2.bf16.msra.mxu1 %v9881_v4  ;;  %v12343_v32 = vadd.f32 %v12183_v19, %v2577_v13  ;;  %v2579_v25 = vadd.f32 %v2578_v18, %v421_v45  ;;  %v9893_v19 = vld [vmem:[%s13965_s3 + $0xde8] ss:$20 sps:$4 sm:$0xff]   ;;  %v9919_v58 = vld [vmem:[%s13965_s3 + $0x124c] ss:$20 sps:$4 sm:$0xff]   ;;  %v9925_v13 = vld [vmem:[%s13965_s3 + $0x1224] ss:$20 sps:$4 sm:$0xff]  }
 0x1f9   :  { %7092 = vmatprep.subr.bf16.mxu1 %v9889_v11  ;;  %v2580_v56 = vpop.f32.mrf.mxu0  ;;  %v9914_v3 = vld [vmem:[%s13965_s3 + $0xfc8] ss:$20 sps:$4 sm:$0xff]   ;;  %v9920_v18 = vld [vmem:[%s13965_s3 + $0xfa0] ss:$20 sps:$4 sm:$0xff]   ;;  %v9949_v6 = vld [vmem:[%s13965_s3 + $0x1184] ss:$20 sps:$4 sm:$0xff]  }
 0x1fa   :  { %7052 = vmatpush2.bf16.msra.mxu0 %v9884_v15  ;;  %v2620_v8 = vadd.f32 %v12194_v61, %v2579_v25  ;;  %v9907_v61 = vld [vmem:[%s13965_s3 + $0x129c] ss:$20 sps:$4 sm:$0xff]   ;;  %v9926_v56 = vld [vmem:[%s13965_s3 + $0xf78] ss:$20 sps:$4 sm:$0xff]   ;;  %vm8142_vm1 = vcmask 1040384   ;;  %vm10575_vm2 = vmmov 0  }
 0x1fb   :  { %v2581_v27 = vpop.f32.mrf.mxu0  ;;  %7053 = vmatprep.subr.bf16.mxu0 %v9892_v21  ;;  %v9917_v11 = vld [vmem:[%s13965_s3 + $0x1248] ss:$20 sps:$4 sm:$0xff]   ;;  %v9923_v21 = vld [vmem:[%s13965_s3 + $0x1220] ss:$20 sps:$4 sm:$0xff]   ;;  %vm8138_vm3 = vcmask 408576   ;;  %vm8291_vm4 = vcmask 261120  }
 0x1fc   :  { %7093 = vmatpush2.bf16.msra.mxu1 %v9887_v20  ;;  %v2719_v0 = vmax.f32 %v2620_v8, 0.0  ;;  %v9931_v25 = vld [vmem:[%s13965_s3 + $0x11fc] ss:$20 sps:$4 sm:$0xff]   ;;  %v9934_v27 = vld [vmem:[%s13965_s3 + $0xf54] ss:$20 sps:$4 sm:$0xff]   ;;  %s10576_s23 = smov [#allocation2]  }
 0x1fd   :  { %7094 = vmatprep.subr.bf16.mxu1 %v9895_v54  ;;  %v9928_v54 = vld [vmem:[%s13965_s3 + $0xf7c] ss:$20 sps:$4 sm:$0xff]   ;;  %v9940_v8 = vld [vmem:[%s13965_s3 + $0xf2c] ss:$20 sps:$4 sm:$0xff]   ;;  %s8343_s24 = sshll.u32 %s10576_s23, 4  ;;  %vm8335_vm5 = vcmask 76800   ;;  %s8344_s24 = int_to_ptr.vmem [resolvable:$true] %s8343_s24 }
 0x1fe   :  { %7054 = vmatpush2.bf16.msra.mxu0 %v9890_v14  ;;  %v12391_v24 = vpack.c.bf16 %v2719_v0, %v2719_v0  ;;  %v9929_v14 = vld [vmem:[%s13965_s3 + $0x11f8] ss:$20 sps:$4 sm:$0xff]   ;;  %v9938_v33 = vld [vmem:[%s13965_s3 + $0xf28] ss:$20 sps:$4 sm:$0xff]   ;;  %v9947_v0 = vld [vmem:[%s13965_s3 + $0x1180] ss:$20 sps:$4 sm:$0xff]   ;;  %p10556_p1 = scmp.lt.s32.totalorder %s8344_s24, %s8344_s24 }
 0x1ff   :  { %7055 = vmatprep.subr.bf16.mxu0 %v9898_v29  ;;  %v9932_v29 = vld [vmem:[%s13965_s3 + $0xf50] ss:$20 sps:$4 sm:$0xff]   ;;  %v9988_v37 = vld [vmem:[%s13965_s3 + $0x106c] ss:$20 sps:$4 sm:$0xff]  }
 0x200   :  { %7095 = vmatpush2.bf16.msra.mxu1 %v9893_v19  ;;  %v9937_v19 = vld [vmem:[%s13965_s3 + $0x11d4] ss:$20 sps:$4 sm:$0xff]  }
 0x201   :  { %7096 = vmatprep.subr.bf16.mxu1 %v9901_v30  ;;  %v9935_v30 = vld [vmem:[%s13965_s3 + $0x11d0] ss:$20 sps:$4 sm:$0xff]  }
 0x202   :  { %7056 = vmatpush2.bf16.msra.mxu0 %v9896_v31  ;;  %v9943_v31 = vld [vmem:[%s13965_s3 + $0x11ac] ss:$20 sps:$4 sm:$0xff]  }
 0x203   :  { %7107 = vmatprep.subr.bf16.mxu0 %v9904_v39  ;;  %v9946_v39 = vld [vmem:[%s13965_s3 + $0xf04] ss:$20 sps:$4 sm:$0xff]  }
 0x204   :  { %7097 = vmatpush2.bf16.msra.mxu1 %v9899_v34  ;;  %v9941_v34 = vld [vmem:[%s13965_s3 + $0x11a8] ss:$20 sps:$4 sm:$0xff]  }
 0x205   :  { %7148 = vmatprep.subr.bf16.mxu1 %v9907_v61  ;;  %v12393_v16 = vpop.f32.mrf.mxu0  ;;  %7058 = vmatmul.mubr.bf16.vlgmr.msra.gmra.mxu0 %v12378_v35  ;;  %v9944_v61 = vld [vmem:[%s13965_s3 + $0xf00] ss:$20 sps:$4 sm:$0xff]  }
 0x206   :  { %7108 = vmatpush1.bf16.msra.mxu0 %v9902_v36  ;;  %7139 = vmatprep.mubr.bf16.mxu0 %v12391_v24  ;;  %v9952_v36 = vld [vmem:[%s13965_s3 + $0x115c] ss:$20 sps:$4 sm:$0xff]  }
 0x207   :  { %v12399_v17 = vpop.f32.mrf.mxu1  ;;  %7099 = vmatmul.mubr.bf16.vlgmr.msra.gmra.mxu1 %v12383_v22  ;;  %v2701_v53 = vpop.f32.mrf.mxu0  ;;  %7109 = vmatprep.subr.bf16.mxu0 %v9910_v10  ;;  %v9950_v10 = vld [vmem:[%s13965_s3 + $0x1158] ss:$20 sps:$4 sm:$0xff]  }
 0x208   :  { %7149 = vmatpush1.bf16.msra.mxu1 %v9905_v38  ;;  %v9955_v38 = vld [vmem:[%s13965_s3 + $0x13dc] ss:$20 sps:$4 sm:$0xff]  }
 0x209   :  { %v2660_v23 = vpop.f32.mrf.mxu1  ;;  %7150 = vmatprep.subr.bf16.mxu1 %v9913_v62  ;;  %v2703_v1 = vpop.f32.mrf.mxu0  ;;  %v9953_v62 = vld [vmem:[%s13965_s3 + $0x13d8] ss:$20 sps:$4 sm:$0xff]  }
 0x20a   :  { %v2661_v63 = vadd.f32 %v2660_v23, %v429_v46  ;;  %7110 = vmatpush1.bf16.msra.mxu0 %v9908_v50  ;;  %v9958_v46 = vld [vmem:[%s13965_s3 + $0x1134] ss:$20 sps:$4 sm:$0xff]   ;;  %v9967_v23 = vld [vmem:[%s13965_s3 + $0x138c] ss:$20 sps:$4 sm:$0xff]   ;;  %v9970_v1 = vld [vmem:[%s13965_s3 + $0x10e4] ss:$20 sps:$4 sm:$0xff]  }
 0x20b   :  { %v2662_v2 = vpop.f32.mrf.mxu1  ;;  %v2704_v9 = vpop.f32.mrf.mxu0  ;;  %7111 = vmatprep.subr.bf16.mxu0 %v9916_v55  ;;  %v9961_v50 = vld [vmem:[%s13965_s3 + $0x13b4] ss:$20 sps:$4 sm:$0xff]   ;;  %v9964_v55 = vld [vmem:[%s13965_s3 + $0x110c] ss:$20 sps:$4 sm:$0xff]  }
 0x20c   :  { %v2702_v4 = vadd.f32 %v2701_v53, %v2661_v63  ;;  %7151 = vmatpush1.bf16.msra.mxu1 %v9911_v57  ;;  %v9956_v53 = vld [vmem:[%s13965_s3 + $0x1130] ss:$20 sps:$4 sm:$0xff]   ;;  %v9965_v63 = vld [vmem:[%s13965_s3 + $0x1388] ss:$20 sps:$4 sm:$0xff]  }
 0x20d   :  { %v2663_v45 = vpop.f32.mrf.mxu1  ;;  %7152 = vmatprep.subr.bf16.mxu1 %v9919_v58  ;;  %v9959_v57 = vld [vmem:[%s13965_s3 + $0x13b0] ss:$20 sps:$4 sm:$0xff]   ;;  %v9962_v58 = vld [vmem:[%s13965_s3 + $0x1108] ss:$20 sps:$4 sm:$0xff]  }
 0x20e   :  { %v2721_v15 = vmax.f32 %v2702_v4, 0.0  ;;  %7112 = vmatpush1.bf16.msra.mxu0 %v9914_v3  ;;  %v9973_v2 = vld [vmem:[%s13965_s3 + $0x1364] ss:$20 sps:$4 sm:$0xff]   ;;  %v9968_v3 = vld [vmem:[%s13965_s3 + $0x10e0] ss:$20 sps:$4 sm:$0xff]  }
 0x20f   :  { %7113 = vmatprep.subr.bf16.mxu0 %v9922_v12  ;;  %v9971_v4 = vld [vmem:[%s13965_s3 + $0x1360] ss:$20 sps:$4 sm:$0xff]   ;;  %v9976_v9 = vld [vmem:[%s13965_s3 + $0x10bc] ss:$20 sps:$4 sm:$0xff]   ;;  %v9974_v12 = vld [vmem:[%s13965_s3 + $0x10b8] ss:$20 sps:$4 sm:$0xff]  }
 0x210   :  { %v12430_v20 = vpack.c.bf16 %v2721_v15, %v2721_v15  ;;  %7153 = vmatpush1.bf16.msra.mxu1 %v9917_v11  ;;  %v9979_v11 = vld [vmem:[%s13965_s3 + $0x133c] ss:$20 sps:$4 sm:$0xff]   ;;  %v9977_v45 = vld [vmem:[%s13965_s3 + $0x1338] ss:$20 sps:$4 sm:$0xff]  }
 0x211   :  { %7154 = vmatprep.subr.bf16.mxu1 %v9925_v13  ;;  %v9982_v13 = vld [vmem:[%s13965_s3 + $0x1094] ss:$20 sps:$4 sm:$0xff]  }
 0x212   :  { %7180 = vmatprep.mubr.bf16.mxu1 %v12430_v20  ;;  %7114 = vmatpush1.bf16.msra.mxu0 %v9920_v18  ;;  %v10549_v15 = vld [vmem:[%s13964_s2 + $0x8] sm:$0xff] }
 0x213   :  { %7115 = vmatprep.subr.bf16.mxu0 %v9928_v54  ;;  %v425_v18 = vrot.slane %v10549_v15, %v392_v26  ;;  %v9980_v54 = vld [vmem:[%s13965_s3 + $0x1090] ss:$20 sps:$4 sm:$0xff]   ;;  %v10021_v15 = vld [vmem:[%s13965_s3 + $0x32c] ss:$20 sps:$4 sm:$0xff]  }
 0x214   :  { %7155 = vmatpush1.bf16.msra.mxu1 %v9923_v21  ;;  %v9985_v21 = vld [vmem:[%s13965_s3 + $0x1314] ss:$20 sps:$4 sm:$0xff]  }
 0x215   :  { %7156 = vmatprep.subr.bf16.mxu1 %v9931_v25  ;;  %v9983_v25 = vld [vmem:[%s13965_s3 + $0x1310] ss:$20 sps:$4 sm:$0xff]   ;;  %v2659_v26 = vadd.f32 %v12399_v17, %v425_v18  ;;  %v10016_v18 = vld [vmem:[%s13965_s3 + $0xa8] ss:$20 sps:$4 sm:$0xff]  }
 0x216   :  { %7116 = vmatpush1.bf16.msra.mxu0 %v9926_v56  ;;  %v9991_v56 = vld [vmem:[%s13965_s3 + $0x12ec] ss:$20 sps:$4 sm:$0xff]   ;;  %v9994_v17 = vld [vmem:[%s13965_s3 + $0x1044] ss:$20 sps:$4 sm:$0xff]  }
 0x217   :  { %7117 = vmatprep.subr.bf16.mxu0 %v9934_v27  ;;  %v9989_v27 = vld [vmem:[%s13965_s3 + $0x12e8] ss:$20 sps:$4 sm:$0xff]  }
 0x218   :  { %7157 = vmatpush1.bf16.msra.mxu1 %v9929_v14  ;;  %v9986_v14 = vld [vmem:[%s13965_s3 + $0x1068] ss:$20 sps:$4 sm:$0xff]  }
 0x219   :  { %7158 = vmatprep.subr.bf16.mxu1 %v9937_v19  ;;  %v2700_v19 = vadd.f32 %v12393_v16, %v2659_v26  ;;  %v3506_v16 = vld [vmem:[%s13966_s4] sm:$0x1f] }
 0x21a   :  { %7118 = vmatpush1.bf16.msra.mxu0 %v9932_v29  ;;  %v9997_v29 = vld [vmem:[%s13965_s3 + $0x12c4] ss:$20 sps:$4 sm:$0xff]   ;;  %v10025_v26 = vld [vmem:[%s13965_s3 + $0x300] ss:$20 sps:$4 sm:$0xff]  }
 0x21b   :  { %7119 = vmatprep.subr.bf16.mxu0 %v9940_v8  ;;  %v9995_v8 = vld [vmem:[%s13965_s3 + $0x12c0] ss:$20 sps:$4 sm:$0xff]  }
 0x21c   :  { %7159 = vmatpush1.bf16.msra.mxu1 %v9935_v30  ;;  %v9992_v30 = vld [vmem:[%s13965_s3 + $0x1040] ss:$20 sps:$4 sm:$0xff]  }
 0x21d   :  { %7160 = vmatprep.subr.bf16.mxu1 %v9943_v31  ;;  %v2718_v31 = vmax.f32 %v12343_v32, 0.0  ;;  %v9998_v32 = vld [vmem:[%s13965_s3 + $0x120] ss:$20 sps:$4 sm:$0xff]  }
 0x21e   :  { %7120 = vmatpush1.bf16.msra.mxu0 %v9938_v33  ;;  %v10000_v33 = vld [vmem:[%s13965_s3 + $0x124] ss:$20 sps:$4 sm:$0xff]  }
 0x21f   :  { %7121 = vmatprep.subr.bf16.mxu0 %v9946_v39  ;;  %v10003_v39 = vld [vmem:[%s13965_s3 + $0x3a4] ss:$20 sps:$4 sm:$0xff]  }
 0x220   :  { %7161 = vmatpush1.bf16.msra.mxu1 %v9941_v34  ;;  %v2720_v34 = vmax.f32 %v2700_v19, 0.0  ;;  %v10036_v19 = vld [vmem:[%s13965_s3 + $0x34] ss:$20 sps:$4 sm:$0xff]  }
 0x221   :  { %7162 = vmatprep.subr.bf16.mxu1 %v9949_v6  ;;  %v3511_v6 = vrot.slane %v3506_v16, %v11469_v48  ;;  %v10006_v48 = vld [vmem:[%s13965_s3 + $0xfc] ss:$20 sps:$4 sm:$0xff]  }
 0x222   :  { %7122 = vmatpush1.bf16.msra.mxu0 %v9944_v61  ;;  %v12601_v61 = vpack.c.bf16 %v2718_v31, %v2718_v31  ;;  %v10042_v31 = vld [vmem:[%s13965_s3 + $0xc] ss:$20 sps:$4 sm:$0xff]  }
 0x223   :  { %7123 = vmatprep.subr.bf16.mxu0 %v9952_v36  ;;  %v12606_v36 = vpack.c.bf16 %v2720_v34, %v2720_v34  ;;  %v10043_v34 = vld [vmem:[%s13965_s3 + $0x288] ss:$20 sps:$4 sm:$0xff]  }
 0x224   :  { %7163 = vmatpush1.bf16.msra.mxu1 %v9947_v0  ;;  %v10001_v0 = vld [vmem:[%s13965_s3 + $0x3a0] ss:$20 sps:$4 sm:$0xff]  }
 0x225   :  { %7164 = vmatprep.subr.bf16.mxu1 %v9955_v38  ;;  %v3515_v38 = vrot.slane %v3506_v16, %v11653_v5  ;;  %v10004_v5 = vld [vmem:[%s13965_s3 + $0xf8] ss:$20 sps:$4 sm:$0xff]  }
 0x226   :  { %7124 = vmatpush2.bf16.msra.mxu0 %v9950_v10  ;;  %v10045_v16 = vld [vmem:[%s13965_s3 + $0x28c] ss:$20 sps:$4 sm:$0xff]  }
 0x227   :  { %7125 = vmatprep.subr.bf16.mxu0 %v9958_v46 }
 0x228   :  { %7165 = vmatpush2.bf16.msra.mxu1 %v9953_v62  ;;  %v10009_v62 = vld [vmem:[%s13965_s3 + $0x37c] ss:$20 sps:$4 sm:$0xff]  }
 0x229   :  { %7166 = vmatprep.subr.bf16.mxu1 %v9961_v50 }
 0x22a   :  { %7126 = vmatpush2.bf16.msra.mxu0 %v9956_v53 }
 0x22b   :  { %7127 = vmatprep.subr.bf16.mxu0 %v9964_v55  ;;  %v10012_v55 = vld [vmem:[%s13965_s3 + $0xd4] ss:$20 sps:$4 sm:$0xff]  }
 0x22c   :  { %7167 = vmatpush2.bf16.msra.mxu1 %v9959_v57  ;;  %v10007_v57 = vld [vmem:[%s13965_s3 + $0x378] ss:$20 sps:$4 sm:$0xff]  }
 0x22d   :  { %7168 = vmatprep.subr.bf16.mxu1 %v9967_v23 }
 0x22e   :  { %7128 = vmatpush2.bf16.msra.mxu0 %v9962_v58 }
 0x22f   :  { %7129 = vmatprep.subr.bf16.mxu0 %v9970_v1  ;;  %v10015_v1 = vld [vmem:[%s13965_s3 + $0x354] ss:$20 sps:$4 sm:$0xff]  }
 0x230   :  { %7169 = vmatpush2.bf16.msra.mxu1 %v9965_v63 }
 0x231   :  { %7170 = vmatprep.subr.bf16.mxu1 %v9973_v2 }
 0x232   :  { %7130 = vmatpush2.bf16.msra.mxu0 %v9968_v3 }
 0x233   :  { %7131 = vmatprep.subr.bf16.mxu0 %v9976_v9  ;;  %v10010_v9 = vld [vmem:[%s13965_s3 + $0xd0] ss:$20 sps:$4 sm:$0xff]  }
 0x234   :  { %7171 = vmatpush2.bf16.msra.mxu1 %v9971_v4 }
 0x235   :  { %7172 = vmatprep.subr.bf16.mxu1 %v9979_v11 }
 0x236   :  { %7132 = vmatpush2.bf16.msra.mxu0 %v9974_v12  ;;  %v10013_v12 = vld [vmem:[%s13965_s3 + $0x350] ss:$20 sps:$4 sm:$0xff]  }
 0x237   :  { %7133 = vmatprep.subr.bf16.mxu0 %v9982_v13 }
 0x238   :  { %7173 = vmatpush2.bf16.msra.mxu1 %v9977_v45  ;;  %v10018_v45 = vld [vmem:[%s13965_s3 + $0xac] ss:$20 sps:$4 sm:$0xff]  }
 0x239   :  { %7174 = vmatprep.subr.bf16.mxu1 %v9985_v21  ;;  %v10019_v21 = vld [vmem:[%s13965_s3 + $0x328] ss:$20 sps:$4 sm:$0xff]  }
 0x23a   :  { %7134 = vmatpush2.bf16.msra.mxu0 %v9980_v54  ;;  %v10024_v54 = vld [vmem:[%s13965_s3 + $0x84] ss:$20 sps:$4 sm:$0xff]  }
 0x23b   :  { %7135 = vmatprep.subr.bf16.mxu0 %v9988_v37  ;;  %v10022_v37 = vld [vmem:[%s13965_s3 + $0x80] ss:$20 sps:$4 sm:$0xff]  }
 0x23c   :  { %7175 = vmatpush2.bf16.msra.mxu1 %v9983_v25  ;;  %v10027_v25 = vld [vmem:[%s13965_s3 + $0x304] ss:$20 sps:$4 sm:$0xff]  }
 0x23d   :  { %7176 = vmatprep.subr.bf16.mxu1 %v9991_v56  ;;  %v10030_v56 = vld [vmem:[%s13965_s3 + $0x5c] ss:$20 sps:$4 sm:$0xff]  }
 0x23e   :  { %7136 = vmatpush2.bf16.msra.mxu0 %v9986_v14  ;;  %v10033_v14 = vld [vmem:[%s13965_s3 + $0x2dc] ss:$20 sps:$4 sm:$0xff]  }
 0x23f   :  { %7137 = vmatprep.subr.bf16.mxu0 %v9994_v17  ;;  %v10031_v17 = vld [vmem:[%s13965_s3 + $0x2d8] ss:$20 sps:$4 sm:$0xff]  }
 0x240   :  { %7177 = vmatpush2.bf16.msra.mxu1 %v9989_v27  ;;  %v10028_v27 = vld [vmem:[%s13965_s3 + $0x58] ss:$20 sps:$4 sm:$0xff]  }
 0x241   :  { %7178 = vmatprep.subr.bf16.mxu1 %v9997_v29  ;;  %v10039_v29 = vld [vmem:[%s13965_s3 + $0x2b4] ss:$20 sps:$4 sm:$0xff]  }
 0x242   :  { %7138 = vmatpush2.bf16.msra.mxu0 %v9992_v30  ;;  %v10034_v30 = vld [vmem:[%s13965_s3 + $0x30] ss:$20 sps:$4 sm:$0xff]  }
 0x243   :  { %7189 = vmatprep.subr.bf16.mxu0 %v10000_v33  ;;  %v10040_v33 = vld [vmem:[%s13965_s3 + $0x8] ss:$20 sps:$4 sm:$0xff]  }
 0x244   :  { %7179 = vmatpush2.bf16.msra.mxu1 %v9995_v8  ;;  %v10037_v8 = vld [vmem:[%s13965_s3 + $0x2b0] ss:$20 sps:$4 sm:$0xff]  }
 0x245   :  { %7230 = vmatprep.subr.bf16.mxu1 %v10003_v39  ;;  %v6895_v10 = vpop.f32.mrf.mxu0  ;;  %7140 = vmatmul.mubr.bf16.vlgmr.msra.gmra.mxu0 %v12601_v61  ;;  %v10048_v39 = vld [vmem:[%s13965_s3 + $0x264] ss:$20 sps:$4 sm:$0xff]  }
 0x246   :  { %v6896_v46 = vadd.f32 %v6895_v10, %v3511_v6  ;;  %7190 = vmatpush1.bf16.msra.mxu0 %v9998_v32  ;;  %7221 = vmatprep.mubr.bf16.mxu0 %v11710_v47  ;;  %v10051_v6 = vld [vmem:[%s13965_s3 + $0x4e4] ss:$20 sps:$4 sm:$0xff]   ;;  %v10046_v32 = vld [vmem:[%s13965_s3 + $0x260] ss:$20 sps:$4 sm:$0xff]  }
 0x247   :  { %v6936_v50 = vpop.f32.mrf.mxu1  ;;  %7181 = vmatmul.mubr.bf16.vlgmr.msra.gmra.mxu1 %v12606_v36  ;;  %v6897_v53 = vpop.f32.mrf.mxu0  ;;  %7191 = vmatprep.subr.bf16.mxu0 %v10006_v48  ;;  %v10057_v48 = vld [vmem:[%s13965_s3 + $0x4bc] ss:$20 sps:$4 sm:$0xff]   ;;  %v10052_v10 = vld [vmem:[%s13965_s3 + $0x238] ss:$20 sps:$4 sm:$0xff]  }
 0x248   :  { %7231 = vmatpush1.bf16.msra.mxu1 %v10001_v0  ;;  %v12627_v23 = vadd.f32 %v6936_v50, %v6896_v46  ;;  %7262 = vmatprep.mubr.bf16.mxu1 %v11720_v51  ;;  %v6898_v58 = vadd.f32 %v6897_v53, %v3515_v38  ;;  %v10049_v0 = vld [vmem:[%s13965_s3 + $0x4e0] ss:$20 sps:$4 sm:$0xff]   ;;  %v10054_v38 = vld [vmem:[%s13965_s3 + $0x23c] ss:$20 sps:$4 sm:$0xff]  }
 0x249   :  { %v6938_v63 = vpop.f32.mrf.mxu1  ;;  %v6899_v2 = vpop.f32.mrf.mxu0  ;;  %7232 = vmatprep.subr.bf16.mxu1 %v10009_v62  ;;  %v10055_v62 = vld [vmem:[%s13965_s3 + $0x4b8] ss:$20 sps:$4 sm:$0xff]   ;;  %v10060_v46 = vld [vmem:[%s13965_s3 + $0x214] ss:$20 sps:$4 sm:$0xff]   ;;  %v10061_v53 = vld [vmem:[%s13965_s3 + $0x490] ss:$20 sps:$4 sm:$0xff]  }
 0x24a   :  { %v12633_v3 = vadd.f32 %v6938_v63, %v6898_v58  ;;  %7192 = vmatpush1.bf16.msra.mxu0 %v10004_v5  ;;  %v10063_v50 = vld [vmem:[%s13965_s3 + $0x494] ss:$20 sps:$4 sm:$0xff]   ;;  %v10058_v5 = vld [vmem:[%s13965_s3 + $0x210] ss:$20 sps:$4 sm:$0xff]  }
 0x24b   :  { %v6940_v4 = vpop.f32.mrf.mxu1  ;;  %v6900_v11 = vpop.f32.mrf.mxu0  ;;  %7193 = vmatprep.subr.bf16.mxu0 %v10012_v55  ;;  %v10069_v55 = vld [vmem:[%s13965_s3 + $0x46c] ss:$20 sps:$4 sm:$0xff]   ;;  %v10064_v58 = vld [vmem:[%s13965_s3 + $0x1e8] ss:$20 sps:$4 sm:$0xff]   ;;  %v10075_v2 = vld [vmem:[%s13965_s3 + $0x444] ss:$20 sps:$4 sm:$0xff]  }
 0x24c   :  { %7233 = vmatpush1.bf16.msra.mxu1 %v10007_v57  ;;  %v10066_v57 = vld [vmem:[%s13965_s3 + $0x1ec] ss:$20 sps:$4 sm:$0xff]   ;;  %v10067_v63 = vld [vmem:[%s13965_s3 + $0x468] ss:$20 sps:$4 sm:$0xff]  }
 0x24d   :  { %v6941_v13 = vpop.f32.mrf.mxu1  ;;  %7234 = vmatprep.subr.bf16.mxu1 %v10015_v1  ;;  %v10072_v1 = vld [vmem:[%s13965_s3 + $0x1c4] ss:$20 sps:$4 sm:$0xff]   ;;  %v10070_v4 = vld [vmem:[%s13965_s3 + $0x1c0] ss:$20 sps:$4 sm:$0xff]   ;;  %v10078_v11 = vld [vmem:[%s13965_s3 + $0x19c] ss:$20 sps:$4 sm:$0xff]  }
 0x24e   :  { %7194 = vmatpush1.bf16.msra.mxu0 %v10010_v9  ;;  %v10073_v9 = vld [vmem:[%s13965_s3 + $0x440] ss:$20 sps:$4 sm:$0xff]   ;;  %v10079_v13 = vld [vmem:[%s13965_s3 + $0x418] ss:$20 sps:$4 sm:$0xff]  }
 0x24f   :  { %7195 = vmatprep.subr.bf16.mxu0 %v10018_v45  ;;  %v10076_v45 = vld [vmem:[%s13965_s3 + $0x198] ss:$20 sps:$4 sm:$0xff]  }
 0x250   :  { %7235 = vmatpush1.bf16.msra.mxu1 %v10013_v12  ;;  %v10081_v12 = vld [vmem:[%s13965_s3 + $0x41c] ss:$20 sps:$4 sm:$0xff]  }
 0x251   :  { %7236 = vmatprep.subr.bf16.mxu1 %v10021_v15  ;;  %v10084_v15 = vld [vmem:[%s13965_s3 + $0x174] ss:$20 sps:$4 sm:$0xff]  }
 0x252   :  { %7196 = vmatpush1.bf16.msra.mxu0 %v10016_v18  ;;  %v10087_v18 = vld [vmem:[%s13965_s3 + $0x3f4] ss:$20 sps:$4 sm:$0xff]  }
 0x253   :  { %7197 = vmatprep.subr.bf16.mxu0 %v10024_v54  ;;  %v10085_v54 = vld [vmem:[%s13965_s3 + $0x3f0] ss:$20 sps:$4 sm:$0xff]  }
 0x254   :  { %7237 = vmatpush1.bf16.msra.mxu1 %v10019_v21  ;;  %v10082_v21 = vld [vmem:[%s13965_s3 + $0x170] ss:$20 sps:$4 sm:$0xff]  }
 0x255   :  { %7238 = vmatprep.subr.bf16.mxu1 %v10027_v25  ;;  %v10090_v25 = vld [vmem:[%s13965_s3 + $0x14c] ss:$20 sps:$4 sm:$0xff]  }
 0x256   :  { %7198 = vmatpush1.bf16.msra.mxu0 %v10022_v37  ;;  %v10093_v37 = vld [vmem:[%s13965_s3 + $0x3cc] ss:$20 sps:$4 sm:$0xff]  }
 0x257   :  { %7199 = vmatprep.subr.bf16.mxu0 %v10030_v56  ;;  %v10091_v56 = vld [vmem:[%s13965_s3 + $0x3c8] ss:$20 sps:$4 sm:$0xff]  }
 0x258   :  { %7239 = vmatpush1.bf16.msra.mxu1 %v10025_v26  ;;  %v10088_v26 = vld [vmem:[%s13965_s3 + $0x148] ss:$20 sps:$4 sm:$0xff]  }
 0x259   :  { %7240 = vmatprep.subr.bf16.mxu1 %v10033_v14  ;;  %v10096_v14 = vld [vmem:[%s13965_s3 + $0x624] ss:$20 sps:$4 sm:$0xff]  }
 0x25a   :  { %7200 = vmatpush1.bf16.msra.mxu0 %v10028_v27  ;;  %v10099_v27 = vld [vmem:[%s13965_s3 + $0x8a4] ss:$20 sps:$4 sm:$0xff]  }
 0x25b   :  { %7201 = vmatprep.subr.bf16.mxu0 %v10036_v19  ;;  %v10097_v19 = vld [vmem:[%s13965_s3 + $0x8a0] ss:$20 sps:$4 sm:$0xff]  }
 0x25c   :  { %7241 = vmatpush1.bf16.msra.mxu1 %v10031_v17  ;;  %v10094_v17 = vld [vmem:[%s13965_s3 + $0x620] ss:$20 sps:$4 sm:$0xff]  }
 0x25d   :  { %7242 = vmatprep.subr.bf16.mxu1 %v10039_v29  ;;  %v10102_v29 = vld [vmem:[%s13965_s3 + $0x5fc] ss:$20 sps:$4 sm:$0xff]  }
 0x25e   :  { %7202 = vmatpush1.bf16.msra.mxu0 %v10034_v30 }
 0x25f   :  { %7203 = vmatprep.subr.bf16.mxu0 %v10042_v31 }
 0x260   :  { %7243 = vmatpush1.bf16.msra.mxu1 %v10037_v8  ;;  %v10105_v8 = vld [vmem:[%s13965_s3 + $0x87c] ss:$20 sps:$4 sm:$0xff]  }
 0x261   :  { %7244 = vmatprep.subr.bf16.mxu1 %v10045_v16 }
 0x262   :  { %7204 = vmatpush1.bf16.msra.mxu0 %v10040_v33  ;;  %v10100_v33 = vld [vmem:[%s13965_s3 + $0x5f8] ss:$20 sps:$4 sm:$0xff]  }
 0x263   :  { %7205 = vmatprep.subr.bf16.mxu0 %v10048_v39  ;;  %v10103_v39 = vld [vmem:[%s13965_s3 + $0x878] ss:$20 sps:$4 sm:$0xff]  }
 0x264   :  { %7245 = vmatpush1.bf16.msra.mxu1 %v10043_v34 }
 0x265   :  { %7246 = vmatprep.subr.bf16.mxu1 %v10051_v6 }
 0x266   :  { %7206 = vmatpush2.bf16.msra.mxu0 %v10046_v32 }
 0x267   :  { %7207 = vmatprep.subr.bf16.mxu0 %v10054_v38  ;;  %v10111_v38 = vld [vmem:[%s13965_s3 + $0x854] ss:$20 sps:$4 sm:$0xff]  }
 0x268   :  { %7247 = vmatpush2.bf16.msra.mxu1 %v10049_v0 }
 0x269   :  { %7248 = vmatprep.subr.bf16.mxu1 %v10057_v48 }
 0x26a   :  { %7208 = vmatpush2.bf16.msra.mxu0 %v10052_v10 }
 0x26b   :  { %7209 = vmatprep.subr.bf16.mxu0 %v10060_v46  ;;  %v10106_v46 = vld [vmem:[%s13965_s3 + $0x5d0] ss:$20 sps:$4 sm:$0xff]  }
 0x26c   :  { %7249 = vmatpush2.bf16.msra.mxu1 %v10055_v62 }
 0x26d   :  { %7250 = vmatprep.subr.bf16.mxu1 %v10063_v50 }
 0x26e   :  { %7210 = vmatpush2.bf16.msra.mxu0 %v10058_v5  ;;  %v10114_v5 = vld [vmem:[%s13965_s3 + $0x5ac] ss:$20 sps:$4 sm:$0xff]  }
 0x26f   :  { %7211 = vmatprep.subr.bf16.mxu0 %v10066_v57  ;;  %v10117_v57 = vld [vmem:[%s13965_s3 + $0x82c] ss:$20 sps:$4 sm:$0xff]  }
 0x270   :  { %7251 = vmatpush2.bf16.msra.mxu1 %v10061_v53 }
 0x271   :  { %7252 = vmatprep.subr.bf16.mxu1 %v10069_v55  ;;  %v10112_v55 = vld [vmem:[%s13965_s3 + $0x5a8] ss:$20 sps:$4 sm:$0xff]  }
 0x272   :  { %7212 = vmatpush2.bf16.msra.mxu0 %v10064_v58  ;;  %v10115_v58 = vld [vmem:[%s13965_s3 + $0x828] ss:$20 sps:$4 sm:$0xff]  }
 0x273   :  { %7213 = vmatprep.subr.bf16.mxu0 %v10072_v1  ;;  %v10123_v1 = vld [vmem:[%s13965_s3 + $0x804] ss:$20 sps:$4 sm:$0xff]  }
 0x274   :  { %7253 = vmatpush2.bf16.msra.mxu1 %v10067_v63  ;;  %v10120_v63 = vld [vmem:[%s13965_s3 + $0x584] ss:$20 sps:$4 sm:$0xff]  }
 0x275   :  { %7254 = vmatprep.subr.bf16.mxu1 %v10075_v2  ;;  %v10118_v2 = vld [vmem:[%s13965_s3 + $0x580] ss:$20 sps:$4 sm:$0xff]  }
 0x276   :  { %7214 = vmatpush2.bf16.msra.mxu0 %v10070_v4  ;;  %v10121_v4 = vld [vmem:[%s13965_s3 + $0x800] ss:$20 sps:$4 sm:$0xff]  }
 0x277   :  { %7215 = vmatprep.subr.bf16.mxu0 %v10078_v11  ;;  %v10129_v11 = vld [vmem:[%s13965_s3 + $0x7dc] ss:$20 sps:$4 sm:$0xff]  }
 0x278   :  { %7255 = vmatpush2.bf16.msra.mxu1 %v10073_v9  ;;  %v10126_v9 = vld [vmem:[%s13965_s3 + $0x55c] ss:$20 sps:$4 sm:$0xff]  }
 0x279   :  { %7256 = vmatprep.subr.bf16.mxu1 %v10081_v12  ;;  %v10124_v12 = vld [vmem:[%s13965_s3 + $0x558] ss:$20 sps:$4 sm:$0xff]  }
 0x27a   :  { %7216 = vmatpush2.bf16.msra.mxu0 %v10076_v45  ;;  %v10127_v45 = vld [vmem:[%s13965_s3 + $0x7d8] ss:$20 sps:$4 sm:$0xff]  }
 0x27b   :  { %7217 = vmatprep.subr.bf16.mxu0 %v10084_v15  ;;  %v10135_v15 = vld [vmem:[%s13965_s3 + $0x7b4] ss:$20 sps:$4 sm:$0xff]  }
 0x27c   :  { %7257 = vmatpush2.bf16.msra.mxu1 %v10079_v13  ;;  %v10132_v13 = vld [vmem:[%s13965_s3 + $0x534] ss:$20 sps:$4 sm:$0xff]  }
 0x27d   :  { %7258 = vmatprep.subr.bf16.mxu1 %v10087_v18  ;;  %v10130_v18 = vld [vmem:[%s13965_s3 + $0x530] ss:$20 sps:$4 sm:$0xff]  }
 0x27e   :  { %7218 = vmatpush2.bf16.msra.mxu0 %v10082_v21  ;;  %v10133_v21 = vld [vmem:[%s13965_s3 + $0x7b0] ss:$20 sps:$4 sm:$0xff]  }
 0x27f   :  { %7219 = vmatprep.subr.bf16.mxu0 %v10090_v25  ;;  %v10141_v25 = vld [vmem:[%s13965_s3 + $0x78c] ss:$20 sps:$4 sm:$0xff]  }
 0x280   :  { %7259 = vmatpush2.bf16.msra.mxu1 %v10085_v54  ;;  %v10138_v54 = vld [vmem:[%s13965_s3 + $0x50c] ss:$20 sps:$4 sm:$0xff]  }
 0x281   :  { %7260 = vmatprep.subr.bf16.mxu1 %v10093_v37  ;;  %v10136_v37 = vld [vmem:[%s13965_s3 + $0x508] ss:$20 sps:$4 sm:$0xff]  }
 0x282   :  { %7220 = vmatpush2.bf16.msra.mxu0 %v10088_v26  ;;  %v10139_v26 = vld [vmem:[%s13965_s3 + $0x788] ss:$20 sps:$4 sm:$0xff]  }
 0x283   :  { %7271 = vmatprep.subr.bf16.mxu0 %v10096_v14  ;;  %v10147_v14 = vld [vmem:[%s13965_s3 + $0x9e4] ss:$20 sps:$4 sm:$0xff]  }
 0x284   :  { %7261 = vmatpush2.bf16.msra.mxu1 %v10091_v56  ;;  %v10144_v56 = vld [vmem:[%s13965_s3 + $0x764] ss:$20 sps:$4 sm:$0xff]  }
 0x285   :  { %7312 = vmatprep.subr.bf16.mxu1 %v10099_v27  ;;  %v6977_v30 = vpop.f32.mrf.mxu0  ;;  %7222 = vmatmul.mubr.bf16.vlgmr.msra.gmra.mxu0 %v11940_v59  ;;  %v10142_v27 = vld [vmem:[%s13965_s3 + $0x760] ss:$20 sps:$4 sm:$0xff]  }
 0x286   :  { %v6978_v31 = vadd.f32 %v6977_v30, %v12627_v23  ;;  %7272 = vmatpush1.bf16.msra.mxu0 %v10094_v17  ;;  %7303 = vmatprep.mubr.bf16.mxu0 %v11947_v41  ;;  %v10108_v23 = vld [vmem:[%s13965_s3 + $0x5d4] ss:$20 sps:$4 sm:$0xff]   ;;  %v10148_v30 = vld [vmem:[%s13965_s3 + $0x738] ss:$20 sps:$4 sm:$0xff]  }
 0x287   :  { %v7018_v16 = vpop.f32.mrf.mxu1  ;;  %7263 = vmatmul.mubr.bf16.vlgmr.msra.gmra.mxu1 %v11942_v40  ;;  %v6979_v34 = vpop.f32.mrf.mxu0  ;;  %7273 = vmatprep.subr.bf16.mxu0 %v10102_v29  ;;  %v10145_v17 = vld [vmem:[%s13965_s3 + $0x9e0] ss:$20 sps:$4 sm:$0xff]   ;;  %v10153_v29 = vld [vmem:[%s13965_s3 + $0x9bc] ss:$20 sps:$4 sm:$0xff]  }
 0x288   :  { %7313 = vmatpush1.bf16.msra.mxu1 %v10097_v19  ;;  %v12828_v6 = vadd.f32 %v7018_v16, %v6978_v31  ;;  %7344 = vmatprep.mubr.bf16.mxu1 %v11956_v43  ;;  %v6980_v32 = vadd.f32 %v6979_v34, %v12633_v3  ;;  %v10109_v3 = vld [vmem:[%s13965_s3 + $0x850] ss:$20 sps:$4 sm:$0xff]   ;;  %v10156_v31 = vld [vmem:[%s13965_s3 + $0x714] ss:$20 sps:$4 sm:$0xff]  }
 0x289   :  { %v7020_v0 = vpop.f32.mrf.mxu1  ;;  %v6981_v48 = vpop.f32.mrf.mxu0  ;;  %7314 = vmatprep.subr.bf16.mxu1 %v10105_v8  ;;  %v10150_v19 = vld [vmem:[%s13965_s3 + $0x73c] ss:$20 sps:$4 sm:$0xff]   ;;  %v10151_v8 = vld [vmem:[%s13965_s3 + $0x9b8] ss:$20 sps:$4 sm:$0xff]   ;;  %v10159_v16 = vld [vmem:[%s13965_s3 + $0x994] ss:$20 sps:$4 sm:$0xff]  }
 0x28a   :  { %v12835_v10 = vadd.f32 %v7020_v0, %v6980_v32  ;;  %7274 = vmatpush1.bf16.msra.mxu0 %v10100_v33  ;;  %v10154_v33 = vld [vmem:[%s13965_s3 + $0x710] ss:$20 sps:$4 sm:$0xff]   ;;  %v10160_v32 = vld [vmem:[%s13965_s3 + $0x6e8] ss:$20 sps:$4 sm:$0xff]  }
 0x28b   :  { %v7022_v62 = vpop.f32.mrf.mxu1  ;;  %v6982_v50 = vpop.f32.mrf.mxu0  ;;  %7275 = vmatprep.subr.bf16.mxu0 %v10108_v23  ;;  %v10157_v34 = vld [vmem:[%s13965_s3 + $0x990] ss:$20 sps:$4 sm:$0xff]   ;;  %v10165_v23 = vld [vmem:[%s13965_s3 + $0x96c] ss:$20 sps:$4 sm:$0xff]   ;;  %v10163_v0 = vld [vmem:[%s13965_s3 + $0x968] ss:$20 sps:$4 sm:$0xff]  }
 0x28c   :  { %7315 = vmatpush1.bf16.msra.mxu1 %v10103_v39  ;;  %v10162_v39 = vld [vmem:[%s13965_s3 + $0x6ec] ss:$20 sps:$4 sm:$0xff]   ;;  %v10171_v48 = vld [vmem:[%s13965_s3 + $0x944] ss:$20 sps:$4 sm:$0xff]   ;;  %v10174_v50 = vld [vmem:[%s13965_s3 + $0x69c] ss:$20 sps:$4 sm:$0xff]  }
 0x28d   :  { %v7023_v53 = vpop.f32.mrf.mxu1  ;;  %7316 = vmatprep.subr.bf16.mxu1 %v10111_v38  ;;  %v10168_v38 = vld [vmem:[%s13965_s3 + $0x6c4] ss:$20 sps:$4 sm:$0xff]   ;;  %v10166_v62 = vld [vmem:[%s13965_s3 + $0x6c0] ss:$20 sps:$4 sm:$0xff]  }
 0x28e   :  { %7276 = vmatpush1.bf16.msra.mxu0 %v10106_v46  ;;  %v10169_v46 = vld [vmem:[%s13965_s3 + $0x940] ss:$20 sps:$4 sm:$0xff]   ;;  %v10175_v53 = vld [vmem:[%s13965_s3 + $0x918] ss:$20 sps:$4 sm:$0xff]  }
 0x28f   :  { %7277 = vmatprep.subr.bf16.mxu0 %v10114_v5  ;;  %v10172_v5 = vld [vmem:[%s13965_s3 + $0x698] ss:$20 sps:$4 sm:$0xff]  }
 0x290   :  { %7317 = vmatpush1.bf16.msra.mxu1 %v10109_v3  ;;  %v10177_v3 = vld [vmem:[%s13965_s3 + $0x91c] ss:$20 sps:$4 sm:$0xff]  }
 0x291   :  { %7318 = vmatprep.subr.bf16.mxu1 %v10117_v57  ;;  %v10180_v57 = vld [vmem:[%s13965_s3 + $0x674] ss:$20 sps:$4 sm:$0xff]  }
 0x292   :  { %7278 = vmatpush1.bf16.msra.mxu0 %v10112_v55  ;;  %v10183_v55 = vld [vmem:[%s13965_s3 + $0x8f4] ss:$20 sps:$4 sm:$0xff]  }
 0x293   :  { %7279 = vmatprep.subr.bf16.mxu0 %v10120_v63  ;;  %v10181_v63 = vld [vmem:[%s13965_s3 + $0x8f0] ss:$20 sps:$4 sm:$0xff]  }
 0x294   :  { %7319 = vmatpush1.bf16.msra.mxu1 %v10115_v58  ;;  %v10178_v58 = vld [vmem:[%s13965_s3 + $0x670] ss:$20 sps:$4 sm:$0xff]  }
 0x295   :  { %7320 = vmatprep.subr.bf16.mxu1 %v10123_v1  ;;  %v10186_v1 = vld [vmem:[%s13965_s3 + $0x64c] ss:$20 sps:$4 sm:$0xff]  }
 0x296   :  { %7280 = vmatpush1.bf16.msra.mxu0 %v10118_v2  ;;  %v10189_v2 = vld [vmem:[%s13965_s3 + $0x8cc] ss:$20 sps:$4 sm:$0xff]  }
 0x297   :  { %7281 = vmatprep.subr.bf16.mxu0 %v10126_v9  ;;  %v10187_v9 = vld [vmem:[%s13965_s3 + $0x8c8] ss:$20 sps:$4 sm:$0xff]  }
 0x298   :  { %7321 = vmatpush1.bf16.msra.mxu1 %v10121_v4  ;;  %v10184_v4 = vld [vmem:[%s13965_s3 + $0x648] ss:$20 sps:$4 sm:$0xff]  }
 0x299   :  { %7322 = vmatprep.subr.bf16.mxu1 %v10129_v11  ;;  %v10192_v11 = vld [vmem:[%s13965_s3 + $0xb24] ss:$20 sps:$4 sm:$0xff]  }
 0x29a   :  { %7282 = vmatpush1.bf16.msra.mxu0 %v10124_v12  ;;  %v10195_v12 = vld [vmem:[%s13965_s3 + $0xda4] ss:$20 sps:$4 sm:$0xff]  }
 0x29b   :  { %7283 = vmatprep.subr.bf16.mxu0 %v10132_v13  ;;  %v10193_v13 = vld [vmem:[%s13965_s3 + $0xda0] ss:$20 sps:$4 sm:$0xff]  }
 0x29c   :  { %7323 = vmatpush1.bf16.msra.mxu1 %v10127_v45  ;;  %v10190_v45 = vld [vmem:[%s13965_s3 + $0xb20] ss:$20 sps:$4 sm:$0xff]  }
 0x29d   :  { %7324 = vmatprep.subr.bf16.mxu1 %v10135_v15  ;;  %v10198_v15 = vld [vmem:[%s13965_s3 + $0xafc] ss:$20 sps:$4 sm:$0xff]  }
 0x29e   :  { %7284 = vmatpush1.bf16.msra.mxu0 %v10130_v18 }
 0x29f   :  { %7285 = vmatprep.subr.bf16.mxu0 %v10138_v54 }
 0x2a0   :  { %7325 = vmatpush1.bf16.msra.mxu1 %v10133_v21  ;;  %v10201_v21 = vld [vmem:[%s13965_s3 + $0xd7c] ss:$20 sps:$4 sm:$0xff]  }
 0x2a1   :  { %7326 = vmatprep.subr.bf16.mxu1 %v10141_v25 }
 0x2a2   :  { %7286 = vmatpush1.bf16.msra.mxu0 %v10136_v37  ;;  %v10196_v37 = vld [vmem:[%s13965_s3 + $0xaf8] ss:$20 sps:$4 sm:$0xff]  }
 0x2a3   :  { %7287 = vmatprep.subr.bf16.mxu0 %v10144_v56  ;;  %v10199_v56 = vld [vmem:[%s13965_s3 + $0xd78] ss:$20 sps:$4 sm:$0xff]  }
 0x2a4   :  { %7327 = vmatpush1.bf16.msra.mxu1 %v10139_v26 }
 0x2a5   :  { %7328 = vmatprep.subr.bf16.mxu1 %v10147_v14 }
 0x2a6   :  { %7288 = vmatpush2.bf16.msra.mxu0 %v10142_v27 }
 0x2a7   :  { %7289 = vmatprep.subr.bf16.mxu0 %v10150_v19  ;;  %v10207_v19 = vld [vmem:[%s13965_s3 + $0xd54] ss:$20 sps:$4 sm:$0xff]  }
 0x2a8   :  { %7329 = vmatpush2.bf16.msra.mxu1 %v10145_v17 }
 0x2a9   :  { %7330 = vmatprep.subr.bf16.mxu1 %v10153_v29 }
 0x2aa   :  { %7290 = vmatpush2.bf16.msra.mxu0 %v10148_v30 }
 0x2ab   :  { %7291 = vmatprep.subr.bf16.mxu0 %v10156_v31  ;;  %v10202_v31 = vld [vmem:[%s13965_s3 + $0xad0] ss:$20 sps:$4 sm:$0xff]  }
 0x2ac   :  { %7331 = vmatpush2.bf16.msra.mxu1 %v10151_v8 }
 0x2ad   :  { %7332 = vmatprep.subr.bf16.mxu1 %v10159_v16 }
 0x2ae   :  { %7292 = vmatpush2.bf16.msra.mxu0 %v10154_v33  ;;  %v10210_v33 = vld [vmem:[%s13965_s3 + $0xaac] ss:$20 sps:$4 sm:$0xff]  }
 0x2af   :  { %7293 = vmatprep.subr.bf16.mxu0 %v10162_v39  ;;  %v10213_v39 = vld [vmem:[%s13965_s3 + $0xd2c] ss:$20 sps:$4 sm:$0xff]  }
 0x2b0   :  { %7333 = vmatpush2.bf16.msra.mxu1 %v10157_v34 }
 0x2b1   :  { %7334 = vmatprep.subr.bf16.mxu1 %v10165_v23  ;;  %v10208_v23 = vld [vmem:[%s13965_s3 + $0xaa8] ss:$20 sps:$4 sm:$0xff]  }
 0x2b2   :  { %7294 = vmatpush2.bf16.msra.mxu0 %v10160_v32  ;;  %v10211_v32 = vld [vmem:[%s13965_s3 + $0xd28] ss:$20 sps:$4 sm:$0xff]  }
 0x2b3   :  { %7295 = vmatprep.subr.bf16.mxu0 %v10168_v38  ;;  %v10219_v38 = vld [vmem:[%s13965_s3 + $0xd04] ss:$20 sps:$4 sm:$0xff]  }
 0x2b4   :  { %7335 = vmatpush2.bf16.msra.mxu1 %v10163_v0  ;;  %v10216_v0 = vld [vmem:[%s13965_s3 + $0xa84] ss:$20 sps:$4 sm:$0xff]  }
 0x2b5   :  { %7336 = vmatprep.subr.bf16.mxu1 %v10171_v48  ;;  %v10214_v48 = vld [vmem:[%s13965_s3 + $0xa80] ss:$20 sps:$4 sm:$0xff]  }
 0x2b6   :  { %7296 = vmatpush2.bf16.msra.mxu0 %v10166_v62  ;;  %v10217_v62 = vld [vmem:[%s13965_s3 + $0xd00] ss:$20 sps:$4 sm:$0xff]  }
 0x2b7   :  { %7297 = vmatprep.subr.bf16.mxu0 %v10174_v50  ;;  %v10225_v50 = vld [vmem:[%s13965_s3 + $0xcdc] ss:$20 sps:$4 sm:$0xff]  }
 0x2b8   :  { %7337 = vmatpush2.bf16.msra.mxu1 %v10169_v46  ;;  %v10222_v46 = vld [vmem:[%s13965_s3 + $0xa5c] ss:$20 sps:$4 sm:$0xff]  }
 0x2b9   :  { %7338 = vmatprep.subr.bf16.mxu1 %v10177_v3  ;;  %v10220_v3 = vld [vmem:[%s13965_s3 + $0xa58] ss:$20 sps:$4 sm:$0xff]  }
 0x2ba   :  { %7298 = vmatpush2.bf16.msra.mxu0 %v10172_v5  ;;  %v10223_v5 = vld [vmem:[%s13965_s3 + $0xcd8] ss:$20 sps:$4 sm:$0xff]  }
 0x2bb   :  { %7299 = vmatprep.subr.bf16.mxu0 %v10180_v57  ;;  %v10231_v57 = vld [vmem:[%s13965_s3 + $0xcb4] ss:$20 sps:$4 sm:$0xff]  }
 0x2bc   :  { %7339 = vmatpush2.bf16.msra.mxu1 %v10175_v53  ;;  %v10228_v53 = vld [vmem:[%s13965_s3 + $0xa34] ss:$20 sps:$4 sm:$0xff]  }
 0x2bd   :  { %7340 = vmatprep.subr.bf16.mxu1 %v10183_v55  ;;  %v10226_v55 = vld [vmem:[%s13965_s3 + $0xa30] ss:$20 sps:$4 sm:$0xff]  }
 0x2be   :  { %7300 = vmatpush2.bf16.msra.mxu0 %v10178_v58  ;;  %v10229_v58 = vld [vmem:[%s13965_s3 + $0xcb0] ss:$20 sps:$4 sm:$0xff]  }
 0x2bf   :  { %7301 = vmatprep.subr.bf16.mxu0 %v10186_v1  ;;  %v10237_v1 = vld [vmem:[%s13965_s3 + $0xc8c] ss:$20 sps:$4 sm:$0xff]  }
 0x2c0   :  { %7341 = vmatpush2.bf16.msra.mxu1 %v10181_v63  ;;  %v10234_v63 = vld [vmem:[%s13965_s3 + $0xa0c] ss:$20 sps:$4 sm:$0xff]  }
 0x2c1   :  { %7342 = vmatprep.subr.bf16.mxu1 %v10189_v2  ;;  %v10232_v2 = vld [vmem:[%s13965_s3 + $0xa08] ss:$20 sps:$4 sm:$0xff]  }
 0x2c2   :  { %7302 = vmatpush2.bf16.msra.mxu0 %v10184_v4  ;;  %v10235_v4 = vld [vmem:[%s13965_s3 + $0xc88] ss:$20 sps:$4 sm:$0xff]  }
 0x2c3   :  { %7353 = vmatprep.subr.bf16.mxu0 %v10192_v11  ;;  %v10243_v11 = vld [vmem:[%s13965_s3 + $0xee4] ss:$20 sps:$4 sm:$0xff]  }
 0x2c4   :  { %7343 = vmatpush2.bf16.msra.mxu1 %v10187_v9  ;;  %v10240_v9 = vld [vmem:[%s13965_s3 + $0xc64] ss:$20 sps:$4 sm:$0xff]  }
 0x2c5   :  { %7394 = vmatprep.subr.bf16.mxu1 %v10195_v12  ;;  %v7059_v18 = vpop.f32.mrf.mxu0  ;;  %7304 = vmatmul.mubr.bf16.vlgmr.msra.gmra.mxu0 %v12165_v52  ;;  %v10238_v12 = vld [vmem:[%s13965_s3 + $0xc60] ss:$20 sps:$4 sm:$0xff]  }
 0x2c6   :  { %v7060_v54 = vadd.f32 %v7059_v18, %v12828_v6  ;;  %7354 = vmatpush1.bf16.msra.mxu0 %v10190_v45  ;;  %7385 = vmatprep.mubr.bf16.mxu0 %v12172_v49  ;;  %v10204_v6 = vld [vmem:[%s13965_s3 + $0xad4] ss:$20 sps:$4 sm:$0xff]   ;;  %v10244_v18 = vld [vmem:[%s13965_s3 + $0xc38] ss:$20 sps:$4 sm:$0xff]  }
 0x2c7   :  { %v7100_v25 = vpop.f32.mrf.mxu1  ;;  %7345 = vmatmul.mubr.bf16.vlgmr.msra.gmra.mxu1 %v12170_v42  ;;  %v7061_v26 = vpop.f32.mrf.mxu0  ;;  %7355 = vmatprep.subr.bf16.mxu0 %v10198_v15  ;;  %v10241_v45 = vld [vmem:[%s13965_s3 + $0xee0] ss:$20 sps:$4 sm:$0xff]   ;;  %v10249_v15 = vld [vmem:[%s13965_s3 + $0xebc] ss:$20 sps:$4 sm:$0xff]  }
 0x2c8   :  { %7395 = vmatpush1.bf16.msra.mxu1 %v10193_v13  ;;  %v13030_v14 = vadd.f32 %v7100_v25, %v7060_v54  ;;  %7426 = vmatprep.mubr.bf16.mxu1 %v12181_v44  ;;  %v7062_v27 = vadd.f32 %v7061_v26, %v12835_v10  ;;  %v10205_v10 = vld [vmem:[%s13965_s3 + $0xd50] ss:$20 sps:$4 sm:$0xff]   ;;  %v10252_v54 = vld [vmem:[%s13965_s3 + $0xc14] ss:$20 sps:$4 sm:$0xff]  }
 0x2c9   :  { %v7102_v17 = vpop.f32.mrf.mxu1  ;;  %v7063_v29 = vpop.f32.mrf.mxu0  ;;  %7396 = vmatprep.subr.bf16.mxu1 %v10201_v21  ;;  %v10246_v13 = vld [vmem:[%s13965_s3 + $0xc3c] ss:$20 sps:$4 sm:$0xff]   ;;  %v10247_v21 = vld [vmem:[%s13965_s3 + $0xeb8] ss:$20 sps:$4 sm:$0xff]   ;;  %v10255_v25 = vld [vmem:[%s13965_s3 + $0xe94] ss:$20 sps:$4 sm:$0xff]  }
 0x2ca   :  { %v13037_v30 = vadd.f32 %v7102_v17, %v7062_v27  ;;  %7356 = vmatpush1.bf16.msra.mxu0 %v10196_v37  ;;  %v10250_v37 = vld [vmem:[%s13965_s3 + $0xc10] ss:$20 sps:$4 sm:$0xff]   ;;  %v10256_v27 = vld [vmem:[%s13965_s3 + $0xbe8] ss:$20 sps:$4 sm:$0xff]  }
 0x2cb   :  { %v7104_v8 = vpop.f32.mrf.mxu1  ;;  %v7064_v16 = vpop.f32.mrf.mxu0  ;;  %7357 = vmatprep.subr.bf16.mxu0 %v10204_v6  ;;  %v10253_v26 = vld [vmem:[%s13965_s3 + $0xe90] ss:$20 sps:$4 sm:$0xff]   ;;  %v10261_v6 = vld [vmem:[%s13965_s3 + $0xe6c] ss:$20 sps:$4 sm:$0xff]   ;;  %v10259_v17 = vld [vmem:[%s13965_s3 + $0xe68] ss:$20 sps:$4 sm:$0xff]  }
 0x2cc   :  { %7397 = vmatpush1.bf16.msra.mxu1 %v10199_v56  ;;  %v10258_v56 = vld [vmem:[%s13965_s3 + $0xbec] ss:$20 sps:$4 sm:$0xff]   ;;  %v10267_v29 = vld [vmem:[%s13965_s3 + $0xe44] ss:$20 sps:$4 sm:$0xff]   ;;  %v10270_v16 = vld [vmem:[%s13965_s3 + $0xb9c] ss:$20 sps:$4 sm:$0xff]  }
 0x2cd   :  { %v7105_v34 = vpop.f32.mrf.mxu1  ;;  %7398 = vmatprep.subr.bf16.mxu1 %v10207_v19  ;;  %v10264_v19 = vld [vmem:[%s13965_s3 + $0xbc4] ss:$20 sps:$4 sm:$0xff]   ;;  %v10262_v8 = vld [vmem:[%s13965_s3 + $0xbc0] ss:$20 sps:$4 sm:$0xff]  }
 0x2ce   :  { %7358 = vmatpush1.bf16.msra.mxu0 %v10202_v31  ;;  %v10265_v31 = vld [vmem:[%s13965_s3 + $0xe40] ss:$20 sps:$4 sm:$0xff]   ;;  %v10271_v34 = vld [vmem:[%s13965_s3 + $0xe18] ss:$20 sps:$4 sm:$0xff]  }
 0x2cf   :  { %7359 = vmatprep.subr.bf16.mxu0 %v10210_v33  ;;  %v10268_v33 = vld [vmem:[%s13965_s3 + $0xb98] ss:$20 sps:$4 sm:$0xff]  }
 0x2d0   :  { %7399 = vmatpush1.bf16.msra.mxu1 %v10205_v10  ;;  %v10273_v10 = vld [vmem:[%s13965_s3 + $0xe1c] ss:$20 sps:$4 sm:$0xff]  }
 0x2d1   :  { %7400 = vmatprep.subr.bf16.mxu1 %v10213_v39  ;;  %v10276_v39 = vld [vmem:[%s13965_s3 + $0xb74] ss:$20 sps:$4 sm:$0xff]  }
 0x2d2   :  { %7360 = vmatpush1.bf16.msra.mxu0 %v10208_v23  ;;  %v10279_v23 = vld [vmem:[%s13965_s3 + $0xdf4] ss:$20 sps:$4 sm:$0xff]  }
 0x2d3   :  { %7361 = vmatprep.subr.bf16.mxu0 %v10216_v0  ;;  %v10277_v0 = vld [vmem:[%s13965_s3 + $0xdf0] ss:$20 sps:$4 sm:$0xff]  }
 0x2d4   :  { %7401 = vmatpush1.bf16.msra.mxu1 %v10211_v32  ;;  %v10274_v32 = vld [vmem:[%s13965_s3 + $0xb70] ss:$20 sps:$4 sm:$0xff]  }
 0x2d5   :  { %7402 = vmatprep.subr.bf16.mxu1 %v10219_v38  ;;  %v10282_v38 = vld [vmem:[%s13965_s3 + $0xb4c] ss:$20 sps:$4 sm:$0xff]  }
 0x2d6   :  { %7362 = vmatpush1.bf16.msra.mxu0 %v10214_v48  ;;  %v10285_v48 = vld [vmem:[%s13965_s3 + $0xdcc] ss:$20 sps:$4 sm:$0xff]  }
 0x2d7   :  { %7363 = vmatprep.subr.bf16.mxu0 %v10222_v46  ;;  %v10283_v46 = vld [vmem:[%s13965_s3 + $0xdc8] ss:$20 sps:$4 sm:$0xff]  }
 0x2d8   :  { %7403 = vmatpush1.bf16.msra.mxu1 %v10217_v62  ;;  %v10280_v62 = vld [vmem:[%s13965_s3 + $0xb48] ss:$20 sps:$4 sm:$0xff]  }
 0x2d9   :  { %7404 = vmatprep.subr.bf16.mxu1 %v10225_v50  ;;  %v10288_v50 = vld [vmem:[%s13965_s3 + $0x1024] ss:$20 sps:$4 sm:$0xff]  }
 0x2da   :  { %7364 = vmatpush1.bf16.msra.mxu0 %v10220_v3  ;;  %v10291_v3 = vld [vmem:[%s13965_s3 + $0x12a4] ss:$20 sps:$4 sm:$0xff]  }
 0x2db   :  { %7365 = vmatprep.subr.bf16.mxu0 %v10228_v53  ;;  %v10289_v53 = vld [vmem:[%s13965_s3 + $0x12a0] ss:$20 sps:$4 sm:$0xff]  }
 0x2dc   :  { %7405 = vmatpush1.bf16.msra.mxu1 %v10223_v5  ;;  %v10286_v5 = vld [vmem:[%s13965_s3 + $0x1020] ss:$20 sps:$4 sm:$0xff]  }
 0x2dd   :  { %7406 = vmatprep.subr.bf16.mxu1 %v10231_v57  ;;  %v10294_v57 = vld [vmem:[%s13965_s3 + $0xffc] ss:$20 sps:$4 sm:$0xff]  }
 0x2de   :  { %7366 = vmatpush1.bf16.msra.mxu0 %v10226_v55 }
 0x2df   :  { %7367 = vmatprep.subr.bf16.mxu0 %v10234_v63 }
 0x2e0   :  { %7407 = vmatpush1.bf16.msra.mxu1 %v10229_v58  ;;  %v10297_v58 = vld [vmem:[%s13965_s3 + $0x127c] ss:$20 sps:$4 sm:$0xff]  }
 0x2e1   :  { %7408 = vmatprep.subr.bf16.mxu1 %v10237_v1 }
 0x2e2   :  { %7368 = vmatpush1.bf16.msra.mxu0 %v10232_v2  ;;  %v10292_v2 = vld [vmem:[%s13965_s3 + $0xff8] ss:$20 sps:$4 sm:$0xff]  }
 0x2e3   :  { %7369 = vmatprep.subr.bf16.mxu0 %v10240_v9  ;;  %v10295_v9 = vld [vmem:[%s13965_s3 + $0x1278] ss:$20 sps:$4 sm:$0xff]  }
 0x2e4   :  { %7409 = vmatpush1.bf16.msra.mxu1 %v10235_v4 }
 0x2e5   :  { %7410 = vmatprep.subr.bf16.mxu1 %v10243_v11 }
 0x2e6   :  { %7370 = vmatpush2.bf16.msra.mxu0 %v10238_v12 }
 0x2e7   :  { %7371 = vmatprep.subr.bf16.mxu0 %v10246_v13  ;;  %v10303_v13 = vld [vmem:[%s13965_s3 + $0x1254] ss:$20 sps:$4 sm:$0xff]  }
 0x2e8   :  { %7411 = vmatpush2.bf16.msra.mxu1 %v10241_v45 }
 0x2e9   :  { %7412 = vmatprep.subr.bf16.mxu1 %v10249_v15 }
 0x2ea   :  { %7372 = vmatpush2.bf16.msra.mxu0 %v10244_v18 }
 0x2eb   :  { %7373 = vmatprep.subr.bf16.mxu0 %v10252_v54  ;;  %v10298_v54 = vld [vmem:[%s13965_s3 + $0xfd0] ss:$20 sps:$4 sm:$0xff]  }
 0x2ec   :  { %7413 = vmatpush2.bf16.msra.mxu1 %v10247_v21 }
 0x2ed   :  { %7414 = vmatprep.subr.bf16.mxu1 %v10255_v25 }
 0x2ee   :  { %7374 = vmatpush2.bf16.msra.mxu0 %v10250_v37  ;;  %v10306_v37 = vld [vmem:[%s13965_s3 + $0xfac] ss:$20 sps:$4 sm:$0xff]  }
 0x2ef   :  { %7375 = vmatprep.subr.bf16.mxu0 %v10258_v56  ;;  %v10309_v56 = vld [vmem:[%s13965_s3 + $0x122c] ss:$20 sps:$4 sm:$0xff]  }
 0x2f0   :  { %7415 = vmatpush2.bf16.msra.mxu1 %v10253_v26 }
 0x2f1   :  { %7416 = vmatprep.subr.bf16.mxu1 %v10261_v6  ;;  %v10304_v6 = vld [vmem:[%s13965_s3 + $0xfa8] ss:$20 sps:$4 sm:$0xff]  }
 0x2f2   :  { %7376 = vmatpush2.bf16.msra.mxu0 %v10256_v27  ;;  %v10307_v27 = vld [vmem:[%s13965_s3 + $0x1228] ss:$20 sps:$4 sm:$0xff]  }
 0x2f3   :  { %7377 = vmatprep.subr.bf16.mxu0 %v10264_v19  ;;  %v10315_v19 = vld [vmem:[%s13965_s3 + $0x1204] ss:$20 sps:$4 sm:$0xff]  }
 0x2f4   :  { %7417 = vmatpush2.bf16.msra.mxu1 %v10259_v17  ;;  %v10312_v17 = vld [vmem:[%s13965_s3 + $0xf84] ss:$20 sps:$4 sm:$0xff]  }
 0x2f5   :  { %7418 = vmatprep.subr.bf16.mxu1 %v10267_v29  ;;  %v10310_v29 = vld [vmem:[%s13965_s3 + $0xf80] ss:$20 sps:$4 sm:$0xff]  }
 0x2f6   :  { %7378 = vmatpush2.bf16.msra.mxu0 %v10262_v8  ;;  %v10313_v8 = vld [vmem:[%s13965_s3 + $0x1200] ss:$20 sps:$4 sm:$0xff]  }
 0x2f7   :  { %7379 = vmatprep.subr.bf16.mxu0 %v10270_v16  ;;  %v10321_v16 = vld [vmem:[%s13965_s3 + $0x11dc] ss:$20 sps:$4 sm:$0xff]  }
 0x2f8   :  { %7419 = vmatpush2.bf16.msra.mxu1 %v10265_v31  ;;  %v10318_v31 = vld [vmem:[%s13965_s3 + $0xf5c] ss:$20 sps:$4 sm:$0xff]  }
 0x2f9   :  { %7420 = vmatprep.subr.bf16.mxu1 %v10273_v10  ;;  %v10316_v10 = vld [vmem:[%s13965_s3 + $0xf58] ss:$20 sps:$4 sm:$0xff]  }
 0x2fa   :  { %7380 = vmatpush2.bf16.msra.mxu0 %v10268_v33  ;;  %v10319_v33 = vld [vmem:[%s13965_s3 + $0x11d8] ss:$20 sps:$4 sm:$0xff]  }
 0x2fb   :  { %7381 = vmatprep.subr.bf16.mxu0 %v10276_v39  ;;  %v10327_v39 = vld [vmem:[%s13965_s3 + $0x11b4] ss:$20 sps:$4 sm:$0xff]  }
 0x2fc   :  { %7421 = vmatpush2.bf16.msra.mxu1 %v10271_v34  ;;  %v10324_v34 = vld [vmem:[%s13965_s3 + $0xf34] ss:$20 sps:$4 sm:$0xff]  }
 0x2fd   :  { %7422 = vmatprep.subr.bf16.mxu1 %v10279_v23  ;;  %v10322_v23 = vld [vmem:[%s13965_s3 + $0xf30] ss:$20 sps:$4 sm:$0xff]  }
 0x2fe   :  { %7382 = vmatpush2.bf16.msra.mxu0 %v10274_v32  ;;  %v10325_v32 = vld [vmem:[%s13965_s3 + $0x11b0] ss:$20 sps:$4 sm:$0xff]  }
 0x2ff   :  { %7383 = vmatprep.subr.bf16.mxu0 %v10282_v38  ;;  %v10333_v38 = vld [vmem:[%s13965_s3 + $0x118c] ss:$20 sps:$4 sm:$0xff]  }
 0x300   :  { %7423 = vmatpush2.bf16.msra.mxu1 %v10277_v0  ;;  %v10330_v0 = vld [vmem:[%s13965_s3 + $0xf0c] ss:$20 sps:$4 sm:$0xff]  }
 0x301   :  { %7424 = vmatprep.subr.bf16.mxu1 %v10285_v48  ;;  %v10328_v48 = vld [vmem:[%s13965_s3 + $0xf08] ss:$20 sps:$4 sm:$0xff]  }
 0x302   :  { %7384 = vmatpush2.bf16.msra.mxu0 %v10280_v62  ;;  %v10331_v62 = vld [vmem:[%s13965_s3 + $0x1188] ss:$20 sps:$4 sm:$0xff]  }
 0x303   :  { %7435 = vmatprep.subr.bf16.mxu0 %v10288_v50  ;;  %v10339_v50 = vld [vmem:[%s13965_s3 + $0x13e4] ss:$20 sps:$4 sm:$0xff]  }
 0x304   :  { %7425 = vmatpush2.bf16.msra.mxu1 %v10283_v46  ;;  %v10336_v46 = vld [vmem:[%s13965_s3 + $0x1164] ss:$20 sps:$4 sm:$0xff]  }
 0x305   :  { %7476 = vmatprep.subr.bf16.mxu1 %v10291_v3  ;;  %v7141_v55 = vpop.f32.mrf.mxu0  ;;  %7386 = vmatmul.mubr.bf16.vlgmr.msra.gmra.mxu0 %v12378_v35  ;;  %v10334_v3 = vld [vmem:[%s13965_s3 + $0x1160] ss:$20 sps:$4 sm:$0xff]  }
 0x306   :  { %v7142_v63 = vadd.f32 %v7141_v55, %v13030_v14  ;;  %7436 = vmatpush1.bf16.msra.mxu0 %v10286_v5  ;;  %7467 = vmatprep.mubr.bf16.mxu0 %v12391_v24  ;;  %v10300_v14 = vld [vmem:[%s13965_s3 + $0xfd4] ss:$20 sps:$4 sm:$0xff]   ;;  %v10340_v55 = vld [vmem:[%s13965_s3 + $0x1138] ss:$20 sps:$4 sm:$0xff]  }
 0x307   :  { %v7182_v1 = vpop.f32.mrf.mxu1  ;;  %7427 = vmatmul.mubr.bf16.vlgmr.msra.gmra.mxu1 %v12383_v22  ;;  %v7143_v4 = vpop.f32.mrf.mxu0  ;;  %7437 = vmatprep.subr.bf16.mxu0 %v10294_v57  ;;  %v10337_v5 = vld [vmem:[%s13965_s3 + $0x13e0] ss:$20 sps:$4 sm:$0xff]   ;;  %v10345_v57 = vld [vmem:[%s13965_s3 + $0x13bc] ss:$20 sps:$4 sm:$0xff]  }
 0x308   :  { %7477 = vmatpush1.bf16.msra.mxu1 %v10289_v53  ;;  %v13232_v11 = vadd.f32 %v7182_v1, %v7142_v63  ;;  %7508 = vmatprep.mubr.bf16.mxu1 %v12430_v20  ;;  %v7144_v12 = vadd.f32 %v7143_v4, %v13037_v30  ;;  %v10301_v30 = vld [vmem:[%s13965_s3 + $0x1250] ss:$20 sps:$4 sm:$0xff]   ;;  %v10348_v63 = vld [vmem:[%s13965_s3 + $0x1114] ss:$20 sps:$4 sm:$0xff]  }
 0x309   :  { %v7184_v45 = vpop.f32.mrf.mxu1  ;;  %v7145_v15 = vpop.f32.mrf.mxu0  ;;  %7478 = vmatprep.subr.bf16.mxu1 %v10297_v58  ;;  %v10342_v53 = vld [vmem:[%s13965_s3 + $0x113c] ss:$20 sps:$4 sm:$0xff]   ;;  %v10343_v58 = vld [vmem:[%s13965_s3 + $0x13b8] ss:$20 sps:$4 sm:$0xff]   ;;  %v10351_v1 = vld [vmem:[%s13965_s3 + $0x1394] ss:$20 sps:$4 sm:$0xff]  }
 0x30a   :  { %v13239_v18 = vadd.f32 %v7184_v45, %v7144_v12  ;;  %7438 = vmatpush1.bf16.msra.mxu0 %v10292_v2  ;;  %v10346_v2 = vld [vmem:[%s13965_s3 + $0x1110] ss:$20 sps:$4 sm:$0xff]   ;;  %v10352_v12 = vld [vmem:[%s13965_s3 + $0x10e8] ss:$20 sps:$4 sm:$0xff]  }
 0x30b   :  { %v7186_v21 = vpop.f32.mrf.mxu1  ;;  %v7146_v25 = vpop.f32.mrf.mxu0  ;;  %7439 = vmatprep.subr.bf16.mxu0 %v10300_v14  ;;  %v10349_v4 = vld [vmem:[%s13965_s3 + $0x1390] ss:$20 sps:$4 sm:$0xff]   ;;  %v10357_v14 = vld [vmem:[%s13965_s3 + $0x136c] ss:$20 sps:$4 sm:$0xff]   ;;  %v10355_v45 = vld [vmem:[%s13965_s3 + $0x1368] ss:$20 sps:$4 sm:$0xff]  }
 0x30c   :  { %7479 = vmatpush1.bf16.msra.mxu1 %v10295_v9  ;;  %v10354_v9 = vld [vmem:[%s13965_s3 + $0x10ec] ss:$20 sps:$4 sm:$0xff]   ;;  %v10363_v15 = vld [vmem:[%s13965_s3 + $0x1344] ss:$20 sps:$4 sm:$0xff]   ;;  %v10366_v25 = vld [vmem:[%s13965_s3 + $0x109c] ss:$20 sps:$4 sm:$0xff]  }
 0x30d   :  { %v7187_v26 = vpop.f32.mrf.mxu1  ;;  %7480 = vmatprep.subr.bf16.mxu1 %v10303_v13  ;;  %v10360_v13 = vld [vmem:[%s13965_s3 + $0x10c4] ss:$20 sps:$4 sm:$0xff]   ;;  %v10358_v21 = vld [vmem:[%s13965_s3 + $0x10c0] ss:$20 sps:$4 sm:$0xff]  }
 0x30e   :  { %7440 = vmatpush1.bf16.msra.mxu0 %v10298_v54  ;;  %v10361_v54 = vld [vmem:[%s13965_s3 + $0x1340] ss:$20 sps:$4 sm:$0xff]   ;;  %v10367_v26 = vld [vmem:[%s13965_s3 + $0x1318] ss:$20 sps:$4 sm:$0xff]  }
 0x30f   :  { %7441 = vmatprep.subr.bf16.mxu0 %v10306_v37  ;;  %v10364_v37 = vld [vmem:[%s13965_s3 + $0x1098] ss:$20 sps:$4 sm:$0xff]  }
 0x310   :  { %7481 = vmatpush1.bf16.msra.mxu1 %v10301_v30  ;;  %v10369_v30 = vld [vmem:[%s13965_s3 + $0x131c] ss:$20 sps:$4 sm:$0xff]  }
 0x311   :  { %7482 = vmatprep.subr.bf16.mxu1 %v10309_v56  ;;  %v10372_v56 = vld [vmem:[%s13965_s3 + $0x1074] ss:$20 sps:$4 sm:$0xff]  }
 0x312   :  { %7442 = vmatpush1.bf16.msra.mxu0 %v10304_v6  ;;  %v10375_v6 = vld [vmem:[%s13965_s3 + $0x12f4] ss:$20 sps:$4 sm:$0xff]  }
 0x313   :  { %7443 = vmatprep.subr.bf16.mxu0 %v10312_v17  ;;  %v10373_v17 = vld [vmem:[%s13965_s3 + $0x12f0] ss:$20 sps:$4 sm:$0xff]  }
 0x314   :  { %7483 = vmatpush1.bf16.msra.mxu1 %v10307_v27  ;;  %v10370_v27 = vld [vmem:[%s13965_s3 + $0x1070] ss:$20 sps:$4 sm:$0xff]  }
 0x315   :  { %7484 = vmatprep.subr.bf16.mxu1 %v10315_v19  ;;  %v10378_v19 = vld [vmem:[%s13965_s3 + $0x104c] ss:$20 sps:$4 sm:$0xff]  }
 0x316   :  { %7444 = vmatpush1.bf16.msra.mxu0 %v10310_v29  ;;  %v10381_v29 = vld [vmem:[%s13965_s3 + $0x12cc] ss:$20 sps:$4 sm:$0xff]  }
 0x317   :  { %7445 = vmatprep.subr.bf16.mxu0 %v10318_v31  ;;  %v10379_v31 = vld [vmem:[%s13965_s3 + $0x12c8] ss:$20 sps:$4 sm:$0xff]  }
 0x318   :  { %7485 = vmatpush1.bf16.msra.mxu1 %v10313_v8  ;;  %v10376_v8 = vld [vmem:[%s13965_s3 + $0x1048] ss:$20 sps:$4 sm:$0xff]  }
 0x319   :  { %7486 = vmatprep.subr.bf16.mxu1 %v10321_v16  ;;  %v10382_v16 = vld [vmem:[%s13965_s3 + $0x268] ss:$20 sps:$4 sm:$0xff]  }
 0x31a   :  { %7446 = vmatpush1.bf16.msra.mxu0 %v10316_v10  ;;  %v10383_v10 = vld [vmem:[%s13965_s3 + $0x4e8] ss:$20 sps:$4 sm:$0xff]  }
 0x31b   :  { %7447 = vmatprep.subr.bf16.mxu0 %v10324_v34 }
 0x31c   :  { %7487 = vmatpush1.bf16.msra.mxu1 %v10319_v33  ;;  %v13412_v33 = vld [vmem:[%s13966_s4] sm:$0x1f] }
 0x31d   :  { %7488 = vmatprep.subr.bf16.mxu1 %v10327_v39  ;;  %v3519_v34 = vrot.slane %v13412_v33, %v11530_v28  ;;  %v10384_v39 = vld [vmem:[%s13965_s3 + $0x128] ss:$20 sps:$4 sm:$0xff]   ;;  %v10387_v28 = vld [vmem:[%s13965_s3 + $0x4c0] ss:$20 sps:$4 sm:$0xff]  }
 0x31e   :  { %7448 = vmatpush1.bf16.msra.mxu0 %v10322_v23  ;;  %v10385_v23 = vld [vmem:[%s13965_s3 + $0x3a8] ss:$20 sps:$4 sm:$0xff]  }
 0x31f   :  { %7449 = vmatprep.subr.bf16.mxu0 %v10330_v0  ;;  %v10386_v0 = vld [vmem:[%s13965_s3 + $0x240] ss:$20 sps:$4 sm:$0xff]  }
 0x320   :  { %7489 = vmatpush1.bf16.msra.mxu1 %v10325_v32  ;;  %v3523_v32 = vrot.slane %v13412_v33, %v11656_v7  ;;  %v10388_v7 = vld [vmem:[%s13965_s3 + $0x100] ss:$20 sps:$4 sm:$0xff]  }
 0x321   :  { %7490 = vmatprep.subr.bf16.mxu1 %v10333_v38 }
 0x322   :  { %7450 = vmatpush1.bf16.msra.mxu0 %v10328_v48 }
 0x323   :  { %7451 = vmatprep.subr.bf16.mxu0 %v10336_v46 }
 0x324   :  { %7491 = vmatpush1.bf16.msra.mxu1 %v10331_v62 }
 0x325   :  { %7492 = vmatprep.subr.bf16.mxu1 %v10339_v50  ;;  %v10389_v50 = vld [vmem:[%s13965_s3 + $0x380] ss:$20 sps:$4 sm:$0xff]  }
 0x326   :  { %7452 = vmatpush2.bf16.msra.mxu0 %v10334_v3  ;;  %v10390_v3 = vld [vmem:[%s13965_s3 + $0x218] ss:$20 sps:$4 sm:$0xff]  }
 0x327   :  { %7453 = vmatprep.subr.bf16.mxu0 %v10342_v53 }
 0x328   :  { %7493 = vmatpush2.bf16.msra.mxu1 %v10337_v5 }
 0x329   :  { %7494 = vmatprep.subr.bf16.mxu1 %v10345_v57 }
 0x32a   :  { %7454 = vmatpush2.bf16.msra.mxu0 %v10340_v55 }
 0x32b   :  { %7455 = vmatprep.subr.bf16.mxu0 %v10348_v63 }
 0x32c   :  { %7495 = vmatpush2.bf16.msra.mxu1 %v10343_v58 }
 0x32d   :  { %7496 = vmatprep.subr.bf16.mxu1 %v10351_v1  ;;  %v10392_v1 = vld [vmem:[%s13965_s3 + $0xd8] ss:$20 sps:$4 sm:$0xff]  }
 0x32e   :  { %7456 = vmatpush2.bf16.msra.mxu0 %v10346_v2 }
 0x32f   :  { %7457 = vmatprep.subr.bf16.mxu0 %v10354_v9 }
 0x330   :  { %7497 = vmatpush2.bf16.msra.mxu1 %v10349_v4  ;;  %v10394_v4 = vld [vmem:[%s13965_s3 + $0x1f0] ss:$20 sps:$4 sm:$0xff]  }
 0x331   :  { %7498 = vmatprep.subr.bf16.mxu1 %v10357_v14  ;;  %v10395_v14 = vld [vmem:[%s13965_s3 + $0x470] ss:$20 sps:$4 sm:$0xff]  }
 0x332   :  { %7458 = vmatpush2.bf16.msra.mxu0 %v10352_v12  ;;  %v10396_v12 = vld [vmem:[%s13965_s3 + $0xb0] ss:$20 sps:$4 sm:$0xff]  }
 0x333   :  { %7459 = vmatprep.subr.bf16.mxu0 %v10360_v13  ;;  %v10398_v13 = vld [vmem:[%s13965_s3 + $0x1c8] ss:$20 sps:$4 sm:$0xff]  }
 0x334   :  { %7499 = vmatpush2.bf16.msra.mxu1 %v10355_v45  ;;  %v10397_v45 = vld [vmem:[%s13965_s3 + $0x330] ss:$20 sps:$4 sm:$0xff]  }
 0x335   :  { %7500 = vmatprep.subr.bf16.mxu1 %v10363_v15  ;;  %v10399_v15 = vld [vmem:[%s13965_s3 + $0x448] ss:$20 sps:$4 sm:$0xff]  }
 0x336   :  { %7460 = vmatpush2.bf16.msra.mxu0 %v10358_v21  ;;  %v10400_v21 = vld [vmem:[%s13965_s3 + $0x88] ss:$20 sps:$4 sm:$0xff]  }
 0x337   :  { %7461 = vmatprep.subr.bf16.mxu0 %v10366_v25  ;;  %v10402_v25 = vld [vmem:[%s13965_s3 + $0x1a0] ss:$20 sps:$4 sm:$0xff]  }
 0x338   :  { %7501 = vmatpush2.bf16.msra.mxu1 %v10361_v54  ;;  %v10401_v54 = vld [vmem:[%s13965_s3 + $0x308] ss:$20 sps:$4 sm:$0xff]  }
 0x339   :  { %7502 = vmatprep.subr.bf16.mxu1 %v10369_v30  ;;  %v10403_v30 = vld [vmem:[%s13965_s3 + $0x420] ss:$20 sps:$4 sm:$0xff]  }
 0x33a   :  { %7462 = vmatpush2.bf16.msra.mxu0 %v10364_v37  ;;  %v10404_v37 = vld [vmem:[%s13965_s3 + $0x60] ss:$20 sps:$4 sm:$0xff]  }
 0x33b   :  { %7463 = vmatprep.subr.bf16.mxu0 %v10372_v56  ;;  %v10406_v56 = vld [vmem:[%s13965_s3 + $0x178] ss:$20 sps:$4 sm:$0xff]  }
 0x33c   :  { %7503 = vmatpush2.bf16.msra.mxu1 %v10367_v26  ;;  %v10405_v26 = vld [vmem:[%s13965_s3 + $0x2e0] ss:$20 sps:$4 sm:$0xff]  }
 0x33d   :  { %7504 = vmatprep.subr.bf16.mxu1 %v10375_v6  ;;  %v10407_v6 = vld [vmem:[%s13965_s3 + $0x3f8] ss:$20 sps:$4 sm:$0xff]  }
 0x33e   :  { %7464 = vmatpush2.bf16.msra.mxu0 %v10370_v27  ;;  %v10408_v27 = vld [vmem:[%s13965_s3 + $0x38] ss:$20 sps:$4 sm:$0xff]  }
 0x33f   :  { %7465 = vmatprep.subr.bf16.mxu0 %v10378_v19  ;;  %v10410_v19 = vld [vmem:[%s13965_s3 + $0x150] ss:$20 sps:$4 sm:$0xff]  }
 0x340   :  { %7505 = vmatpush2.bf16.msra.mxu1 %v10373_v17  ;;  %v10409_v17 = vld [vmem:[%s13965_s3 + $0x2b8] ss:$20 sps:$4 sm:$0xff]  }
 0x341   :  { %7506 = vmatprep.subr.bf16.mxu1 %v10381_v29  ;;  %v10411_v29 = vld [vmem:[%s13965_s3 + $0x3d0] ss:$20 sps:$4 sm:$0xff]  }
 0x342   :  { %7466 = vmatpush2.bf16.msra.mxu0 %v10376_v8  ;;  %v10412_v8 = vld [vmem:[%s13965_s3 + $0x10] ss:$20 sps:$4 sm:$0xff]  }
 0x343   :  { %9361 = vmatprep.subr.bf16.mxu0 %v10382_v16  ;;  %v10414_v16 = vld [vmem:[%s13965_s3 + $0x768] ss:$20 sps:$4 sm:$0xff]  }
 0x344   :  { %7507 = vmatpush2.bf16.msra.mxu1 %v10379_v31  ;;  %v10413_v31 = vld [vmem:[%s13965_s3 + $0x290] ss:$20 sps:$4 sm:$0xff]  }
 0x345   :  { %9383 = vmatprep.subr.bf16.mxu1 %v10383_v10  ;;  %v7223_v38 = vpop.f32.mrf.mxu0  ;;  %7468 = vmatmul.mubr.bf16.vlgmr.msra.gmra.mxu0 %v12601_v61  ;;  %v10415_v10 = vld [vmem:[%s13965_s3 + $0x9e8] ss:$20 sps:$4 sm:$0xff]  }
 0x346   :  { %v7224_v48 = vadd.f32 %v7223_v38, %v3519_v34  ;;  %9362 = vmatpush3.bf16.msra.mxu0 %v10384_v39  ;;  %7549 = vmatprep.mubr.bf16.mxu0 %v11710_v47  ;;  %v10391_v47 = vld [vmem:[%s13965_s3 + $0x498] ss:$20 sps:$4 sm:$0xff]   ;;  %v10416_v34 = vld [vmem:[%s13965_s3 + $0x628] ss:$20 sps:$4 sm:$0xff]   ;;  %v10421_v38 = vld [vmem:[%s13965_s3 + $0x880] ss:$20 sps:$4 sm:$0xff]  }
 0x347   :  { %v7264_v62 = vpop.f32.mrf.mxu1  ;;  %7509 = vmatmul.mubr.bf16.vlgmr.msra.gmra.mxu1 %v12606_v36  ;;  %v7225_v46 = vpop.f32.mrf.mxu0  ;;  %9363 = vmatprep.subr.bf16.mxu0 %v10386_v0  ;;  %v10417_v39 = vld [vmem:[%s13965_s3 + $0x8a8] ss:$20 sps:$4 sm:$0xff]   ;;  %v10420_v0 = vld [vmem:[%s13965_s3 + $0x600] ss:$20 sps:$4 sm:$0xff]  }
 0x348   :  { %9384 = vmatpush3.bf16.msra.mxu1 %v10385_v23  ;;  %v13442_v5 = vadd.f32 %v7264_v62, %v7224_v48  ;;  %7589 = vmatprep.mubr.bf16.mxu1 %v11720_v51  ;;  %v7226_v53 = vadd.f32 %v7225_v46, %v3523_v32  ;;  %v10393_v51 = vld [vmem:[%s13965_s3 + $0x358] ss:$20 sps:$4 sm:$0xff]   ;;  %v10418_v23 = vld [vmem:[%s13965_s3 + $0x740] ss:$20 sps:$4 sm:$0xff]   ;;  %v10427_v48 = vld [vmem:[%s13965_s3 + $0x970] ss:$20 sps:$4 sm:$0xff]  }
 0x349   :  { %v7266_v57 = vpop.f32.mrf.mxu1  ;;  %v7227_v55 = vpop.f32.mrf.mxu0  ;;  %9385 = vmatprep.subr.bf16.mxu1 %v10387_v28  ;;  %v10419_v32 = vld [vmem:[%s13965_s3 + $0x9c0] ss:$20 sps:$4 sm:$0xff]   ;;  %v10425_v28 = vld [vmem:[%s13965_s3 + $0x858] ss:$20 sps:$4 sm:$0xff]   ;;  %v10428_v62 = vld [vmem:[%s13965_s3 + $0x5b0] ss:$20 sps:$4 sm:$0xff]  }
 0x34a   :  { %v13448_v58 = vadd.f32 %v7266_v57, %v7226_v53  ;;  %9364 = vmatpush3.bf16.msra.mxu0 %v10388_v7  ;;  %v10429_v7 = vld [vmem:[%s13965_s3 + $0x830] ss:$20 sps:$4 sm:$0xff]   ;;  %v10430_v46 = vld [vmem:[%s13965_s3 + $0x6c8] ss:$20 sps:$4 sm:$0xff]   ;;  %v10434_v57 = vld [vmem:[%s13965_s3 + $0x6a0] ss:$20 sps:$4 sm:$0xff]  }
 0x34b   :  { %v7268_v63 = vpop.f32.mrf.mxu1  ;;  %v7228_v2 = vpop.f32.mrf.mxu0  ;;  %9365 = vmatprep.subr.bf16.mxu0 %v10390_v3  ;;  %v10432_v3 = vld [vmem:[%s13965_s3 + $0x588] ss:$20 sps:$4 sm:$0xff]   ;;  %v10436_v55 = vld [vmem:[%s13965_s3 + $0x560] ss:$20 sps:$4 sm:$0xff]  }
 0x34c   :  { %9386 = vmatpush3.bf16.msra.mxu1 %v10389_v50  ;;  %v10431_v50 = vld [vmem:[%s13965_s3 + $0x948] ss:$20 sps:$4 sm:$0xff]   ;;  %v10437_v63 = vld [vmem:[%s13965_s3 + $0x7e0] ss:$20 sps:$4 sm:$0xff]   ;;  %v10439_v2 = vld [vmem:[%s13965_s3 + $0x8f8] ss:$20 sps:$4 sm:$0xff]  }
 0x34d   :  { %v7269_v9 = vpop.f32.mrf.mxu1  ;;  %9387 = vmatprep.subr.bf16.mxu1 %v10391_v47  ;;  %v10433_v53 = vld [vmem:[%s13965_s3 + $0x808] ss:$20 sps:$4 sm:$0xff]   ;;  %v10435_v47 = vld [vmem:[%s13965_s3 + $0x920] ss:$20 sps:$4 sm:$0xff]  }
 0x34e   :  { %9366 = vmatpush3.bf16.msra.mxu0 %v10392_v1  ;;  %v10438_v1 = vld [vmem:[%s13965_s3 + $0x678] ss:$20 sps:$4 sm:$0xff]   ;;  %v10442_v9 = vld [vmem:[%s13965_s3 + $0x650] ss:$20 sps:$4 sm:$0xff]  }
 0x34f   :  { %9367 = vmatprep.subr.bf16.mxu0 %v10394_v4  ;;  %v10441_v4 = vld [vmem:[%s13965_s3 + $0x7b8] ss:$20 sps:$4 sm:$0xff]  }
 0x350   :  { %9388 = vmatpush3.bf16.msra.mxu1 %v10393_v51  ;;  %v10440_v51 = vld [vmem:[%s13965_s3 + $0x538] ss:$20 sps:$4 sm:$0xff]  }
 0x351   :  { %9389 = vmatprep.subr.bf16.mxu1 %v10395_v14  ;;  %v10443_v14 = vld [vmem:[%s13965_s3 + $0x8d0] ss:$20 sps:$4 sm:$0xff]  }
 0x352   :  { %9368 = vmatpush3.bf16.msra.mxu0 %v10396_v12  ;;  %v10444_v12 = vld [vmem:[%s13965_s3 + $0x510] ss:$20 sps:$4 sm:$0xff]  }
 0x353   :  { %9369 = vmatprep.subr.bf16.mxu0 %v10398_v13  ;;  %v10446_v13 = vld [vmem:[%s13965_s3 + $0xc68] ss:$20 sps:$4 sm:$0xff]  }
 0x354   :  { %9390 = vmatpush3.bf16.msra.mxu1 %v10397_v45  ;;  %v10445_v45 = vld [vmem:[%s13965_s3 + $0x790] ss:$20 sps:$4 sm:$0xff]  }
 0x355   :  { %9391 = vmatprep.subr.bf16.mxu1 %v10399_v15  ;;  %v10447_v15 = vld [vmem:[%s13965_s3 + $0xee8] ss:$20 sps:$4 sm:$0xff]  }
 0x356   :  { %9370 = vmatpush3.bf16.msra.mxu0 %v10400_v21  ;;  %v10448_v21 = vld [vmem:[%s13965_s3 + $0xb28] ss:$20 sps:$4 sm:$0xff]  }
 0x357   :  { %9371 = vmatprep.subr.bf16.mxu0 %v10402_v25  ;;  %v10450_v25 = vld [vmem:[%s13965_s3 + $0xc40] ss:$20 sps:$4 sm:$0xff]  }
 0x358   :  { %9392 = vmatpush3.bf16.msra.mxu1 %v10401_v54  ;;  %v10449_v54 = vld [vmem:[%s13965_s3 + $0xda8] ss:$20 sps:$4 sm:$0xff]  }
 0x359   :  { %9393 = vmatprep.subr.bf16.mxu1 %v10403_v30 }
 0x35a   :  { %9372 = vmatpush3.bf16.msra.mxu0 %v10404_v37  ;;  %v10451_v37 = vld [vmem:[%s13965_s3 + $0xec0] ss:$20 sps:$4 sm:$0xff]  }
 0x35b   :  { %9373 = vmatprep.subr.bf16.mxu0 %v10406_v56 }
 0x35c   :  { %9394 = vmatpush3.bf16.msra.mxu1 %v10405_v26 }
 0x35d   :  { %9395 = vmatprep.subr.bf16.mxu1 %v10407_v6  ;;  %v10452_v6 = vld [vmem:[%s13965_s3 + $0xb00] ss:$20 sps:$4 sm:$0xff]  }
 0x35e   :  { %9374 = vmatpush3.bf16.msra.mxu0 %v10408_v27 }
 0x35f   :  { %9375 = vmatprep.subr.bf16.mxu0 %v10410_v19 }
 0x360   :  { %9396 = vmatpush3.bf16.msra.mxu1 %v10409_v17 }
 0x361   :  { %9397 = vmatprep.subr.bf16.mxu1 %v10411_v29 }
 0x362   :  { %9376 = vmatpush3.bf16.msra.mxu0 %v10412_v8 }
 0x363   :  { %9405 = vmatprep.subr.bf16.mxu0 %v10414_v16  ;;  %v10456_v16 = vld [vmem:[%s13965_s3 + $0xad8] ss:$20 sps:$4 sm:$0xff]  }
 0x364   :  { %9398 = vmatpush3.bf16.msra.mxu1 %v10413_v31 }
 0x365   :  { %9427 = vmatprep.subr.bf16.mxu1 %v10415_v10  ;;  %7550 = vmatmul.mubr.bf16.vlgmr.msra.gmra.mxu0 %v11940_v59  ;;  %v10422_v59 = vld [vmem:[%s13965_s3 + $0x718] ss:$20 sps:$4 sm:$0xff]   ;;  %v10458_v10 = vld [vmem:[%s13965_s3 + $0xbf0] ss:$20 sps:$4 sm:$0xff]  }
 0x366   :  { %9406 = vmatpush3.bf16.msra.mxu0 %v10416_v34  ;;  %7629 = vmatprep.mubr.bf16.mxu0 %v11947_v41  ;;  %v10424_v41 = vld [vmem:[%s13965_s3 + $0x5d8] ss:$20 sps:$4 sm:$0xff]  }
 0x367   :  { %7590 = vmatmul.mubr.bf16.vlgmr.msra.gmra.mxu1 %v11942_v40  ;;  %9407 = vmatprep.subr.bf16.mxu0 %v10418_v23  ;;  %v10423_v40 = vld [vmem:[%s13965_s3 + $0x998] ss:$20 sps:$4 sm:$0xff]   ;;  %v10460_v23 = vld [vmem:[%s13965_s3 + $0xab0] ss:$20 sps:$4 sm:$0xff]  }
 0x368   :  { %9428 = vmatpush3.bf16.msra.mxu1 %v10417_v39  ;;  %7669 = vmatprep.mubr.bf16.mxu1 %v11956_v43  ;;  %v10426_v43 = vld [vmem:[%s13965_s3 + $0x6f0] ss:$20 sps:$4 sm:$0xff]  }
 0x369   :  { %9429 = vmatprep.subr.bf16.mxu1 %v10419_v32  ;;  %v10459_v39 = vld [vmem:[%s13965_s3 + $0xe70] ss:$20 sps:$4 sm:$0xff]  }
 0x36a   :  { %9408 = vmatpush3.bf16.msra.mxu0 %v10420_v0  ;;  %v10461_v32 = vld [vmem:[%s13965_s3 + $0xd30] ss:$20 sps:$4 sm:$0xff]   ;;  %v10462_v0 = vld [vmem:[%s13965_s3 + $0xbc8] ss:$20 sps:$4 sm:$0xff]  }
 0x36b   :  { %9409 = vmatprep.subr.bf16.mxu0 %v10422_v59  ;;  %v10464_v59 = vld [vmem:[%s13965_s3 + $0xa88] ss:$20 sps:$4 sm:$0xff]  }
 0x36c   :  { %9430 = vmatpush3.bf16.msra.mxu1 %v10421_v38  ;;  %v10463_v38 = vld [vmem:[%s13965_s3 + $0xe48] ss:$20 sps:$4 sm:$0xff]  }
 0x36d   :  { %9431 = vmatprep.subr.bf16.mxu1 %v10423_v40  ;;  %v10465_v40 = vld [vmem:[%s13965_s3 + $0xd08] ss:$20 sps:$4 sm:$0xff]  }
 0x36e   :  { %9410 = vmatpush3.bf16.msra.mxu0 %v10424_v41  ;;  %v10466_v41 = vld [vmem:[%s13965_s3 + $0xba0] ss:$20 sps:$4 sm:$0xff]  }
 0x36f   :  { %9411 = vmatprep.subr.bf16.mxu0 %v10426_v43  ;;  %v10468_v43 = vld [vmem:[%s13965_s3 + $0xa60] ss:$20 sps:$4 sm:$0xff]  }
 0x370   :  { %9432 = vmatpush3.bf16.msra.mxu1 %v10425_v28  ;;  %v10467_v28 = vld [vmem:[%s13965_s3 + $0xe20] ss:$20 sps:$4 sm:$0xff]  }
 0x371   :  { %9433 = vmatprep.subr.bf16.mxu1 %v10427_v48  ;;  %v10469_v48 = vld [vmem:[%s13965_s3 + $0xce0] ss:$20 sps:$4 sm:$0xff]  }
 0x372   :  { %9412 = vmatpush3.bf16.msra.mxu0 %v10428_v62  ;;  %v10470_v62 = vld [vmem:[%s13965_s3 + $0xb78] ss:$20 sps:$4 sm:$0xff]  }
 0x373   :  { %9413 = vmatprep.subr.bf16.mxu0 %v10430_v46  ;;  %v10472_v46 = vld [vmem:[%s13965_s3 + $0xa38] ss:$20 sps:$4 sm:$0xff]  }
 0x374   :  { %9434 = vmatpush3.bf16.msra.mxu1 %v10429_v7  ;;  %v10471_v7 = vld [vmem:[%s13965_s3 + $0xdf8] ss:$20 sps:$4 sm:$0xff]  }
 0x375   :  { %9435 = vmatprep.subr.bf16.mxu1 %v10431_v50  ;;  %v10473_v50 = vld [vmem:[%s13965_s3 + $0xcb8] ss:$20 sps:$4 sm:$0xff]  }
 0x376   :  { %9414 = vmatpush3.bf16.msra.mxu0 %v10432_v3  ;;  %v10474_v3 = vld [vmem:[%s13965_s3 + $0xb50] ss:$20 sps:$4 sm:$0xff]  }
 0x377   :  { %9415 = vmatprep.subr.bf16.mxu0 %v10434_v57  ;;  %v10476_v57 = vld [vmem:[%s13965_s3 + $0xa10] ss:$20 sps:$4 sm:$0xff]  }
 0x378   :  { %9436 = vmatpush3.bf16.msra.mxu1 %v10433_v53  ;;  %v10475_v53 = vld [vmem:[%s13965_s3 + $0xdd0] ss:$20 sps:$4 sm:$0xff]  }
 0x379   :  { %9437 = vmatprep.subr.bf16.mxu1 %v10435_v47  ;;  %v10477_v47 = vld [vmem:[%s13965_s3 + $0xc90] ss:$20 sps:$4 sm:$0xff]  }
 0x37a   :  { %9416 = vmatpush3.bf16.msra.mxu0 %v10436_v55  ;;  %v10478_v55 = vld [vmem:[%s13965_s3 + $0x1168] ss:$20 sps:$4 sm:$0xff]  }
 0x37b   :  { %9417 = vmatprep.subr.bf16.mxu0 %v10438_v1  ;;  %v10480_v1 = vld [vmem:[%s13965_s3 + $0x1028] ss:$20 sps:$4 sm:$0xff]  }
 0x37c   :  { %9438 = vmatpush3.bf16.msra.mxu1 %v10437_v63  ;;  %v10479_v63 = vld [vmem:[%s13965_s3 + $0x13e8] ss:$20 sps:$4 sm:$0xff]  }
 0x37d   :  { %9439 = vmatprep.subr.bf16.mxu1 %v10439_v2  ;;  %v10481_v2 = vld [vmem:[%s13965_s3 + $0x12a8] ss:$20 sps:$4 sm:$0xff]  }
 0x37e   :  { %9418 = vmatpush3.bf16.msra.mxu0 %v10440_v51  ;;  %v10482_v51 = vld [vmem:[%s13965_s3 + $0x1140] ss:$20 sps:$4 sm:$0xff]  }
 0x37f   :  { %9419 = vmatprep.subr.bf16.mxu0 %v10442_v9  ;;  %v10484_v9 = vld [vmem:[%s13965_s3 + $0x1000] ss:$20 sps:$4 sm:$0xff]  }
 0x380   :  { %9440 = vmatpush3.bf16.msra.mxu1 %v10441_v4  ;;  %v10483_v4 = vld [vmem:[%s13965_s3 + $0x13c0] ss:$20 sps:$4 sm:$0xff]  }
 0x381   :  { %9441 = vmatprep.subr.bf16.mxu1 %v10443_v14  ;;  %v10485_v14 = vld [vmem:[%s13965_s3 + $0x1280] ss:$20 sps:$4 sm:$0xff]  }
 0x382   :  { %9420 = vmatpush3.bf16.msra.mxu0 %v10444_v12  ;;  %v10489_v12 = vld [vmem:[%s13965_s3 + $0x1258] ss:$20 sps:$4 sm:$0xff]  }
 0x383   :  { %9449 = vmatprep.subr.bf16.mxu0 %v10446_v13  ;;  %v10492_v13 = vld [vmem:[%s13965_s3 + $0xfb0] ss:$20 sps:$4 sm:$0xff]  }
 0x384   :  { %9442 = vmatpush3.bf16.msra.mxu1 %v10445_v45  ;;  %v10491_v45 = vld [vmem:[%s13965_s3 + $0x1370] ss:$20 sps:$4 sm:$0xff]  }
 0x385   :  { %9471 = vmatprep.subr.bf16.mxu1 %v10447_v15  ;;  %v7305_v30 = vpop.f32.mrf.mxu0  ;;  %7630 = vmatmul.mubr.bf16.vlgmr.msra.gmra.mxu0 %v12165_v52  ;;  %v10453_v52 = vld [vmem:[%s13965_s3 + $0xd80] ss:$20 sps:$4 sm:$0xff]   ;;  %v10493_v15 = vld [vmem:[%s13965_s3 + $0x1230] ss:$20 sps:$4 sm:$0xff]  }
 0x386   :  { %v7306_v26 = vadd.f32 %v7305_v30, %v13442_v5  ;;  %9450 = vmatpush3.bf16.msra.mxu0 %v10448_v21  ;;  %7709 = vmatprep.mubr.bf16.mxu0 %v12172_v49  ;;  %v10454_v5 = vld [vmem:[%s13965_s3 + $0xc18] ss:$20 sps:$4 sm:$0xff]   ;;  %v10494_v21 = vld [vmem:[%s13965_s3 + $0x10c8] ss:$20 sps:$4 sm:$0xff]  }
 0x387   :  { %v7346_v56 = vpop.f32.mrf.mxu1  ;;  %7670 = vmatmul.mubr.bf16.vlgmr.msra.gmra.mxu1 %v12170_v42  ;;  %v7307_v27 = vpop.f32.mrf.mxu0  ;;  %9451 = vmatprep.subr.bf16.mxu0 %v10450_v25  ;;  %v10455_v49 = vld [vmem:[%s13965_s3 + $0xe98] ss:$20 sps:$4 sm:$0xff]   ;;  %v10496_v25 = vld [vmem:[%s13965_s3 + $0xf88] ss:$20 sps:$4 sm:$0xff]  }
 0x388   :  { %9472 = vmatpush3.bf16.msra.mxu1 %v10449_v54  ;;  %v13647_v17 = vadd.f32 %v7346_v56, %v7306_v26  ;;  %7749 = vmatprep.mubr.bf16.mxu1 %v12181_v44  ;;  %v7308_v42 = vadd.f32 %v7307_v27, %v13448_v58  ;;  %v10457_v58 = vld [vmem:[%s13965_s3 + $0xd58] ss:$20 sps:$4 sm:$0xff]   ;;  %v10495_v54 = vld [vmem:[%s13965_s3 + $0x1348] ss:$20 sps:$4 sm:$0xff]   ;;  %v10499_v26 = vld [vmem:[%s13965_s3 + $0x1320] ss:$20 sps:$4 sm:$0xff]  }
 0x389   :  { %v7348_v19 = vpop.f32.mrf.mxu1  ;;  %v7309_v29 = vpop.f32.mrf.mxu0  ;;  %9473 = vmatprep.subr.bf16.mxu1 %v10451_v37  ;;  %v10497_v30 = vld [vmem:[%s13965_s3 + $0x1208] ss:$20 sps:$4 sm:$0xff]   ;;  %v10498_v37 = vld [vmem:[%s13965_s3 + $0x10a0] ss:$20 sps:$4 sm:$0xff]   ;;  %v10502_v27 = vld [vmem:[%s13965_s3 + $0x1078] ss:$20 sps:$4 sm:$0xff]  }
 0x38a   :  { %v13654_v8 = vadd.f32 %v7348_v19, %v7308_v42  ;;  %9452 = vmatpush3.bf16.msra.mxu0 %v10452_v6  ;;  %v10500_v56 = vld [vmem:[%s13965_s3 + $0xf60] ss:$20 sps:$4 sm:$0xff]   ;;  %v10505_v42 = vld [vmem:[%s13965_s3 + $0x11b8] ss:$20 sps:$4 sm:$0xff]   ;;  %v10506_v19 = vld [vmem:[%s13965_s3 + $0x1050] ss:$20 sps:$4 sm:$0xff]  }
 0x38b   :  { %v7350_v31 = vpop.f32.mrf.mxu1  ;;  %v7310_v44 = vpop.f32.mrf.mxu0  ;;  %9453 = vmatprep.subr.bf16.mxu0 %v10454_v5  ;;  %v10501_v6 = vld [vmem:[%s13965_s3 + $0x11e0] ss:$20 sps:$4 sm:$0xff]   ;;  %v10504_v5 = vld [vmem:[%s13965_s3 + $0xf38] ss:$20 sps:$4 sm:$0xff]   ;;  %v10508_v29 = vld [vmem:[%s13965_s3 + $0xf10] ss:$20 sps:$4 sm:$0xff]  }
 0x38c   :  { %9474 = vmatpush3.bf16.msra.mxu1 %v10453_v52  ;;  %v10503_v52 = vld [vmem:[%s13965_s3 + $0x12f8] ss:$20 sps:$4 sm:$0xff]   ;;  %v10509_v31 = vld [vmem:[%s13965_s3 + $0x1190] ss:$20 sps:$4 sm:$0xff]  }
 0x38d   :  { %v7351_v34 = vpop.f32.mrf.mxu1  ;;  %9475 = vmatprep.subr.bf16.mxu1 %v10455_v49  ;;  %v10507_v49 = vld [vmem:[%s13965_s3 + $0x12d0] ss:$20 sps:$4 sm:$0xff]   ;;  %v10526_v44 = vld [vmem:[%s13967_s5 + $0xf8] sm:$0xff]  }
 0x38e   :  { %9454 = vmatpush3.bf16.msra.mxu0 %v10456_v16  ;;  %v10510_v16 = vld [vmem:[%s13967_s5 + $0x78] sm:$0xff]   ;;  %v10512_v34 = vld [vmem:[%s13967_s5 + $0x70] sm:$0xff]  }
 0x38f   :  { %9455 = vmatprep.subr.bf16.mxu0 %v10458_v10  ;;  %v10511_v10 = vld [vmem:[%s13967_s5 + $0x38] sm:$0xff]  }
 0x390   :  { %9476 = vmatpush3.bf16.msra.mxu1 %v10457_v58  ;;  %v7838_v58 = vmax.f32 %v13239_v18, 0.0  ;;  %v10528_v18 = vld [vmem:[%s13967_s5 + $0xf0] sm:$0xff]  }
 0x391   :  { %9477 = vmatprep.subr.bf16.mxu1 %v10459_v39  ;;  %v10527_v39 = vld [vmem:[%s13967_s5 + $0xb8] sm:$0xff]  }
 0x392   :  { %9456 = vmatpush3.bf16.msra.mxu0 %v10460_v23  ;;  %v7843_v23 = vpack.c.bf16 %v7838_v58, %v7838_v58  ;;  %v10544_v58 = vld [vmem:[%s13967_s5 + $0x108] sm:$0xff]  }
 0x393   :  { %9457 = vmatprep.subr.bf16.mxu0 %v10462_v0 }
 0x394   :  { %9478 = vmatpush3.bf16.msra.mxu1 %v10461_v32 }
 0x395   :  { %9479 = vmatprep.subr.bf16.mxu1 %v10463_v38 }
 0x396   :  { %9458 = vmatpush3.bf16.msra.mxu0 %v10464_v59  ;;  %v10513_v59 = vld [vmem:[%s13967_s5 + $0x30] sm:$0xff]  }
 0x397   :  { %9459 = vmatprep.subr.bf16.mxu0 %v10466_v41 }
 0x398   :  { %9480 = vmatpush3.bf16.msra.mxu1 %v10465_v40 }
 0x399   :  { %9481 = vmatprep.subr.bf16.mxu1 %v10467_v28 }
 0x39a   :  { %9460 = vmatpush3.bf16.msra.mxu0 %v10468_v43  ;;  %v10530_v43 = vld [vmem:[%s13967_s5 + $0xe8] sm:$0xff]  }
 0x39b   :  { %9461 = vmatprep.subr.bf16.mxu0 %v10470_v62  ;;  %v10515_v62 = vld [vmem:[%s13967_s5 + $0x28] sm:$0xff]  }
 0x39c   :  { %9482 = vmatpush3.bf16.msra.mxu1 %v10469_v48 }
 0x39d   :  { %9483 = vmatprep.subr.bf16.mxu1 %v10471_v7 }
 0x39e   :  { %9462 = vmatpush3.bf16.msra.mxu0 %v10472_v46  ;;  %v10516_v46 = vld [vmem:[%s13967_s5 + $0x60] sm:$0xff]  }
 0x39f   :  { %9463 = vmatprep.subr.bf16.mxu0 %v10474_v3  ;;  %v10531_v3 = vld [vmem:[%s13967_s5 + $0xa8] sm:$0xff]  }
 0x3a0   :  { %9484 = vmatpush3.bf16.msra.mxu1 %v10473_v50 }
 0x3a1   :  { %9485 = vmatprep.subr.bf16.mxu1 %v10475_v53  ;;  %v10532_v53 = vld [vmem:[%s13967_s5 + $0xe0] sm:$0xff]  }
 0x3a2   :  { %9464 = vmatpush3.bf16.msra.mxu0 %v10476_v57  ;;  %v10517_v57 = vld [vmem:[%s13967_s5 + $0x20] sm:$0xff]  }
 0x3a3   :  { %9493 = vmatprep.subr.bf16.mxu0 %v10478_v55  ;;  %v10533_v55 = vld [vmem:[%s13967_s5 + $0xa0] sm:$0xff]  }
 0x3a4   :  { %9486 = vmatpush3.bf16.msra.mxu1 %v10477_v47  ;;  %v10518_v47 = vld [vmem:[%s13967_s5 + $0x58] sm:$0xff]  }
 0x3a5   :  { %9515 = vmatprep.subr.bf16.mxu1 %v10479_v63  ;;  %7710 = vmatmul.mubr.bf16.vlgmr.msra.gmra.mxu0 %v12378_v35  ;;  %v10486_v35 = vld [vmem:[%s13965_s3 + $0x1118] ss:$20 sps:$4 sm:$0xff]  }
 0x3a6   :  { %9494 = vmatpush3.bf16.msra.mxu0 %v10480_v1  ;;  %7789 = vmatprep.mubr.bf16.mxu0 %v12391_v24  ;;  %v10488_v24 = vld [vmem:[%s13965_s3 + $0xfd8] ss:$20 sps:$4 sm:$0xff]  }
 0x3a7   :  { %7750 = vmatmul.mubr.bf16.vlgmr.msra.gmra.mxu1 %v12383_v22  ;;  %9495 = vmatprep.subr.bf16.mxu0 %v10482_v51  ;;  %v10487_v22 = vld [vmem:[%s13965_s3 + $0x1398] ss:$20 sps:$4 sm:$0xff]  }
 0x3a8   :  { %9516 = vmatpush3.bf16.msra.mxu1 %v10481_v2  ;;  %7829 = vmatprep.mubr.bf16.mxu1 %v12430_v20  ;;  %v10490_v20 = vld [vmem:[%s13965_s3 + $0x10f0] ss:$20 sps:$4 sm:$0xff]   ;;  %v10534_v63 = vld [vmem:[%s13967_s5 + $0xd8] sm:$0xff]  }
 0x3a9   :  { %9517 = vmatprep.subr.bf16.mxu1 %v10483_v4  ;;  %v10519_v1 = vld [vmem:[%s13967_s5 + $0x18] sm:$0xff]   ;;  %v10520_v2 = vld [vmem:[%s13967_s5 + $0x50] sm:$0xff]  }
 0x3aa   :  { %9496 = vmatpush3.bf16.msra.mxu0 %v10484_v9  ;;  %v10535_v51 = vld [vmem:[%s13967_s5 + $0x98] sm:$0xff]   ;;  %v10536_v4 = vld [vmem:[%s13967_s5 + $0xd0] sm:$0xff]  }
 0x3ab   :  { %9497 = vmatprep.subr.bf16.mxu0 %v10486_v35  ;;  %v10521_v9 = vld [vmem:[%s13967_s5 + $0x10] sm:$0xff]  }
 0x3ac   :  { %9518 = vmatpush3.bf16.msra.mxu1 %v10485_v14  ;;  %v10522_v14 = vld [vmem:[%s13967_s5 + $0x48] sm:$0xff]   ;;  %v10537_v35 = vld [vmem:[%s13967_s5 + $0x90] sm:$0xff]  }
 0x3ad   :  { %9519 = vmatprep.subr.bf16.mxu1 %v10487_v22  ;;  %v10538_v22 = vld [vmem:[%s13967_s5 + $0xc8] sm:$0xff]  }
 0x3ae   :  { %9498 = vmatpush3.bf16.msra.mxu0 %v10488_v24  ;;  %v10523_v24 = vld [vmem:[%s13967_s5 + $0x8] sm:$0xff]  }
 0x3af   :  { %9499 = vmatprep.subr.bf16.mxu0 %v10490_v20  ;;  %v10539_v20 = vld [vmem:[%s13967_s5 + $0x88] sm:$0xff]  }
 0x3b0   :  { %9520 = vmatpush3.bf16.msra.mxu1 %v10489_v12  ;;  %v10524_v12 = vld [vmem:[%s13967_s5 + $0x40] sm:$0xff]  }
 0x3b1   :  { %9521 = vmatprep.subr.bf16.mxu1 %v10491_v45  ;;  %v10540_v45 = vld [vmem:[%s13967_s5 + $0xc0] sm:$0xff]  }
 0x3b2   :  { %9500 = vmatpush3.bf16.msra.mxu0 %v10492_v13  ;;  %v10525_v13 = vld [vmem:[%s13967_s5] sm:$0xff]  }
 0x3b3   :  { %9501 = vmatprep.subr.bf16.mxu0 %v10494_v21  ;;  %v10541_v21 = vld [vmem:[%s13967_s5 + $0x80] sm:$0xff]  }
 0x3b4   :  { %9522 = vmatpush3.bf16.msra.mxu1 %v10493_v15  ;;  %v7837_v15 = vmax.f32 %v13232_v11, 0.0 }
 0x3b5   :  { %9523 = vmatprep.subr.bf16.mxu1 %v10495_v54 }
 0x3b6   :  { %9502 = vmatpush3.bf16.msra.mxu0 %v10496_v25  ;;  %v7842_v54 = vpack.c.bf16 %v7837_v15, %v7837_v15  ;;  %v10542_v25 = vld [vmem:[%s13967_s5 + $0x118] ss:$0 sps:$4 sm:$0x11]  }
 0x3b7   :  { %9503 = vmatprep.subr.bf16.mxu0 %v10498_v37  ;;  %v8144_v11 = vsel %vm8142_vm1, %v10542_v25, 0 }
 0x3b8   :  { %9524 = vmatpush3.bf16.msra.mxu1 %v10497_v30  ;;  %v10574_v30 = vmov 0.0  }
 0x3b9   :  { %9525 = vmatprep.subr.bf16.mxu1 %v10499_v26 }
 0x3ba   :  { %9504 = vmatpush3.bf16.msra.mxu0 %v10500_v56 }
 0x3bb   :  { %9505 = vmatprep.subr.bf16.mxu0 %v10502_v27 }
 0x3bc   :  { %9526 = vmatpush3.bf16.msra.mxu1 %v10501_v6 }
 0x3bd   :  { %9527 = vmatprep.subr.bf16.mxu1 %v10503_v52 }
 0x3be   :  { %9506 = vmatpush3.bf16.msra.mxu0 %v10504_v5  ;;  %v10543_v5 = vld [vmem:[%s13967_s5 + $0x110] sm:$0xff]  }
 0x3bf   :  { %9507 = vmatprep.subr.bf16.mxu0 %v10506_v19 }
 0x3c0   :  { %9528 = vmatpush3.bf16.msra.mxu1 %v10505_v42 }
 0x3c1   :  { %9529 = vmatprep.subr.bf16.mxu1 %v10507_v49 }
 0x3c2   :  { %9508 = vmatpush3.bf16.msra.mxu0 %v10508_v29 }
 0x3c3   :  { %9537 = vmatprep.subr.bf16.mxu0 %v10510_v16 }
 0x3c4   :  { %9530 = vmatpush3.bf16.msra.mxu1 %v10509_v31 }
 0x3c5   :  { %9559 = vmatprep.subr.bf16.mxu1 %v10526_v44  ;;  %v7387_v32 = vpop.f32.mrf.mxu0  ;;  %7790 = vmatmul.mubr.bf16.vlgmr.msra.gmra.mxu0 %v12601_v61  ;;  %v10514_v61 = vld [vmem:[%s13967_s5 + $0x68] sm:$0xff]  }
 0x3c6   :  { %v7388_v0 = vadd.f32 %v7387_v32, %v13647_v17  ;;  %9538 = vmatpush3.bf16.msra.mxu0 %v10511_v10  ;;  %8178 = vmatprep.mubr.bf16.mxu0 %v7843_v23  ;;  %v10545_v32 = vld [vmem:[%s13967_s5 + $0x100] sm:$0xff]  }
 0x3c7   :  { %v7428_v38 = vpop.f32.mrf.mxu1  ;;  %7830 = vmatmul.mubr.bf16.vlgmr.msra.gmra.mxu1 %v12606_v36  ;;  %v13847_v40 = vpop.f32.mrf.mxu0  ;;  %9539 = vmatprep.subr.bf16.mxu0 %v10512_v34  ;;  %v10529_v36 = vld [vmem:[%s13967_s5 + $0xb0] sm:$0xff]  }
 0x3c8   :  { %v13852_v41 = vadd.f32 %v7428_v38, %v7388_v0  ;;  %9560 = vmatpush3.bf16.msra.mxu1 %v10527_v39  ;;  %v7390_v37 = vadd.f32 %v13847_v40, %v13654_v8  ;;  %v3527_v38 = vrot.slane %v13412_v33, %v11747_v60  ;;  %v10546_v60 = vld [vmem:[%s13969_s7 + $0x8] sm:$0xff]  }
 0x3c9   :  { %v13854_v28 = vpop.f32.mrf.mxu1  ;;  %v7391_v17 = vpop.f32.mrf.mxu0  ;;  %9561 = vmatprep.subr.bf16.mxu1 %v10528_v18 }
 0x3ca   :  { %9540 = vmatpush3.bf16.msra.mxu0 %v10513_v59  ;;  %v7431_v56 = vadd.f32 %v13854_v28, %v7390_v37 }
 0x3cb   :  { %v7432_v48 = vpop.f32.mrf.mxu1  ;;  %v7392_v7 = vpop.f32.mrf.mxu0  ;;  %9541 = vmatprep.subr.bf16.mxu0 %v10514_v61 }
 0x3cc   :  { %9562 = vmatpush3.bf16.msra.mxu1 %v10529_v36 }
 0x3cd   :  { %v7433_v50 = vpop.f32.mrf.mxu1  ;;  %9563 = vmatprep.subr.bf16.mxu1 %v10530_v43 }
 0x3ce   :  { %9542 = vmatpush3.bf16.msra.mxu0 %v10515_v62 }
 0x3cf   :  { %9543 = vmatprep.subr.bf16.mxu0 %v10516_v46 }
 0x3d0   :  { %9564 = vmatpush3.bf16.msra.mxu1 %v10531_v3 }
 0x3d1   :  { %9565 = vmatprep.subr.bf16.mxu1 %v10532_v53 }
 0x3d2   :  { %9544 = vmatpush3.bf16.msra.mxu0 %v10517_v57 }
 0x3d3   :  { %9545 = vmatprep.subr.bf16.mxu0 %v10518_v47 }
 0x3d4   :  { %9566 = vmatpush3.bf16.msra.mxu1 %v10533_v55 }
 0x3d5   :  { %9567 = vmatprep.subr.bf16.mxu1 %v10534_v63 }
 0x3d6   :  { %9546 = vmatpush3.bf16.msra.mxu0 %v10519_v1 }
 0x3d7   :  { %9547 = vmatprep.subr.bf16.mxu0 %v10520_v2 }
 0x3d8   :  { %9568 = vmatpush3.bf16.msra.mxu1 %v10535_v51 }
 0x3d9   :  { %9569 = vmatprep.subr.bf16.mxu1 %v10536_v4 }
 0x3da   :  { %9548 = vmatpush3.bf16.msra.mxu0 %v10521_v9 }
 0x3db   :  { %9549 = vmatprep.subr.bf16.mxu0 %v10522_v14 }
 0x3dc   :  { %9570 = vmatpush3.bf16.msra.mxu1 %v10537_v35 }
 0x3dd   :  { %9571 = vmatprep.subr.bf16.mxu1 %v10538_v22 }
 0x3de   :  { %9550 = vmatpush3.bf16.msra.mxu0 %v10523_v24 }
 0x3df   :  { %9551 = vmatprep.subr.bf16.mxu0 %v10524_v12 }
 0x3e0   :  { %9572 = vmatpush3.bf16.msra.mxu1 %v10539_v20 }
 0x3e1   :  { %9573 = vmatprep.subr.bf16.mxu1 %v10540_v45 }
 0x3e2   :  { %9552 = vmatpush3.bf16.msra.mxu0 %v10525_v13 }
 0x3e3   :  { %9589 = vmatprep.subr.bf16.mxu0 %v10574_v30 }
 0x3e4   :  { %9574 = vmatpush3.bf16.msra.mxu1 %v10541_v21 }
 0x3e5   :  { %8179 = vmatmul.mubr.bf16.vlgmr.msra.gmra.mxu0 %v7842_v54  ;;  %9601 = vmatprep.subr.bf16.mxu1 %v10574_v30 }
 0x3e6   :  { %9590 = vmatpush3.bf16.msra.mxu0 %v8144_v11  ;;  %9597 = vmatprep.mubr.msk.bf16.mxu0 %vm10575_vm2, %v10574_v30 }
 0x3e7   :  { %9591 = vmatprep.subr.bf16.mxu0 %v10574_v30 }
 0x3ea   :  { %9592 = vmatpush3.bf16.msra.mxu0 %v10543_v5 }
 0x3eb   :  { %9593 = vmatprep.subr.bf16.mxu0 %v10574_v30 }
 0x3ee   :  { %9594 = vmatpush3.bf16.msra.mxu0 %v10544_v58 }
 0x3ef   :  { %9595 = vmatprep.subr.bf16.mxu0 %v10574_v30 }
 0x3f2   :  { %9596 = vmatpush3.bf16.msra.mxu0 %v10545_v32 }
 0x405   :  { %v7469_v26 = vpop.f32.mrf.mxu0 }
 0x406   :  { %v7470_v6 = vadd.f32 %v7469_v26, %v13852_v41 }
 0x407   :  { %v7510_v27 = vpop.f32.mrf.mxu1  ;;  %v7471_v52 = vpop.f32.mrf.mxu0 }
 0x408   :  { %v7511_v42 = vadd.f32 %v7510_v27, %v7470_v6  ;;  %v7472_v19 = vadd.f32 %v7471_v52, %v7431_v56 }
 0x409   :  { %v7512_v49 = vpop.f32.mrf.mxu1  ;;  %v7473_v29 = vpop.f32.mrf.mxu0 }
 0x40a   :  { %v7513_v31 = vadd.f32 %v7512_v49, %v7472_v19  ;;  %v7839_v8 = vmax.f32 %v7511_v42, 0.0 }
 0x40b   :  { %v7514_v16 = vpop.f32.mrf.mxu1  ;;  %v7474_v44 = vpop.f32.mrf.mxu0 }
 0x40c   :  { %v7840_v10 = vmax.f32 %v7513_v31, 0.0  ;;  %v7844_v23 = vpack.c.bf16 %v7839_v8, %v7839_v8  ;;  %v9319_v44 = vld [vmem:[%s13968_s6] ss:$0 sm:$0xff] }
 0x40d   :  { %v7515_v34 = vpop.f32.mrf.mxu1 }
 0x40e   :  { %v7845_v39 = vpack.c.bf16 %v7840_v10, %v7840_v10 }
 0x410   :  { %8218 = vmatprep.mubr.bf16.mxu1 %v7845_v39 }
 0x411   :  { %8219 = vmatmul.mubr.bf16.vlgmr.msra.gmra.mxu1 %v7844_v23 }
 0x412   :  { %9605 = vmatprep.mubr.msk.bf16.mxu1 %vm10575_vm2, %v10574_v30  ;;  %9602 = vmatpush3.bf16.msra.mxu1 %v10546_v60 }
 0x413   :  { %9603 = vmatprep.subr.bf16.mxu1 %v10574_v30 }
 0x425   :  { %v9377_v18 = vpop.f32.mrf.mxu0 }
 0x427   :  { %v9399_v0 = vpop.f32.mrf.mxu1  ;;  %v9378_v59 = vpop.f32.mrf.mxu0 }
 0x428   :  { %v9379_v40 = vadd.f32 %v9378_v59, %v9377_v18  ;;  %v10547_v18 = vld [vmem:[%s13969_s7] sm:$0xff]   ;;  %s10551_s7 = scalar_lea.vmem %s8344_s24, 64 }
 0x429   :  { %v9400_v61 = vpop.f32.mrf.mxu1  ;;  %v9380_v28 = vpop.f32.mrf.mxu0  ;;  %9604 = vmatpush3.bf16.msra.mxu1 %v10547_v18  ;;  %p10552_p0 = scmp.ne.s32.totalorder %s8344_s24, %s10551_s7  ;;  %p10557_p2 = scmp.lt.s32.totalorder %s10551_s7, %s10551_s7 }
 0x42a   :  { %v9401_v41 = vadd.f32 %v9400_v61, %v9399_v0  ;;  %v7552_v36 = vadd.f32 %v9379_v40, %v3527_v38 }
 0x42b   :  { %v9402_v17 = vpop.f32.mrf.mxu1  ;;  %v9381_v43 = vpop.f32.mrf.mxu0  ;;  %p10558_p3 = por %p10557_p2, %p10556_p1 }
 0x42c   :  { %v7592_v48 = vadd.f32 %v9401_v41, %v7552_v36  ;;  %v9357_v17 = vld [vmem:[%s13970_s8] ss:$0 sm:$0xff] }
 0x42d   :  { %v9403_v62 = vpop.f32.mrf.mxu1  ;;  %p10559_p4 = pnand %p10558_p3, %p10552_p0 }
 0x445   :  { %v9421_v7 = vpop.f32.mrf.mxu0 }
 0x447   :  { %v9443_v46 = vpop.f32.mrf.mxu1  ;;  %v9422_v50 = vpop.f32.mrf.mxu0 }
 0x448   :  { %v9423_v35 = vadd.f32 %v9422_v50, %v9421_v7 }
 0x449   :  { %v9444_v3 = vpop.f32.mrf.mxu1  ;;  %v9424_v53 = vpop.f32.mrf.mxu0 }
 0x44a   :  { %v7632_v22 = vadd.f32 %v9423_v35, %v7592_v48  ;;  %v9445_v24 = vadd.f32 %v9444_v3, %v9443_v46 }
 0x44b   :  { %v9446_v57 = vpop.f32.mrf.mxu1  ;;  %v9425_v47 = vpop.f32.mrf.mxu0 }
 0x44c   :  { %v7672_v20 = vadd.f32 %v9445_v24, %v7632_v22 }
 0x44d   :  { %v9447_v55 = vpop.f32.mrf.mxu1 }
 0x465   :  { %v9465_v33 = vpop.f32.mrf.mxu0 }
 0x467   :  { %v9487_v63 = vpop.f32.mrf.mxu1  ;;  %v9466_v1 = vpop.f32.mrf.mxu0 }
 0x468   :  { %v9467_v12 = vadd.f32 %v9466_v1, %v9465_v33 }
 0x469   :  { %v9488_v2 = vpop.f32.mrf.mxu1  ;;  %v9468_v51 = vpop.f32.mrf.mxu0 }
 0x46a   :  { %v7712_v45 = vadd.f32 %v9467_v12, %v7672_v20  ;;  %v9489_v15 = vadd.f32 %v9488_v2, %v9487_v63 }
 0x46b   :  { %v9490_v4 = vpop.f32.mrf.mxu1  ;;  %v9469_v9 = vpop.f32.mrf.mxu0 }
 0x46c   :  { %v7752_v25 = vadd.f32 %v9489_v15, %v7712_v45 }
 0x46d   :  { %v9491_v14 = vpop.f32.mrf.mxu1 }
 0x485   :  { %v9509_v13 = vpop.f32.mrf.mxu0 }
 0x487   :  { %v9531_v21 = vpop.f32.mrf.mxu1  ;;  %v9510_v54 = vpop.f32.mrf.mxu0 }
 0x488   :  { %v9511_v30 = vadd.f32 %v9510_v54, %v9509_v13 }
 0x489   :  { %v9532_v11 = vpop.f32.mrf.mxu1  ;;  %v9512_v37 = vpop.f32.mrf.mxu0 }
 0x48a   :  { %v7792_v26 = vadd.f32 %v9511_v30, %v7752_v25  ;;  %v9533_v56 = vadd.f32 %v9532_v11, %v9531_v21 }
 0x48b   :  { %v9534_v6 = vpop.f32.mrf.mxu1  ;;  %v9513_v27 = vpop.f32.mrf.mxu0 }
 0x48c   :  { %v7832_v52 = vadd.f32 %v9533_v56, %v7792_v26 }
 0x48d   :  { %v9535_v5 = vpop.f32.mrf.mxu1 }
 0x48e   :  { %v7841_v42 = vmax.f32 %v7832_v52, 0.0 }
 0x490   :  { %v7846_v19 = vpack.c.bf16 %v7841_v42, %v7841_v42 }
 0x492   :  { %9598 = vmatmul.mubr.msk.bf16.vlgmr.msra.gmra.mxu0 %vm8138_vm3, %v7846_v19 }
 0x4a5   :  { %v9553_v49 = vpop.f32.mrf.mxu0 }
 0x4a7   :  { %v9554_v29 = vpop.f32.mrf.mxu0 }
 0x4a8   :  { %v9555_v31 = vadd.f32 %v9554_v29, %v9553_v49 }
 0x4a9   :  { %v9556_v16 = vpop.f32.mrf.mxu0 }
 0x4aa   :  { %v8181_v34 = vadd.f32 %v9555_v31, %v9319_v44 }
 0x4ab   :  { %v9557_v8 = vpop.f32.mrf.mxu0 }
 0x4d1   :  { %v9575_v58 = vpop.f32.mrf.mxu1 }
 0x4d3   :  { %v9576_v10 = vpop.f32.mrf.mxu1 }
 0x4d4   :  { %v9577_v39 = vadd.f32 %v9576_v10, %v9575_v58 }
 0x4d5   :  { %v9578_v23 = vpop.f32.mrf.mxu1 }
 0x4d6   :  { %v8221_v32 = vadd.f32 %v9577_v39, %v8181_v34 }
 0x4d7   :  { %v9579_v0 = vpop.f32.mrf.mxu1 }
 0x552   :  { %v8260_v38 = vpop.f32.mrf.mxu0 }
 0x553   :  { %v8261_v59 = vadd.f32 %v8260_v38, %v8221_v32 }
 0x554   :  { %v9599_v40 = vpop.f32.mrf.mxu0 }
 0x555   :  { %v8266_v61 = vmax.f32 %v8261_v59, 0.0 }
 0x556   :  { %v8263_v41 = vpop.f32.mrf.mxu0 }
 0x557   :  { %v8267_v28 = vpack.c.bf16 %v8266_v61, %v8266_v61 }
 0x558   :  { %v9600_v36 = vpop.f32.mrf.mxu0 }
 0x559   :  { %9606 = vmatmul.mubr.msk.bf16.vlgmr.msra.gmra.mxu1 %vm8291_vm4, %v8267_v28 }
 0x619   :  { %v8329_v43 = vpop.f32.mrf.mxu1 }
 0x61a   :  { %v8330_v48 = vadd.f32 %v9357_v17, %v8329_v43 }
 0x61b   :  { %v9607_v62 = vpop.f32.mrf.mxu1 }
 0x61c   :  { %8336 = vst.msk [vmem:[#allocation2] sm:$0xf] %vm8335_vm5, %v8330_v48 }
 0x61d   :  { %v8332_v7 = vpop.f32.mrf.mxu1 }
 0x61e   :  { %10562 = shalt.err (!%p10559_p4)
}
 0x61f   :  { %8346 = dma.vmem_to_hbm [thread:$0]  %s8344_s24, 64, %s13971_s9, [#allocation3]   ;;  %v9608_v46 = vpop.f32.mrf.mxu1 }
 0x620   :  { %10571 = dma.done.wait [#allocation3], 64  }
 0x621   :  { %10572 = vsyncadd [#allocation3], 4294967232 }
 0x622   :  { %8350 = vsyncpa [#allocation3], 1 }

</bundles_post_ra>
